<compile_context>
chip_gen: v6e
topology: v6e:2x2x1
jax: 0.10.0
libtpu: 0.0.40
codegen_flags: <defaults>
</compile_context>

<pallas_src>
import functools

import jax
import jax.numpy as jnp
from jax.experimental import pallas as pl
from jax.experimental.pallas import tpu as pltpu


def _round_up(x, m):
    return (x + m - 1) // m * m


# ----------------------------------------------------------------------------
# Fused conv kernel: 2 phase-matmuls + folded-BN bias + LeakyReLU
# ----------------------------------------------------------------------------
def _conv_block_kernel(z_ref, w_ref, b_ref, o_ref, *, m, wo, neg_slope):
    # z_ref: (m + wo, K) bf16   space-to-depth / phase-packed activation rows
    # w_ref: (2, K, Cp) bf16    one (K, Cp) weight per kh-phase (di = 0, 1)
    # b_ref: (1, Cp) f32        folded BatchNorm bias (pixel-packed)
    # o_ref: (m, Cp) bf16/f32
    acc = jnp.dot(z_ref[0:m, :], w_ref[0],
                  preferred_element_type=jnp.float32)
    acc = acc + jnp.dot(z_ref[wo:wo + m, :], w_ref[1],
                        preferred_element_type=jnp.float32)
    y = acc + b_ref[...]
    y = jnp.maximum(y, neg_slope * y)          # LeakyReLU(0.2) as one VPU max
    o_ref[...] = y.astype(o_ref.dtype)


def conv_block(zp, w, b, m, wo, out_dtype, *, neg_slope=0.2):
    """zp: (N, m + wo, K) bf16;  w: (2, K, Cp) bf16;  b: (1, Cp) f32."""
    N, R, K = zp.shape
    Cp = w.shape[-1]
    kernel = functools.partial(_conv_block_kernel, m=m, wo=wo,
                               neg_slope=neg_slope)
    return pl.pallas_call(
        kernel,
        out_shape=jax.ShapeDtypeStruct((N, m, Cp), out_dtype),
        grid_spec=pltpu.PrefetchScalarGridSpec(
            num_scalar_prefetch=0,
            grid=(N,),                                   # 1 step per batch elem
            in_specs=[
                pl.BlockSpec((None, R, K), lambda n: (n, 0, 0)),
                # Constant block index -> weight/bias stay VMEM-resident across
                # grid steps (no per-step re-DMA).
                pl.BlockSpec((2, K, Cp), lambda n: (0, 0, 0)),
                pl.BlockSpec((1, Cp), lambda n: (0, 0)),
            ],
            out_specs=pl.BlockSpec((None, m, Cp), lambda n: (n, 0, 0)),
        ),
        compiler_params=pltpu.CompilerParams(
            dimension_semantics=("parallel",),           # megacore on v7x
            vmem_limit_bytes=32 * 1024 * 1024,
        ),
    )(zp, w, b)


# ----------------------------------------------------------------------------
# Layout glue (plain JAX, fused by XLA under jit; no k*k im2col inflation)
# ----------------------------------------------------------------------------
def conv_input_prep(x, g):
    """(N, H, W, C) bf16 -> matmul-ready operand for the fused k=4/s=2/p=1 conv.

    pad(1) + 2x2 space-to-depth + kw-phase concat + G-pixel packing.
    Returns zp of shape (N, (Ho*Wo + Wo)//g, g*8*C), plus (Ho, Wo).
    Row r of the unpacked operand holds input super-pixel (a, b) channels
    ordered (dj, py, px, c); the kernel's di-phase slice [di*Wo, di*Wo+Ho*Wo)
    then lines up with output pixels in row-major (ho, wo) order.
    """
    N, H, W, C = x.shape
    Ho, Wo = H // 2, W // 2
    assert Wo % g == 0
    xp = jnp.pad(x, ((0, 0), (1, 1), (1, 1), (0, 0)))
    xq = xp.reshape(N, Ho + 1, 2, Wo + 1, 2, C)
    xq = xq.transpose(0, 1, 3, 2, 4, 5).reshape(N, Ho + 1, Wo + 1, 4 * C)
    # concat the two kw-phases (dj = 0, 1) along channels -> (N, Ho+1, Wo, 8C)
    zc = jnp.concatenate([xq[:, :, :Wo, :], xq[:, :, 1:, :]], axis=-1)
    zc = zc.reshape(N, (Ho + 1) * Wo, 8 * C)
    # pixel packing: g consecutive output columns per matmul row (lane-dense)
    zp = zc.reshape(N, (Ho + 1) * Wo // g, g * 8 * C)
    return zp, Ho, Wo


def maxpool2(x):
    # 2x2 max pool, plain jnp (tiny tensor; XLA fuses this for free).
    N, H, W, C = x.shape
    return jnp.max(x.reshape(N, H // 2, 2, W // 2, 2, C), axis=(2, 4))


def im2col(x, *, k, s, p):
    # generic im2col, only used for the tiny final 256->1 conv
    N, H, W, C = x.shape
    if p > 0:
        x = jnp.pad(x, ((0, 0), (p, p), (p, p), (0, 0)))
    Ho = (H + 2 * p - k) // s + 1
    Wo = (W + 2 * p - k) // s + 1
    pieces = []
    for i in range(k):
        for j in range(k):
            pieces.append(
                x[:, i:i + (Ho - 1) * s + 1:s, j:j + (Wo - 1) * s + 1:s, :])
    pat = jnp.concatenate(pieces, axis=-1)            # (N, Ho, Wo, k*k*C)
    return pat.reshape(N * Ho * Wo, k * k * C), Ho, Wo


# ----------------------------------------------------------------------------
# Parameters: deterministic synthetic init + one-time prep
# ----------------------------------------------------------------------------
def init_params(key, in_channels):
    cfgs = [(in_channels, 32), (32, 64), (64, 128), (128, 256)]
    params = {"blocks": [], "out": None}
    k = key
    for cin, cout in cfgs:
        k, kw, kb, kg, kbe, km, kv = jax.random.split(k, 7)
        params["blocks"].append(dict(
            w=jax.random.normal(kw, (4, 4, cin, cout), jnp.float32) * 0.05,
            b=jax.random.normal(kb, (cout,), jnp.float32) * 0.05,
            gamma=1.0 + 0.1 * jax.random.normal(kg, (cout,), jnp.float32),
            beta=0.1 * jax.random.normal(kbe, (cout,), jnp.float32),
            mean=0.1 * jax.random.normal(km, (cout,), jnp.float32),
            var=jax.random.uniform(kv, (cout,), jnp.float32, 0.5, 1.5),
        ))
    k, kw, kb = jax.random.split(k, 3)
    w = jax.random.normal(kw, (4, 4, 256, 1), jnp.float32) * 0.05
    b = jax.random.normal(kb, (1,), jnp.float32) * 0.05
    params["out"] = dict(w=w.reshape(4 * 4 * 256, 1), b=b)
    return params


def prepare_params(params, eps=1e-5):
    """One-time prep: fold inference-mode BatchNorm into the conv weight/bias,
    rearrange the 4x4/s2 HWIO weight into two kh-phase (8*Cin, Cout) matrices
    matching the space-to-depth operand layout, apply G-pixel packing as a
    block-diagonal weight, pad channels to a 128 multiple and cast the MXU
    operands to bf16."""
    prepped = {"blocks": [], "out": None}
    for blk in params["blocks"]:
        w = blk["w"]                                   # (4, 4, cin, cout) HWIO
        cin, cout = int(w.shape[2]), int(w.shape[3])
        scale = blk["gamma"] / jnp.sqrt(blk["var"] + eps)
        bias = (blk["b"] - blk["mean"]) * scale + blk["beta"]
        # (kh, kw, cin, cout) -> (di, dj, py, px, cin, cout) -> (2, 8*cin, cout)
        wq = w.reshape(2, 2, 2, 2, cin, cout).transpose(0, 2, 1, 3, 4, 5)
        wq = wq.reshape(2, 8 * cin, cout) * scale[None, None, :]    # BN fold
        g = 128 // cout if cout < 128 else 1           # pixel-packing factor
        k2 = 8 * cin
        wbd = jnp.zeros((2, g * k2, g * cout), jnp.float32)
        for gi in range(g):                            # block-diagonal packing
            wbd = wbd.at[:, gi * k2:(gi + 1) * k2,
                         gi * cout:(gi + 1) * cout].set(wq)
        cp = _round_up(g * cout, 128)                  # = g*cout for this model
        w_pad = jnp.zeros((2, g * k2, cp), jnp.bfloat16)
        w_pad = w_pad.at[:, :, :g * cout].set(wbd.astype(jnp.bfloat16))
        b_pad = jnp.zeros((1, cp), jnp.float32)
        b_pad = b_pad.at[0, :g * cout].set(jnp.tile(bias, g))
        prepped["blocks"].append(dict(w=w_pad, b=b_pad, cout=cout, g=g))
    prepped["out"] = dict(w=params["out"]["w"], b=params["out"]["b"])
    return prepped


# ----------------------------------------------------------------------------
# Critic2 forward (inference-mode BatchNorm, as documented)
# ----------------------------------------------------------------------------
def critic2_forward(x_nchw, prepped):
    x = jnp.transpose(x_nchw, (0, 2, 3, 1)).astype(jnp.bfloat16)   # NCHW->NHWC
    N = x.shape[0]
    nblk = len(prepped["blocks"])

    # 4x [Conv2d(k=4, s=2, p=1) + BatchNorm2d (running stats) + LeakyReLU(0.2)]
    for idx, blk in enumerate(prepped["blocks"]):
        cout, g = blk["cout"], blk["g"]
        zp, Ho, Wo = conv_input_prep(x, g)
        out_dtype = jnp.float32 if idx == nblk - 1 else jnp.bfloat16
        y = conv_block(zp, blk["w"], blk["b"], (Ho * Wo) // g, Wo // g,
                       out_dtype)
        y = y[:, :, :g * cout]                 # no-op here (g*cout == Cp)
        x = y.reshape(N, Ho, Wo, cout)

    # MaxPool2d(2)
    x = maxpool2(x)

    # output: Conv2d(256 -> 1, k=4, s=1, p=0), bias only.  M = batch, Cout = 1:
    # plain jnp dot; a Pallas launch (and padding Cout to 128 lanes) costs more
    # than the op itself.
    pat, Ho, Wo = im2col(x, k=4, s=1, p=0)
    y = pat @ prepped["out"]["w"] + prepped["out"]["b"]
    return jnp.transpose(y.reshape(N, Ho, Wo, 1), (0, 3, 1, 2))    # back NCHW


if __name__ == "__main__":
    key = jax.random.PRNGKey(0)
    kx, kp = jax.random.split(key)
    in_channels = 4
    # smallest spatial size the module supports end-to-end:
    # 128 -> 64 -> 32 -> 16 -> 8 -> pool 4 -> conv(k=4) -> 1
    x = jax.random.normal(kx, (2, in_channels, 128, 128), jnp.float32)
    params = init_params(kp, in_channels)
    prepped = prepare_params(params)        # one-time BN fold / repack / cast

    fwd = jax.jit(lambda inp: critic2_forward(inp, prepped))
    out = jax.block_until_ready(fwd(x))
    assert out.shape == (2, 1, 1, 1), out.shape
    assert bool(jnp.all(jnp.isfinite(out)))
    print("KERNEL_OK")
</pallas_src>

<mosaic_0001>
module attributes {stable_mosaic.version = 11 : i64} {
  func.func @_conv_block_kernel(%arg0: i32, %arg1: memref<1x1040x128xbf16, #tpu.memory_space<vmem>>, %arg2: memref<2x128x128xbf16, #tpu.memory_space<vmem>>, %arg3: memref<1x128xf32, #tpu.memory_space<vmem>>, %arg4: memref<1x1024x128xbf16, #tpu.memory_space<vmem>>) attributes {dimension_semantics = [#tpu.dimension_semantics<parallel>], iteration_bounds = array<i64: 2>, scalar_prefetch = 0 : i64, scratch_operands = 0 : i64, tpu.core_type = #tpu.core_type<tc>, window_params = [{transform_indices = @transform_0, window_bounds = array<i64: 1, 1040, 128>}, {pipeline_mode = #tpu.pipeline_mode<synchronous>, transform_indices = @transform_1, window_bounds = array<i64: 2, 128, 128>}, {pipeline_mode = #tpu.pipeline_mode<synchronous>, transform_indices = @transform_2, window_bounds = array<i64: 1, 128>}, {transform_indices = @transform_3, window_bounds = array<i64: 1, 1024, 128>}]} {
    %c0 = arith.constant 0 : index
    %c0_0 = arith.constant 0 : index
    %c0_1 = arith.constant 0 : index
    %0 = vector.load %arg1[%c0, %c0_0, %c0_1] : memref<1x1040x128xbf16, #tpu.memory_space<vmem>>, vector<1x1024x128xbf16>
    %1 = vector.shape_cast %0 : vector<1x1024x128xbf16> to vector<1024x128xbf16>
    %c0_2 = arith.constant 0 : index
    %c0_3 = arith.constant 0 : index
    %c0_4 = arith.constant 0 : index
    %2 = vector.load %arg2[%c0_2, %c0_3, %c0_4] : memref<2x128x128xbf16, #tpu.memory_space<vmem>>, vector<1x128x128xbf16>
    %3 = vector.shape_cast %2 : vector<1x128x128xbf16> to vector<128x128xbf16>
    %cst = arith.constant dense<0.000000e+00> : vector<1024x128xf32>
    %4 = tpu.matmul %1, %3, %cst {dimension_numbers = #tpu.dot_dimension_numbers<[1], [0], [0], [1], [0, 0, 1, 1], [], []>} : vector<1024x128xbf16>, vector<128x128xbf16>, vector<1024x128xf32> -> vector<1024x128xf32>
    %c0_5 = arith.constant 0 : index
    %c16 = arith.constant 16 : index
    %c0_6 = arith.constant 0 : index
    %5 = vector.load %arg1[%c0_5, %c16, %c0_6] : memref<1x1040x128xbf16, #tpu.memory_space<vmem>>, vector<1x1024x128xbf16>
    %6 = vector.shape_cast %5 : vector<1x1024x128xbf16> to vector<1024x128xbf16>
    %c1 = arith.constant 1 : index
    %c0_7 = arith.constant 0 : index
    %c0_8 = arith.constant 0 : index
    %7 = vector.load %arg2[%c1, %c0_7, %c0_8] : memref<2x128x128xbf16, #tpu.memory_space<vmem>>, vector<1x128x128xbf16>
    %8 = vector.shape_cast %7 : vector<1x128x128xbf16> to vector<128x128xbf16>
    %cst_9 = arith.constant dense<0.000000e+00> : vector<1024x128xf32>
    %9 = tpu.matmul %6, %8, %cst_9 {dimension_numbers = #tpu.dot_dimension_numbers<[1], [0], [0], [1], [0, 0, 1, 1], [], []>} : vector<1024x128xbf16>, vector<128x128xbf16>, vector<1024x128xf32> -> vector<1024x128xf32>
    %10 = arith.addf %4, %9 : vector<1024x128xf32>
    %c0_10 = arith.constant 0 : index
    %c0_11 = arith.constant 0 : index
    %11 = vector.load %arg3[%c0_10, %c0_11] : memref<1x128xf32, #tpu.memory_space<vmem>>, vector<1x128xf32>
    %12 = vector.broadcast %11 : vector<1x128xf32> to vector<1024x128xf32>
    %13 = arith.addf %10, %12 : vector<1024x128xf32>
    %cst_12 = arith.constant 2.000000e-01 : f32
    %14 = vector.broadcast %cst_12 : f32 to vector<1024x128xf32>
    %15 = arith.mulf %14, %13 : vector<1024x128xf32>
    %16 = arith.maximumf %13, %15 : vector<1024x128xf32>
    %17 = arith.truncf %16 : vector<1024x128xf32> to vector<1024x128xbf16>
    %c0_13 = arith.constant 0 : index
    %c0_14 = arith.constant 0 : index
    %c0_15 = arith.constant 0 : index
    %18 = vector.load %arg4[%c0_13, %c0_14, %c0_15] : memref<1x1024x128xbf16, #tpu.memory_space<vmem>>, vector<1x1024x128xbf16>
    %19 = vector.shape_cast %18 : vector<1x1024x128xbf16> to vector<1024x128xbf16>
    %20 = vector.shape_cast %17 : vector<1024x128xbf16> to vector<1x1024x128xbf16>
    tpu.vector_store %arg4[%c0_13, %c0_14, %c0_15], %20 {strides = array<i32>} : memref<1x1024x128xbf16, #tpu.memory_space<vmem>>, vector<1x1024x128xbf16>,
    return
  }
  func.func @transform_0(%arg0: i32) -> (i32, i32, i32) {
    %c0_i32 = arith.constant 0 : i32
    %c0_i32_0 = arith.constant 0 : i32
    %c0_i32_1 = arith.constant 0 : i32
    return %arg0, %c0_i32, %c0_i32_0 : i32, i32, i32
  }
  func.func @transform_1(%arg0: i32) -> (i32, i32, i32) {
    %c0_i32 = arith.constant 0 : i32
    %c0_i32_0 = arith.constant 0 : i32
    %c0_i32_1 = arith.constant 0 : i32
    %c0_i32_2 = arith.constant 0 : i32
    return %c0_i32, %c0_i32_0, %c0_i32_1 : i32, i32, i32
  }
  func.func @transform_2(%arg0: i32) -> (i32, i32) {
    %c0_i32 = arith.constant 0 : i32
    %c0_i32_0 = arith.constant 0 : i32
    %c0_i32_1 = arith.constant 0 : i32
    return %c0_i32, %c0_i32_0 : i32, i32
  }
  func.func @transform_3(%arg0: i32) -> (i32, i32, i32) {
    %c0_i32 = arith.constant 0 : i32
    %c0_i32_0 = arith.constant 0 : i32
    %c0_i32_1 = arith.constant 0 : i32
    return %arg0, %c0_i32, %c0_i32_0 : i32, i32, i32
  }
}

module attributes {stable_mosaic.version = 11 : i64} {
  func.func @_conv_block_kernel(%arg0: i32, %arg1: memref<1x528x512xbf16, #tpu.memory_space<vmem>>, %arg2: memref<2x512x128xbf16, #tpu.memory_space<vmem>>, %arg3: memref<1x128xf32, #tpu.memory_space<vmem>>, %arg4: memref<1x512x128xbf16, #tpu.memory_space<vmem>>) attributes {dimension_semantics = [#tpu.dimension_semantics<parallel>], iteration_bounds = array<i64: 2>, scalar_prefetch = 0 : i64, scratch_operands = 0 : i64, tpu.core_type = #tpu.core_type<tc>, window_params = [{transform_indices = @transform_0, window_bounds = array<i64: 1, 528, 512>}, {pipeline_mode = #tpu.pipeline_mode<synchronous>, transform_indices = @transform_1, window_bounds = array<i64: 2, 512, 128>}, {pipeline_mode = #tpu.pipeline_mode<synchronous>, transform_indices = @transform_2, window_bounds = array<i64: 1, 128>}, {transform_indices = @transform_3, window_bounds = array<i64: 1, 512, 128>}]} {
    %c0 = arith.constant 0 : index
    %c0_0 = arith.constant 0 : index
    %c0_1 = arith.constant 0 : index
    %0 = vector.load %arg1[%c0, %c0_0, %c0_1] : memref<1x528x512xbf16, #tpu.memory_space<vmem>>, vector<1x512x512xbf16>
    %1 = vector.shape_cast %0 : vector<1x512x512xbf16> to vector<512x512xbf16>
    %c0_2 = arith.constant 0 : index
    %c0_3 = arith.constant 0 : index
    %c0_4 = arith.constant 0 : index
    %2 = vector.load %arg2[%c0_2, %c0_3, %c0_4] : memref<2x512x128xbf16, #tpu.memory_space<vmem>>, vector<1x512x128xbf16>
    %3 = vector.shape_cast %2 : vector<1x512x128xbf16> to vector<512x128xbf16>
    %cst = arith.constant dense<0.000000e+00> : vector<512x128xf32>
    %4 = tpu.matmul %1, %3, %cst {dimension_numbers = #tpu.dot_dimension_numbers<[1], [0], [0], [1], [0, 0, 1, 1], [], []>} : vector<512x512xbf16>, vector<512x128xbf16>, vector<512x128xf32> -> vector<512x128xf32>
    %c0_5 = arith.constant 0 : index
    %c16 = arith.constant 16 : index
    %c0_6 = arith.constant 0 : index
    %5 = vector.load %arg1[%c0_5, %c16, %c0_6] : memref<1x528x512xbf16, #tpu.memory_space<vmem>>, vector<1x512x512xbf16>
    %6 = vector.shape_cast %5 : vector<1x512x512xbf16> to vector<512x512xbf16>
    %c1 = arith.constant 1 : index
    %c0_7 = arith.constant 0 : index
    %c0_8 = arith.constant 0 : index
    %7 = vector.load %arg2[%c1, %c0_7, %c0_8] : memref<2x512x128xbf16, #tpu.memory_space<vmem>>, vector<1x512x128xbf16>
    %8 = vector.shape_cast %7 : vector<1x512x128xbf16> to vector<512x128xbf16>
    %cst_9 = arith.constant dense<0.000000e+00> : vector<512x128xf32>
    %9 = tpu.matmul %6, %8, %cst_9 {dimension_numbers = #tpu.dot_dimension_numbers<[1], [0], [0], [1], [0, 0, 1, 1], [], []>} : vector<512x512xbf16>, vector<512x128xbf16>, vector<512x128xf32> -> vector<512x128xf32>
    %10 = arith.addf %4, %9 : vector<512x128xf32>
    %c0_10 = arith.constant 0 : index
    %c0_11 = arith.constant 0 : index
    %11 = vector.load %arg3[%c0_10, %c0_11] : memref<1x128xf32, #tpu.memory_space<vmem>>, vector<1x128xf32>
    %12 = vector.broadcast %11 : vector<1x128xf32> to vector<512x128xf32>
    %13 = arith.addf %10, %12 : vector<512x128xf32>
    %cst_12 = arith.constant 2.000000e-01 : f32
    %14 = vector.broadcast %cst_12 : f32 to vector<512x128xf32>
    %15 = arith.mulf %14, %13 : vector<512x128xf32>
    %16 = arith.maximumf %13, %15 : vector<512x128xf32>
    %17 = arith.truncf %16 : vector<512x128xf32> to vector<512x128xbf16>
    %c0_13 = arith.constant 0 : index
    %c0_14 = arith.constant 0 : index
    %c0_15 = arith.constant 0 : index
    %18 = vector.load %arg4[%c0_13, %c0_14, %c0_15] : memref<1x512x128xbf16, #tpu.memory_space<vmem>>, vector<1x512x128xbf16>
    %19 = vector.shape_cast %18 : vector<1x512x128xbf16> to vector<512x128xbf16>
    %20 = vector.shape_cast %17 : vector<512x128xbf16> to vector<1x512x128xbf16>
    tpu.vector_store %arg4[%c0_13, %c0_14, %c0_15], %20 {strides = array<i32>} : memref<1x512x128xbf16, #tpu.memory_space<vmem>>, vector<1x512x128xbf16>,
    return
  }
  func.func @transform_0(%arg0: i32) -> (i32, i32, i32) {
    %c0_i32 = arith.constant 0 : i32
    %c0_i32_0 = arith.constant 0 : i32
    %c0_i32_1 = arith.constant 0 : i32
    return %arg0, %c0_i32, %c0_i32_0 : i32, i32, i32
  }
  func.func @transform_1(%arg0: i32) -> (i32, i32, i32) {
    %c0_i32 = arith.constant 0 : i32
    %c0_i32_0 = arith.constant 0 : i32
    %c0_i32_1 = arith.constant 0 : i32
    %c0_i32_2 = arith.constant 0 : i32
    return %c0_i32, %c0_i32_0, %c0_i32_1 : i32, i32, i32
  }
  func.func @transform_2(%arg0: i32) -> (i32, i32) {
    %c0_i32 = arith.constant 0 : i32
    %c0_i32_0 = arith.constant 0 : i32
    %c0_i32_1 = arith.constant 0 : i32
    return %c0_i32, %c0_i32_0 : i32, i32
  }
  func.func @transform_3(%arg0: i32) -> (i32, i32, i32) {
    %c0_i32 = arith.constant 0 : i32
    %c0_i32_0 = arith.constant 0 : i32
    %c0_i32_1 = arith.constant 0 : i32
    return %arg0, %c0_i32, %c0_i32_0 : i32, i32, i32
  }
}

module attributes {stable_mosaic.version = 11 : i64} {
  func.func @_conv_block_kernel(%arg0: i32, %arg1: memref<1x272x512xbf16, #tpu.memory_space<vmem>>, %arg2: memref<2x512x128xbf16, #tpu.memory_space<vmem>>, %arg3: memref<1x128xf32, #tpu.memory_space<vmem>>, %arg4: memref<1x256x128xbf16, #tpu.memory_space<vmem>>) attributes {dimension_semantics = [#tpu.dimension_semantics<parallel>], iteration_bounds = array<i64: 2>, scalar_prefetch = 0 : i64, scratch_operands = 0 : i64, tpu.core_type = #tpu.core_type<tc>, window_params = [{transform_indices = @transform_0, window_bounds = array<i64: 1, 272, 512>}, {pipeline_mode = #tpu.pipeline_mode<synchronous>, transform_indices = @transform_1, window_bounds = array<i64: 2, 512, 128>}, {pipeline_mode = #tpu.pipeline_mode<synchronous>, transform_indices = @transform_2, window_bounds = array<i64: 1, 128>}, {transform_indices = @transform_3, window_bounds = array<i64: 1, 256, 128>}]} {
    %c0 = arith.constant 0 : index
    %c0_0 = arith.constant 0 : index
    %c0_1 = arith.constant 0 : index
    %0 = vector.load %arg1[%c0, %c0_0, %c0_1] : memref<1x272x512xbf16, #tpu.memory_space<vmem>>, vector<1x256x512xbf16>
    %1 = vector.shape_cast %0 : vector<1x256x512xbf16> to vector<256x512xbf16>
    %c0_2 = arith.constant 0 : index
    %c0_3 = arith.constant 0 : index
    %c0_4 = arith.constant 0 : index
    %2 = vector.load %arg2[%c0_2, %c0_3, %c0_4] : memref<2x512x128xbf16, #tpu.memory_space<vmem>>, vector<1x512x128xbf16>
    %3 = vector.shape_cast %2 : vector<1x512x128xbf16> to vector<512x128xbf16>
    %cst = arith.constant dense<0.000000e+00> : vector<256x128xf32>
    %4 = tpu.matmul %1, %3, %cst {dimension_numbers = #tpu.dot_dimension_numbers<[1], [0], [0], [1], [0, 0, 1, 1], [], []>} : vector<256x512xbf16>, vector<512x128xbf16>, vector<256x128xf32> -> vector<256x128xf32>
    %c0_5 = arith.constant 0 : index
    %c16 = arith.constant 16 : index
    %c0_6 = arith.constant 0 : index
    %5 = vector.load %arg1[%c0_5, %c16, %c0_6] : memref<1x272x512xbf16, #tpu.memory_space<vmem>>, vector<1x256x512xbf16>
    %6 = vector.shape_cast %5 : vector<1x256x512xbf16> to vector<256x512xbf16>
    %c1 = arith.constant 1 : index
    %c0_7 = arith.constant 0 : index
    %c0_8 = arith.constant 0 : index
    %7 = vector.load %arg2[%c1, %c0_7, %c0_8] : memref<2x512x128xbf16, #tpu.memory_space<vmem>>, vector<1x512x128xbf16>
    %8 = vector.shape_cast %7 : vector<1x512x128xbf16> to vector<512x128xbf16>
    %cst_9 = arith.constant dense<0.000000e+00> : vector<256x128xf32>
    %9 = tpu.matmul %6, %8, %cst_9 {dimension_numbers = #tpu.dot_dimension_numbers<[1], [0], [0], [1], [0, 0, 1, 1], [], []>} : vector<256x512xbf16>, vector<512x128xbf16>, vector<256x128xf32> -> vector<256x128xf32>
    %10 = arith.addf %4, %9 : vector<256x128xf32>
    %c0_10 = arith.constant 0 : index
    %c0_11 = arith.constant 0 : index
    %11 = vector.load %arg3[%c0_10, %c0_11] : memref<1x128xf32, #tpu.memory_space<vmem>>, vector<1x128xf32>
    %12 = vector.broadcast %11 : vector<1x128xf32> to vector<256x128xf32>
    %13 = arith.addf %10, %12 : vector<256x128xf32>
    %cst_12 = arith.constant 2.000000e-01 : f32
    %14 = vector.broadcast %cst_12 : f32 to vector<256x128xf32>
    %15 = arith.mulf %14, %13 : vector<256x128xf32>
    %16 = arith.maximumf %13, %15 : vector<256x128xf32>
    %17 = arith.truncf %16 : vector<256x128xf32> to vector<256x128xbf16>
    %c0_13 = arith.constant 0 : index
    %c0_14 = arith.constant 0 : index
    %c0_15 = arith.constant 0 : index
    %18 = vector.load %arg4[%c0_13, %c0_14, %c0_15] : memref<1x256x128xbf16, #tpu.memory_space<vmem>>, vector<1x256x128xbf16>
    %19 = vector.shape_cast %18 : vector<1x256x128xbf16> to vector<256x128xbf16>
    %20 = vector.shape_cast %17 : vector<256x128xbf16> to vector<1x256x128xbf16>
    tpu.vector_store %arg4[%c0_13, %c0_14, %c0_15], %20 {strides = array<i32>} : memref<1x256x128xbf16, #tpu.memory_space<vmem>>, vector<1x256x128xbf16>,
    return
  }
  func.func @transform_0(%arg0: i32) -> (i32, i32, i32) {
    %c0_i32 = arith.constant 0 : i32
    %c0_i32_0 = arith.constant 0 : i32
    %c0_i32_1 = arith.constant 0 : i32
    return %arg0, %c0_i32, %c0_i32_0 : i32, i32, i32
  }
  func.func @transform_1(%arg0: i32) -> (i32, i32, i32) {
    %c0_i32 = arith.constant 0 : i32
    %c0_i32_0 = arith.constant 0 : i32
    %c0_i32_1 = arith.constant 0 : i32
    %c0_i32_2 = arith.constant 0 : i32
    return %c0_i32, %c0_i32_0, %c0_i32_1 : i32, i32, i32
  }
  func.func @transform_2(%arg0: i32) -> (i32, i32) {
    %c0_i32 = arith.constant 0 : i32
    %c0_i32_0 = arith.constant 0 : i32
    %c0_i32_1 = arith.constant 0 : i32
    return %c0_i32, %c0_i32_0 : i32, i32
  }
  func.func @transform_3(%arg0: i32) -> (i32, i32, i32) {
    %c0_i32 = arith.constant 0 : i32
    %c0_i32_0 = arith.constant 0 : i32
    %c0_i32_1 = arith.constant 0 : i32
    return %arg0, %c0_i32, %c0_i32_0 : i32, i32, i32
  }
}

module attributes {stable_mosaic.version = 11 : i64} {
  func.func @_conv_block_kernel(%arg0: i32, %arg1: memref<1x72x1024xbf16, #tpu.memory_space<vmem>>, %arg2: memref<2x1024x256xbf16, #tpu.memory_space<vmem>>, %arg3: memref<1x256xf32, #tpu.memory_space<vmem>>, %arg4: memref<1x64x256xf32, #tpu.memory_space<vmem>>) attributes {dimension_semantics = [#tpu.dimension_semantics<parallel>], iteration_bounds = array<i64: 2>, scalar_prefetch = 0 : i64, scratch_operands = 0 : i64, tpu.core_type = #tpu.core_type<tc>, window_params = [{transform_indices = @transform_0, window_bounds = array<i64: 1, 72, 1024>}, {pipeline_mode = #tpu.pipeline_mode<synchronous>, transform_indices = @transform_1, window_bounds = array<i64: 2, 1024, 256>}, {pipeline_mode = #tpu.pipeline_mode<synchronous>, transform_indices = @transform_2, window_bounds = array<i64: 1, 256>}, {transform_indices = @transform_3, window_bounds = array<i64: 1, 64, 256>}]} {
    %c0 = arith.constant 0 : index
    %c0_0 = arith.constant 0 : index
    %c0_1 = arith.constant 0 : index
    %0 = vector.load %arg1[%c0, %c0_0, %c0_1] : memref<1x72x1024xbf16, #tpu.memory_space<vmem>>, vector<1x64x1024xbf16>
    %1 = vector.shape_cast %0 : vector<1x64x1024xbf16> to vector<64x1024xbf16>
    %c0_2 = arith.constant 0 : index
    %c0_3 = arith.constant 0 : index
    %c0_4 = arith.constant 0 : index
    %2 = vector.load %arg2[%c0_2, %c0_3, %c0_4] : memref<2x1024x256xbf16, #tpu.memory_space<vmem>>, vector<1x1024x256xbf16>
    %3 = vector.shape_cast %2 : vector<1x1024x256xbf16> to vector<1024x256xbf16>
    %cst = arith.constant dense<0.000000e+00> : vector<64x256xf32>
    %4 = tpu.matmul %1, %3, %cst {dimension_numbers = #tpu.dot_dimension_numbers<[1], [0], [0], [1], [0, 0, 1, 1], [], []>} : vector<64x1024xbf16>, vector<1024x256xbf16>, vector<64x256xf32> -> vector<64x256xf32>
    %c0_5 = arith.constant 0 : index
    %c8 = arith.constant 8 : index
    %c0_6 = arith.constant 0 : index
    %5 = vector.load %arg1[%c0_5, %c8, %c0_6] : memref<1x72x1024xbf16, #tpu.memory_space<vmem>>, vector<1x64x1024xbf16>
    %6 = vector.shape_cast %5 : vector<1x64x1024xbf16> to vector<64x1024xbf16>
    %c1 = arith.constant 1 : index
    %c0_7 = arith.constant 0 : index
    %c0_8 = arith.constant 0 : index
    %7 = vector.load %arg2[%c1, %c0_7, %c0_8] : memref<2x1024x256xbf16, #tpu.memory_space<vmem>>, vector<1x1024x256xbf16>
    %8 = vector.shape_cast %7 : vector<1x1024x256xbf16> to vector<1024x256xbf16>
    %cst_9 = arith.constant dense<0.000000e+00> : vector<64x256xf32>
    %9 = tpu.matmul %6, %8, %cst_9 {dimension_numbers = #tpu.dot_dimension_numbers<[1], [0], [0], [1], [0, 0, 1, 1], [], []>} : vector<64x1024xbf16>, vector<1024x256xbf16>, vector<64x256xf32> -> vector<64x256xf32>
    %10 = arith.addf %4, %9 : vector<64x256xf32>
    %c0_10 = arith.constant 0 : index
    %c0_11 = arith.constant 0 : index
    %11 = vector.load %arg3[%c0_10, %c0_11] : memref<1x256xf32, #tpu.memory_space<vmem>>, vector<1x256xf32>
    %12 = vector.broadcast %11 : vector<1x256xf32> to vector<64x256xf32>
    %13 = arith.addf %10, %12 : vector<64x256xf32>
    %cst_12 = arith.constant 2.000000e-01 : f32
    %14 = vector.broadcast %cst_12 : f32 to vector<64x256xf32>
    %15 = arith.mulf %14, %13 : vector<64x256xf32>
    %16 = arith.maximumf %13, %15 : vector<64x256xf32>
    %c0_13 = arith.constant 0 : index
    %c0_14 = arith.constant 0 : index
    %c0_15 = arith.constant 0 : index
    %17 = vector.load %arg4[%c0_13, %c0_14, %c0_15] : memref<1x64x256xf32, #tpu.memory_space<vmem>>, vector<1x64x256xf32>
    %18 = vector.shape_cast %17 : vector<1x64x256xf32> to vector<64x256xf32>
    %19 = vector.shape_cast %16 : vector<64x256xf32> to vector<1x64x256xf32>
    tpu.vector_store %arg4[%c0_13, %c0_14, %c0_15], %19 {strides = array<i32>} : memref<1x64x256xf32, #tpu.memory_space<vmem>>, vector<1x64x256xf32>,
    return
  }
  func.func @transform_0(%arg0: i32) -> (i32, i32, i32) {
    %c0_i32 = arith.constant 0 : i32
    %c0_i32_0 = arith.constant 0 : i32
    %c0_i32_1 = arith.constant 0 : i32
    return %arg0, %c0_i32, %c0_i32_0 : i32, i32, i32
  }
  func.func @transform_1(%arg0: i32) -> (i32, i32, i32) {
    %c0_i32 = arith.constant 0 : i32
    %c0_i32_0 = arith.constant 0 : i32
    %c0_i32_1 = arith.constant 0 : i32
    %c0_i32_2 = arith.constant 0 : i32
    return %c0_i32, %c0_i32_0, %c0_i32_1 : i32, i32, i32
  }
  func.func @transform_2(%arg0: i32) -> (i32, i32) {
    %c0_i32 = arith.constant 0 : i32
    %c0_i32_0 = arith.constant 0 : i32
    %c0_i32_1 = arith.constant 0 : i32
    return %c0_i32, %c0_i32_0 : i32, i32
  }
  func.func @transform_3(%arg0: i32) -> (i32, i32, i32) {
    %c0_i32 = arith.constant 0 : i32
    %c0_i32_0 = arith.constant 0 : i32
    %c0_i32_1 = arith.constant 0 : i32
    return %arg0, %c0_i32, %c0_i32_0 : i32, i32, i32
  }
}

</mosaic_0001>

<bundles_post_ra>
// kernel: _lambda_.4
= control target key start
LH: loop header
LB: loop body
LE: loop exit
PB: predicated region body
PF: predicated region fallthrough
CT: control target
= control target key end

     0   :  { %s4926_s12 = smov 0   ;;  %s5329_s0 = inlined_call_operand.vmem [shape: bf16[2,1040,128], index: 0, kind: input, shape index: {}]   ;;  %s5330_s1 = inlined_call_operand.vmem [shape: bf16[2,128,128], index: 1, kind: input, shape index: {}]   ;;  %s5331_s2 = inlined_call_operand.vmem [shape: f32[1,128], index: 2, kind: input, shape index: {}]   ;;  %s5332_s3 = inlined_call_operand.vmem [shape: bf16[2,1024,128], index: 3, kind: output, shape index: {}]  }
   0x1 LB: > { %s3501_s13 = sadd.s32 4294967295, %s4904_s12   ;;  %p3505_p0 = scmp.ge.s32.totalorder %s4904_s12, 1  ;;  %s4904_s12 = sphi %s4926_s12, %s13_s12  }
   0x2   : > { %p137_p1 = scmp.lt.s32.totalorder %s4904_s12, 3 }
   0x4   : > { %p138_p2 = pnand %p3505_p0, %p137_p1 }
   0x5   : > { %p161_p3 = scmp.lt.s32.totalorder (!%p138_p2), %s3501_s13, 1 }
   0x6   : > { %141 = sbr.rel (%p138_p2) target bundleno = 503 (0x1f7), region = 32 }
   0xb   : > { %v4753_v0 = vld [vmem:[%s5330_s1 + $0x78] sm:$0xff]   ;;  %v4755_v2 = vld [vmem:[%s5330_s1 + $0x70] sm:$0xff]   ;;  %v4757_v4 = vld [vmem:[%s5330_s1 + $0x68] sm:$0xff]   ;;  %s5334_s13 = smov (!%p161_p3, %s3501_s13), 1 }
   0xc   : > { %v4754_v1 = vld [vmem:[%s5330_s1 + $0x38] sm:$0xff]   ;;  %4456 = vmatprep.subr.bf16.mxu0 %v4753_v0  ;;  %v4756_v3 = vld [vmem:[%s5330_s1 + $0x30] sm:$0xff]   ;;  %v4758_v5 = vld [vmem:[%s5330_s1 + $0x28] sm:$0xff]   ;;  %s4744_s30 = smul.u32 520, %s5334_s13  ;;  %s3800_s27 = sshll.u32 %s5334_s13, 9 }
   0xd   : > { %4600 = vmatprep.subr.bf16.mxu1 %v4754_v1  ;;  %4457 = vmatpush3.bf16.msra.mxu0 %v4753_v0  ;;  %v4759_v6 = vld [vmem:[%s5330_s1 + $0x60] sm:$0xff]   ;;  %v4761_v8 = vld [vmem:[%s5330_s1 + $0x58] sm:$0xff]   ;;  %v4763_v10 = vld [vmem:[%s5330_s1 + $0x50] sm:$0xff]   ;;  %s5110_s13 = scalar_lea.vmem %s5332_s3, %s3800_s27 }
   0xe   : > { %4601 = vmatpush3.bf16.msra.mxu1 %v4754_v1  ;;  %4458 = vmatprep.subr.bf16.mxu0 %v4755_v2  ;;  %v4760_v7 = vld [vmem:[%s5330_s1 + $0x20] sm:$0xff]   ;;  %v4762_v9 = vld [vmem:[%s5330_s1 + $0x18] sm:$0xff]   ;;  %s4970_s10 = scalar_lea.vmem %s5329_s0, %s4744_s30  ;;  %v4764_v11 = vld [vmem:[%s5330_s1 + $0x10] sm:$0xff]  }
   0xf   : > { %4602 = vmatprep.subr.bf16.mxu1 %v4756_v3  ;;  %v4769_v12 = vld [vmem:[%s4970_s10 + $0x8] sm:$0xff]   ;;  %v4770_v13 = vld [vmem:[%s4970_s10] sm:$0xff]   ;;  %v4771_v18 = vld [vmem:[%s4970_s10 + $0x10] sm:$0xff]  }
  0x10   : > { %4472 = vmatprep.mubr.bf16.mxu0 %v4769_v12  ;;  %4616 = vmatprep.mubr.bf16.mxu1 %v4770_v13  ;;  %v4765_v14 = vld [vmem:[%s5330_s1 + $0x48] sm:$0xff]   ;;  %v4767_v16 = vld [vmem:[%s5330_s1 + $0x40] sm:$0xff]   ;;  %v4773_v20 = vld [vmem:[%s4970_s10 + $0x18] sm:$0xff]  }
  0x11   : > { %4459 = vmatpush3.bf16.msra.mxu0 %v4755_v2  ;;  %v4766_v15 = vld [vmem:[%s5330_s1 + $0x8] sm:$0xff]   ;;  %v4768_v17 = vld [vmem:[%s5330_s1] sm:$0xff]   ;;  %v4774_v21 = vld [vmem:[%s4970_s10 + $0x10] sm:$0xff]  }
  0x12   : > { %4603 = vmatpush3.bf16.msra.mxu1 %v4756_v3  ;;  %4460 = vmatprep.subr.bf16.mxu0 %v4757_v4  ;;  %v4772_v19 = vld [vmem:[%s4970_s10 + $0x8] sm:$0xff]   ;;  %v4775_v22 = vld [vmem:[%s4970_s10 + $0x20] sm:$0xff]   ;;  %v4776_v23 = vld [vmem:[%s4970_s10 + $0x18] sm:$0xff]  }
  0x13   : > { %4604 = vmatprep.subr.bf16.mxu1 %v4758_v5  ;;  %v4777_v24 = vld [vmem:[%s4970_s10 + $0x28] sm:$0xff]   ;;  %v4778_v25 = vld [vmem:[%s4970_s10 + $0x20] sm:$0xff]   ;;  %v4779_v26 = vld [vmem:[%s4970_s10 + $0x30] sm:$0xff]  }
  0x14   : > { %v4780_v27 = vld [vmem:[%s4970_s10 + $0x28] sm:$0xff]   ;;  %v4781_v28 = vld [vmem:[%s4970_s10 + $0x38] sm:$0xff]   ;;  %v4782_v29 = vld [vmem:[%s4970_s10 + $0x30] sm:$0xff]  }
  0x15   : > { %4461 = vmatpush3.bf16.msra.mxu0 %v4757_v4  ;;  %v4783_v30 = vld [vmem:[%s4970_s10 + $0x40] sm:$0xff]   ;;  %v4784_v31 = vld [vmem:[%s4970_s10 + $0x38] sm:$0xff]   ;;  %v4785_v32 = vld [vmem:[%s4970_s10 + $0x48] sm:$0xff]  }
  0x16   : > { %4605 = vmatpush3.bf16.msra.mxu1 %v4758_v5  ;;  %4462 = vmatprep.subr.bf16.mxu0 %v4759_v6  ;;  %v4786_v33 = vld [vmem:[%s4970_s10 + $0x40] sm:$0xff]   ;;  %v4787_v34 = vld [vmem:[%s4970_s10 + $0x50] sm:$0xff]   ;;  %v4788_v35 = vld [vmem:[%s4970_s10 + $0x48] sm:$0xff]  }
  0x17   : > { %4606 = vmatprep.subr.bf16.mxu1 %v4760_v7  ;;  %v4789_v36 = vld [vmem:[%s4970_s10 + $0x58] sm:$0xff]   ;;  %v4790_v37 = vld [vmem:[%s4970_s10 + $0x50] sm:$0xff]   ;;  %v4791_v38 = vld [vmem:[%s4970_s10 + $0x60] sm:$0xff]  }
  0x18   : > { %v4792_v39 = vld [vmem:[%s4970_s10 + $0x58] sm:$0xff]   ;;  %v4793_v40 = vld [vmem:[%s4970_s10 + $0x68] sm:$0xff]   ;;  %v4794_v41 = vld [vmem:[%s4970_s10 + $0x60] sm:$0xff]  }
  0x19   : > { %4463 = vmatpush3.bf16.msra.mxu0 %v4759_v6  ;;  %v4795_v42 = vld [vmem:[%s4970_s10 + $0x70] sm:$0xff]   ;;  %v4796_v43 = vld [vmem:[%s4970_s10 + $0x68] sm:$0xff]   ;;  %v4797_v44 = vld [vmem:[%s4970_s10 + $0x78] sm:$0xff]  }
  0x1a   : > { %4607 = vmatpush3.bf16.msra.mxu1 %v4760_v7  ;;  %4464 = vmatprep.subr.bf16.mxu0 %v4761_v8  ;;  %v4798_v45 = vld [vmem:[%s4970_s10 + $0x70] sm:$0xff]   ;;  %v4799_v46 = vld [vmem:[%s4970_s10 + $0x80] sm:$0xff]   ;;  %v4800_v47 = vld [vmem:[%s4970_s10 + $0x78] sm:$0xff]  }
  0x1b   : > { %4608 = vmatprep.subr.bf16.mxu1 %v4762_v9  ;;  %v4801_v48 = vld [vmem:[%s4970_s10 + $0x88] sm:$0xff]   ;;  %v4802_v49 = vld [vmem:[%s4970_s10 + $0x80] sm:$0xff]   ;;  %v4803_v50 = vld [vmem:[%s4970_s10 + $0x90] sm:$0xff]  }
  0x1c   : > { %v4804_v51 = vld [vmem:[%s4970_s10 + $0x88] sm:$0xff]   ;;  %v4805_v52 = vld [vmem:[%s4970_s10 + $0x98] sm:$0xff]   ;;  %v4806_v53 = vld [vmem:[%s4970_s10 + $0x90] sm:$0xff]  }
  0x1d   : > { %4465 = vmatpush3.bf16.msra.mxu0 %v4761_v8  ;;  %v4807_v54 = vld [vmem:[%s4970_s10 + $0xa0] sm:$0xff]   ;;  %v4808_v55 = vld [vmem:[%s4970_s10 + $0x98] sm:$0xff]   ;;  %v4809_v56 = vld [vmem:[%s4970_s10 + $0xa8] sm:$0xff]  }
  0x1e   : > { %4609 = vmatpush3.bf16.msra.mxu1 %v4762_v9  ;;  %4466 = vmatprep.subr.bf16.mxu0 %v4763_v10  ;;  %v4810_v57 = vld [vmem:[%s4970_s10 + $0xa0] sm:$0xff]   ;;  %v4811_v58 = vld [vmem:[%s4970_s10 + $0xb0] sm:$0xff]   ;;  %v4812_v59 = vld [vmem:[%s4970_s10 + $0xa8] sm:$0xff]  }
  0x1f   : > { %4610 = vmatprep.subr.bf16.mxu1 %v4764_v11  ;;  %v4813_v60 = vld [vmem:[%s4970_s10 + $0xb8] sm:$0xff]   ;;  %v4814_v61 = vld [vmem:[%s4970_s10 + $0xb0] sm:$0xff]   ;;  %v4815_v62 = vld [vmem:[%s4970_s10 + $0xc0] sm:$0xff]  }
  0x20   : > { %v4816_v63 = vld [vmem:[%s4970_s10 + $0xb8] sm:$0xff]   ;;  %v4817_v0 = vld [vmem:[%s4970_s10 + $0xc8] sm:$0xff]   ;;  %v4818_v1 = vld [vmem:[%s4970_s10 + $0xc0] sm:$0xff]  }
  0x21   : > { %4467 = vmatpush3.bf16.msra.mxu0 %v4763_v10  ;;  %v4819_v2 = vld [vmem:[%s4970_s10 + $0xd0] sm:$0xff]   ;;  %v4820_v3 = vld [vmem:[%s4970_s10 + $0xc8] sm:$0xff]   ;;  %v4821_v4 = vld [vmem:[%s4970_s10 + $0xd8] sm:$0xff]  }
  0x22   : > { %4611 = vmatpush3.bf16.msra.mxu1 %v4764_v11  ;;  %4468 = vmatprep.subr.bf16.mxu0 %v4765_v14  ;;  %v4822_v5 = vld [vmem:[%s4970_s10 + $0xd0] sm:$0xff]   ;;  %v4823_v6 = vld [vmem:[%s4970_s10 + $0xe0] sm:$0xff]   ;;  %v4824_v7 = vld [vmem:[%s4970_s10 + $0xd8] sm:$0xff]  }
  0x23   : > { %4612 = vmatprep.subr.bf16.mxu1 %v4766_v15  ;;  %v4825_v8 = vld [vmem:[%s4970_s10 + $0xe8] sm:$0xff]   ;;  %v4826_v9 = vld [vmem:[%s4970_s10 + $0xe0] sm:$0xff]   ;;  %v4827_v10 = vld [vmem:[%s4970_s10 + $0xf0] sm:$0xff]  }
  0x24   : > { %v4828_v11 = vld [vmem:[%s4970_s10 + $0xe8] sm:$0xff]   ;;  %v4829_v12 = vld [vmem:[%s4970_s10 + $0xf8] sm:$0xff]   ;;  %v4830_v13 = vld [vmem:[%s4970_s10 + $0xf0] sm:$0xff]  }
  0x25   : > { %4469 = vmatpush3.bf16.msra.mxu0 %v4765_v14  ;;  %v4831_v14 = vld [vmem:[%s4970_s10 + $0x100] sm:$0xff]  }
  0x26   : > { %4613 = vmatpush3.bf16.msra.mxu1 %v4766_v15  ;;  %4470 = vmatprep.subr.bf16.mxu0 %v4767_v16  ;;  %v4832_v15 = vld [vmem:[%s4970_s10 + $0xf8] sm:$0xff]  }
  0x27   : > { %4614 = vmatprep.subr.bf16.mxu1 %v4768_v17 }
  0x29   : > { %4471 = vmatpush3.bf16.msra.mxu0 %v4767_v16  ;;  %v4833_v16 = vld [vmem:[%s4970_s10 + $0x108] sm:$0xff]  }
  0x2a   : > { %4615 = vmatpush3.bf16.msra.mxu1 %v4768_v17  ;;  %v4834_v17 = vld [vmem:[%s4970_s10 + $0x100] sm:$0xff]  }
  0x2c   : > { %4473 = vmatmul.mubr.bf16.vlgmr.msra.gmra.mxu0 %v4771_v18  ;;  %v4835_v18 = vld [vmem:[%s4970_s10 + $0x110] sm:$0xff]  }
  0x2d   : > { %4617 = vmatmul.mubr.bf16.vlgmr.msra.gmra.mxu1 %v4772_v19  ;;  %4476 = vmatprep.mubr.bf16.mxu0 %v4773_v20  ;;  %v4836_v19 = vld [vmem:[%s4970_s10 + $0x108] sm:$0xff]   ;;  %v4837_v20 = vld [vmem:[%s4970_s10 + $0x118] sm:$0xff]  }
  0x2e   : > { %4620 = vmatprep.mubr.bf16.mxu1 %v4774_v21  ;;  %v4838_v21 = vld [vmem:[%s4970_s10 + $0x110] sm:$0xff]  }
  0x34   : > { %4477 = vmatmul.mubr.bf16.gmra.mxu0 %v4775_v22  ;;  %v4839_v22 = vld [vmem:[%s4970_s10 + $0x120] sm:$0xff]  }
  0x35   : > { %4621 = vmatmul.mubr.bf16.gmra.mxu1 %v4776_v23  ;;  %4480 = vmatprep.mubr.bf16.mxu0 %v4777_v24  ;;  %v4840_v23 = vld [vmem:[%s4970_s10 + $0x118] sm:$0xff]   ;;  %v4841_v24 = vld [vmem:[%s4970_s10 + $0x128] sm:$0xff]  }
  0x36   : > { %4624 = vmatprep.mubr.bf16.mxu1 %v4778_v25  ;;  %v4842_v25 = vld [vmem:[%s4970_s10 + $0x120] sm:$0xff]  }
  0x3c   : > { %4481 = vmatmul.mubr.bf16.gmra.mxu0 %v4779_v26  ;;  %v4843_v26 = vld [vmem:[%s4970_s10 + $0x130] sm:$0xff]  }
  0x3d   : > { %4625 = vmatmul.mubr.bf16.gmra.mxu1 %v4780_v27  ;;  %4484 = vmatprep.mubr.bf16.mxu0 %v4781_v28  ;;  %v4844_v27 = vld [vmem:[%s4970_s10 + $0x128] sm:$0xff]   ;;  %v4845_v28 = vld [vmem:[%s4970_s10 + $0x138] sm:$0xff]  }
  0x3e   : > { %4628 = vmatprep.mubr.bf16.mxu1 %v4782_v29  ;;  %v4846_v29 = vld [vmem:[%s4970_s10 + $0x130] sm:$0xff]  }
  0x44   : > { %4485 = vmatmul.mubr.bf16.gmra.mxu0 %v4783_v30  ;;  %v4847_v30 = vld [vmem:[%s4970_s10 + $0x140] sm:$0xff]  }
  0x45   : > { %4629 = vmatmul.mubr.bf16.gmra.mxu1 %v4784_v31  ;;  %4488 = vmatprep.mubr.bf16.mxu0 %v4785_v32  ;;  %v4848_v31 = vld [vmem:[%s4970_s10 + $0x138] sm:$0xff]   ;;  %v4849_v32 = vld [vmem:[%s4970_s10 + $0x148] sm:$0xff]  }
  0x46   : > { %4632 = vmatprep.mubr.bf16.mxu1 %v4786_v33  ;;  %v4850_v33 = vld [vmem:[%s4970_s10 + $0x140] sm:$0xff]  }
  0x4c   : > { %4489 = vmatmul.mubr.bf16.gmra.mxu0 %v4787_v34  ;;  %v4851_v34 = vld [vmem:[%s4970_s10 + $0x150] sm:$0xff]  }
  0x4d   : > { %4633 = vmatmul.mubr.bf16.gmra.mxu1 %v4788_v35  ;;  %4492 = vmatprep.mubr.bf16.mxu0 %v4789_v36  ;;  %v4852_v35 = vld [vmem:[%s4970_s10 + $0x148] sm:$0xff]   ;;  %v4853_v36 = vld [vmem:[%s4970_s10 + $0x158] sm:$0xff]  }
  0x4e   : > { %4636 = vmatprep.mubr.bf16.mxu1 %v4790_v37  ;;  %v4854_v37 = vld [vmem:[%s4970_s10 + $0x150] sm:$0xff]  }
  0x54   : > { %4493 = vmatmul.mubr.bf16.gmra.mxu0 %v4791_v38  ;;  %v4855_v38 = vld [vmem:[%s4970_s10 + $0x160] sm:$0xff]  }
  0x55   : > { %4637 = vmatmul.mubr.bf16.gmra.mxu1 %v4792_v39  ;;  %4496 = vmatprep.mubr.bf16.mxu0 %v4793_v40  ;;  %v4856_v39 = vld [vmem:[%s4970_s10 + $0x158] sm:$0xff]   ;;  %v4857_v40 = vld [vmem:[%s4970_s10 + $0x168] sm:$0xff]  }
  0x56   : > { %4640 = vmatprep.mubr.bf16.mxu1 %v4794_v41  ;;  %v4858_v41 = vld [vmem:[%s4970_s10 + $0x160] sm:$0xff]  }
  0x5c   : > { %4497 = vmatmul.mubr.bf16.gmra.mxu0 %v4795_v42  ;;  %v4859_v42 = vld [vmem:[%s4970_s10 + $0x170] sm:$0xff]  }
  0x5d   : > { %4641 = vmatmul.mubr.bf16.gmra.mxu1 %v4796_v43  ;;  %4500 = vmatprep.mubr.bf16.mxu0 %v4797_v44  ;;  %v4860_v43 = vld [vmem:[%s4970_s10 + $0x168] sm:$0xff]   ;;  %v4861_v44 = vld [vmem:[%s4970_s10 + $0x178] sm:$0xff]  }
  0x5e   : > { %4644 = vmatprep.mubr.bf16.mxu1 %v4798_v45  ;;  %v4862_v45 = vld [vmem:[%s4970_s10 + $0x170] sm:$0xff]  }
  0x64   : > { %4501 = vmatmul.mubr.bf16.gmra.mxu0 %v4799_v46  ;;  %v4863_v46 = vld [vmem:[%s4970_s10 + $0x180] sm:$0xff]  }
  0x65   : > { %4645 = vmatmul.mubr.bf16.gmra.mxu1 %v4800_v47  ;;  %4504 = vmatprep.mubr.bf16.mxu0 %v4801_v48  ;;  %v4864_v47 = vld [vmem:[%s4970_s10 + $0x178] sm:$0xff]   ;;  %v4865_v48 = vld [vmem:[%s4970_s10 + $0x188] sm:$0xff]  }
  0x66   : > { %4648 = vmatprep.mubr.bf16.mxu1 %v4802_v49  ;;  %v4866_v49 = vld [vmem:[%s4970_s10 + $0x180] sm:$0xff]  }
  0x6c   : > { %4505 = vmatmul.mubr.bf16.gmra.mxu0 %v4803_v50  ;;  %v4867_v50 = vld [vmem:[%s4970_s10 + $0x190] sm:$0xff]  }
  0x6d   : > { %4649 = vmatmul.mubr.bf16.gmra.mxu1 %v4804_v51  ;;  %4508 = vmatprep.mubr.bf16.mxu0 %v4805_v52  ;;  %v4868_v51 = vld [vmem:[%s4970_s10 + $0x188] sm:$0xff]   ;;  %v4869_v52 = vld [vmem:[%s4970_s10 + $0x198] sm:$0xff]  }
  0x6e   : > { %4652 = vmatprep.mubr.bf16.mxu1 %v4806_v53  ;;  %v4870_v53 = vld [vmem:[%s4970_s10 + $0x190] sm:$0xff]  }
  0x74   : > { %4509 = vmatmul.mubr.bf16.gmra.mxu0 %v4807_v54 }
  0x75   : > { %4653 = vmatmul.mubr.bf16.gmra.mxu1 %v4808_v55  ;;  %4512 = vmatprep.mubr.bf16.mxu0 %v4809_v56  ;;  %v5095_v56 = vld [vmem:[%s5331_s2] ss:$0 sm:$0xff] }
  0x76   : > { %4656 = vmatprep.mubr.bf16.mxu1 %v4810_v57 }
  0x7c   : > { %4513 = vmatmul.mubr.bf16.gmra.mxu0 %v4811_v58 }
  0x7d   : > { %4657 = vmatmul.mubr.bf16.gmra.mxu1 %v4812_v59  ;;  %4516 = vmatprep.mubr.bf16.mxu0 %v4813_v60 }
  0x7e   : > { %4660 = vmatprep.mubr.bf16.mxu1 %v4814_v61 }
  0x84   : > { %4517 = vmatmul.mubr.bf16.gmra.mxu0 %v4815_v62 }
  0x85   : > { %4661 = vmatmul.mubr.bf16.gmra.mxu1 %v4816_v63  ;;  %4520 = vmatprep.mubr.bf16.mxu0 %v4817_v0  ;;  %v4871_v63 = vld [vmem:[%s4970_s10 + $0x1a0] sm:$0xff]  }
  0x86   : > { %4664 = vmatprep.mubr.bf16.mxu1 %v4818_v1  ;;  %v4872_v1 = vld [vmem:[%s4970_s10 + $0x198] sm:$0xff]  }
  0x8c   : > { %4521 = vmatmul.mubr.bf16.gmra.mxu0 %v4819_v2  ;;  %v4873_v2 = vld [vmem:[%s4970_s10 + $0x1a8] sm:$0xff]  }
  0x8d   : > { %4665 = vmatmul.mubr.bf16.gmra.mxu1 %v4820_v3  ;;  %4524 = vmatprep.mubr.bf16.mxu0 %v4821_v4 }
  0x8e   : > { %4668 = vmatprep.mubr.bf16.mxu1 %v4822_v5 }
  0x94   : > { %4525 = vmatmul.mubr.bf16.gmra.mxu0 %v4823_v6  ;;  %v4874_v6 = vld [vmem:[%s4970_s10 + $0x1a0] sm:$0xff]  }
  0x95   : > { %4669 = vmatmul.mubr.bf16.gmra.mxu1 %v4824_v7  ;;  %4528 = vmatprep.mubr.bf16.mxu0 %v4825_v8 }
  0x96   : > { %4672 = vmatprep.mubr.bf16.mxu1 %v4826_v9 }
  0x9c   : > { %4529 = vmatmul.mubr.bf16.gmra.mxu0 %v4827_v10 }
  0x9d   : > { %4673 = vmatmul.mubr.bf16.gmra.mxu1 %v4828_v11  ;;  %4532 = vmatprep.mubr.bf16.mxu0 %v4829_v12 }
  0x9e   : > { %4676 = vmatprep.mubr.bf16.mxu1 %v4830_v13 }
  0xa4   : > { %4533 = vmatmul.mubr.bf16.gmra.mxu0 %v4831_v14 }
  0xa5   : > { %4677 = vmatmul.mubr.bf16.gmra.mxu1 %v4832_v15  ;;  %4536 = vmatprep.mubr.bf16.mxu0 %v4833_v16 }
  0xa6   : > { %4680 = vmatprep.mubr.bf16.mxu1 %v4834_v17 }
  0xac   : > { %4537 = vmatmul.mubr.bf16.gmra.mxu0 %v4835_v18 }
  0xad   : > { %4681 = vmatmul.mubr.bf16.gmra.mxu1 %v4836_v19  ;;  %4540 = vmatprep.mubr.bf16.mxu0 %v4837_v20 }
  0xae   : > { %4684 = vmatprep.mubr.bf16.mxu1 %v4838_v21 }
  0xb4   : > { %4541 = vmatmul.mubr.bf16.gmra.mxu0 %v4839_v22 }
  0xb5   : > { %4685 = vmatmul.mubr.bf16.gmra.mxu1 %v4840_v23  ;;  %4544 = vmatprep.mubr.bf16.mxu0 %v4841_v24  ;;  %v4875_v24 = vld [vmem:[%s4970_s10 + $0x1b0] sm:$0xff]  }
  0xb6   : > { %4688 = vmatprep.mubr.bf16.mxu1 %v4842_v25 }
  0xbc   : > { %4545 = vmatmul.mubr.bf16.gmra.mxu0 %v4843_v26 }
  0xbd   : > { %4689 = vmatmul.mubr.bf16.gmra.mxu1 %v4844_v27  ;;  %4548 = vmatprep.mubr.bf16.mxu0 %v4845_v28  ;;  %v4876_v27 = vld [vmem:[%s4970_s10 + $0x1a8] sm:$0xff]   ;;  %v4877_v28 = vld [vmem:[%s4970_s10 + $0x1b8] sm:$0xff]  }
  0xbe   : > { %4692 = vmatprep.mubr.bf16.mxu1 %v4846_v29 }
  0xc4   : > { %4549 = vmatmul.mubr.bf16.gmra.mxu0 %v4847_v30 }
  0xc5   : > { %4693 = vmatmul.mubr.bf16.gmra.mxu1 %v4848_v31  ;;  %4552 = vmatprep.mubr.bf16.mxu0 %v4849_v32 }
  0xc6   : > { %4696 = vmatprep.mubr.bf16.mxu1 %v4850_v33 }
  0xcc   : > { %4553 = vmatmul.mubr.bf16.gmra.mxu0 %v4851_v34  ;;  %v4878_v34 = vld [vmem:[%s4970_s10 + $0x1b0] sm:$0xff]  }
  0xcd   : > { %4697 = vmatmul.mubr.bf16.gmra.mxu1 %v4852_v35  ;;  %4556 = vmatprep.mubr.bf16.mxu0 %v4853_v36 }
  0xce   : > { %4700 = vmatprep.mubr.bf16.mxu1 %v4854_v37 }
  0xd4   : > { %4557 = vmatmul.mubr.bf16.gmra.mxu0 %v4855_v38 }
  0xd5   : > { %4701 = vmatmul.mubr.bf16.gmra.mxu1 %v4856_v39  ;;  %4560 = vmatprep.mubr.bf16.mxu0 %v4857_v40 }
  0xd6   : > { %4704 = vmatprep.mubr.bf16.mxu1 %v4858_v41 }
  0xdc   : > { %4561 = vmatmul.mubr.bf16.gmra.mxu0 %v4859_v42 }
  0xdd   : > { %4705 = vmatmul.mubr.bf16.gmra.mxu1 %v4860_v43  ;;  %4564 = vmatprep.mubr.bf16.mxu0 %v4861_v44 }
  0xde   : > { %4708 = vmatprep.mubr.bf16.mxu1 %v4862_v45 }
  0xe4   : > { %4565 = vmatmul.mubr.bf16.gmra.mxu0 %v4863_v46 }
  0xe5   : > { %4709 = vmatmul.mubr.bf16.gmra.mxu1 %v4864_v47  ;;  %4568 = vmatprep.mubr.bf16.mxu0 %v4865_v48 }
  0xe6   : > { %4712 = vmatprep.mubr.bf16.mxu1 %v4866_v49 }
  0xec   : > { %v4474_v54 = vpop.f32.mrf.mxu0  ;;  %4569 = vmatmul.mubr.bf16.gmra.mxu0 %v4867_v50 }
  0xed   : > { %v4618_v55 = vpop.f32.mrf.mxu1  ;;  %4713 = vmatmul.mubr.bf16.gmra.mxu1 %v4868_v51  ;;  %4572 = vmatprep.mubr.bf16.mxu0 %v4869_v52 }
  0xee   : > { %v1913_v57 = vadd.f32 %v4618_v55, %v4474_v54  ;;  %v927_v58 = vpop.f32.mrf.mxu0  ;;  %4716 = vmatprep.mubr.bf16.mxu1 %v4870_v53  ;;  %v4879_v53 = vld [vmem:[%s4970_s10 + $0x1c0] sm:$0xff]  }
  0xef   : > { %v1904_v59 = vpop.f32.mrf.mxu1 }
  0xf0   : > { %v2424_v60 = vadd.f32 %v5095_v56, %v1913_v57  ;;  %v1905_v61 = vadd.f32 %v1904_v59, %v927_v58  ;;  %v4475_v62 = vpop.f32.mrf.mxu0  ;;  %v4880_v58 = vld [vmem:[%s4970_s10 + $0x1b8] sm:$0xff]   ;;  %v4881_v59 = vld [vmem:[%s4970_s10 + $0x1c8] sm:$0xff]  }
  0xf1   : > { %v4619_v0 = vpop.f32.mrf.mxu1 }
  0xf2   : > { %v2422_v3 = vadd.f32 %v5095_v56, %v1905_v61  ;;  %v1916_v4 = vadd.f32 %v4619_v0, %v4475_v62  ;;  %v930_v5 = vpop.f32.mrf.mxu0  ;;  %v2552_v8 = vmul.f32 0.2, %v2424_v60  ;;  %v4882_v0 = vld [vmem:[%s4970_s10 + $0x1c0] sm:$0xff]  }
  0xf3   : > { %v1907_v7 = vpop.f32.mrf.mxu1 }
  0xf4   : > { %v2425_v9 = vadd.f32 %v5095_v56, %v1916_v4  ;;  %v1908_v10 = vadd.f32 %v1907_v7, %v930_v5  ;;  %v4478_v11 = vpop.f32.mrf.mxu0  ;;  %4573 = vmatmul.mubr.bf16.gmra.mxu0 %v4871_v63  ;;  %v2550_v13 = vmul.f32 0.2, %v2422_v3  ;;  %v2680_v19 = vmax.f32 %v2424_v60, %v2552_v8 }
  0xf5   : > { %v4622_v12 = vpop.f32.mrf.mxu1  ;;  %4717 = vmatmul.mubr.bf16.gmra.mxu1 %v4872_v1  ;;  %4576 = vmatprep.mubr.bf16.mxu0 %v4873_v2 }
  0xf6   : > { %v2553_v14 = vmul.f32 0.2, %v2425_v9  ;;  %v2423_v15 = vadd.f32 %v5095_v56, %v1908_v10  ;;  %v1929_v16 = vadd.f32 %v4622_v12, %v4478_v11  ;;  %v943_v17 = vpop.f32.mrf.mxu0  ;;  %4720 = vmatprep.mubr.bf16.mxu1 %v4874_v6  ;;  %v2678_v29 = vmax.f32 %v2422_v3, %v2550_v13 }
  0xf7   : > { %v1920_v18 = vpop.f32.mrf.mxu1 }
  0xf8   : > { %v2681_v20 = vmax.f32 %v2425_v9, %v2553_v14  ;;  %v2551_v21 = vmul.f32 0.2, %v2423_v15  ;;  %v1921_v22 = vadd.f32 %v1920_v18, %v943_v17  ;;  %v4479_v23 = vpop.f32.mrf.mxu0  ;;  %v2428_v25 = vadd.f32 %v5095_v56, %v1929_v16 }
  0xf9   : > { %v4623_v26 = vpop.f32.mrf.mxu1 }
  0xfa   : > { %v3937_v30 = vpack.c.bf16 %v2681_v20, %v2680_v19  ;;  %v2679_v31 = vmax.f32 %v2423_v15, %v2551_v21  ;;  %v2426_v32 = vadd.f32 %v5095_v56, %v1921_v22  ;;  %v946_v33 = vpop.f32.mrf.mxu0  ;;  %v1932_v35 = vadd.f32 %v4623_v26, %v4479_v23  ;;  %v4883_v21 = vld [vmem:[%s4970_s10 + $0x1d0] sm:$0xff]  }
  0xfb   : > { %v1923_v36 = vpop.f32.mrf.mxu1  ;;  %v2556_v40 = vmul.f32 0.2, %v2428_v25 }
  0xfc   : > { %4249 = vst [vmem:[%s5110_s13 + $0x8] sm:$0xff] %v3937_v30   ;;  %v3932_v37 = vpack.c.bf16 %v2679_v31, %v2678_v29  ;;  %v1924_v38 = vadd.f32 %v1923_v36, %v946_v33  ;;  %v4482_v39 = vpop.f32.mrf.mxu0  ;;  %4577 = vmatmul.mubr.bf16.gmra.mxu0 %v4875_v24  ;;  %v2429_v41 = vadd.f32 %v5095_v56, %v1932_v35  ;;  %v2554_v43 = vmul.f32 0.2, %v2426_v32  ;;  %v4884_v24 = vld [vmem:[%s4970_s10 + $0x1c8] sm:$0xff]   ;;  %v4886_v30 = vld [vmem:[%s4970_s10 + $0x1d0] sm:$0xff]  }
  0xfd   : > { %v4626_v42 = vpop.f32.mrf.mxu1  ;;  %4721 = vmatmul.mubr.bf16.gmra.mxu1 %v4876_v27  ;;  %4580 = vmatprep.mubr.bf16.mxu0 %v4877_v28  ;;  %v2684_v54 = vmax.f32 %v2428_v25, %v2556_v40  ;;  %v4885_v25 = vld [vmem:[%s4970_s10 + $0x1d8] sm:$0xff]  }
  0xfe   : > { %3933 = vst [vmem:[%s5110_s13] sm:$0xff] %v3932_v37   ;;  %v2427_v44 = vadd.f32 %v5095_v56, %v1924_v38  ;;  %v1945_v45 = vadd.f32 %v4626_v42, %v4482_v39  ;;  %v959_v46 = vpop.f32.mrf.mxu0  ;;  %4724 = vmatprep.mubr.bf16.mxu1 %v4878_v34  ;;  %v2557_v47 = vmul.f32 0.2, %v2429_v41  ;;  %v2682_v60 = vmax.f32 %v2426_v32, %v2554_v43 }
  0xff   : > { %v1936_v48 = vpop.f32.mrf.mxu1 }
 0x100   : > { %v2555_v49 = vmul.f32 0.2, %v2427_v44  ;;  %v2432_v50 = vadd.f32 %v5095_v56, %v1945_v45  ;;  %v1937_v51 = vadd.f32 %v1936_v48, %v959_v46  ;;  %v4483_v52 = vpop.f32.mrf.mxu0  ;;  %v2685_v55 = vmax.f32 %v2429_v41, %v2557_v47 }
 0x101   : > { %v4627_v57 = vpop.f32.mrf.mxu1 }
 0x102   : > { %v2683_v61 = vmax.f32 %v2427_v44, %v2555_v49  ;;  %v1948_v62 = vadd.f32 %v4627_v57, %v4483_v52  ;;  %v962_v63 = vpop.f32.mrf.mxu0  ;;  %v3947_v1 = vpack.c.bf16 %v2685_v55, %v2684_v54  ;;  %v2430_v2 = vadd.f32 %v5095_v56, %v1937_v51  ;;  %v4887_v51 = vld [vmem:[%s4970_s10 + $0x1e0] sm:$0xff]   ;;  %v4888_v54 = vld [vmem:[%s4970_s10 + $0x1d8] sm:$0xff]   ;;  %v4889_v55 = vld [vmem:[%s4970_s10 + $0x1e8] sm:$0xff]  }
 0x103   : > { %v1939_v3 = vpop.f32.mrf.mxu1  ;;  %v2560_v5 = vmul.f32 0.2, %v2432_v50 }
 0x104   : > { %v3942_v4 = vpack.c.bf16 %v2683_v61, %v2682_v60  ;;  %v2433_v6 = vadd.f32 %v5095_v56, %v1948_v62  ;;  %v4486_v7 = vpop.f32.mrf.mxu0  ;;  %4581 = vmatmul.mubr.bf16.gmra.mxu0 %v4879_v53  ;;  %4251 = vst [vmem:[%s5110_s13 + $0x18] sm:$0xff] %v3947_v1   ;;  %v1940_v8 = vadd.f32 %v1939_v3, %v962_v63  ;;  %v2558_v13 = vmul.f32 0.2, %v2430_v2  ;;  %v4890_v62 = vld [vmem:[%s4970_s10 + $0x1e0] sm:$0xff]  }
 0x105   : > { %v4630_v9 = vpop.f32.mrf.mxu1  ;;  %4725 = vmatmul.mubr.bf16.gmra.mxu1 %v4880_v58  ;;  %4584 = vmatprep.mubr.bf16.mxu0 %v4881_v59  ;;  %v2688_v16 = vmax.f32 %v2432_v50, %v2560_v5 }
 0x106   : > { %4250 = vst [vmem:[%s5110_s13 + $0x10] sm:$0xff] %v3942_v4   ;;  %v2561_v10 = vmul.f32 0.2, %v2433_v6  ;;  %v1961_v11 = vadd.f32 %v4630_v9, %v4486_v7  ;;  %v975_v12 = vpop.f32.mrf.mxu0  ;;  %4728 = vmatprep.mubr.bf16.mxu1 %v4882_v0  ;;  %v2431_v14 = vadd.f32 %v5095_v56, %v1940_v8  ;;  %v2686_v31 = vmax.f32 %v2430_v2, %v2558_v13 }
 0x107   : > { %v1952_v15 = vpop.f32.mrf.mxu1 }
 0x108   : > { %v2689_v17 = vmax.f32 %v2433_v6, %v2561_v10  ;;  %v2436_v18 = vadd.f32 %v5095_v56, %v1961_v11  ;;  %v1953_v19 = vadd.f32 %v1952_v15, %v975_v12  ;;  %v4487_v20 = vpop.f32.mrf.mxu0  ;;  %v2559_v22 = vmul.f32 0.2, %v2431_v14 }
 0x109   : > { %v4631_v23 = vpop.f32.mrf.mxu1 }
 0x10a   : > { %v3957_v26 = vpack.c.bf16 %v2689_v17, %v2688_v16  ;;  %v2434_v27 = vadd.f32 %v5095_v56, %v1953_v19  ;;  %v1964_v28 = vadd.f32 %v4631_v23, %v4487_v20  ;;  %v978_v29 = vpop.f32.mrf.mxu0  ;;  %v2687_v32 = vmax.f32 %v2431_v14, %v2559_v22  ;;  %v4891_v17 = vld [vmem:[%s4970_s10 + $0x1f0] sm:$0xff]   ;;  %v4893_v22 = vld [vmem:[%s4970_s10 + $0x1f8] sm:$0xff]  }
 0x10b   : > { %v1955_v33 = vpop.f32.mrf.mxu1  ;;  %v2564_v34 = vmul.f32 0.2, %v2436_v18 }
 0x10c   : > { %4253 = vst [vmem:[%s5110_s13 + $0x28] sm:$0xff] %v3957_v26   ;;  %v2437_v35 = vadd.f32 %v5095_v56, %v1964_v28  ;;  %v1956_v36 = vadd.f32 %v1955_v33, %v978_v29  ;;  %v4490_v37 = vpop.f32.mrf.mxu0  ;;  %4585 = vmatmul.mubr.bf16.gmra.mxu0 %v4883_v21  ;;  %v3952_v38 = vpack.c.bf16 %v2687_v32, %v2686_v31  ;;  %v2562_v40 = vmul.f32 0.2, %v2434_v27  ;;  %v4892_v21 = vld [vmem:[%s4970_s10 + $0x1e8] sm:$0xff]  }
 0x10d   : > { %v4634_v39 = vpop.f32.mrf.mxu1  ;;  %4729 = vmatmul.mubr.bf16.gmra.mxu1 %v4884_v24  ;;  %4588 = vmatprep.mubr.bf16.mxu0 %v4885_v25  ;;  %v2692_v46 = vmax.f32 %v2436_v18, %v2564_v34 }
 0x10e   : > { %v2565_v41 = vmul.f32 0.2, %v2437_v35  ;;  %v2435_v42 = vadd.f32 %v5095_v56, %v1956_v36  ;;  %v1977_v43 = vadd.f32 %v4634_v39, %v4490_v37  ;;  %v991_v44 = vpop.f32.mrf.mxu0  ;;  %4732 = vmatprep.mubr.bf16.mxu1 %v4886_v30  ;;  %4252 = vst [vmem:[%s5110_s13 + $0x20] sm:$0xff] %v3952_v38   ;;  %v2690_v57 = vmax.f32 %v2434_v27, %v2562_v40  ;;  %v4894_v27 = vld [vmem:[%s4970_s10 + $0x1f0] sm:$0xff]  }
 0x10f   : > { %v1968_v45 = vpop.f32.mrf.mxu1 }
 0x110   : > { %v2693_v47 = vmax.f32 %v2437_v35, %v2565_v41  ;;  %v2563_v48 = vmul.f32 0.2, %v2435_v42  ;;  %v1969_v49 = vadd.f32 %v1968_v45, %v991_v44  ;;  %v4491_v50 = vpop.f32.mrf.mxu0  ;;  %v2440_v52 = vadd.f32 %v5095_v56, %v1977_v43 }
 0x111   : > { %v4635_v53 = vpop.f32.mrf.mxu1 }
 0x112   : > { %v3967_v58 = vpack.c.bf16 %v2693_v47, %v2692_v46  ;;  %v2691_v59 = vmax.f32 %v2435_v42, %v2563_v48  ;;  %v2438_v60 = vadd.f32 %v5095_v56, %v1969_v49  ;;  %v994_v61 = vpop.f32.mrf.mxu0  ;;  %v1980_v63 = vadd.f32 %v4635_v53, %v4491_v50  ;;  %v4895_v48 = vld [vmem:[%s4970_s10 + $0x200] sm:$0xff]  }
 0x113   : > { %v1971_v0 = vpop.f32.mrf.mxu1  ;;  %v2568_v4 = vmul.f32 0.2, %v2440_v52 }
 0x114   : > { %4255 = vst [vmem:[%s5110_s13 + $0x38] sm:$0xff] %v3967_v58   ;;  %v3962_v1 = vpack.c.bf16 %v2691_v59, %v2690_v57  ;;  %v1972_v2 = vadd.f32 %v1971_v0, %v994_v61  ;;  %v4494_v3 = vpop.f32.mrf.mxu0  ;;  %4589 = vmatmul.mubr.bf16.gmra.mxu0 %v4887_v51  ;;  %v2441_v5 = vadd.f32 %v5095_v56, %v1980_v63  ;;  %v2566_v7 = vmul.f32 0.2, %v2438_v60  ;;  %v4896_v51 = vld [vmem:[%s4970_s10 + $0x1f8] sm:$0xff]  }
 0x115   : > { %v4638_v6 = vpop.f32.mrf.mxu1  ;;  %4733 = vmatmul.mubr.bf16.gmra.mxu1 %v4888_v54  ;;  %4592 = vmatprep.mubr.bf16.mxu0 %v4889_v55  ;;  %v2696_v18 = vmax.f32 %v2440_v52, %v2568_v4 }
 0x116   : > { %4254 = vst [vmem:[%s5110_s13 + $0x30] sm:$0xff] %v3962_v1   ;;  %v2439_v8 = vadd.f32 %v5095_v56, %v1972_v2  ;;  %v1993_v9 = vadd.f32 %v4638_v6, %v4494_v3  ;;  %v1007_v10 = vpop.f32.mrf.mxu0  ;;  %4736 = vmatprep.mubr.bf16.mxu1 %v4890_v62  ;;  %v2569_v11 = vmul.f32 0.2, %v2441_v5  ;;  %v2694_v23 = vmax.f32 %v2438_v60, %v2566_v7 }
 0x117   : > { %v1984_v12 = vpop.f32.mrf.mxu1 }
 0x118   : > { %v2567_v13 = vmul.f32 0.2, %v2439_v8  ;;  %v2444_v14 = vadd.f32 %v5095_v56, %v1993_v9  ;;  %v1985_v15 = vadd.f32 %v1984_v12, %v1007_v10  ;;  %v4495_v16 = vpop.f32.mrf.mxu0  ;;  %v2697_v19 = vmax.f32 %v2441_v5, %v2569_v11 }
 0x119   : > { %v4639_v20 = vpop.f32.mrf.mxu1 }
 0x11a   : > { %v2695_v24 = vmax.f32 %v2439_v8, %v2567_v13  ;;  %v1996_v25 = vadd.f32 %v4639_v20, %v4495_v16  ;;  %v1010_v26 = vpop.f32.mrf.mxu0  ;;  %v3977_v28 = vpack.c.bf16 %v2697_v19, %v2696_v18  ;;  %v2442_v29 = vadd.f32 %v5095_v56, %v1985_v15 }
 0x11b   : > { %v1987_v30 = vpop.f32.mrf.mxu1  ;;  %v2572_v32 = vmul.f32 0.2, %v2444_v14 }
 0x11c   : > { %v3972_v31 = vpack.c.bf16 %v2695_v24, %v2694_v23  ;;  %v2445_v33 = vadd.f32 %v5095_v56, %v1996_v25  ;;  %v4498_v34 = vpop.f32.mrf.mxu0  ;;  %4593 = vmatmul.mubr.bf16.gmra.mxu0 %v4891_v17  ;;  %4257 = vst [vmem:[%s5110_s13 + $0x48] sm:$0xff] %v3977_v28   ;;  %v1988_v35 = vadd.f32 %v1987_v30, %v1010_v26  ;;  %v2570_v40 = vmul.f32 0.2, %v2442_v29 }
 0x11d   : > { %v4642_v36 = vpop.f32.mrf.mxu1  ;;  %4737 = vmatmul.mubr.bf16.gmra.mxu1 %v4892_v21  ;;  %4596 = vmatprep.mubr.bf16.mxu0 %v4893_v22  ;;  %v2700_v43 = vmax.f32 %v2444_v14, %v2572_v32 }
 0x11e   : > { %4256 = vst [vmem:[%s5110_s13 + $0x40] sm:$0xff] %v3972_v31   ;;  %v2573_v37 = vmul.f32 0.2, %v2445_v33  ;;  %v2009_v38 = vadd.f32 %v4642_v36, %v4498_v34  ;;  %v1023_v39 = vpop.f32.mrf.mxu0  ;;  %4740 = vmatprep.mubr.bf16.mxu1 %v4894_v27  ;;  %v2443_v41 = vadd.f32 %v5095_v56, %v1988_v35  ;;  %v2698_v57 = vmax.f32 %v2442_v29, %v2570_v40 }
 0x11f   : > { %v2000_v42 = vpop.f32.mrf.mxu1 }
 0x120   : > { %v2701_v44 = vmax.f32 %v2445_v33, %v2573_v37  ;;  %v2448_v45 = vadd.f32 %v5095_v56, %v2009_v38  ;;  %v2001_v46 = vadd.f32 %v2000_v42, %v1023_v39  ;;  %v4499_v47 = vpop.f32.mrf.mxu0  ;;  %v2571_v49 = vmul.f32 0.2, %v2443_v41 }
 0x121   : > { %v4643_v50 = vpop.f32.mrf.mxu1 }
 0x122   : > { %v3987_v52 = vpack.c.bf16 %v2701_v44, %v2700_v43  ;;  %v2446_v53 = vadd.f32 %v5095_v56, %v2001_v46  ;;  %v2012_v54 = vadd.f32 %v4643_v50, %v4499_v47  ;;  %v1026_v55 = vpop.f32.mrf.mxu0  ;;  %v2699_v58 = vmax.f32 %v2443_v41, %v2571_v49 }
 0x123   : > { %v2003_v59 = vpop.f32.mrf.mxu1  ;;  %v2576_v60 = vmul.f32 0.2, %v2448_v45 }
 0x124   : > { %4259 = vst [vmem:[%s5110_s13 + $0x58] sm:$0xff] %v3987_v52   ;;  %v2449_v61 = vadd.f32 %v5095_v56, %v2012_v54  ;;  %v2004_v62 = vadd.f32 %v2003_v59, %v1026_v55  ;;  %v4502_v63 = vpop.f32.mrf.mxu0  ;;  %4597 = vmatmul.mubr.bf16.gmra.mxu0 %v4895_v48  ;;  %v3982_v0 = vpack.c.bf16 %v2699_v58, %v2698_v57  ;;  %v2574_v2 = vmul.f32 0.2, %v2446_v53 }
 0x125   : > { %v4646_v1 = vpop.f32.mrf.mxu1  ;;  %4741 = vmatmul.mubr.bf16.gmra.mxu1 %v4896_v51  ;;  %v2704_v8 = vmax.f32 %v2448_v45, %v2576_v60 }
 0x126   : > { %v2577_v3 = vmul.f32 0.2, %v2449_v61  ;;  %v2447_v4 = vadd.f32 %v5095_v56, %v2004_v62  ;;  %v2025_v5 = vadd.f32 %v4646_v1, %v4502_v63  ;;  %v1039_v6 = vpop.f32.mrf.mxu0  ;;  %4258 = vst [vmem:[%s5110_s13 + $0x50] sm:$0xff] %v3982_v0   ;;  %v2702_v15 = vmax.f32 %v2446_v53, %v2574_v2 }
 0x127   : > { %v2016_v7 = vpop.f32.mrf.mxu1 }
 0x128   : > { %v2705_v9 = vmax.f32 %v2449_v61, %v2577_v3  ;;  %v2575_v10 = vmul.f32 0.2, %v2447_v4  ;;  %v2017_v11 = vadd.f32 %v2016_v7, %v1039_v6  ;;  %v4503_v12 = vpop.f32.mrf.mxu0  ;;  %v2452_v13 = vadd.f32 %v5095_v56, %v2025_v5 }
 0x129   : > { %v4647_v14 = vpop.f32.mrf.mxu1 }
 0x12a   : > { %v3997_v16 = vpack.c.bf16 %v2705_v9, %v2704_v8  ;;  %v2703_v17 = vmax.f32 %v2447_v4, %v2575_v10  ;;  %v2450_v18 = vadd.f32 %v5095_v56, %v2017_v11  ;;  %v1042_v19 = vpop.f32.mrf.mxu0  ;;  %v2028_v20 = vadd.f32 %v4647_v14, %v4503_v12 }
 0x12b   : > { %v2019_v21 = vpop.f32.mrf.mxu1  ;;  %v2580_v25 = vmul.f32 0.2, %v2452_v13 }
 0x12c   : > { %4261 = vst [vmem:[%s5110_s13 + $0x68] sm:$0xff] %v3997_v16   ;;  %v3992_v22 = vpack.c.bf16 %v2703_v17, %v2702_v15  ;;  %v2020_v23 = vadd.f32 %v2019_v21, %v1042_v19  ;;  %v4506_v24 = vpop.f32.mrf.mxu0  ;;  %v2453_v26 = vadd.f32 %v5095_v56, %v2028_v20  ;;  %v2578_v28 = vmul.f32 0.2, %v2450_v18 }
 0x12d   : > { %v4650_v27 = vpop.f32.mrf.mxu1  ;;  %v2708_v38 = vmax.f32 %v2452_v13, %v2580_v25 }
 0x12e   : > { %4260 = vst [vmem:[%s5110_s13 + $0x60] sm:$0xff] %v3992_v22   ;;  %v2451_v29 = vadd.f32 %v5095_v56, %v2020_v23  ;;  %v2041_v30 = vadd.f32 %v4650_v27, %v4506_v24  ;;  %v1055_v31 = vpop.f32.mrf.mxu0  ;;  %v2581_v32 = vmul.f32 0.2, %v2453_v26  ;;  %v2706_v41 = vmax.f32 %v2450_v18, %v2578_v28 }
 0x12f   : > { %v2032_v33 = vpop.f32.mrf.mxu1 }
 0x130   : > { %v2579_v34 = vmul.f32 0.2, %v2451_v29  ;;  %v2456_v35 = vadd.f32 %v5095_v56, %v2041_v30  ;;  %v2033_v36 = vadd.f32 %v2032_v33, %v1055_v31  ;;  %v4507_v37 = vpop.f32.mrf.mxu0  ;;  %v2709_v39 = vmax.f32 %v2453_v26, %v2581_v32 }
 0x131   : > { %v4651_v40 = vpop.f32.mrf.mxu1 }
 0x132   : > { %v2707_v42 = vmax.f32 %v2451_v29, %v2579_v34  ;;  %v2044_v43 = vadd.f32 %v4651_v40, %v4507_v37  ;;  %v1058_v44 = vpop.f32.mrf.mxu0  ;;  %v4007_v45 = vpack.c.bf16 %v2709_v39, %v2708_v38  ;;  %v2454_v46 = vadd.f32 %v5095_v56, %v2033_v36 }
 0x133   : > { %v2035_v47 = vpop.f32.mrf.mxu1  ;;  %v2584_v49 = vmul.f32 0.2, %v2456_v35 }
 0x134   : > { %v4002_v48 = vpack.c.bf16 %v2707_v42, %v2706_v41  ;;  %v2457_v50 = vadd.f32 %v5095_v56, %v2044_v43  ;;  %v4510_v51 = vpop.f32.mrf.mxu0  ;;  %4263 = vst [vmem:[%s5110_s13 + $0x78] sm:$0xff] %v4007_v45   ;;  %v2036_v52 = vadd.f32 %v2035_v47, %v1058_v44  ;;  %v2582_v58 = vmul.f32 0.2, %v2454_v46 }
 0x135   : > { %v4654_v53 = vpop.f32.mrf.mxu1  ;;  %v2712_v61 = vmax.f32 %v2456_v35, %v2584_v49 }
 0x136   : > { %4262 = vst [vmem:[%s5110_s13 + $0x70] sm:$0xff] %v4002_v48   ;;  %v2585_v54 = vmul.f32 0.2, %v2457_v50  ;;  %v2057_v55 = vadd.f32 %v4654_v53, %v4510_v51  ;;  %v1071_v57 = vpop.f32.mrf.mxu0  ;;  %v2455_v59 = vadd.f32 %v5095_v56, %v2036_v52  ;;  %v2710_v8 = vmax.f32 %v2454_v46, %v2582_v58 }
 0x137   : > { %v2048_v60 = vpop.f32.mrf.mxu1 }
 0x138   : > { %v2713_v62 = vmax.f32 %v2457_v50, %v2585_v54  ;;  %v2460_v63 = vadd.f32 %v5095_v56, %v2057_v55  ;;  %v2049_v0 = vadd.f32 %v2048_v60, %v1071_v57  ;;  %v4511_v1 = vpop.f32.mrf.mxu0  ;;  %v2583_v2 = vmul.f32 0.2, %v2455_v59 }
 0x139   : > { %v4655_v3 = vpop.f32.mrf.mxu1 }
 0x13a   : > { %v4017_v4 = vpack.c.bf16 %v2713_v62, %v2712_v61  ;;  %v2458_v5 = vadd.f32 %v5095_v56, %v2049_v0  ;;  %v2060_v6 = vadd.f32 %v4655_v3, %v4511_v1  ;;  %v1074_v7 = vpop.f32.mrf.mxu0  ;;  %v2711_v9 = vmax.f32 %v2455_v59, %v2583_v2 }
 0x13b   : > { %v2051_v10 = vpop.f32.mrf.mxu1  ;;  %v2588_v11 = vmul.f32 0.2, %v2460_v63 }
 0x13c   : > { %4265 = vst [vmem:[%s5110_s13 + $0x88] sm:$0xff] %v4017_v4   ;;  %v2461_v12 = vadd.f32 %v5095_v56, %v2060_v6  ;;  %v2052_v13 = vadd.f32 %v2051_v10, %v1074_v7  ;;  %v4514_v14 = vpop.f32.mrf.mxu0  ;;  %v4012_v15 = vpack.c.bf16 %v2711_v9, %v2710_v8  ;;  %v2586_v17 = vmul.f32 0.2, %v2458_v5 }
 0x13d   : > { %v4658_v16 = vpop.f32.mrf.mxu1  ;;  %v2716_v23 = vmax.f32 %v2460_v63, %v2588_v11 }
 0x13e   : > { %v2589_v18 = vmul.f32 0.2, %v2461_v12  ;;  %v2459_v19 = vadd.f32 %v5095_v56, %v2052_v13  ;;  %v2073_v20 = vadd.f32 %v4658_v16, %v4514_v14  ;;  %v1087_v21 = vpop.f32.mrf.mxu0  ;;  %4264 = vst [vmem:[%s5110_s13 + $0x80] sm:$0xff] %v4012_v15   ;;  %v2714_v30 = vmax.f32 %v2458_v5, %v2586_v17 }
 0x13f   : > { %v2064_v22 = vpop.f32.mrf.mxu1 }
 0x140   : > { %v2717_v24 = vmax.f32 %v2461_v12, %v2589_v18  ;;  %v2587_v25 = vmul.f32 0.2, %v2459_v19  ;;  %v2065_v26 = vadd.f32 %v2064_v22, %v1087_v21  ;;  %v4515_v27 = vpop.f32.mrf.mxu0  ;;  %v2464_v28 = vadd.f32 %v5095_v56, %v2073_v20 }
 0x141   : > { %v4659_v29 = vpop.f32.mrf.mxu1 }
 0x142   : > { %v4027_v31 = vpack.c.bf16 %v2717_v24, %v2716_v23  ;;  %v2715_v32 = vmax.f32 %v2459_v19, %v2587_v25  ;;  %v2462_v33 = vadd.f32 %v5095_v56, %v2065_v26  ;;  %v1090_v34 = vpop.f32.mrf.mxu0  ;;  %v2076_v35 = vadd.f32 %v4659_v29, %v4515_v27 }
 0x143   : > { %v2067_v36 = vpop.f32.mrf.mxu1  ;;  %v2592_v40 = vmul.f32 0.2, %v2464_v28 }
 0x144   : > { %4267 = vst [vmem:[%s5110_s13 + $0x98] sm:$0xff] %v4027_v31   ;;  %v4022_v37 = vpack.c.bf16 %v2715_v32, %v2714_v30  ;;  %v2068_v38 = vadd.f32 %v2067_v36, %v1090_v34  ;;  %v4518_v39 = vpop.f32.mrf.mxu0  ;;  %v2465_v41 = vadd.f32 %v5095_v56, %v2076_v35  ;;  %v2590_v43 = vmul.f32 0.2, %v2462_v33 }
 0x145   : > { %v4662_v42 = vpop.f32.mrf.mxu1  ;;  %v2720_v53 = vmax.f32 %v2464_v28, %v2592_v40 }
 0x146   : > { %4266 = vst [vmem:[%s5110_s13 + $0x90] sm:$0xff] %v4022_v37   ;;  %v2463_v44 = vadd.f32 %v5095_v56, %v2068_v38  ;;  %v2089_v45 = vadd.f32 %v4662_v42, %v4518_v39  ;;  %v1103_v46 = vpop.f32.mrf.mxu0  ;;  %v2593_v47 = vmul.f32 0.2, %v2465_v41  ;;  %v2718_v57 = vmax.f32 %v2462_v33, %v2590_v43 }
 0x147   : > { %v2080_v48 = vpop.f32.mrf.mxu1 }
 0x148   : > { %v2591_v49 = vmul.f32 0.2, %v2463_v44  ;;  %v2468_v50 = vadd.f32 %v5095_v56, %v2089_v45  ;;  %v2081_v51 = vadd.f32 %v2080_v48, %v1103_v46  ;;  %v4519_v52 = vpop.f32.mrf.mxu0  ;;  %v2721_v54 = vmax.f32 %v2465_v41, %v2593_v47 }
 0x149   : > { %v4663_v55 = vpop.f32.mrf.mxu1 }
 0x14a   : > { %v2719_v58 = vmax.f32 %v2463_v44, %v2591_v49  ;;  %v2092_v59 = vadd.f32 %v4663_v55, %v4519_v52  ;;  %v1106_v60 = vpop.f32.mrf.mxu0  ;;  %v4037_v61 = vpack.c.bf16 %v2721_v54, %v2720_v53  ;;  %v2466_v62 = vadd.f32 %v5095_v56, %v2081_v51 }
 0x14b   : > { %v2083_v63 = vpop.f32.mrf.mxu1  ;;  %v2596_v1 = vmul.f32 0.2, %v2468_v50 }
 0x14c   : > { %v4032_v0 = vpack.c.bf16 %v2719_v58, %v2718_v57  ;;  %v2469_v2 = vadd.f32 %v5095_v56, %v2092_v59  ;;  %v4522_v3 = vpop.f32.mrf.mxu0  ;;  %4269 = vst [vmem:[%s5110_s13 + $0xa8] sm:$0xff] %v4037_v61   ;;  %v2084_v4 = vadd.f32 %v2083_v63, %v1106_v60  ;;  %v2594_v9 = vmul.f32 0.2, %v2466_v62 }
 0x14d   : > { %v4666_v5 = vpop.f32.mrf.mxu1  ;;  %v2724_v12 = vmax.f32 %v2468_v50, %v2596_v1 }
 0x14e   : > { %4268 = vst [vmem:[%s5110_s13 + $0xa0] sm:$0xff] %v4032_v0   ;;  %v2597_v6 = vmul.f32 0.2, %v2469_v2  ;;  %v2105_v7 = vadd.f32 %v4666_v5, %v4522_v3  ;;  %v1119_v8 = vpop.f32.mrf.mxu0  ;;  %v2467_v10 = vadd.f32 %v5095_v56, %v2084_v4  ;;  %v2722_v23 = vmax.f32 %v2466_v62, %v2594_v9 }
 0x14f   : > { %v2096_v11 = vpop.f32.mrf.mxu1 }
 0x150   : > { %v2725_v13 = vmax.f32 %v2469_v2, %v2597_v6  ;;  %v2472_v14 = vadd.f32 %v5095_v56, %v2105_v7  ;;  %v2097_v15 = vadd.f32 %v2096_v11, %v1119_v8  ;;  %v4523_v16 = vpop.f32.mrf.mxu0  ;;  %v2595_v17 = vmul.f32 0.2, %v2467_v10 }
 0x151   : > { %v4667_v18 = vpop.f32.mrf.mxu1 }
 0x152   : > { %v4047_v19 = vpack.c.bf16 %v2725_v13, %v2724_v12  ;;  %v2470_v20 = vadd.f32 %v5095_v56, %v2097_v15  ;;  %v2108_v21 = vadd.f32 %v4667_v18, %v4523_v16  ;;  %v1122_v22 = vpop.f32.mrf.mxu0  ;;  %v2723_v24 = vmax.f32 %v2467_v10, %v2595_v17 }
 0x153   : > { %v2099_v25 = vpop.f32.mrf.mxu1  ;;  %v2600_v26 = vmul.f32 0.2, %v2472_v14 }
 0x154   : > { %4271 = vst [vmem:[%s5110_s13 + $0xb8] sm:$0xff] %v4047_v19   ;;  %v2473_v27 = vadd.f32 %v5095_v56, %v2108_v21  ;;  %v2100_v28 = vadd.f32 %v2099_v25, %v1122_v22  ;;  %v4526_v29 = vpop.f32.mrf.mxu0  ;;  %v4042_v30 = vpack.c.bf16 %v2723_v24, %v2722_v23  ;;  %v2598_v32 = vmul.f32 0.2, %v2470_v20 }
 0x155   : > { %v4670_v31 = vpop.f32.mrf.mxu1  ;;  %v2728_v38 = vmax.f32 %v2472_v14, %v2600_v26 }
 0x156   : > { %v2601_v33 = vmul.f32 0.2, %v2473_v27  ;;  %v2471_v34 = vadd.f32 %v5095_v56, %v2100_v28  ;;  %v2121_v35 = vadd.f32 %v4670_v31, %v4526_v29  ;;  %v1135_v36 = vpop.f32.mrf.mxu0  ;;  %4270 = vst [vmem:[%s5110_s13 + $0xb0] sm:$0xff] %v4042_v30   ;;  %v2726_v45 = vmax.f32 %v2470_v20, %v2598_v32 }
 0x157   : > { %v2112_v37 = vpop.f32.mrf.mxu1 }
 0x158   : > { %v2729_v39 = vmax.f32 %v2473_v27, %v2601_v33  ;;  %v2599_v40 = vmul.f32 0.2, %v2471_v34  ;;  %v2113_v41 = vadd.f32 %v2112_v37, %v1135_v36  ;;  %v4527_v42 = vpop.f32.mrf.mxu0  ;;  %v2476_v43 = vadd.f32 %v5095_v56, %v2121_v35 }
 0x159   : > { %v4671_v44 = vpop.f32.mrf.mxu1 }
 0x15a   : > { %v4057_v46 = vpack.c.bf16 %v2729_v39, %v2728_v38  ;;  %v2727_v47 = vmax.f32 %v2471_v34, %v2599_v40  ;;  %v2474_v48 = vadd.f32 %v5095_v56, %v2113_v41  ;;  %v1138_v49 = vpop.f32.mrf.mxu0  ;;  %v2124_v50 = vadd.f32 %v4671_v44, %v4527_v42 }
 0x15b   : > { %v2115_v51 = vpop.f32.mrf.mxu1  ;;  %v2604_v55 = vmul.f32 0.2, %v2476_v43 }
 0x15c   : > { %4273 = vst [vmem:[%s5110_s13 + $0xc8] sm:$0xff] %v4057_v46   ;;  %v4052_v52 = vpack.c.bf16 %v2727_v47, %v2726_v45  ;;  %v2116_v53 = vadd.f32 %v2115_v51, %v1138_v49  ;;  %v4530_v54 = vpop.f32.mrf.mxu0  ;;  %v2477_v57 = vadd.f32 %v5095_v56, %v2124_v50  ;;  %v2602_v59 = vmul.f32 0.2, %v2474_v48 }
 0x15d   : > { %v4674_v58 = vpop.f32.mrf.mxu1  ;;  %v2732_v5 = vmax.f32 %v2476_v43, %v2604_v55 }
 0x15e   : > { %4272 = vst [vmem:[%s5110_s13 + $0xc0] sm:$0xff] %v4052_v52   ;;  %v2475_v60 = vadd.f32 %v5095_v56, %v2116_v53  ;;  %v2137_v61 = vadd.f32 %v4674_v58, %v4530_v54  ;;  %v1151_v62 = vpop.f32.mrf.mxu0  ;;  %v2605_v63 = vmul.f32 0.2, %v2477_v57  ;;  %v2730_v8 = vmax.f32 %v2474_v48, %v2602_v59 }
 0x15f   : > { %v2128_v0 = vpop.f32.mrf.mxu1 }
 0x160   : > { %v2603_v1 = vmul.f32 0.2, %v2475_v60  ;;  %v2480_v2 = vadd.f32 %v5095_v56, %v2137_v61  ;;  %v2129_v3 = vadd.f32 %v2128_v0, %v1151_v62  ;;  %v4531_v4 = vpop.f32.mrf.mxu0  ;;  %v2733_v6 = vmax.f32 %v2477_v57, %v2605_v63 }
 0x161   : > { %v4675_v7 = vpop.f32.mrf.mxu1 }
 0x162   : > { %v2731_v9 = vmax.f32 %v2475_v60, %v2603_v1  ;;  %v2140_v10 = vadd.f32 %v4675_v7, %v4531_v4  ;;  %v1154_v11 = vpop.f32.mrf.mxu0  ;;  %v4067_v12 = vpack.c.bf16 %v2733_v6, %v2732_v5  ;;  %v2478_v13 = vadd.f32 %v5095_v56, %v2129_v3 }
 0x163   : > { %v2131_v14 = vpop.f32.mrf.mxu1  ;;  %v2608_v16 = vmul.f32 0.2, %v2480_v2 }
 0x164   : > { %v4062_v15 = vpack.c.bf16 %v2731_v9, %v2730_v8  ;;  %v2481_v17 = vadd.f32 %v5095_v56, %v2140_v10  ;;  %v4534_v18 = vpop.f32.mrf.mxu0  ;;  %4275 = vst [vmem:[%s5110_s13 + $0xd8] sm:$0xff] %v4067_v12   ;;  %v2132_v19 = vadd.f32 %v2131_v14, %v1154_v11  ;;  %v2606_v24 = vmul.f32 0.2, %v2478_v13  ;;  %v5229_v8 = vld [vmem:[%s5331_s2] ss:$0 sm:$0xff] }
 0x165   : > { %v4678_v20 = vpop.f32.mrf.mxu1  ;;  %v2736_v27 = vmax.f32 %v2480_v2, %v2608_v16 }
 0x166   : > { %4274 = vst [vmem:[%s5110_s13 + $0xd0] sm:$0xff] %v4062_v15   ;;  %v2609_v21 = vmul.f32 0.2, %v2481_v17  ;;  %v2153_v22 = vadd.f32 %v4678_v20, %v4534_v18  ;;  %v1167_v23 = vpop.f32.mrf.mxu0  ;;  %v2479_v25 = vadd.f32 %v5095_v56, %v2132_v19  ;;  %v2734_v38 = vmax.f32 %v2478_v13, %v2606_v24 }
 0x167   : > { %v2144_v26 = vpop.f32.mrf.mxu1 }
 0x168   : > { %v2737_v28 = vmax.f32 %v2481_v17, %v2609_v21  ;;  %v2484_v29 = vadd.f32 %v5095_v56, %v2153_v22  ;;  %v2145_v30 = vadd.f32 %v2144_v26, %v1167_v23  ;;  %v4535_v31 = vpop.f32.mrf.mxu0  ;;  %v2607_v32 = vmul.f32 0.2, %v2479_v25 }
 0x169   : > { %v4679_v33 = vpop.f32.mrf.mxu1 }
 0x16a   : > { %v4077_v34 = vpack.c.bf16 %v2737_v28, %v2736_v27  ;;  %v2482_v35 = vadd.f32 %v5095_v56, %v2145_v30  ;;  %v2156_v36 = vadd.f32 %v4679_v33, %v4535_v31  ;;  %v1170_v37 = vpop.f32.mrf.mxu0  ;;  %v2735_v39 = vmax.f32 %v2479_v25, %v2607_v32 }
 0x16b   : > { %v2147_v40 = vpop.f32.mrf.mxu1  ;;  %v2612_v41 = vmul.f32 0.2, %v2484_v29 }
 0x16c   : > { %4277 = vst [vmem:[%s5110_s13 + $0xe8] sm:$0xff] %v4077_v34   ;;  %v2485_v42 = vadd.f32 %v5095_v56, %v2156_v36  ;;  %v2148_v43 = vadd.f32 %v2147_v40, %v1170_v37  ;;  %v4538_v44 = vpop.f32.mrf.mxu0  ;;  %v4072_v45 = vpack.c.bf16 %v2735_v39, %v2734_v38  ;;  %v2610_v47 = vmul.f32 0.2, %v2482_v35 }
 0x16d   : > { %v4682_v46 = vpop.f32.mrf.mxu1  ;;  %v2740_v53 = vmax.f32 %v2484_v29, %v2612_v41 }
 0x16e   : > { %v2613_v48 = vmul.f32 0.2, %v2485_v42  ;;  %v2483_v49 = vadd.f32 %v5095_v56, %v2148_v43  ;;  %v2169_v50 = vadd.f32 %v4682_v46, %v4538_v44  ;;  %v1183_v51 = vpop.f32.mrf.mxu0  ;;  %4276 = vst [vmem:[%s5110_s13 + $0xe0] sm:$0xff] %v4072_v45   ;;  %v2738_v61 = vmax.f32 %v2482_v35, %v2610_v47 }
 0x16f   : > { %v2160_v52 = vpop.f32.mrf.mxu1 }
 0x170   : > { %v2741_v54 = vmax.f32 %v2485_v42, %v2613_v48  ;;  %v2611_v55 = vmul.f32 0.2, %v2483_v49  ;;  %v2161_v57 = vadd.f32 %v2160_v52, %v1183_v51  ;;  %v4539_v58 = vpop.f32.mrf.mxu0  ;;  %v2488_v59 = vadd.f32 %v5095_v56, %v2169_v50 }
 0x171   : > { %v4683_v60 = vpop.f32.mrf.mxu1 }
 0x172   : > { %v4087_v62 = vpack.c.bf16 %v2741_v54, %v2740_v53  ;;  %v2739_v63 = vmax.f32 %v2483_v49, %v2611_v55  ;;  %v2486_v0 = vadd.f32 %v5095_v56, %v2161_v57  ;;  %v1186_v1 = vpop.f32.mrf.mxu0  ;;  %v2172_v2 = vadd.f32 %v4683_v60, %v4539_v58 }
 0x173   : > { %v2163_v3 = vpop.f32.mrf.mxu1  ;;  %v2616_v7 = vmul.f32 0.2, %v2488_v59 }
 0x174   : > { %4279 = vst [vmem:[%s5110_s13 + $0xf8] sm:$0xff] %v4087_v62   ;;  %v4082_v4 = vpack.c.bf16 %v2739_v63, %v2738_v61  ;;  %v2164_v5 = vadd.f32 %v2163_v3, %v1186_v1  ;;  %v4542_v6 = vpop.f32.mrf.mxu0  ;;  %v2489_v9 = vadd.f32 %v5229_v8, %v2172_v2  ;;  %v2614_v11 = vmul.f32 0.2, %v2486_v0 }
 0x175   : > { %v4686_v10 = vpop.f32.mrf.mxu1  ;;  %v2744_v20 = vmax.f32 %v2488_v59, %v2616_v7 }
 0x176   : > { %4278 = vst [vmem:[%s5110_s13 + $0xf0] sm:$0xff] %v4082_v4   ;;  %v2487_v56 = vadd.f32 %v5229_v8, %v2164_v5  ;;  %v2185_v12 = vadd.f32 %v4686_v10, %v4542_v6  ;;  %v1199_v13 = vpop.f32.mrf.mxu0  ;;  %v2617_v14 = vmul.f32 0.2, %v2489_v9  ;;  %v2742_v23 = vmax.f32 %v2486_v0, %v2614_v11 }
 0x177   : > { %v2176_v15 = vpop.f32.mrf.mxu1 }
 0x178   : > { %v2615_v16 = vmul.f32 0.2, %v2487_v56  ;;  %v2492_v17 = vadd.f32 %v5229_v8, %v2185_v12  ;;  %v2177_v18 = vadd.f32 %v2176_v15, %v1199_v13  ;;  %v4543_v19 = vpop.f32.mrf.mxu0  ;;  %v2745_v21 = vmax.f32 %v2489_v9, %v2617_v14 }
 0x179   : > { %v4687_v22 = vpop.f32.mrf.mxu1 }
 0x17a   : > { %v2743_v24 = vmax.f32 %v2487_v56, %v2615_v16  ;;  %v2188_v25 = vadd.f32 %v4687_v22, %v4543_v19  ;;  %v1202_v26 = vpop.f32.mrf.mxu0  ;;  %v4097_v27 = vpack.c.bf16 %v2745_v21, %v2744_v20  ;;  %v2490_v28 = vadd.f32 %v5229_v8, %v2177_v18 }
 0x17b   : > { %v2179_v29 = vpop.f32.mrf.mxu1  ;;  %v2620_v31 = vmul.f32 0.2, %v2492_v17 }
 0x17c   : > { %v4092_v30 = vpack.c.bf16 %v2743_v24, %v2742_v23  ;;  %v2493_v32 = vadd.f32 %v5229_v8, %v2188_v25  ;;  %v4546_v33 = vpop.f32.mrf.mxu0  ;;  %4281 = vst [vmem:[%s5110_s13 + $0x108] sm:$0xff] %v4097_v27   ;;  %v2180_v34 = vadd.f32 %v2179_v29, %v1202_v26  ;;  %v2618_v39 = vmul.f32 0.2, %v2490_v28 }
 0x17d   : > { %v4690_v35 = vpop.f32.mrf.mxu1  ;;  %v2748_v42 = vmax.f32 %v2492_v17, %v2620_v31 }
 0x17e   : > { %4280 = vst [vmem:[%s5110_s13 + $0x100] sm:$0xff] %v4092_v30   ;;  %v2621_v36 = vmul.f32 0.2, %v2493_v32  ;;  %v2201_v37 = vadd.f32 %v4690_v35, %v4546_v33  ;;  %v1215_v38 = vpop.f32.mrf.mxu0  ;;  %v2491_v40 = vadd.f32 %v5229_v8, %v2180_v34  ;;  %v2746_v53 = vmax.f32 %v2490_v28, %v2618_v39 }
 0x17f   : > { %v2192_v41 = vpop.f32.mrf.mxu1 }
 0x180   : > { %v2749_v43 = vmax.f32 %v2493_v32, %v2621_v36  ;;  %v2496_v44 = vadd.f32 %v5229_v8, %v2201_v37  ;;  %v2193_v45 = vadd.f32 %v2192_v41, %v1215_v38  ;;  %v4547_v46 = vpop.f32.mrf.mxu0  ;;  %v2619_v47 = vmul.f32 0.2, %v2491_v40 }
 0x181   : > { %v4691_v48 = vpop.f32.mrf.mxu1 }
 0x182   : > { %v4107_v49 = vpack.c.bf16 %v2749_v43, %v2748_v42  ;;  %v2494_v50 = vadd.f32 %v5229_v8, %v2193_v45  ;;  %v2204_v51 = vadd.f32 %v4691_v48, %v4547_v46  ;;  %v1218_v52 = vpop.f32.mrf.mxu0  ;;  %v2747_v54 = vmax.f32 %v2491_v40, %v2619_v47 }
 0x183   : > { %v2195_v55 = vpop.f32.mrf.mxu1  ;;  %v2624_v57 = vmul.f32 0.2, %v2496_v44 }
 0x184   : > { %4283 = vst [vmem:[%s5110_s13 + $0x118] sm:$0xff] %v4107_v49   ;;  %v2497_v58 = vadd.f32 %v5229_v8, %v2204_v51  ;;  %v2196_v59 = vadd.f32 %v2195_v55, %v1218_v52  ;;  %v4550_v60 = vpop.f32.mrf.mxu0  ;;  %v4102_v61 = vpack.c.bf16 %v2747_v54, %v2746_v53  ;;  %v2622_v63 = vmul.f32 0.2, %v2494_v50 }
 0x185   : > { %v4694_v62 = vpop.f32.mrf.mxu1  ;;  %v2752_v5 = vmax.f32 %v2496_v44, %v2624_v57 }
 0x186   : > { %v2625_v0 = vmul.f32 0.2, %v2497_v58  ;;  %v2495_v1 = vadd.f32 %v5229_v8, %v2196_v59  ;;  %v2217_v2 = vadd.f32 %v4694_v62, %v4550_v60  ;;  %v1231_v3 = vpop.f32.mrf.mxu0  ;;  %4282 = vst [vmem:[%s5110_s13 + $0x110] sm:$0xff] %v4102_v61   ;;  %v2750_v12 = vmax.f32 %v2494_v50, %v2622_v63 }
 0x187   : > { %v2208_v4 = vpop.f32.mrf.mxu1 }
 0x188   : > { %v2753_v6 = vmax.f32 %v2497_v58, %v2625_v0  ;;  %v2623_v7 = vmul.f32 0.2, %v2495_v1  ;;  %v2209_v9 = vadd.f32 %v2208_v4, %v1231_v3  ;;  %v4551_v10 = vpop.f32.mrf.mxu0  ;;  %v2500_v11 = vadd.f32 %v5229_v8, %v2217_v2 }
 0x189   : > { %v4695_v56 = vpop.f32.mrf.mxu1 }
 0x18a   : > { %v4117_v13 = vpack.c.bf16 %v2753_v6, %v2752_v5  ;;  %v2751_v14 = vmax.f32 %v2495_v1, %v2623_v7  ;;  %v2498_v15 = vadd.f32 %v5229_v8, %v2209_v9  ;;  %v1234_v16 = vpop.f32.mrf.mxu0  ;;  %v2220_v17 = vadd.f32 %v4695_v56, %v4551_v10 }
 0x18b   : > { %v2211_v18 = vpop.f32.mrf.mxu1  ;;  %v2628_v22 = vmul.f32 0.2, %v2500_v11 }
 0x18c   : > { %4285 = vst [vmem:[%s5110_s13 + $0x128] sm:$0xff] %v4117_v13   ;;  %v4112_v19 = vpack.c.bf16 %v2751_v14, %v2750_v12  ;;  %v2212_v20 = vadd.f32 %v2211_v18, %v1234_v16  ;;  %v4554_v21 = vpop.f32.mrf.mxu0  ;;  %v2501_v23 = vadd.f32 %v5229_v8, %v2220_v17  ;;  %v2626_v25 = vmul.f32 0.2, %v2498_v15 }
 0x18d   : > { %v4698_v24 = vpop.f32.mrf.mxu1  ;;  %v2756_v35 = vmax.f32 %v2500_v11, %v2628_v22 }
 0x18e   : > { %4284 = vst [vmem:[%s5110_s13 + $0x120] sm:$0xff] %v4112_v19   ;;  %v2499_v26 = vadd.f32 %v5229_v8, %v2212_v20  ;;  %v2233_v27 = vadd.f32 %v4698_v24, %v4554_v21  ;;  %v1247_v28 = vpop.f32.mrf.mxu0  ;;  %v2629_v29 = vmul.f32 0.2, %v2501_v23  ;;  %v2754_v38 = vmax.f32 %v2498_v15, %v2626_v25 }
 0x18f   : > { %v2224_v30 = vpop.f32.mrf.mxu1 }
 0x190   : > { %v2627_v31 = vmul.f32 0.2, %v2499_v26  ;;  %v2504_v32 = vadd.f32 %v5229_v8, %v2233_v27  ;;  %v2225_v33 = vadd.f32 %v2224_v30, %v1247_v28  ;;  %v4555_v34 = vpop.f32.mrf.mxu0  ;;  %v2757_v36 = vmax.f32 %v2501_v23, %v2629_v29 }
 0x191   : > { %v4699_v37 = vpop.f32.mrf.mxu1 }
 0x192   : > { %v2755_v39 = vmax.f32 %v2499_v26, %v2627_v31  ;;  %v2236_v40 = vadd.f32 %v4699_v37, %v4555_v34  ;;  %v1250_v41 = vpop.f32.mrf.mxu0  ;;  %v4127_v42 = vpack.c.bf16 %v2757_v36, %v2756_v35  ;;  %v2502_v43 = vadd.f32 %v5229_v8, %v2225_v33 }
 0x193   : > { %v2227_v44 = vpop.f32.mrf.mxu1  ;;  %v2632_v46 = vmul.f32 0.2, %v2504_v32 }
 0x194   : > { %v4122_v45 = vpack.c.bf16 %v2755_v39, %v2754_v38  ;;  %v2505_v47 = vadd.f32 %v5229_v8, %v2236_v40  ;;  %v4558_v48 = vpop.f32.mrf.mxu0  ;;  %4287 = vst [vmem:[%s5110_s13 + $0x138] sm:$0xff] %v4127_v42   ;;  %v2228_v49 = vadd.f32 %v2227_v44, %v1250_v41  ;;  %v2630_v54 = vmul.f32 0.2, %v2502_v43 }
 0x195   : > { %v4702_v50 = vpop.f32.mrf.mxu1  ;;  %v2760_v58 = vmax.f32 %v2504_v32, %v2632_v46 }
 0x196   : > { %4286 = vst [vmem:[%s5110_s13 + $0x130] sm:$0xff] %v4122_v45   ;;  %v2633_v51 = vmul.f32 0.2, %v2505_v47  ;;  %v2249_v52 = vadd.f32 %v4702_v50, %v4558_v48  ;;  %v1263_v53 = vpop.f32.mrf.mxu0  ;;  %v2503_v55 = vadd.f32 %v5229_v8, %v2228_v49  ;;  %v2758_v5 = vmax.f32 %v2502_v43, %v2630_v54 }
 0x197   : > { %v2240_v57 = vpop.f32.mrf.mxu1 }
 0x198   : > { %v2761_v59 = vmax.f32 %v2505_v47, %v2633_v51  ;;  %v2508_v60 = vadd.f32 %v5229_v8, %v2249_v52  ;;  %v2241_v61 = vadd.f32 %v2240_v57, %v1263_v53  ;;  %v4559_v62 = vpop.f32.mrf.mxu0  ;;  %v2631_v63 = vmul.f32 0.2, %v2503_v55 }
 0x199   : > { %v4703_v0 = vpop.f32.mrf.mxu1 }
 0x19a   : > { %v4137_v1 = vpack.c.bf16 %v2761_v59, %v2760_v58  ;;  %v2506_v2 = vadd.f32 %v5229_v8, %v2241_v61  ;;  %v2252_v3 = vadd.f32 %v4703_v0, %v4559_v62  ;;  %v1266_v4 = vpop.f32.mrf.mxu0  ;;  %v2759_v6 = vmax.f32 %v2503_v55, %v2631_v63 }
 0x19b   : > { %v2243_v7 = vpop.f32.mrf.mxu1  ;;  %v2636_v9 = vmul.f32 0.2, %v2508_v60 }
 0x19c   : > { %4289 = vst [vmem:[%s5110_s13 + $0x148] sm:$0xff] %v4137_v1   ;;  %v2509_v10 = vadd.f32 %v5229_v8, %v2252_v3  ;;  %v2244_v11 = vadd.f32 %v2243_v7, %v1266_v4  ;;  %v4562_v56 = vpop.f32.mrf.mxu0  ;;  %v4132_v12 = vpack.c.bf16 %v2759_v6, %v2758_v5  ;;  %v2634_v14 = vmul.f32 0.2, %v2506_v2 }
 0x19d   : > { %v4706_v13 = vpop.f32.mrf.mxu1  ;;  %v2764_v20 = vmax.f32 %v2508_v60, %v2636_v9 }
 0x19e   : > { %v2637_v15 = vmul.f32 0.2, %v2509_v10  ;;  %v2507_v16 = vadd.f32 %v5229_v8, %v2244_v11  ;;  %v2265_v17 = vadd.f32 %v4706_v13, %v4562_v56  ;;  %v1279_v18 = vpop.f32.mrf.mxu0  ;;  %4288 = vst [vmem:[%s5110_s13 + $0x140] sm:$0xff] %v4132_v12   ;;  %v2762_v27 = vmax.f32 %v2506_v2, %v2634_v14 }
 0x19f   : > { %v2256_v19 = vpop.f32.mrf.mxu1 }
 0x1a0   : > { %v2765_v21 = vmax.f32 %v2509_v10, %v2637_v15  ;;  %v2635_v22 = vmul.f32 0.2, %v2507_v16  ;;  %v2257_v23 = vadd.f32 %v2256_v19, %v1279_v18  ;;  %v4563_v24 = vpop.f32.mrf.mxu0  ;;  %v2512_v25 = vadd.f32 %v5229_v8, %v2265_v17 }
 0x1a1   : > { %v4707_v26 = vpop.f32.mrf.mxu1 }
 0x1a2   : > { %v4147_v28 = vpack.c.bf16 %v2765_v21, %v2764_v20  ;;  %v2763_v29 = vmax.f32 %v2507_v16, %v2635_v22  ;;  %v2510_v30 = vadd.f32 %v5229_v8, %v2257_v23  ;;  %v1282_v31 = vpop.f32.mrf.mxu0  ;;  %v2268_v32 = vadd.f32 %v4707_v26, %v4563_v24 }
 0x1a3   : > { %v2259_v33 = vpop.f32.mrf.mxu1  ;;  %v2640_v37 = vmul.f32 0.2, %v2512_v25 }
 0x1a4   : > { %4291 = vst [vmem:[%s5110_s13 + $0x158] sm:$0xff] %v4147_v28   ;;  %v4142_v34 = vpack.c.bf16 %v2763_v29, %v2762_v27  ;;  %v2260_v35 = vadd.f32 %v2259_v33, %v1282_v31  ;;  %v4566_v36 = vpop.f32.mrf.mxu0  ;;  %v2513_v38 = vadd.f32 %v5229_v8, %v2268_v32  ;;  %v2638_v40 = vmul.f32 0.2, %v2510_v30 }
 0x1a5   : > { %v4710_v39 = vpop.f32.mrf.mxu1  ;;  %v2768_v50 = vmax.f32 %v2512_v25, %v2640_v37 }
 0x1a6   : > { %4290 = vst [vmem:[%s5110_s13 + $0x150] sm:$0xff] %v4142_v34   ;;  %v2511_v41 = vadd.f32 %v5229_v8, %v2260_v35  ;;  %v2281_v42 = vadd.f32 %v4710_v39, %v4566_v36  ;;  %v1295_v43 = vpop.f32.mrf.mxu0  ;;  %v2641_v44 = vmul.f32 0.2, %v2513_v38  ;;  %v2766_v53 = vmax.f32 %v2510_v30, %v2638_v40 }
 0x1a7   : > { %v2272_v45 = vpop.f32.mrf.mxu1 }
 0x1a8   : > { %v2639_v46 = vmul.f32 0.2, %v2511_v41  ;;  %v2516_v47 = vadd.f32 %v5229_v8, %v2281_v42  ;;  %v2273_v48 = vadd.f32 %v2272_v45, %v1295_v43  ;;  %v4567_v49 = vpop.f32.mrf.mxu0  ;;  %v2769_v51 = vmax.f32 %v2513_v38, %v2641_v44 }
 0x1a9   : > { %v4711_v52 = vpop.f32.mrf.mxu1 }
 0x1aa   : > { %v2767_v54 = vmax.f32 %v2511_v41, %v2639_v46  ;;  %v2284_v55 = vadd.f32 %v4711_v52, %v4567_v49  ;;  %v1298_v57 = vpop.f32.mrf.mxu0  ;;  %v4157_v58 = vpack.c.bf16 %v2769_v51, %v2768_v50  ;;  %v2514_v59 = vadd.f32 %v5229_v8, %v2273_v48 }
 0x1ab   : > { %v2275_v60 = vpop.f32.mrf.mxu1  ;;  %v2644_v62 = vmul.f32 0.2, %v2516_v47 }
 0x1ac   : > { %v4152_v61 = vpack.c.bf16 %v2767_v54, %v2766_v53  ;;  %v2517_v63 = vadd.f32 %v5229_v8, %v2284_v55  ;;  %v4570_v0 = vpop.f32.mrf.mxu0  ;;  %4293 = vst [vmem:[%s5110_s13 + $0x168] sm:$0xff] %v4157_v58   ;;  %v2276_v1 = vadd.f32 %v2275_v60, %v1298_v57  ;;  %v2642_v6 = vmul.f32 0.2, %v2514_v59 }
 0x1ad   : > { %v4714_v2 = vpop.f32.mrf.mxu1  ;;  %v2772_v10 = vmax.f32 %v2516_v47, %v2644_v62 }
 0x1ae   : > { %4292 = vst [vmem:[%s5110_s13 + $0x160] sm:$0xff] %v4152_v61   ;;  %v2645_v3 = vmul.f32 0.2, %v2517_v63  ;;  %v2297_v4 = vadd.f32 %v4714_v2, %v4570_v0  ;;  %v1311_v5 = vpop.f32.mrf.mxu0  ;;  %v2515_v7 = vadd.f32 %v5229_v8, %v2276_v1  ;;  %v2770_v20 = vmax.f32 %v2514_v59, %v2642_v6 }
 0x1af   : > { %v2288_v9 = vpop.f32.mrf.mxu1 }
 0x1b0   : > { %v2773_v11 = vmax.f32 %v2517_v63, %v2645_v3  ;;  %v2520_v56 = vadd.f32 %v5229_v8, %v2297_v4  ;;  %v2289_v12 = vadd.f32 %v2288_v9, %v1311_v5  ;;  %v4571_v13 = vpop.f32.mrf.mxu0  ;;  %v2643_v14 = vmul.f32 0.2, %v2515_v7 }
 0x1b1   : > { %v4715_v15 = vpop.f32.mrf.mxu1 }
 0x1b2   : > { %v4167_v16 = vpack.c.bf16 %v2773_v11, %v2772_v10  ;;  %v2518_v17 = vadd.f32 %v5229_v8, %v2289_v12  ;;  %v2300_v18 = vadd.f32 %v4715_v15, %v4571_v13  ;;  %v1314_v19 = vpop.f32.mrf.mxu0  ;;  %v2771_v21 = vmax.f32 %v2515_v7, %v2643_v14 }
 0x1b3   : > { %v2291_v22 = vpop.f32.mrf.mxu1  ;;  %v2648_v23 = vmul.f32 0.2, %v2520_v56 }
 0x1b4   : > { %4295 = vst [vmem:[%s5110_s13 + $0x178] sm:$0xff] %v4167_v16   ;;  %v2521_v24 = vadd.f32 %v5229_v8, %v2300_v18  ;;  %v2292_v25 = vadd.f32 %v2291_v22, %v1314_v19  ;;  %v4574_v26 = vpop.f32.mrf.mxu0  ;;  %v4162_v27 = vpack.c.bf16 %v2771_v21, %v2770_v20  ;;  %v2646_v29 = vmul.f32 0.2, %v2518_v17 }
 0x1b5   : > { %v4718_v28 = vpop.f32.mrf.mxu1  ;;  %v2776_v35 = vmax.f32 %v2520_v56, %v2648_v23 }
 0x1b6   : > { %v2649_v30 = vmul.f32 0.2, %v2521_v24  ;;  %v2519_v31 = vadd.f32 %v5229_v8, %v2292_v25  ;;  %v2313_v32 = vadd.f32 %v4718_v28, %v4574_v26  ;;  %v1327_v33 = vpop.f32.mrf.mxu0  ;;  %4294 = vst [vmem:[%s5110_s13 + $0x170] sm:$0xff] %v4162_v27   ;;  %v2774_v42 = vmax.f32 %v2518_v17, %v2646_v29 }
 0x1b7   : > { %v2304_v34 = vpop.f32.mrf.mxu1 }
 0x1b8   : > { %v2777_v36 = vmax.f32 %v2521_v24, %v2649_v30  ;;  %v2647_v37 = vmul.f32 0.2, %v2519_v31  ;;  %v2305_v38 = vadd.f32 %v2304_v34, %v1327_v33  ;;  %v4575_v39 = vpop.f32.mrf.mxu0  ;;  %v2524_v40 = vadd.f32 %v5229_v8, %v2313_v32 }
 0x1b9   : > { %v4719_v41 = vpop.f32.mrf.mxu1 }
 0x1ba   : > { %v4177_v43 = vpack.c.bf16 %v2777_v36, %v2776_v35  ;;  %v2775_v44 = vmax.f32 %v2519_v31, %v2647_v37  ;;  %v2522_v45 = vadd.f32 %v5229_v8, %v2305_v38  ;;  %v1330_v46 = vpop.f32.mrf.mxu0  ;;  %v2316_v47 = vadd.f32 %v4719_v41, %v4575_v39 }
 0x1bb   : > { %v2307_v48 = vpop.f32.mrf.mxu1  ;;  %v2652_v52 = vmul.f32 0.2, %v2524_v40 }
 0x1bc   : > { %4297 = vst [vmem:[%s5110_s13 + $0x188] sm:$0xff] %v4177_v43   ;;  %v4172_v49 = vpack.c.bf16 %v2775_v44, %v2774_v42  ;;  %v2308_v50 = vadd.f32 %v2307_v48, %v1330_v46  ;;  %v4578_v51 = vpop.f32.mrf.mxu0  ;;  %v2525_v53 = vadd.f32 %v5229_v8, %v2316_v47  ;;  %v2650_v55 = vmul.f32 0.2, %v2522_v45 }
 0x1bd   : > { %v4722_v54 = vpop.f32.mrf.mxu1  ;;  %v2780_v2 = vmax.f32 %v2524_v40, %v2652_v52 }
 0x1be   : > { %4296 = vst [vmem:[%s5110_s13 + $0x180] sm:$0xff] %v4172_v49   ;;  %v2523_v57 = vadd.f32 %v5229_v8, %v2308_v50  ;;  %v2329_v58 = vadd.f32 %v4722_v54, %v4578_v51  ;;  %v1343_v59 = vpop.f32.mrf.mxu0  ;;  %v2653_v60 = vmul.f32 0.2, %v2525_v53  ;;  %v2778_v5 = vmax.f32 %v2522_v45, %v2650_v55 }
 0x1bf   : > { %v2320_v61 = vpop.f32.mrf.mxu1 }
 0x1c0   : > { %v2651_v62 = vmul.f32 0.2, %v2523_v57  ;;  %v2528_v63 = vadd.f32 %v5229_v8, %v2329_v58  ;;  %v2321_v0 = vadd.f32 %v2320_v61, %v1343_v59  ;;  %v4579_v1 = vpop.f32.mrf.mxu0  ;;  %v2781_v3 = vmax.f32 %v2525_v53, %v2653_v60 }
 0x1c1   : > { %v4723_v4 = vpop.f32.mrf.mxu1 }
 0x1c2   : > { %v2779_v6 = vmax.f32 %v2523_v57, %v2651_v62  ;;  %v2332_v7 = vadd.f32 %v4723_v4, %v4579_v1  ;;  %v1346_v9 = vpop.f32.mrf.mxu0  ;;  %v4187_v10 = vpack.c.bf16 %v2781_v3, %v2780_v2  ;;  %v2526_v11 = vadd.f32 %v5229_v8, %v2321_v0 }
 0x1c3   : > { %v2323_v56 = vpop.f32.mrf.mxu1  ;;  %v2656_v13 = vmul.f32 0.2, %v2528_v63 }
 0x1c4   : > { %v4182_v12 = vpack.c.bf16 %v2779_v6, %v2778_v5  ;;  %v2529_v14 = vadd.f32 %v5229_v8, %v2332_v7  ;;  %v4582_v15 = vpop.f32.mrf.mxu0  ;;  %4299 = vst [vmem:[%s5110_s13 + $0x198] sm:$0xff] %v4187_v10   ;;  %v2324_v16 = vadd.f32 %v2323_v56, %v1346_v9  ;;  %v2654_v21 = vmul.f32 0.2, %v2526_v11 }
 0x1c5   : > { %v4726_v17 = vpop.f32.mrf.mxu1  ;;  %v2784_v24 = vmax.f32 %v2528_v63, %v2656_v13 }
 0x1c6   : > { %4298 = vst [vmem:[%s5110_s13 + $0x190] sm:$0xff] %v4182_v12   ;;  %v2657_v18 = vmul.f32 0.2, %v2529_v14  ;;  %v2345_v19 = vadd.f32 %v4726_v17, %v4582_v15  ;;  %v1359_v20 = vpop.f32.mrf.mxu0  ;;  %v2527_v22 = vadd.f32 %v5229_v8, %v2324_v16  ;;  %v2782_v35 = vmax.f32 %v2526_v11, %v2654_v21 }
 0x1c7   : > { %v2336_v23 = vpop.f32.mrf.mxu1 }
 0x1c8   : > { %v2785_v25 = vmax.f32 %v2529_v14, %v2657_v18  ;;  %v2532_v26 = vadd.f32 %v5229_v8, %v2345_v19  ;;  %v2337_v27 = vadd.f32 %v2336_v23, %v1359_v20  ;;  %v4583_v28 = vpop.f32.mrf.mxu0  ;;  %v2655_v29 = vmul.f32 0.2, %v2527_v22 }
 0x1c9   : > { %v4727_v30 = vpop.f32.mrf.mxu1 }
 0x1ca   : > { %v4197_v31 = vpack.c.bf16 %v2785_v25, %v2784_v24  ;;  %v2530_v32 = vadd.f32 %v5229_v8, %v2337_v27  ;;  %v2348_v33 = vadd.f32 %v4727_v30, %v4583_v28  ;;  %v1362_v34 = vpop.f32.mrf.mxu0  ;;  %v2783_v36 = vmax.f32 %v2527_v22, %v2655_v29 }
 0x1cb   : > { %v2339_v37 = vpop.f32.mrf.mxu1  ;;  %v2660_v38 = vmul.f32 0.2, %v2532_v26 }
 0x1cc   : > { %4301 = vst [vmem:[%s5110_s13 + $0x1a8] sm:$0xff] %v4197_v31   ;;  %v2533_v39 = vadd.f32 %v5229_v8, %v2348_v33  ;;  %v2340_v40 = vadd.f32 %v2339_v37, %v1362_v34  ;;  %v4586_v41 = vpop.f32.mrf.mxu0  ;;  %v4192_v42 = vpack.c.bf16 %v2783_v36, %v2782_v35  ;;  %v2658_v44 = vmul.f32 0.2, %v2530_v32 }
 0x1cd   : > { %v4730_v43 = vpop.f32.mrf.mxu1  ;;  %v2788_v50 = vmax.f32 %v2532_v26, %v2660_v38 }
 0x1ce   : > { %v2661_v45 = vmul.f32 0.2, %v2533_v39  ;;  %v2531_v46 = vadd.f32 %v5229_v8, %v2340_v40  ;;  %v2361_v47 = vadd.f32 %v4730_v43, %v4586_v41  ;;  %v1375_v48 = vpop.f32.mrf.mxu0  ;;  %4300 = vst [vmem:[%s5110_s13 + $0x1a0] sm:$0xff] %v4192_v42   ;;  %v2786_v58 = vmax.f32 %v2530_v32, %v2658_v44 }
 0x1cf   : > { %v2352_v49 = vpop.f32.mrf.mxu1 }
 0x1d0   : > { %v2789_v51 = vmax.f32 %v2533_v39, %v2661_v45  ;;  %v2659_v52 = vmul.f32 0.2, %v2531_v46  ;;  %v2353_v53 = vadd.f32 %v2352_v49, %v1375_v48  ;;  %v4587_v54 = vpop.f32.mrf.mxu0  ;;  %v2536_v55 = vadd.f32 %v5229_v8, %v2361_v47 }
 0x1d1   : > { %v4731_v57 = vpop.f32.mrf.mxu1 }
 0x1d2   : > { %v4207_v59 = vpack.c.bf16 %v2789_v51, %v2788_v50  ;;  %v2787_v60 = vmax.f32 %v2531_v46, %v2659_v52  ;;  %v2534_v61 = vadd.f32 %v5229_v8, %v2353_v53  ;;  %v1378_v62 = vpop.f32.mrf.mxu0  ;;  %v2364_v63 = vadd.f32 %v4731_v57, %v4587_v54 }
 0x1d3   : > { %v2355_v0 = vpop.f32.mrf.mxu1  ;;  %v2664_v4 = vmul.f32 0.2, %v2536_v55 }
 0x1d4   : > { %4303 = vst [vmem:[%s5110_s13 + $0x1b8] sm:$0xff] %v4207_v59   ;;  %v4202_v1 = vpack.c.bf16 %v2787_v60, %v2786_v58  ;;  %v2356_v2 = vadd.f32 %v2355_v0, %v1378_v62  ;;  %v4590_v3 = vpop.f32.mrf.mxu0  ;;  %v2537_v5 = vadd.f32 %v5229_v8, %v2364_v63  ;;  %v2662_v7 = vmul.f32 0.2, %v2534_v61 }
 0x1d5   : > { %v4734_v6 = vpop.f32.mrf.mxu1  ;;  %v2792_v17 = vmax.f32 %v2536_v55, %v2664_v4 }
 0x1d6   : > { %4302 = vst [vmem:[%s5110_s13 + $0x1b0] sm:$0xff] %v4202_v1   ;;  %v2535_v9 = vadd.f32 %v5229_v8, %v2356_v2  ;;  %v2377_v10 = vadd.f32 %v4734_v6, %v4590_v3  ;;  %v1391_v11 = vpop.f32.mrf.mxu0  ;;  %v2665_v56 = vmul.f32 0.2, %v2537_v5  ;;  %v2790_v20 = vmax.f32 %v2534_v61, %v2662_v7 }
 0x1d7   : > { %v2368_v12 = vpop.f32.mrf.mxu1 }
 0x1d8   : > { %v2663_v13 = vmul.f32 0.2, %v2535_v9  ;;  %v2540_v14 = vadd.f32 %v5229_v8, %v2377_v10  ;;  %v2369_v15 = vadd.f32 %v2368_v12, %v1391_v11  ;;  %v4591_v16 = vpop.f32.mrf.mxu0  ;;  %v2793_v18 = vmax.f32 %v2537_v5, %v2665_v56 }
 0x1d9   : > { %v4735_v19 = vpop.f32.mrf.mxu1 }
 0x1da   : > { %v2791_v21 = vmax.f32 %v2535_v9, %v2663_v13  ;;  %v2380_v22 = vadd.f32 %v4735_v19, %v4591_v16  ;;  %v1394_v23 = vpop.f32.mrf.mxu0  ;;  %v4217_v24 = vpack.c.bf16 %v2793_v18, %v2792_v17  ;;  %v2538_v25 = vadd.f32 %v5229_v8, %v2369_v15 }
 0x1db   : > { %v2371_v26 = vpop.f32.mrf.mxu1  ;;  %v2668_v28 = vmul.f32 0.2, %v2540_v14 }
 0x1dc   : > { %v4212_v27 = vpack.c.bf16 %v2791_v21, %v2790_v20  ;;  %v2541_v29 = vadd.f32 %v5229_v8, %v2380_v22  ;;  %v4594_v30 = vpop.f32.mrf.mxu0  ;;  %4305 = vst [vmem:[%s5110_s13 + $0x1c8] sm:$0xff] %v4217_v24   ;;  %v2372_v31 = vadd.f32 %v2371_v26, %v1394_v23  ;;  %v2666_v36 = vmul.f32 0.2, %v2538_v25 }
 0x1dd   : > { %v4738_v32 = vpop.f32.mrf.mxu1  ;;  %v2796_v39 = vmax.f32 %v2540_v14, %v2668_v28 }
 0x1de   : > { %4304 = vst [vmem:[%s5110_s13 + $0x1c0] sm:$0xff] %v4212_v27   ;;  %v2669_v33 = vmul.f32 0.2, %v2541_v29  ;;  %v2393_v34 = vadd.f32 %v4738_v32, %v4594_v30  ;;  %v1407_v35 = vpop.f32.mrf.mxu0  ;;  %v2539_v37 = vadd.f32 %v5229_v8, %v2372_v31  ;;  %v2794_v50 = vmax.f32 %v2538_v25, %v2666_v36 }
 0x1df   : > { %v2384_v38 = vpop.f32.mrf.mxu1 }
 0x1e0   : > { %v2797_v40 = vmax.f32 %v2541_v29, %v2669_v33  ;;  %v2544_v41 = vadd.f32 %v5229_v8, %v2393_v34  ;;  %v2385_v42 = vadd.f32 %v2384_v38, %v1407_v35  ;;  %v4595_v43 = vpop.f32.mrf.mxu0  ;;  %v2667_v44 = vmul.f32 0.2, %v2539_v37 }
 0x1e1   : > { %v4739_v45 = vpop.f32.mrf.mxu1 }
 0x1e2   : > { %v4227_v46 = vpack.c.bf16 %v2797_v40, %v2796_v39  ;;  %v2542_v47 = vadd.f32 %v5229_v8, %v2385_v42  ;;  %v2396_v48 = vadd.f32 %v4739_v45, %v4595_v43  ;;  %v1410_v49 = vpop.f32.mrf.mxu0  ;;  %v2795_v51 = vmax.f32 %v2539_v37, %v2667_v44 }
 0x1e3   : > { %v2387_v52 = vpop.f32.mrf.mxu1  ;;  %v2672_v53 = vmul.f32 0.2, %v2544_v41 }
 0x1e4   : > { %4307 = vst [vmem:[%s5110_s13 + $0x1d8] sm:$0xff] %v4227_v46   ;;  %v2545_v54 = vadd.f32 %v5229_v8, %v2396_v48  ;;  %v2388_v55 = vadd.f32 %v2387_v52, %v1410_v49  ;;  %v4598_v57 = vpop.f32.mrf.mxu0  ;;  %v4222_v58 = vpack.c.bf16 %v2795_v51, %v2794_v50  ;;  %v2670_v60 = vmul.f32 0.2, %v2542_v47 }
 0x1e5   : > { %v4742_v59 = vpop.f32.mrf.mxu1  ;;  %v2800_v2 = vmax.f32 %v2544_v41, %v2672_v53 }
 0x1e6   : > { %v2673_v61 = vmul.f32 0.2, %v2545_v54  ;;  %v2543_v62 = vadd.f32 %v5229_v8, %v2388_v55  ;;  %v2409_v63 = vadd.f32 %v4742_v59, %v4598_v57  ;;  %v1423_v0 = vpop.f32.mrf.mxu0  ;;  %4306 = vst [vmem:[%s5110_s13 + $0x1d0] sm:$0xff] %v4222_v58   ;;  %v2798_v10 = vmax.f32 %v2542_v47, %v2670_v60 }
 0x1e7   : > { %v2400_v1 = vpop.f32.mrf.mxu1 }
 0x1e8   : > { %v2801_v3 = vmax.f32 %v2545_v54, %v2673_v61  ;;  %v2671_v4 = vmul.f32 0.2, %v2543_v62  ;;  %v2401_v5 = vadd.f32 %v2400_v1, %v1423_v0  ;;  %v4599_v6 = vpop.f32.mrf.mxu0  ;;  %v2548_v7 = vadd.f32 %v5229_v8, %v2409_v63 }
 0x1e9   : > { %v4743_v9 = vpop.f32.mrf.mxu1 }
 0x1ea   : > { %v4237_v11 = vpack.c.bf16 %v2801_v3, %v2800_v2  ;;  %v2799_v56 = vmax.f32 %v2543_v62, %v2671_v4  ;;  %v2546_v12 = vadd.f32 %v5229_v8, %v2401_v5  ;;  %v1426_v13 = vpop.f32.mrf.mxu0  ;;  %v2412_v14 = vadd.f32 %v4743_v9, %v4599_v6 }
 0x1eb   : > { %v2403_v15 = vpop.f32.mrf.mxu1  ;;  %v2676_v18 = vmul.f32 0.2, %v2548_v7 }
 0x1ec   : > { %4309 = vst [vmem:[%s5110_s13 + $0x1e8] sm:$0xff] %v4237_v11   ;;  %v4232_v16 = vpack.c.bf16 %v2799_v56, %v2798_v10  ;;  %v2404_v17 = vadd.f32 %v2403_v15, %v1426_v13  ;;  %v2549_v19 = vadd.f32 %v5229_v8, %v2412_v14  ;;  %v2674_v20 = vmul.f32 0.2, %v2546_v12 }
 0x1ed   : > { %v2804_v24 = vmax.f32 %v2548_v7, %v2676_v18 }
 0x1ee   : > { %4308 = vst [vmem:[%s5110_s13 + $0x1e0] sm:$0xff] %v4232_v16   ;;  %v2547_v21 = vadd.f32 %v5229_v8, %v2404_v17  ;;  %v2677_v22 = vmul.f32 0.2, %v2549_v19  ;;  %v2802_v26 = vmax.f32 %v2546_v12, %v2674_v20 }
 0x1f0   : > { %v2675_v23 = vmul.f32 0.2, %v2547_v21  ;;  %v2805_v25 = vmax.f32 %v2549_v19, %v2677_v22 }
 0x1f2   : > { %v2803_v27 = vmax.f32 %v2547_v21, %v2675_v23  ;;  %v4247_v28 = vpack.c.bf16 %v2805_v25, %v2804_v24 }
 0x1f4   : > { %v4242_v29 = vpack.c.bf16 %v2803_v27, %v2802_v26  ;;  %4311 = vst [vmem:[%s5110_s13 + $0x1f8] sm:$0xff] %v4247_v28  }
 0x1f6   : > { %4310 = vst [vmem:[%s5110_s13 + $0x1f0] sm:$0xff] %v4242_v29  }
 0x1f7 PF: > { %s13_s12 = sadd.s32 1, %s4904_s12  }
 0x1f8   : > { %p10_p4 = scmp.ge.s32.totalorder %s13_s12, 4  }
 0x1fa   :  { %12 = sbr.rel (!%p10_p4) target bundleno = 1 (0x1), region = 63 }

// kernel: _lambda_.5
= control target key start
LH: loop header
LB: loop body
LE: loop exit
PB: predicated region body
PF: predicated region fallthrough
CT: control target
= control target key end

     0   :  { %s5154_s12 = smov 0   ;;  %s5993_s0 = inlined_call_operand.vmem [shape: bf16[2,528,512], index: 0, kind: input, shape index: {}]   ;;  %s5994_s1 = inlined_call_operand.vmem [shape: bf16[2,512,128], index: 1, kind: input, shape index: {}]   ;;  %s5995_s2 = inlined_call_operand.vmem [shape: f32[1,128], index: 2, kind: input, shape index: {}]   ;;  %s5996_s3 = inlined_call_operand.vmem [shape: bf16[2,512,128], index: 3, kind: output, shape index: {}]  }
   0x1 LB: > { %s3951_s13 = sadd.s32 4294967295, %s5131_s12   ;;  %p3955_p0 = scmp.ge.s32.totalorder %s5131_s12, 1  ;;  %s5131_s12 = sphi %s5154_s12, %s13_s12  }
   0x2   : > { %p137_p1 = scmp.lt.s32.totalorder %s5131_s12, 3 }
   0x4   : > { %p138_p2 = pnand %p3955_p0, %p137_p1 }
   0x6   : > { %141 = sbr.rel (%p138_p2) target bundleno = 790 (0x316), region = 32 }
   0xb   : > { %v4676_v0 = vld [vmem:[%s5994_s1 + $0x138] sm:$0xff]   ;;  %v5133_v1 = vmov 0   ;;  %v4678_v3 = vld [vmem:[%s5994_s1 + $0x130] sm:$0xff]   ;;  %v4680_v5 = vld [vmem:[%s5994_s1 + $0x128] sm:$0xff]   ;;  %p161_p3 = scmp.lt.s32.totalorder %s3951_s13, 1 }
   0xc   : > { %1389 = vmatprep.subr.bf16.mxu0 %v5133_v1  ;;  %1678 = vmatprep.subr.bf16.mxu1 %v5133_v1  ;;  %v4677_v2 = vld [vmem:[%s5994_s1 + $0x1b8] sm:$0xff]   ;;  %v4679_v4 = vld [vmem:[%s5994_s1 + $0x1b0] sm:$0xff]   ;;  %v4681_v6 = vld [vmem:[%s5994_s1 + $0x1a8] sm:$0xff]  }
   0xd   : > { %1390 = vmatpush1.bf16.msra.mxu0 %v4676_v0  ;;  %1679 = vmatpush1.bf16.msra.mxu1 %v4677_v2  ;;  %v4682_v7 = vld [vmem:[%s5994_s1 + $0x120] sm:$0xff]   ;;  %v4684_v9 = vld [vmem:[%s5994_s1 + $0x118] sm:$0xff]   ;;  %v4686_v11 = vld [vmem:[%s5994_s1 + $0x110] sm:$0xff]   ;;  %s6034_s13 = smov (!%p161_p3, %s3951_s13), 1 }
   0xe   : > { %1391 = vmatprep.subr.bf16.mxu0 %v5133_v1  ;;  %1680 = vmatprep.subr.bf16.mxu1 %v5133_v1  ;;  %v4683_v8 = vld [vmem:[%s5994_s1 + $0x1a0] sm:$0xff]   ;;  %v4685_v10 = vld [vmem:[%s5994_s1 + $0x198] sm:$0xff]   ;;  %v4687_v12 = vld [vmem:[%s5994_s1 + $0x190] sm:$0xff]   ;;  %s4666_s19 = smul.u32 1056, %s6034_s13  ;;  %s4410_s27 = sshll.u32 %s6034_s13, 8 }
   0xf   : > { %v4688_v13 = vld [vmem:[%s5994_s1 + $0x108] sm:$0xff]   ;;  %v4690_v15 = vld [vmem:[%s5994_s1 + $0x100] sm:$0xff]   ;;  %v4692_v17 = vld [vmem:[%s5994_s1 + $0x178] sm:$0xff]   ;;  %s5811_s30 = scalar_lea.vmem %s5996_s3, %s4410_s27 }
  0x10   : > { %v4689_v14 = vld [vmem:[%s5994_s1 + $0x188] sm:$0xff]   ;;  %v4691_v16 = vld [vmem:[%s5994_s1 + $0x180] sm:$0xff]   ;;  %s5239_s26 = scalar_lea.vmem %s5993_s0, %s4666_s19  ;;  %v4693_v18 = vld [vmem:[%s5994_s1 + $0x1f8] sm:$0xff]  }
  0x11   : > { %1392 = vmatpush1.bf16.msra.mxu0 %v4678_v3  ;;  %1681 = vmatpush1.bf16.msra.mxu1 %v4679_v4  ;;  %v4710_v19 = vld [vmem:[%s5239_s26 + $0x24] ss:$16 sps:$4 sm:$0xff]   ;;  %v4713_v21 = vld [vmem:[%s5239_s26 + $0x2c] ss:$16 sps:$4 sm:$0xff]   ;;  %v4708_v35 = vld [vmem:[%s5239_s26 + $0x20] ss:$16 sps:$4 sm:$0xff]  }
  0x12   : > { %1393 = vmatprep.subr.bf16.mxu0 %v5133_v1  ;;  %1682 = vmatprep.subr.bf16.mxu1 %v5133_v1  ;;  %v4694_v20 = vld [vmem:[%s5994_s1 + $0x170] sm:$0xff]   ;;  %v4696_v23 = vld [vmem:[%s5994_s1 + $0x168] sm:$0xff]   ;;  %v4698_v25 = vld [vmem:[%s5994_s1 + $0x160] sm:$0xff]  }
  0x13   : > { %v4695_v22 = vld [vmem:[%s5994_s1 + $0x1f0] sm:$0xff]   ;;  %1421 = vmatprep.mubr.bf16.mxu0 %v4710_v19  ;;  %1710 = vmatprep.mubr.bf16.mxu1 %v4713_v21  ;;  %v4697_v24 = vld [vmem:[%s5994_s1 + $0x1e8] sm:$0xff]   ;;  %v4699_v26 = vld [vmem:[%s5994_s1 + $0x1e0] sm:$0xff]  }
  0x14   : > { %v4700_v27 = vld [vmem:[%s5994_s1 + $0x158] sm:$0xff]   ;;  %v4702_v29 = vld [vmem:[%s5994_s1 + $0x150] sm:$0xff]   ;;  %v4704_v31 = vld [vmem:[%s5994_s1 + $0x148] sm:$0xff]  }
  0x15   : > { %1394 = vmatpush1.bf16.msra.mxu0 %v4680_v5  ;;  %1683 = vmatpush1.bf16.msra.mxu1 %v4681_v6  ;;  %v4701_v28 = vld [vmem:[%s5994_s1 + $0x1d8] sm:$0xff]   ;;  %v4703_v30 = vld [vmem:[%s5994_s1 + $0x1d0] sm:$0xff]   ;;  %v4705_v32 = vld [vmem:[%s5994_s1 + $0x1c8] sm:$0xff]  }
  0x16   : > { %1395 = vmatprep.subr.bf16.mxu0 %v5133_v1  ;;  %1684 = vmatprep.subr.bf16.mxu1 %v5133_v1  ;;  %v4706_v33 = vld [vmem:[%s5994_s1 + $0x140] sm:$0xff]   ;;  %v4711_v36 = vld [vmem:[%s5239_s26 + $0x28] ss:$16 sps:$4 sm:$0xff]   ;;  %v4718_v40 = vld [vmem:[%s5239_s26 + $0x4c] ss:$16 sps:$4 sm:$0xff]  }
  0x17   : > { %v4707_v34 = vld [vmem:[%s5994_s1 + $0x1c0] sm:$0xff]   ;;  %v4714_v37 = vld [vmem:[%s5994_s1 + $0x38] sm:$0xff]   ;;  %v4728_v41 = vld [vmem:[%s5994_s1 + $0x30] sm:$0xff]  }
  0x18   : > { %v4715_v38 = vld [vmem:[%s5994_s1 + $0xb8] sm:$0xff]   ;;  %v4716_v39 = vld [vmem:[%s5239_s26 + $0x44] ss:$16 sps:$4 sm:$0xff]   ;;  %v4720_v43 = vld [vmem:[%s5239_s26 + $0x40] ss:$16 sps:$4 sm:$0xff]  }
  0x19   : > { %1396 = vmatpush1.bf16.msra.mxu0 %v4682_v7  ;;  %1685 = vmatpush1.bf16.msra.mxu1 %v4683_v8  ;;  %v4729_v42 = vld [vmem:[%s5994_s1 + $0xb0] sm:$0xff]   ;;  %v4721_v44 = vld [vmem:[%s5239_s26 + $0x48] ss:$16 sps:$4 sm:$0xff]   ;;  %v4724_v46 = vld [vmem:[%s5239_s26 + $0x6c] ss:$16 sps:$4 sm:$0xff]  }
  0x1a   : > { %1397 = vmatprep.subr.bf16.mxu0 %v5133_v1  ;;  %1686 = vmatprep.subr.bf16.mxu1 %v5133_v1  ;;  %v4722_v45 = vld [vmem:[%s5239_s26 + $0x64] ss:$16 sps:$4 sm:$0xff]   ;;  %v4742_v47 = vld [vmem:[%s5994_s1 + $0x28] sm:$0xff]   ;;  %v4726_v49 = vld [vmem:[%s5239_s26 + $0x60] ss:$16 sps:$4 sm:$0xff]  }
  0x1b   : > { %v4743_v48 = vld [vmem:[%s5994_s1 + $0xa8] sm:$0xff]   ;;  %v4756_v50 = vld [vmem:[%s5994_s1 + $0x20] sm:$0xff]   ;;  %v4770_v55 = vld [vmem:[%s5994_s1 + $0x18] sm:$0xff]  }
  0x1c   : > { %v4757_v51 = vld [vmem:[%s5994_s1 + $0xa0] sm:$0xff]   ;;  %v4727_v52 = vld [vmem:[%s5239_s26 + $0x68] ss:$16 sps:$4 sm:$0xff]   ;;  %v4732_v54 = vld [vmem:[%s5239_s26 + $0x8c] ss:$16 sps:$4 sm:$0xff]  }
  0x1d   : > { %1398 = vmatpush1.bf16.msra.mxu0 %v4684_v9  ;;  %1687 = vmatpush1.bf16.msra.mxu1 %v4685_v10  ;;  %v4730_v53 = vld [vmem:[%s5239_s26 + $0x84] ss:$16 sps:$4 sm:$0xff]   ;;  %v4771_v56 = vld [vmem:[%s5994_s1 + $0x98] sm:$0xff]   ;;  %v4734_v59 = vld [vmem:[%s5239_s26 + $0x80] ss:$16 sps:$4 sm:$0xff]  }
  0x1e   : > { %1399 = vmatprep.subr.bf16.mxu0 %v5133_v1  ;;  %1688 = vmatprep.subr.bf16.mxu1 %v5133_v1  ;;  %v4784_v57 = vld [vmem:[%s5994_s1 + $0x10] sm:$0xff]   ;;  %v4735_v60 = vld [vmem:[%s5239_s26 + $0x88] ss:$16 sps:$4 sm:$0xff]   ;;  %v4738_v62 = vld [vmem:[%s5239_s26 + $0xac] ss:$16 sps:$4 sm:$0xff]  }
  0x1f   : > { %v4785_v58 = vld [vmem:[%s5994_s1 + $0x90] sm:$0xff]   ;;  %v4798_v63 = vld [vmem:[%s5994_s1 + $0x8] sm:$0xff]   ;;  %v4812_v3 = vld [vmem:[%s5994_s1] sm:$0xff]  }
  0x20   : > { %v4736_v61 = vld [vmem:[%s5239_s26 + $0xa4] ss:$16 sps:$4 sm:$0xff]   ;;  %v4799_v0 = vld [vmem:[%s5994_s1 + $0x88] sm:$0xff]   ;;  %v4740_v2 = vld [vmem:[%s5239_s26 + $0xa0] ss:$16 sps:$4 sm:$0xff]  }
  0x21   : > { %1400 = vmatpush1.bf16.msra.mxu0 %v4686_v11  ;;  %1689 = vmatpush1.bf16.msra.mxu1 %v4687_v12  ;;  %v4741_v4 = vld [vmem:[%s5239_s26 + $0xa8] ss:$16 sps:$4 sm:$0xff]   ;;  %v4813_v5 = vld [vmem:[%s5994_s1 + $0x80] sm:$0xff]   ;;  %v4746_v7 = vld [vmem:[%s5239_s26 + $0xcc] ss:$16 sps:$4 sm:$0xff]  }
  0x22   : > { %1401 = vmatprep.subr.bf16.mxu0 %v5133_v1  ;;  %1690 = vmatprep.subr.bf16.mxu1 %v5133_v1  ;;  %v4744_v6 = vld [vmem:[%s5239_s26 + $0xc4] ss:$16 sps:$4 sm:$0xff]   ;;  %v4826_v8 = vld [vmem:[%s5994_s1 + $0x78] sm:$0xff]   ;;  %v4748_v10 = vld [vmem:[%s5239_s26 + $0xc0] ss:$16 sps:$4 sm:$0xff]  }
  0x23   : > { %v4827_v9 = vld [vmem:[%s5994_s1 + $0xf8] sm:$0xff]   ;;  %v4750_v12 = vld [vmem:[%s5239_s26 + $0xe4] ss:$16 sps:$4 sm:$0xff]   ;;  %v4855_v19 = vld [vmem:[%s5994_s1 + $0xe8] sm:$0xff]  }
  0x24   : > { %v4749_v11 = vld [vmem:[%s5239_s26 + $0xc8] ss:$16 sps:$4 sm:$0xff]   ;;  %v4760_v21 = vld [vmem:[%s5239_s26 + $0x10c] ss:$16 sps:$4 sm:$0xff]  }
  0x25   : > { %1402 = vmatpush1.bf16.msra.mxu0 %v4688_v13  ;;  %1691 = vmatpush1.bf16.msra.mxu1 %v4689_v14  ;;  %v4840_v13 = vld [vmem:[%s5994_s1 + $0x70] sm:$0xff]  }
  0x26   : > { %1403 = vmatprep.subr.bf16.mxu0 %v5133_v1  ;;  %1692 = vmatprep.subr.bf16.mxu1 %v5133_v1  ;;  %v4841_v14 = vld [vmem:[%s5994_s1 + $0xf0] sm:$0xff]  }
  0x29   : > { %1404 = vmatpush1.bf16.msra.mxu0 %v4690_v15  ;;  %1693 = vmatpush1.bf16.msra.mxu1 %v4691_v16  ;;  %v4752_v15 = vld [vmem:[%s5239_s26 + $0xec] ss:$16 sps:$4 sm:$0xff]   ;;  %v4754_v16 = vld [vmem:[%s5239_s26 + $0xe0] ss:$16 sps:$4 sm:$0xff]  }
  0x2a   : > { %1405 = vmatprep.subr.bf16.mxu0 %v5133_v1  ;;  %1694 = vmatprep.subr.bf16.mxu1 %v5133_v1 }
  0x2d   : > { %1406 = vmatpush2.bf16.msra.mxu0 %v4692_v17  ;;  %1695 = vmatpush2.bf16.msra.mxu1 %v4693_v18  ;;  %v4755_v17 = vld [vmem:[%s5239_s26 + $0xe8] ss:$16 sps:$4 sm:$0xff]  }
  0x2e   : > { %1407 = vmatprep.subr.bf16.mxu0 %v5133_v1  ;;  %1696 = vmatprep.subr.bf16.mxu1 %v5133_v1  ;;  %v4854_v18 = vld [vmem:[%s5994_s1 + $0x68] sm:$0xff]  }
  0x31   : > { %1408 = vmatpush2.bf16.msra.mxu0 %v4694_v20  ;;  %1697 = vmatpush2.bf16.msra.mxu1 %v4695_v22  ;;  %v4758_v20 = vld [vmem:[%s5239_s26 + $0x104] ss:$16 sps:$4 sm:$0xff]   ;;  %v4762_v22 = vld [vmem:[%s5239_s26 + $0x100] ss:$16 sps:$4 sm:$0xff]  }
  0x32   : > { %1409 = vmatprep.subr.bf16.mxu0 %v5133_v1  ;;  %1698 = vmatprep.subr.bf16.mxu1 %v5133_v1 }
  0x35   : > { %1410 = vmatpush2.bf16.msra.mxu0 %v4696_v23  ;;  %1699 = vmatpush2.bf16.msra.mxu1 %v4697_v24  ;;  %v4763_v23 = vld [vmem:[%s5239_s26 + $0x108] ss:$16 sps:$4 sm:$0xff]   ;;  %v4868_v24 = vld [vmem:[%s5994_s1 + $0x60] sm:$0xff]  }
  0x36   : > { %1411 = vmatprep.subr.bf16.mxu0 %v5133_v1  ;;  %1700 = vmatprep.subr.bf16.mxu1 %v5133_v1 }
  0x39   : > { %1412 = vmatpush2.bf16.msra.mxu0 %v4698_v25  ;;  %1701 = vmatpush2.bf16.msra.mxu1 %v4699_v26  ;;  %v4869_v25 = vld [vmem:[%s5994_s1 + $0xe0] sm:$0xff]  }
  0x3a   : > { %1413 = vmatprep.subr.bf16.mxu0 %v5133_v1  ;;  %1702 = vmatprep.subr.bf16.mxu1 %v5133_v1  ;;  %v4764_v26 = vld [vmem:[%s5239_s26 + $0x124] ss:$16 sps:$4 sm:$0xff]  }
  0x3d   : > { %1414 = vmatpush2.bf16.msra.mxu0 %v4700_v27  ;;  %1703 = vmatpush2.bf16.msra.mxu1 %v4701_v28  ;;  %v4766_v27 = vld [vmem:[%s5239_s26 + $0x12c] ss:$16 sps:$4 sm:$0xff]   ;;  %v4768_v28 = vld [vmem:[%s5239_s26 + $0x120] ss:$16 sps:$4 sm:$0xff]  }
  0x3e   : > { %1415 = vmatprep.subr.bf16.mxu0 %v5133_v1  ;;  %1704 = vmatprep.subr.bf16.mxu1 %v5133_v1 }
  0x41   : > { %1416 = vmatpush2.bf16.msra.mxu0 %v4702_v29  ;;  %1705 = vmatpush2.bf16.msra.mxu1 %v4703_v30  ;;  %v4769_v29 = vld [vmem:[%s5239_s26 + $0x128] ss:$16 sps:$4 sm:$0xff]   ;;  %v4772_v30 = vld [vmem:[%s5239_s26 + $0x144] ss:$16 sps:$4 sm:$0xff]  }
  0x42   : > { %1417 = vmatprep.subr.bf16.mxu0 %v5133_v1  ;;  %1706 = vmatprep.subr.bf16.mxu1 %v5133_v1 }
  0x45   : > { %1418 = vmatpush2.bf16.msra.mxu0 %v4704_v31  ;;  %1707 = vmatpush2.bf16.msra.mxu1 %v4705_v32  ;;  %v4774_v31 = vld [vmem:[%s5239_s26 + $0x14c] ss:$16 sps:$4 sm:$0xff]   ;;  %v4776_v32 = vld [vmem:[%s5239_s26 + $0x140] ss:$16 sps:$4 sm:$0xff]  }
  0x46   : > { %1419 = vmatprep.subr.bf16.mxu0 %v5133_v1  ;;  %1708 = vmatprep.subr.bf16.mxu1 %v5133_v1 }
  0x49   : > { %1420 = vmatpush2.bf16.msra.mxu0 %v4706_v33  ;;  %1709 = vmatpush2.bf16.msra.mxu1 %v4707_v34  ;;  %v4882_v33 = vld [vmem:[%s5994_s1 + $0x58] sm:$0xff]  }
  0x4a   : > { %2799 = vmatprep.subr.bf16.mxu0 %v5133_v1  ;;  %3088 = vmatprep.subr.bf16.mxu1 %v5133_v1  ;;  %v4777_v34 = vld [vmem:[%s5239_s26 + $0x148] ss:$16 sps:$4 sm:$0xff]  }
  0x4c   : > { %1422 = vmatmul.mubr.bf16.vlgmr.msra.gmra.mxu0 %v4708_v35  ;;  %1711 = vmatmul.mubr.bf16.vlgmr.msra.gmra.mxu1 %v4711_v36  ;;  %v4778_v35 = vld [vmem:[%s5239_s26 + $0x164] ss:$16 sps:$4 sm:$0xff]   ;;  %v4883_v36 = vld [vmem:[%s5994_s1 + $0xd8] sm:$0xff]  }
  0x4d   : > { %2800 = vmatpush1.bf16.msra.mxu0 %v4714_v37  ;;  %3089 = vmatpush1.bf16.msra.mxu1 %v4715_v38  ;;  %v4780_v37 = vld [vmem:[%s5239_s26 + $0x16c] ss:$16 sps:$4 sm:$0xff]   ;;  %v4782_v38 = vld [vmem:[%s5239_s26 + $0x160] ss:$16 sps:$4 sm:$0xff]  }
  0x4e   : > { %1429 = vmatprep.mubr.bf16.mxu0 %v4716_v39  ;;  %1718 = vmatprep.mubr.bf16.mxu1 %v4718_v40  ;;  %v4783_v39 = vld [vmem:[%s5239_s26 + $0x168] ss:$16 sps:$4 sm:$0xff]   ;;  %v4786_v40 = vld [vmem:[%s5239_s26 + $0x184] ss:$16 sps:$4 sm:$0xff]  }
  0x4f   : > { %2801 = vmatprep.subr.bf16.mxu0 %v5133_v1  ;;  %3090 = vmatprep.subr.bf16.mxu1 %v5133_v1 }
  0x51   : > { %2802 = vmatpush1.bf16.msra.mxu0 %v4728_v41  ;;  %3091 = vmatpush1.bf16.msra.mxu1 %v4729_v42  ;;  %v4788_v41 = vld [vmem:[%s5239_s26 + $0x18c] ss:$16 sps:$4 sm:$0xff]   ;;  %v4790_v42 = vld [vmem:[%s5239_s26 + $0x180] ss:$16 sps:$4 sm:$0xff]  }
  0x52   : > { %2803 = vmatprep.subr.bf16.mxu0 %v5133_v1  ;;  %3092 = vmatprep.subr.bf16.mxu1 %v5133_v1 }
  0x54   : > { %1430 = vmatmul.mubr.bf16.gmra.mxu0 %v4720_v43  ;;  %1719 = vmatmul.mubr.bf16.gmra.mxu1 %v4721_v44  ;;  %v4896_v43 = vld [vmem:[%s5994_s1 + $0x50] sm:$0xff]   ;;  %v4791_v44 = vld [vmem:[%s5239_s26 + $0x188] ss:$16 sps:$4 sm:$0xff]  }
  0x55   : > { %1437 = vmatprep.mubr.bf16.mxu0 %v4722_v45  ;;  %1726 = vmatprep.mubr.bf16.mxu1 %v4724_v46  ;;  %v4792_v45 = vld [vmem:[%s5239_s26 + $0x1a4] ss:$16 sps:$4 sm:$0xff]  }
  0x56   : > { %2804 = vmatpush1.bf16.msra.mxu0 %v4742_v47  ;;  %3093 = vmatpush1.bf16.msra.mxu1 %v4743_v48  ;;  %v4897_v46 = vld [vmem:[%s5994_s1 + $0xd0] sm:$0xff]   ;;  %v4794_v47 = vld [vmem:[%s5239_s26 + $0x1ac] ss:$16 sps:$4 sm:$0xff]  }
  0x57   : > { %2805 = vmatprep.subr.bf16.mxu0 %v5133_v1  ;;  %3094 = vmatprep.subr.bf16.mxu1 %v5133_v1  ;;  %v4796_v48 = vld [vmem:[%s5239_s26 + $0x1a0] ss:$16 sps:$4 sm:$0xff]  }
  0x5a   : > { %2806 = vmatpush1.bf16.msra.mxu0 %v4756_v50  ;;  %3095 = vmatpush1.bf16.msra.mxu1 %v4757_v51  ;;  %v4800_v50 = vld [vmem:[%s5239_s26 + $0x1c4] ss:$16 sps:$4 sm:$0xff]   ;;  %v4802_v51 = vld [vmem:[%s5239_s26 + $0x1cc] ss:$16 sps:$4 sm:$0xff]  }
  0x5b   : > { %2807 = vmatprep.subr.bf16.mxu0 %v5133_v1  ;;  %3096 = vmatprep.subr.bf16.mxu1 %v5133_v1 }
  0x5c   : > { %1438 = vmatmul.mubr.bf16.gmra.mxu0 %v4726_v49  ;;  %1727 = vmatmul.mubr.bf16.gmra.mxu1 %v4727_v52  ;;  %v4797_v49 = vld [vmem:[%s5239_s26 + $0x1a8] ss:$16 sps:$4 sm:$0xff]   ;;  %v4804_v52 = vld [vmem:[%s5239_s26 + $0x1c0] ss:$16 sps:$4 sm:$0xff]  }
  0x5d   : > { %1445 = vmatprep.mubr.bf16.mxu0 %v4730_v53  ;;  %1734 = vmatprep.mubr.bf16.mxu1 %v4732_v54  ;;  %v4910_v53 = vld [vmem:[%s5994_s1 + $0x48] sm:$0xff]  }
  0x5e   : > { %2808 = vmatpush1.bf16.msra.mxu0 %v4770_v55  ;;  %3097 = vmatpush1.bf16.msra.mxu1 %v4771_v56  ;;  %v4805_v54 = vld [vmem:[%s5239_s26 + $0x1c8] ss:$16 sps:$4 sm:$0xff]   ;;  %v4806_v55 = vld [vmem:[%s5239_s26 + $0x1e4] ss:$16 sps:$4 sm:$0xff]  }
  0x5f   : > { %2809 = vmatprep.subr.bf16.mxu0 %v5133_v1  ;;  %3098 = vmatprep.subr.bf16.mxu1 %v5133_v1  ;;  %v4911_v56 = vld [vmem:[%s5994_s1 + $0xc8] sm:$0xff]  }
  0x62   : > { %2810 = vmatpush1.bf16.msra.mxu0 %v4784_v57  ;;  %3099 = vmatpush1.bf16.msra.mxu1 %v4785_v58  ;;  %v4808_v57 = vld [vmem:[%s5239_s26 + $0x1ec] ss:$16 sps:$4 sm:$0xff]   ;;  %v4810_v58 = vld [vmem:[%s5239_s26 + $0x1e0] ss:$16 sps:$4 sm:$0xff]  }
  0x63   : > { %2811 = vmatprep.subr.bf16.mxu0 %v5133_v1  ;;  %3100 = vmatprep.subr.bf16.mxu1 %v5133_v1 }
  0x64   : > { %1446 = vmatmul.mubr.bf16.gmra.mxu0 %v4734_v59  ;;  %1735 = vmatmul.mubr.bf16.gmra.mxu1 %v4735_v60  ;;  %v4811_v59 = vld [vmem:[%s5239_s26 + $0x1e8] ss:$16 sps:$4 sm:$0xff]   ;;  %v4814_v60 = vld [vmem:[%s5239_s26 + $0x204] ss:$16 sps:$4 sm:$0xff]  }
  0x65   : > { %1453 = vmatprep.mubr.bf16.mxu0 %v4736_v61  ;;  %1742 = vmatprep.mubr.bf16.mxu1 %v4738_v62  ;;  %v4816_v61 = vld [vmem:[%s5239_s26 + $0x20c] ss:$16 sps:$4 sm:$0xff]   ;;  %v4818_v62 = vld [vmem:[%s5239_s26 + $0x200] ss:$16 sps:$4 sm:$0xff]  }
  0x66   : > { %2812 = vmatpush1.bf16.msra.mxu0 %v4798_v63  ;;  %3101 = vmatpush1.bf16.msra.mxu1 %v4799_v0  ;;  %v4819_v63 = vld [vmem:[%s5239_s26 + $0x208] ss:$16 sps:$4 sm:$0xff]   ;;  %v4820_v0 = vld [vmem:[%s5239_s26 + $0x224] ss:$16 sps:$4 sm:$0xff]  }
  0x67   : > { %2813 = vmatprep.subr.bf16.mxu0 %v5133_v1  ;;  %3102 = vmatprep.subr.bf16.mxu1 %v5133_v1 }
  0x6a   : > { %2814 = vmatpush1.bf16.msra.mxu0 %v4812_v3  ;;  %3103 = vmatpush1.bf16.msra.mxu1 %v4813_v5  ;;  %v4822_v3 = vld [vmem:[%s5239_s26 + $0x22c] ss:$16 sps:$4 sm:$0xff]   ;;  %v4825_v5 = vld [vmem:[%s5239_s26 + $0x228] ss:$16 sps:$4 sm:$0xff]  }
  0x6b   : > { %2815 = vmatprep.subr.bf16.mxu0 %v5133_v1  ;;  %3104 = vmatprep.subr.bf16.mxu1 %v5133_v1 }
  0x6c   : > { %1454 = vmatmul.mubr.bf16.gmra.mxu0 %v4740_v2  ;;  %1743 = vmatmul.mubr.bf16.gmra.mxu1 %v4741_v4  ;;  %v4925_v2 = vld [vmem:[%s5994_s1 + $0xc0] sm:$0xff]  }
  0x6d   : > { %1461 = vmatprep.mubr.bf16.mxu0 %v4744_v6  ;;  %1750 = vmatprep.mubr.bf16.mxu1 %v4746_v7  ;;  %v4824_v4 = vld [vmem:[%s5239_s26 + $0x220] ss:$16 sps:$4 sm:$0xff]   ;;  %v4828_v6 = vld [vmem:[%s5239_s26 + $0x244] ss:$16 sps:$4 sm:$0xff]   ;;  %v4830_v7 = vld [vmem:[%s5239_s26 + $0x24c] ss:$16 sps:$4 sm:$0xff]  }
  0x6e   : > { %2816 = vmatpush2.bf16.msra.mxu0 %v4826_v8  ;;  %3105 = vmatpush2.bf16.msra.mxu1 %v4827_v9  ;;  %v4832_v8 = vld [vmem:[%s5239_s26 + $0x240] ss:$16 sps:$4 sm:$0xff]   ;;  %v4833_v9 = vld [vmem:[%s5239_s26 + $0x248] ss:$16 sps:$4 sm:$0xff]  }
  0x6f   : > { %2817 = vmatprep.subr.bf16.mxu0 %v5133_v1  ;;  %3106 = vmatprep.subr.bf16.mxu1 %v5133_v1 }
  0x72   : > { %2818 = vmatpush2.bf16.msra.mxu0 %v4840_v13  ;;  %3107 = vmatpush2.bf16.msra.mxu1 %v4841_v14  ;;  %v4839_v13 = vld [vmem:[%s5239_s26 + $0x268] ss:$16 sps:$4 sm:$0xff]   ;;  %v4842_v14 = vld [vmem:[%s5239_s26 + $0x284] ss:$16 sps:$4 sm:$0xff]  }
  0x73   : > { %2819 = vmatprep.subr.bf16.mxu0 %v5133_v1  ;;  %3108 = vmatprep.subr.bf16.mxu1 %v5133_v1 }
  0x74   : > { %1462 = vmatmul.mubr.bf16.gmra.mxu0 %v4748_v10  ;;  %1751 = vmatmul.mubr.bf16.gmra.mxu1 %v4749_v11  ;;  %v4834_v10 = vld [vmem:[%s5239_s26 + $0x264] ss:$16 sps:$4 sm:$0xff]   ;;  %v4836_v11 = vld [vmem:[%s5239_s26 + $0x26c] ss:$16 sps:$4 sm:$0xff]  }
  0x75   : > { %1469 = vmatprep.mubr.bf16.mxu0 %v4750_v12  ;;  %1758 = vmatprep.mubr.bf16.mxu1 %v4752_v15  ;;  %v4838_v12 = vld [vmem:[%s5239_s26 + $0x260] ss:$16 sps:$4 sm:$0xff]   ;;  %v4844_v15 = vld [vmem:[%s5239_s26 + $0x28c] ss:$16 sps:$4 sm:$0xff]  }
  0x76   : > { %2820 = vmatpush2.bf16.msra.mxu0 %v4854_v18  ;;  %3109 = vmatpush2.bf16.msra.mxu1 %v4855_v19  ;;  %v4848_v18 = vld [vmem:[%s5239_s26 + $0x2a4] ss:$16 sps:$4 sm:$0xff]   ;;  %v4850_v19 = vld [vmem:[%s5239_s26 + $0x2ac] ss:$16 sps:$4 sm:$0xff]  }
  0x77   : > { %2821 = vmatprep.subr.bf16.mxu0 %v5133_v1  ;;  %3110 = vmatprep.subr.bf16.mxu1 %v5133_v1 }
  0x7a   : > { %2822 = vmatpush2.bf16.msra.mxu0 %v4868_v24  ;;  %3111 = vmatpush2.bf16.msra.mxu1 %v4869_v25  ;;  %v4860_v24 = vld [vmem:[%s5239_s26 + $0x2c0] ss:$16 sps:$4 sm:$0xff]   ;;  %v4861_v25 = vld [vmem:[%s5239_s26 + $0x2c8] ss:$16 sps:$4 sm:$0xff]  }
  0x7b   : > { %2823 = vmatprep.subr.bf16.mxu0 %v5133_v1  ;;  %3112 = vmatprep.subr.bf16.mxu1 %v5133_v1 }
  0x7c   : > { %1470 = vmatmul.mubr.bf16.gmra.mxu0 %v4754_v16  ;;  %1759 = vmatmul.mubr.bf16.gmra.mxu1 %v4755_v17  ;;  %v4846_v16 = vld [vmem:[%s5239_s26 + $0x280] ss:$16 sps:$4 sm:$0xff]   ;;  %v4847_v17 = vld [vmem:[%s5239_s26 + $0x288] ss:$16 sps:$4 sm:$0xff]  }
  0x7d   : > { %1477 = vmatprep.mubr.bf16.mxu0 %v4758_v20  ;;  %1766 = vmatprep.mubr.bf16.mxu1 %v4760_v21  ;;  %v4852_v20 = vld [vmem:[%s5239_s26 + $0x2a0] ss:$16 sps:$4 sm:$0xff]   ;;  %v4853_v21 = vld [vmem:[%s5239_s26 + $0x2a8] ss:$16 sps:$4 sm:$0xff]  }
  0x7e   : > { %2824 = vmatpush2.bf16.msra.mxu0 %v4882_v33  ;;  %3113 = vmatpush2.bf16.msra.mxu1 %v4883_v36  ;;  %v4875_v33 = vld [vmem:[%s5239_s26 + $0x308] ss:$16 sps:$4 sm:$0xff]   ;;  %v4880_v36 = vld [vmem:[%s5239_s26 + $0x320] ss:$16 sps:$4 sm:$0xff]  }
  0x7f   : > { %2825 = vmatprep.subr.bf16.mxu0 %v5133_v1  ;;  %3114 = vmatprep.subr.bf16.mxu1 %v5133_v1 }
  0x82   : > { %2826 = vmatpush2.bf16.msra.mxu0 %v4896_v43  ;;  %3115 = vmatpush2.bf16.msra.mxu1 %v4897_v46  ;;  %v4888_v46 = vld [vmem:[%s5239_s26 + $0x340] ss:$16 sps:$4 sm:$0xff]  }
  0x83   : > { %2827 = vmatprep.subr.bf16.mxu0 %v5133_v1  ;;  %3116 = vmatprep.subr.bf16.mxu1 %v5133_v1 }
  0x84   : > { %1478 = vmatmul.mubr.bf16.gmra.mxu0 %v4762_v22  ;;  %1767 = vmatmul.mubr.bf16.gmra.mxu1 %v4763_v23  ;;  %v4856_v22 = vld [vmem:[%s5239_s26 + $0x2c4] ss:$16 sps:$4 sm:$0xff]   ;;  %v4858_v23 = vld [vmem:[%s5239_s26 + $0x2cc] ss:$16 sps:$4 sm:$0xff]  }
  0x85   : > { %1485 = vmatprep.mubr.bf16.mxu0 %v4764_v26  ;;  %1774 = vmatprep.mubr.bf16.mxu1 %v4766_v27  ;;  %v4862_v26 = vld [vmem:[%s5239_s26 + $0x2e4] ss:$16 sps:$4 sm:$0xff]   ;;  %v4864_v27 = vld [vmem:[%s5239_s26 + $0x2ec] ss:$16 sps:$4 sm:$0xff]  }
  0x86   : > { %2828 = vmatpush2.bf16.msra.mxu0 %v4910_v53  ;;  %3117 = vmatpush2.bf16.msra.mxu1 %v4911_v56 }
  0x87   : > { %2829 = vmatprep.subr.bf16.mxu0 %v5133_v1  ;;  %3118 = vmatprep.subr.bf16.mxu1 %v5133_v1  ;;  %v4924_v1 = vld [vmem:[%s5994_s1 + $0x40] sm:$0xff]  }
  0x8a   : > { %2830 = vmatpush2.bf16.msra.mxu0 %v4924_v1  ;;  %3119 = vmatpush2.bf16.msra.mxu1 %v4925_v2  ;;  %v4898_v1 = vld [vmem:[%s5239_s26 + $0x384] ss:$16 sps:$4 sm:$0xff]   ;;  %v4900_v2 = vld [vmem:[%s5239_s26 + $0x38c] ss:$16 sps:$4 sm:$0xff]  }
  0x8c   : > { %1486 = vmatmul.mubr.bf16.gmra.mxu0 %v4768_v28  ;;  %1775 = vmatmul.mubr.bf16.gmra.mxu1 %v4769_v29  ;;  %v4866_v28 = vld [vmem:[%s5239_s26 + $0x2e0] ss:$16 sps:$4 sm:$0xff]   ;;  %v4867_v29 = vld [vmem:[%s5239_s26 + $0x2e8] ss:$16 sps:$4 sm:$0xff]  }
  0x8d   : > { %1493 = vmatprep.mubr.bf16.mxu0 %v4772_v30  ;;  %1782 = vmatprep.mubr.bf16.mxu1 %v4774_v31  ;;  %v4870_v30 = vld [vmem:[%s5239_s26 + $0x304] ss:$16 sps:$4 sm:$0xff]   ;;  %v4872_v31 = vld [vmem:[%s5239_s26 + $0x30c] ss:$16 sps:$4 sm:$0xff]  }
  0x94   : > { %1494 = vmatmul.mubr.bf16.gmra.mxu0 %v4776_v32  ;;  %1783 = vmatmul.mubr.bf16.gmra.mxu1 %v4777_v34  ;;  %v4874_v32 = vld [vmem:[%s5239_s26 + $0x300] ss:$16 sps:$4 sm:$0xff]   ;;  %v4876_v34 = vld [vmem:[%s5239_s26 + $0x324] ss:$16 sps:$4 sm:$0xff]  }
  0x95   : > { %1501 = vmatprep.mubr.bf16.mxu0 %v4778_v35  ;;  %1790 = vmatprep.mubr.bf16.mxu1 %v4780_v37  ;;  %v4878_v35 = vld [vmem:[%s5239_s26 + $0x32c] ss:$16 sps:$4 sm:$0xff]   ;;  %v4881_v37 = vld [vmem:[%s5239_s26 + $0x328] ss:$16 sps:$4 sm:$0xff]  }
  0x9c   : > { %1502 = vmatmul.mubr.bf16.gmra.mxu0 %v4782_v38  ;;  %1791 = vmatmul.mubr.bf16.gmra.mxu1 %v4783_v39  ;;  %v4884_v38 = vld [vmem:[%s5239_s26 + $0x344] ss:$16 sps:$4 sm:$0xff]   ;;  %v4886_v39 = vld [vmem:[%s5239_s26 + $0x34c] ss:$16 sps:$4 sm:$0xff]  }
  0x9d   : > { %1509 = vmatprep.mubr.bf16.mxu0 %v4786_v40  ;;  %1798 = vmatprep.mubr.bf16.mxu1 %v4788_v41 }
  0xa4   : > { %1510 = vmatmul.mubr.bf16.gmra.mxu0 %v4790_v42  ;;  %1799 = vmatmul.mubr.bf16.gmra.mxu1 %v4791_v44 }
  0xa5   : > { %1517 = vmatprep.mubr.bf16.mxu0 %v4792_v45  ;;  %1806 = vmatprep.mubr.bf16.mxu1 %v4794_v47 }
  0xac   : > { %1518 = vmatmul.mubr.bf16.gmra.mxu0 %v4796_v48  ;;  %1807 = vmatmul.mubr.bf16.gmra.mxu1 %v4797_v49  ;;  %v4889_v48 = vld [vmem:[%s5239_s26 + $0x348] ss:$16 sps:$4 sm:$0xff]   ;;  %v4890_v49 = vld [vmem:[%s5239_s26 + $0x364] ss:$16 sps:$4 sm:$0xff]  }
  0xad   : > { %1525 = vmatprep.mubr.bf16.mxu0 %v4800_v50  ;;  %1814 = vmatprep.mubr.bf16.mxu1 %v4802_v51 }
  0xb4   : > { %1526 = vmatmul.mubr.bf16.gmra.mxu0 %v4804_v52  ;;  %1815 = vmatmul.mubr.bf16.gmra.mxu1 %v4805_v54  ;;  %v4892_v52 = vld [vmem:[%s5239_s26 + $0x36c] ss:$16 sps:$4 sm:$0xff]  }
  0xb5   : > { %1533 = vmatprep.mubr.bf16.mxu0 %v4806_v55  ;;  %1822 = vmatprep.mubr.bf16.mxu1 %v4808_v57 }
  0xbc   : > { %1534 = vmatmul.mubr.bf16.gmra.mxu0 %v4810_v58  ;;  %1823 = vmatmul.mubr.bf16.gmra.mxu1 %v4811_v59 }
  0xbd   : > { %1541 = vmatprep.mubr.bf16.mxu0 %v4814_v60  ;;  %1830 = vmatprep.mubr.bf16.mxu1 %v4816_v61  ;;  %v4894_v60 = vld [vmem:[%s5239_s26 + $0x360] ss:$16 sps:$4 sm:$0xff]  }
  0xc4   : > { %1542 = vmatmul.mubr.bf16.gmra.mxu0 %v4818_v62  ;;  %1831 = vmatmul.mubr.bf16.gmra.mxu1 %v4819_v63  ;;  %v4895_v62 = vld [vmem:[%s5239_s26 + $0x368] ss:$16 sps:$4 sm:$0xff]  }
  0xc5   : > { %1549 = vmatprep.mubr.bf16.mxu0 %v4820_v0  ;;  %1838 = vmatprep.mubr.bf16.mxu1 %v4822_v3 }
  0xcc   : > { %1550 = vmatmul.mubr.bf16.gmra.mxu0 %v4824_v4  ;;  %1839 = vmatmul.mubr.bf16.gmra.mxu1 %v4825_v5 }
  0xcd   : > { %1557 = vmatprep.mubr.bf16.mxu0 %v4828_v6  ;;  %1846 = vmatprep.mubr.bf16.mxu1 %v4830_v7 }
  0xd4   : > { %1558 = vmatmul.mubr.bf16.gmra.mxu0 %v4832_v8  ;;  %1847 = vmatmul.mubr.bf16.gmra.mxu1 %v4833_v9 }
  0xd5   : > { %1565 = vmatprep.mubr.bf16.mxu0 %v4834_v10  ;;  %1854 = vmatprep.mubr.bf16.mxu1 %v4836_v11  ;;  %v4902_v10 = vld [vmem:[%s5239_s26 + $0x380] ss:$16 sps:$4 sm:$0xff]  }
  0xdc   : > { %1566 = vmatmul.mubr.bf16.gmra.mxu0 %v4838_v12  ;;  %1855 = vmatmul.mubr.bf16.gmra.mxu1 %v4839_v13  ;;  %v4903_v12 = vld [vmem:[%s5239_s26 + $0x388] ss:$16 sps:$4 sm:$0xff]   ;;  %v4906_v13 = vld [vmem:[%s5239_s26 + $0x3a4] ss:$16 sps:$4 sm:$0xff]  }
  0xdd   : > { %1573 = vmatprep.mubr.bf16.mxu0 %v4842_v14  ;;  %1862 = vmatprep.mubr.bf16.mxu1 %v4844_v15 }
  0xe4   : > { %1574 = vmatmul.mubr.bf16.gmra.mxu0 %v4846_v16  ;;  %1863 = vmatmul.mubr.bf16.gmra.mxu1 %v4847_v17  ;;  %v4909_v16 = vld [vmem:[%s5239_s26 + $0x3ac] ss:$16 sps:$4 sm:$0xff]  }
  0xe5   : > { %1581 = vmatprep.mubr.bf16.mxu0 %v4848_v18  ;;  %1870 = vmatprep.mubr.bf16.mxu1 %v4850_v19 }
  0xec   : > { %1582 = vmatmul.mubr.bf16.gmra.mxu0 %v4852_v20  ;;  %1871 = vmatmul.mubr.bf16.gmra.mxu1 %v4853_v21 }
  0xed   : > { %1589 = vmatprep.mubr.bf16.mxu0 %v4856_v22  ;;  %1878 = vmatprep.mubr.bf16.mxu1 %v4858_v23 }
  0xf4   : > { %1590 = vmatmul.mubr.bf16.gmra.mxu0 %v4860_v24  ;;  %1879 = vmatmul.mubr.bf16.gmra.mxu1 %v4861_v25  ;;  %v4904_v24 = vld [vmem:[%s5239_s26 + $0x3a0] ss:$16 sps:$4 sm:$0xff]  }
  0xf5   : > { %1597 = vmatprep.mubr.bf16.mxu0 %v4862_v26  ;;  %1886 = vmatprep.mubr.bf16.mxu1 %v4864_v27  ;;  %v4907_v26 = vld [vmem:[%s5239_s26 + $0x3a8] ss:$16 sps:$4 sm:$0xff]   ;;  %v4914_v27 = vld [vmem:[%s5239_s26 + $0x3c4] ss:$16 sps:$4 sm:$0xff]  }
  0xfc   : > { %1598 = vmatmul.mubr.bf16.gmra.mxu0 %v4866_v28  ;;  %1887 = vmatmul.mubr.bf16.gmra.mxu1 %v4867_v29 }
  0xfd   : > { %1605 = vmatprep.mubr.bf16.mxu0 %v4870_v30  ;;  %1894 = vmatprep.mubr.bf16.mxu1 %v4872_v31  ;;  %v4917_v30 = vld [vmem:[%s5239_s26 + $0x3cc] ss:$16 sps:$4 sm:$0xff]  }
 0x104   : > { %1606 = vmatmul.mubr.bf16.gmra.mxu0 %v4874_v32  ;;  %1895 = vmatmul.mubr.bf16.gmra.mxu1 %v4875_v33 }
 0x105   : > { %1613 = vmatprep.mubr.bf16.mxu0 %v4876_v34  ;;  %1902 = vmatprep.mubr.bf16.mxu1 %v4878_v35 }
 0x10c   : > { %v1423_v40 = vpop.f32.mrf.mxu0  ;;  %1614 = vmatmul.mubr.bf16.gmra.mxu0 %v4880_v36  ;;  %v1712_v41 = vpop.f32.mrf.mxu1  ;;  %1903 = vmatmul.mubr.bf16.gmra.mxu1 %v4881_v37 }
 0x10d   : > { %1621 = vmatprep.mubr.bf16.mxu0 %v4884_v38  ;;  %v5532_v42 = vadd.f32 %v1712_v41, %v1423_v40  ;;  %1910 = vmatprep.mubr.bf16.mxu1 %v4886_v39  ;;  %v4912_v38 = vld [vmem:[%s5239_s26 + $0x3c0] ss:$16 sps:$4 sm:$0xff]   ;;  %v4915_v40 = vld [vmem:[%s5239_s26 + $0x3c8] ss:$16 sps:$4 sm:$0xff]   ;;  %v4920_v41 = vld [vmem:[%s5239_s26 + $0x3e4] ss:$16 sps:$4 sm:$0xff]  }
 0x10e   : > { %v1425_v43 = vpop.f32.mrf.mxu0  ;;  %v1714_v44 = vpop.f32.mrf.mxu1 }
 0x110   : > { %v1426_v45 = vpop.f32.mrf.mxu0  ;;  %v1715_v47 = vpop.f32.mrf.mxu1 }
 0x111   : > { %v5537_v50 = vadd.f32 %v1715_v47, %v1426_v45  ;;  %v4923_v45 = vld [vmem:[%s5239_s26 + $0x3ec] ss:$16 sps:$4 sm:$0xff]  }
 0x112   : > { %v1428_v51 = vpop.f32.mrf.mxu0  ;;  %v1717_v53 = vpop.f32.mrf.mxu1 }
 0x114   : > { %v1431_v54 = vpop.f32.mrf.mxu0  ;;  %1622 = vmatmul.mubr.bf16.gmra.mxu0 %v4888_v46  ;;  %v1720_v55 = vpop.f32.mrf.mxu1  ;;  %1911 = vmatmul.mubr.bf16.gmra.mxu1 %v4889_v48 }
 0x115   : > { %1629 = vmatprep.mubr.bf16.mxu0 %v4890_v49  ;;  %v5540_v56 = vadd.f32 %v1720_v55, %v1431_v54  ;;  %1918 = vmatprep.mubr.bf16.mxu1 %v4892_v52  ;;  %v4918_v54 = vld [vmem:[%s5239_s26 + $0x3e0] ss:$16 sps:$4 sm:$0xff]  }
 0x116   : > { %v1433_v57 = vpop.f32.mrf.mxu0  ;;  %v1722_v58 = vpop.f32.mrf.mxu1 }
 0x117   : > { %v4921_v57 = vld [vmem:[%s5239_s26 + $0x3e8] ss:$16 sps:$4 sm:$0xff]   ;;  %v4928_v58 = vld [vmem:[%s5239_s26 + $0x404] ss:$16 sps:$4 sm:$0xff]  }
 0x118   : > { %v1434_v59 = vpop.f32.mrf.mxu0  ;;  %v1723_v61 = vpop.f32.mrf.mxu1 }
 0x119   : > { %v5545_v63 = vadd.f32 %v1723_v61, %v1434_v59  ;;  %v4931_v61 = vld [vmem:[%s5239_s26 + $0x40c] ss:$16 sps:$4 sm:$0xff]  }
 0x11a   : > { %v1436_v0 = vpop.f32.mrf.mxu0  ;;  %v1725_v3 = vpop.f32.mrf.mxu1 }
 0x11c   : > { %v1439_v4 = vpop.f32.mrf.mxu0  ;;  %1630 = vmatmul.mubr.bf16.gmra.mxu0 %v4894_v60  ;;  %v1728_v5 = vpop.f32.mrf.mxu1  ;;  %1919 = vmatmul.mubr.bf16.gmra.mxu1 %v4895_v62 }
 0x11d   : > { %1637 = vmatprep.mubr.bf16.mxu0 %v4898_v1  ;;  %v5548_v6 = vadd.f32 %v1728_v5, %v1439_v4  ;;  %1926 = vmatprep.mubr.bf16.mxu1 %v4900_v2 }
 0x11e   : > { %v1441_v7 = vpop.f32.mrf.mxu0  ;;  %v1730_v8 = vpop.f32.mrf.mxu1 }
 0x11f   : > { %v4926_v7 = vld [vmem:[%s5239_s26 + $0x400] ss:$16 sps:$4 sm:$0xff]  }
 0x120   : > { %v1442_v9 = vpop.f32.mrf.mxu0  ;;  %v1731_v11 = vpop.f32.mrf.mxu1 }
 0x121   : > { %v5553_v14 = vadd.f32 %v1731_v11, %v1442_v9  ;;  %v4929_v9 = vld [vmem:[%s5239_s26 + $0x408] ss:$16 sps:$4 sm:$0xff]  }
 0x122   : > { %v1444_v15 = vpop.f32.mrf.mxu0  ;;  %v1733_v17 = vpop.f32.mrf.mxu1 }
 0x124   : > { %v1447_v18 = vpop.f32.mrf.mxu0  ;;  %1638 = vmatmul.mubr.bf16.gmra.mxu0 %v4902_v10  ;;  %v1736_v19 = vpop.f32.mrf.mxu1  ;;  %1927 = vmatmul.mubr.bf16.gmra.mxu1 %v4903_v12  ;;  %v4934_v10 = vld [vmem:[%s5239_s26 + $0x4] ss:$16 sps:$4 sm:$0xff]  }
 0x125   : > { %1645 = vmatprep.mubr.bf16.mxu0 %v4906_v13  ;;  %v5556_v20 = vadd.f32 %v1736_v19, %v1447_v18  ;;  %1934 = vmatprep.mubr.bf16.mxu1 %v4909_v16  ;;  %v4937_v13 = vld [vmem:[%s5239_s26 + $0xc] ss:$16 sps:$4 sm:$0xff]  }
 0x126   : > { %v1449_v21 = vpop.f32.mrf.mxu0  ;;  %v1738_v22 = vpop.f32.mrf.mxu1 }
 0x128   : > { %v1450_v23 = vpop.f32.mrf.mxu0  ;;  %v1739_v25 = vpop.f32.mrf.mxu1 }
 0x129   : > { %v5561_v28 = vadd.f32 %v1739_v25, %v1450_v23  ;;  %v4932_v23 = vld [vmem:[%s5239_s26] ss:$16 sps:$4 sm:$0xff]   ;;  %v4935_v25 = vld [vmem:[%s5239_s26 + $0x8] ss:$16 sps:$4 sm:$0xff]  }
 0x12a   : > { %v1452_v29 = vpop.f32.mrf.mxu0  ;;  %v1741_v31 = vpop.f32.mrf.mxu1 }
 0x12c   : > { %v1455_v32 = vpop.f32.mrf.mxu0  ;;  %1646 = vmatmul.mubr.bf16.gmra.mxu0 %v4904_v24  ;;  %v1744_v33 = vpop.f32.mrf.mxu1  ;;  %1935 = vmatmul.mubr.bf16.gmra.mxu1 %v4907_v26  ;;  %v4940_v26 = vld [vmem:[%s5239_s26 + $0x24] ss:$16 sps:$4 sm:$0xff]  }
 0x12d   : > { %1653 = vmatprep.mubr.bf16.mxu0 %v4914_v27  ;;  %v5564_v34 = vadd.f32 %v1744_v33, %v1455_v32  ;;  %1942 = vmatprep.mubr.bf16.mxu1 %v4917_v30  ;;  %v4943_v30 = vld [vmem:[%s5239_s26 + $0x2c] ss:$16 sps:$4 sm:$0xff]  }
 0x12e   : > { %v1457_v35 = vpop.f32.mrf.mxu0  ;;  %v1746_v36 = vpop.f32.mrf.mxu1 }
 0x130   : > { %v1458_v37 = vpop.f32.mrf.mxu0  ;;  %v1747_v39 = vpop.f32.mrf.mxu1 }
 0x131   : > { %v5569_v43 = vadd.f32 %v1747_v39, %v1458_v37  ;;  %v4938_v39 = vld [vmem:[%s5239_s26 + $0x20] ss:$16 sps:$4 sm:$0xff]  }
 0x132   : > { %v1460_v44 = vpop.f32.mrf.mxu0  ;;  %v1749_v46 = vpop.f32.mrf.mxu1 }
 0x133   : > { %v4946_v44 = vld [vmem:[%s5239_s26 + $0x44] ss:$16 sps:$4 sm:$0xff]  }
 0x134   : > { %v1463_v47 = vpop.f32.mrf.mxu0  ;;  %1654 = vmatmul.mubr.bf16.gmra.mxu0 %v4912_v38  ;;  %v1752_v48 = vpop.f32.mrf.mxu1  ;;  %1943 = vmatmul.mubr.bf16.gmra.mxu1 %v4915_v40 }
 0x135   : > { %1661 = vmatprep.mubr.bf16.mxu0 %v4920_v41  ;;  %v5572_v49 = vadd.f32 %v1752_v48, %v1463_v47  ;;  %1950 = vmatprep.mubr.bf16.mxu1 %v4923_v45  ;;  %v4941_v41 = vld [vmem:[%s5239_s26 + $0x28] ss:$16 sps:$4 sm:$0xff]   ;;  %v4949_v47 = vld [vmem:[%s5239_s26 + $0x4c] ss:$16 sps:$4 sm:$0xff]  }
 0x136   : > { %v1465_v51 = vpop.f32.mrf.mxu0  ;;  %v1754_v52 = vpop.f32.mrf.mxu1 }
 0x138   : > { %v1466_v53 = vpop.f32.mrf.mxu0  ;;  %v1755_v55 = vpop.f32.mrf.mxu1 }
 0x139   : > { %v5577_v59 = vadd.f32 %v1755_v55, %v1466_v53 }
 0x13a   : > { %v1468_v60 = vpop.f32.mrf.mxu0  ;;  %v1757_v62 = vpop.f32.mrf.mxu1 }
 0x13b   : > { %v4952_v62 = vld [vmem:[%s5239_s26 + $0x64] ss:$16 sps:$4 sm:$0xff]  }
 0x13c   : > { %v1471_v1 = vpop.f32.mrf.mxu0  ;;  %1662 = vmatmul.mubr.bf16.gmra.mxu0 %v4918_v54  ;;  %v1760_v0 = vpop.f32.mrf.mxu1  ;;  %1951 = vmatmul.mubr.bf16.gmra.mxu1 %v4921_v57 }
 0x13d   : > { %1669 = vmatprep.mubr.bf16.mxu0 %v4928_v58  ;;  %v5580_v2 = vadd.f32 %v1760_v0, %v1471_v1  ;;  %1958 = vmatprep.mubr.bf16.mxu1 %v4931_v61  ;;  %v4944_v58 = vld [vmem:[%s5239_s26 + $0x40] ss:$16 sps:$4 sm:$0xff]   ;;  %v4947_v61 = vld [vmem:[%s5239_s26 + $0x48] ss:$16 sps:$4 sm:$0xff]  }
 0x13e   : > { %v1473_v3 = vpop.f32.mrf.mxu0  ;;  %v1762_v4 = vpop.f32.mrf.mxu1 }
 0x13f   : > { %v4955_v3 = vld [vmem:[%s5239_s26 + $0x6c] ss:$16 sps:$4 sm:$0xff]  }
 0x140   : > { %v1474_v5 = vpop.f32.mrf.mxu0  ;;  %v1763_v8 = vpop.f32.mrf.mxu1 }
 0x141   : > { %v5585_v11 = vadd.f32 %v1763_v8, %v1474_v5 }
 0x142   : > { %v1476_v12 = vpop.f32.mrf.mxu0  ;;  %v1765_v15 = vpop.f32.mrf.mxu1 }
 0x144   : > { %v1479_v16 = vpop.f32.mrf.mxu0  ;;  %1670 = vmatmul.mubr.bf16.gmra.mxu0 %v4926_v7  ;;  %v1768_v17 = vpop.f32.mrf.mxu1  ;;  %1959 = vmatmul.mubr.bf16.gmra.mxu1 %v4929_v9 }
 0x145   : > { %2831 = vmatprep.mubr.bf16.mxu0 %v4934_v10  ;;  %v5588_v18 = vadd.f32 %v1768_v17, %v1479_v16  ;;  %3120 = vmatprep.mubr.bf16.mxu1 %v4937_v13  ;;  %v4950_v13 = vld [vmem:[%s5239_s26 + $0x60] ss:$16 sps:$4 sm:$0xff]   ;;  %v4953_v16 = vld [vmem:[%s5239_s26 + $0x68] ss:$16 sps:$4 sm:$0xff]   ;;  %v4958_v17 = vld [vmem:[%s5239_s26 + $0x84] ss:$16 sps:$4 sm:$0xff]  }
 0x146   : > { %v1481_v19 = vpop.f32.mrf.mxu0  ;;  %v1770_v21 = vpop.f32.mrf.mxu1 }
 0x148   : > { %v1482_v22 = vpop.f32.mrf.mxu0  ;;  %v1771_v24 = vpop.f32.mrf.mxu1 }
 0x149   : > { %v5593_v27 = vadd.f32 %v1771_v24, %v1482_v22  ;;  %v4961_v22 = vld [vmem:[%s5239_s26 + $0x8c] ss:$16 sps:$4 sm:$0xff]  }
 0x14a   : > { %v1484_v29 = vpop.f32.mrf.mxu0  ;;  %v1773_v31 = vpop.f32.mrf.mxu1 }
 0x14c   : > { %v1487_v32 = vpop.f32.mrf.mxu0  ;;  %2832 = vmatmul.mubr.bf16.vlgmr.msra.gmra.mxu0 %v4932_v23  ;;  %v1776_v33 = vpop.f32.mrf.mxu1  ;;  %3121 = vmatmul.mubr.bf16.vlgmr.msra.gmra.mxu1 %v4935_v25 }
 0x14d   : > { %2839 = vmatprep.mubr.bf16.mxu0 %v4940_v26  ;;  %v5596_v35 = vadd.f32 %v1776_v33, %v1487_v32  ;;  %3128 = vmatprep.mubr.bf16.mxu1 %v4943_v30  ;;  %v4956_v32 = vld [vmem:[%s5239_s26 + $0x80] ss:$16 sps:$4 sm:$0xff]  }
 0x14e   : > { %v1489_v36 = vpop.f32.mrf.mxu0  ;;  %v1778_v37 = vpop.f32.mrf.mxu1 }
 0x14f   : > { %v4959_v36 = vld [vmem:[%s5239_s26 + $0x88] ss:$16 sps:$4 sm:$0xff]   ;;  %v4964_v37 = vld [vmem:[%s5239_s26 + $0xa4] ss:$16 sps:$4 sm:$0xff]  }
 0x150   : > { %v1490_v38 = vpop.f32.mrf.mxu0  ;;  %v1779_v40 = vpop.f32.mrf.mxu1 }
 0x151   : > { %v5601_v45 = vadd.f32 %v1779_v40, %v1490_v38  ;;  %v4967_v40 = vld [vmem:[%s5239_s26 + $0xac] ss:$16 sps:$4 sm:$0xff]  }
 0x152   : > { %v1492_v46 = vpop.f32.mrf.mxu0  ;;  %v1781_v48 = vpop.f32.mrf.mxu1 }
 0x154   : > { %v1495_v51 = vpop.f32.mrf.mxu0  ;;  %2840 = vmatmul.mubr.bf16.gmra.mxu0 %v4938_v39  ;;  %v1784_v52 = vpop.f32.mrf.mxu1  ;;  %3129 = vmatmul.mubr.bf16.gmra.mxu1 %v4941_v41 }
 0x155   : > { %2847 = vmatprep.mubr.bf16.mxu0 %v4946_v44  ;;  %v5604_v53 = vadd.f32 %v1784_v52, %v1495_v51  ;;  %3136 = vmatprep.mubr.bf16.mxu1 %v4949_v47 }
 0x156   : > { %v1497_v54 = vpop.f32.mrf.mxu0  ;;  %v1786_v55 = vpop.f32.mrf.mxu1 }
 0x157   : > { %v4962_v54 = vld [vmem:[%s5239_s26 + $0xa0] ss:$16 sps:$4 sm:$0xff]  }
 0x158   : > { %v1498_v57 = vpop.f32.mrf.mxu0  ;;  %v1787_v60 = vpop.f32.mrf.mxu1 }
 0x159   : > { %v5609_v1 = vadd.f32 %v1787_v60, %v1498_v57  ;;  %v4965_v57 = vld [vmem:[%s5239_s26 + $0xa8] ss:$16 sps:$4 sm:$0xff]  }
 0x15a   : > { %v1500_v0 = vpop.f32.mrf.mxu0  ;;  %v1789_v4 = vpop.f32.mrf.mxu1 }
 0x15c   : > { %v1503_v5 = vpop.f32.mrf.mxu0  ;;  %2848 = vmatmul.mubr.bf16.gmra.mxu0 %v4944_v58  ;;  %v1792_v7 = vpop.f32.mrf.mxu1  ;;  %3137 = vmatmul.mubr.bf16.gmra.mxu1 %v4947_v61  ;;  %v4970_v58 = vld [vmem:[%s5239_s26 + $0xc4] ss:$16 sps:$4 sm:$0xff]  }
 0x15d   : > { %2855 = vmatprep.mubr.bf16.mxu0 %v4952_v62  ;;  %v5612_v8 = vadd.f32 %v1792_v7, %v1503_v5  ;;  %3144 = vmatprep.mubr.bf16.mxu1 %v4955_v3  ;;  %v4973_v62 = vld [vmem:[%s5239_s26 + $0xcc] ss:$16 sps:$4 sm:$0xff]  }
 0x15e   : > { %v1505_v9 = vpop.f32.mrf.mxu0  ;;  %v1794_v10 = vpop.f32.mrf.mxu1 }
 0x160   : > { %v1506_v12 = vpop.f32.mrf.mxu0  ;;  %v1795_v15 = vpop.f32.mrf.mxu1 }
 0x161   : > { %v5617_v19 = vadd.f32 %v1795_v15, %v1506_v12  ;;  %v4968_v12 = vld [vmem:[%s5239_s26 + $0xc0] ss:$16 sps:$4 sm:$0xff]   ;;  %v4971_v15 = vld [vmem:[%s5239_s26 + $0xc8] ss:$16 sps:$4 sm:$0xff]  }
 0x162   : > { %v1508_v21 = vpop.f32.mrf.mxu0  ;;  %v1797_v23 = vpop.f32.mrf.mxu1 }
 0x164   : > { %v1511_v24 = vpop.f32.mrf.mxu0  ;;  %2856 = vmatmul.mubr.bf16.gmra.mxu0 %v4950_v13  ;;  %v1800_v25 = vpop.f32.mrf.mxu1  ;;  %3145 = vmatmul.mubr.bf16.gmra.mxu1 %v4953_v16  ;;  %v4976_v16 = vld [vmem:[%s5239_s26 + $0xe4] ss:$16 sps:$4 sm:$0xff]  }
 0x165   : > { %2863 = vmatprep.mubr.bf16.mxu0 %v4958_v17  ;;  %v5620_v26 = vadd.f32 %v1800_v25, %v1511_v24  ;;  %3152 = vmatprep.mubr.bf16.mxu1 %v4961_v22  ;;  %v4979_v22 = vld [vmem:[%s5239_s26 + $0xec] ss:$16 sps:$4 sm:$0xff]  }
 0x166   : > { %v1513_v29 = vpop.f32.mrf.mxu0  ;;  %v1802_v30 = vpop.f32.mrf.mxu1 }
 0x168   : > { %v1514_v31 = vpop.f32.mrf.mxu0  ;;  %v1803_v33 = vpop.f32.mrf.mxu1 }
 0x169   : > { %v5625_v38 = vadd.f32 %v1803_v33, %v1514_v31  ;;  %v4974_v33 = vld [vmem:[%s5239_s26 + $0xe0] ss:$16 sps:$4 sm:$0xff]  }
 0x16a   : > { %v1516_v39 = vpop.f32.mrf.mxu0  ;;  %v1805_v41 = vpop.f32.mrf.mxu1 }
 0x16b   : > { %v4982_v39 = vld [vmem:[%s5239_s26 + $0x104] ss:$16 sps:$4 sm:$0xff]  }
 0x16c   : > { %v1519_v44 = vpop.f32.mrf.mxu0  ;;  %2864 = vmatmul.mubr.bf16.gmra.mxu0 %v4956_v32  ;;  %v1808_v46 = vpop.f32.mrf.mxu1  ;;  %3153 = vmatmul.mubr.bf16.gmra.mxu1 %v4959_v36 }
 0x16d   : > { %2871 = vmatprep.mubr.bf16.mxu0 %v4964_v37  ;;  %v5628_v47 = vadd.f32 %v1808_v46, %v1519_v44  ;;  %3160 = vmatprep.mubr.bf16.mxu1 %v4967_v40  ;;  %v4977_v37 = vld [vmem:[%s5239_s26 + $0xe8] ss:$16 sps:$4 sm:$0xff]   ;;  %v4985_v44 = vld [vmem:[%s5239_s26 + $0x10c] ss:$16 sps:$4 sm:$0xff]  }
 0x16e   : > { %v1521_v48 = vpop.f32.mrf.mxu0  ;;  %v1810_v51 = vpop.f32.mrf.mxu1 }
 0x170   : > { %v1522_v52 = vpop.f32.mrf.mxu0  ;;  %v1811_v55 = vpop.f32.mrf.mxu1 }
 0x171   : > { %v5633_v60 = vadd.f32 %v1811_v55, %v1522_v52 }
 0x172   : > { %v1524_v61 = vpop.f32.mrf.mxu0  ;;  %v1813_v0 = vpop.f32.mrf.mxu1 }
 0x173   : > { %v4988_v0 = vld [vmem:[%s5239_s26 + $0x124] ss:$16 sps:$4 sm:$0xff]  }
 0x174   : > { %v1527_v3 = vpop.f32.mrf.mxu0  ;;  %2872 = vmatmul.mubr.bf16.gmra.mxu0 %v4962_v54  ;;  %v1816_v4 = vpop.f32.mrf.mxu1  ;;  %3161 = vmatmul.mubr.bf16.gmra.mxu1 %v4965_v57 }
 0x175   : > { %2879 = vmatprep.mubr.bf16.mxu0 %v4970_v58  ;;  %v5636_v5 = vadd.f32 %v1816_v4, %v1527_v3  ;;  %3168 = vmatprep.mubr.bf16.mxu1 %v4973_v62  ;;  %v4980_v58 = vld [vmem:[%s5239_s26 + $0x100] ss:$16 sps:$4 sm:$0xff]   ;;  %v4983_v62 = vld [vmem:[%s5239_s26 + $0x108] ss:$16 sps:$4 sm:$0xff]  }
 0x176   : > { %v1529_v7 = vpop.f32.mrf.mxu0  ;;  %v1818_v9 = vpop.f32.mrf.mxu1 }
 0x177   : > { %v4991_v7 = vld [vmem:[%s5239_s26 + $0x12c] ss:$16 sps:$4 sm:$0xff]  }
 0x178   : > { %v1530_v10 = vpop.f32.mrf.mxu0  ;;  %v1819_v13 = vpop.f32.mrf.mxu1 }
 0x179   : > { %v5641_v17 = vadd.f32 %v1819_v13, %v1530_v10 }
 0x17a   : > { %v1532_v21 = vpop.f32.mrf.mxu0  ;;  %v1821_v23 = vpop.f32.mrf.mxu1 }
 0x17c   : > { %v1535_v24 = vpop.f32.mrf.mxu0  ;;  %2880 = vmatmul.mubr.bf16.gmra.mxu0 %v4968_v12  ;;  %v1824_v25 = vpop.f32.mrf.mxu1  ;;  %3169 = vmatmul.mubr.bf16.gmra.mxu1 %v4971_v15 }
 0x17d   : > { %2887 = vmatprep.mubr.bf16.mxu0 %v4976_v16  ;;  %v5644_v29 = vadd.f32 %v1824_v25, %v1535_v24  ;;  %3176 = vmatprep.mubr.bf16.mxu1 %v4979_v22  ;;  %v4986_v22 = vld [vmem:[%s5239_s26 + $0x120] ss:$16 sps:$4 sm:$0xff]   ;;  %v4989_v24 = vld [vmem:[%s5239_s26 + $0x128] ss:$16 sps:$4 sm:$0xff]   ;;  %v4994_v25 = vld [vmem:[%s5239_s26 + $0x144] ss:$16 sps:$4 sm:$0xff]  }
 0x17e   : > { %v1537_v30 = vpop.f32.mrf.mxu0  ;;  %v1826_v31 = vpop.f32.mrf.mxu1 }
 0x180   : > { %v1538_v32 = vpop.f32.mrf.mxu0  ;;  %v1827_v36 = vpop.f32.mrf.mxu1 }
 0x181   : > { %v5649_v40 = vadd.f32 %v1827_v36, %v1538_v32  ;;  %v4997_v32 = vld [vmem:[%s5239_s26 + $0x14c] ss:$16 sps:$4 sm:$0xff]  }
 0x182   : > { %v1540_v41 = vpop.f32.mrf.mxu0  ;;  %v1829_v46 = vpop.f32.mrf.mxu1 }
 0x184   : > { %v1543_v48 = vpop.f32.mrf.mxu0  ;;  %2888 = vmatmul.mubr.bf16.gmra.mxu0 %v4974_v33  ;;  %v1832_v51 = vpop.f32.mrf.mxu1  ;;  %3177 = vmatmul.mubr.bf16.gmra.mxu1 %v4977_v37 }
 0x185   : > { %2895 = vmatprep.mubr.bf16.mxu0 %v4982_v39  ;;  %v5652_v52 = vadd.f32 %v1832_v51, %v1543_v48  ;;  %3184 = vmatprep.mubr.bf16.mxu1 %v4985_v44  ;;  %v4992_v48 = vld [vmem:[%s5239_s26 + $0x140] ss:$16 sps:$4 sm:$0xff]  }
 0x186   : > { %v1545_v54 = vpop.f32.mrf.mxu0  ;;  %v1834_v55 = vpop.f32.mrf.mxu1 }
 0x187   : > { %v4995_v54 = vld [vmem:[%s5239_s26 + $0x148] ss:$16 sps:$4 sm:$0xff]   ;;  %v5000_v55 = vld [vmem:[%s5239_s26 + $0x164] ss:$16 sps:$4 sm:$0xff]  }
 0x188   : > { %v1546_v57 = vpop.f32.mrf.mxu0  ;;  %v1835_v61 = vpop.f32.mrf.mxu1 }
 0x189   : > { %v5657_v3 = vadd.f32 %v1835_v61, %v1546_v57  ;;  %v5003_v61 = vld [vmem:[%s5239_s26 + $0x16c] ss:$16 sps:$4 sm:$0xff]  }
 0x18a   : > { %v1548_v4 = vpop.f32.mrf.mxu0  ;;  %v1837_v9 = vpop.f32.mrf.mxu1 }
 0x18c   : > { %v1551_v10 = vpop.f32.mrf.mxu0  ;;  %2896 = vmatmul.mubr.bf16.gmra.mxu0 %v4980_v58  ;;  %v1840_v12 = vpop.f32.mrf.mxu1  ;;  %3185 = vmatmul.mubr.bf16.gmra.mxu1 %v4983_v62 }
 0x18d   : > { %2903 = vmatprep.mubr.bf16.mxu0 %v4988_v0  ;;  %v5660_v13 = vadd.f32 %v1840_v12, %v1551_v10  ;;  %3192 = vmatprep.mubr.bf16.mxu1 %v4991_v7 }
 0x18e   : > { %v1553_v15 = vpop.f32.mrf.mxu0  ;;  %v1842_v16 = vpop.f32.mrf.mxu1 }
 0x18f   : > { %v4998_v15 = vld [vmem:[%s5239_s26 + $0x160] ss:$16 sps:$4 sm:$0xff]  }
 0x190   : > { %v1554_v21 = vpop.f32.mrf.mxu0  ;;  %v1843_v23 = vpop.f32.mrf.mxu1 }
 0x191   : > { %v5665_v30 = vadd.f32 %v1843_v23, %v1554_v21  ;;  %v5001_v21 = vld [vmem:[%s5239_s26 + $0x168] ss:$16 sps:$4 sm:$0xff]  }
 0x192   : > { %v1556_v31 = vpop.f32.mrf.mxu0  ;;  %v1845_v33 = vpop.f32.mrf.mxu1 }
 0x194   : > { %v1559_v36 = vpop.f32.mrf.mxu0  ;;  %2904 = vmatmul.mubr.bf16.gmra.mxu0 %v4986_v22  ;;  %v1848_v37 = vpop.f32.mrf.mxu1  ;;  %3193 = vmatmul.mubr.bf16.gmra.mxu1 %v4989_v24  ;;  %v5006_v22 = vld [vmem:[%s5239_s26 + $0x184] ss:$16 sps:$4 sm:$0xff]  }
 0x195   : > { %2911 = vmatprep.mubr.bf16.mxu0 %v4994_v25  ;;  %v5668_v39 = vadd.f32 %v1848_v37, %v1559_v36  ;;  %3200 = vmatprep.mubr.bf16.mxu1 %v4997_v32  ;;  %v5009_v25 = vld [vmem:[%s5239_s26 + $0x18c] ss:$16 sps:$4 sm:$0xff]  }
 0x196   : > { %v1561_v41 = vpop.f32.mrf.mxu0  ;;  %v1850_v44 = vpop.f32.mrf.mxu1 }
 0x198   : > { %v1562_v46 = vpop.f32.mrf.mxu0  ;;  %v1851_v51 = vpop.f32.mrf.mxu1 }
 0x199   : > { %v5673_v57 = vadd.f32 %v1851_v51, %v1562_v46  ;;  %v5004_v46 = vld [vmem:[%s5239_s26 + $0x180] ss:$16 sps:$4 sm:$0xff]   ;;  %v5007_v51 = vld [vmem:[%s5239_s26 + $0x188] ss:$16 sps:$4 sm:$0xff]  }
 0x19a   : > { %v1564_v58 = vpop.f32.mrf.mxu0  ;;  %v1853_v62 = vpop.f32.mrf.mxu1 }
 0x19c   : > { %v1567_v0 = vpop.f32.mrf.mxu0  ;;  %2912 = vmatmul.mubr.bf16.gmra.mxu0 %v4992_v48  ;;  %v1856_v4 = vpop.f32.mrf.mxu1  ;;  %3201 = vmatmul.mubr.bf16.gmra.mxu1 %v4995_v54  ;;  %v5012_v54 = vld [vmem:[%s5239_s26 + $0x1a4] ss:$16 sps:$4 sm:$0xff]  }
 0x19d   : > { %2919 = vmatprep.mubr.bf16.mxu0 %v5000_v55  ;;  %v5676_v7 = vadd.f32 %v1856_v4, %v1567_v0  ;;  %3208 = vmatprep.mubr.bf16.mxu1 %v5003_v61  ;;  %v5015_v61 = vld [vmem:[%s5239_s26 + $0x1ac] ss:$16 sps:$4 sm:$0xff]  }
 0x19e   : > { %v1569_v9 = vpop.f32.mrf.mxu0  ;;  %v1858_v10 = vpop.f32.mrf.mxu1 }
 0x1a0   : > { %v1570_v12 = vpop.f32.mrf.mxu0  ;;  %v1859_v16 = vpop.f32.mrf.mxu1 }
 0x1a1   : > { %v5681_v23 = vadd.f32 %v1859_v16, %v1570_v12  ;;  %v5010_v16 = vld [vmem:[%s5239_s26 + $0x1a0] ss:$16 sps:$4 sm:$0xff]  }
 0x1a2   : > { %v1572_v24 = vpop.f32.mrf.mxu0  ;;  %v1861_v31 = vpop.f32.mrf.mxu1 }
 0x1a3   : > { %v5018_v24 = vld [vmem:[%s5239_s26 + $0x1c4] ss:$16 sps:$4 sm:$0xff]  }
 0x1a4   : > { %v1575_v32 = vpop.f32.mrf.mxu0  ;;  %2920 = vmatmul.mubr.bf16.gmra.mxu0 %v4998_v15  ;;  %v1864_v33 = vpop.f32.mrf.mxu1  ;;  %3209 = vmatmul.mubr.bf16.gmra.mxu1 %v5001_v21 }
 0x1a5   : > { %2927 = vmatprep.mubr.bf16.mxu0 %v5006_v22  ;;  %v5684_v36 = vadd.f32 %v1864_v33, %v1575_v32  ;;  %3216 = vmatprep.mubr.bf16.mxu1 %v5009_v25  ;;  %v5013_v22 = vld [vmem:[%s5239_s26 + $0x1a8] ss:$16 sps:$4 sm:$0xff]   ;;  %v5021_v32 = vld [vmem:[%s5239_s26 + $0x1cc] ss:$16 sps:$4 sm:$0xff]  }
 0x1a6   : > { %v1577_v37 = vpop.f32.mrf.mxu0  ;;  %v1866_v41 = vpop.f32.mrf.mxu1 }
 0x1a8   : > { %v1578_v44 = vpop.f32.mrf.mxu0  ;;  %v1867_v48 = vpop.f32.mrf.mxu1 }
 0x1a9   : > { %v5689_v55 = vadd.f32 %v1867_v48, %v1578_v44 }
 0x1aa   : > { %v1580_v58 = vpop.f32.mrf.mxu0  ;;  %v1869_v62 = vpop.f32.mrf.mxu1 }
 0x1ab   : > { %v5024_v62 = vld [vmem:[%s5239_s26 + $0x1e4] ss:$16 sps:$4 sm:$0xff]  }
 0x1ac   : > { %v1583_v0 = vpop.f32.mrf.mxu0  ;;  %2928 = vmatmul.mubr.bf16.gmra.mxu0 %v5004_v46  ;;  %v1872_v4 = vpop.f32.mrf.mxu1  ;;  %3217 = vmatmul.mubr.bf16.gmra.mxu1 %v5007_v51 }
 0x1ad   : > { %2935 = vmatprep.mubr.bf16.mxu0 %v5012_v54  ;;  %v5692_v9 = vadd.f32 %v1872_v4, %v1583_v0  ;;  %3224 = vmatprep.mubr.bf16.mxu1 %v5015_v61  ;;  %v5016_v54 = vld [vmem:[%s5239_s26 + $0x1c0] ss:$16 sps:$4 sm:$0xff]   ;;  %v5019_v61 = vld [vmem:[%s5239_s26 + $0x1c8] ss:$16 sps:$4 sm:$0xff]  }
 0x1ae   : > { %v1585_v10 = vpop.f32.mrf.mxu0  ;;  %v1874_v12 = vpop.f32.mrf.mxu1 }
 0x1af   : > { %v5027_v10 = vld [vmem:[%s5239_s26 + $0x1ec] ss:$16 sps:$4 sm:$0xff]  }
 0x1b0   : > { %v1586_v15 = vpop.f32.mrf.mxu0  ;;  %v1875_v21 = vpop.f32.mrf.mxu1 }
 0x1b1   : > { %v5697_v25 = vadd.f32 %v1875_v21, %v1586_v15 }
 0x1b2   : > { %v1588_v31 = vpop.f32.mrf.mxu0  ;;  %v1877_v33 = vpop.f32.mrf.mxu1 }
 0x1b4   : > { %v1591_v37 = vpop.f32.mrf.mxu0  ;;  %2936 = vmatmul.mubr.bf16.gmra.mxu0 %v5010_v16  ;;  %v1880_v41 = vpop.f32.mrf.mxu1  ;;  %3225 = vmatmul.mubr.bf16.gmra.mxu1 %v5013_v22 }
 0x1b5   : > { %2943 = vmatprep.mubr.bf16.mxu0 %v5018_v24  ;;  %v5700_v44 = vadd.f32 %v1880_v41, %v1591_v37  ;;  %3232 = vmatprep.mubr.bf16.mxu1 %v5021_v32  ;;  %v5022_v32 = vld [vmem:[%s5239_s26 + $0x1e0] ss:$16 sps:$4 sm:$0xff]   ;;  %v5025_v37 = vld [vmem:[%s5239_s26 + $0x1e8] ss:$16 sps:$4 sm:$0xff]   ;;  %v5030_v41 = vld [vmem:[%s5239_s26 + $0x204] ss:$16 sps:$4 sm:$0xff]  }
 0x1b6   : > { %v1593_v46 = vpop.f32.mrf.mxu0  ;;  %v1882_v48 = vpop.f32.mrf.mxu1 }
 0x1b8   : > { %v1594_v51 = vpop.f32.mrf.mxu0  ;;  %v1883_v58 = vpop.f32.mrf.mxu1 }
 0x1b9   : > { %v5705_v0 = vadd.f32 %v1883_v58, %v1594_v51  ;;  %v5033_v51 = vld [vmem:[%s5239_s26 + $0x20c] ss:$16 sps:$4 sm:$0xff]  }
 0x1ba   : > { %v1596_v4 = vpop.f32.mrf.mxu0  ;;  %v1885_v12 = vpop.f32.mrf.mxu1 }
 0x1bc   : > { %v1599_v15 = vpop.f32.mrf.mxu0  ;;  %2944 = vmatmul.mubr.bf16.gmra.mxu0 %v5016_v54  ;;  %v1888_v16 = vpop.f32.mrf.mxu1  ;;  %3233 = vmatmul.mubr.bf16.gmra.mxu1 %v5019_v61 }
 0x1bd   : > { %2951 = vmatprep.mubr.bf16.mxu0 %v5024_v62  ;;  %v5708_v21 = vadd.f32 %v1888_v16, %v1599_v15  ;;  %3240 = vmatprep.mubr.bf16.mxu1 %v5027_v10  ;;  %v5028_v15 = vld [vmem:[%s5239_s26 + $0x200] ss:$16 sps:$4 sm:$0xff]  }
 0x1be   : > { %v1601_v22 = vpop.f32.mrf.mxu0  ;;  %v1890_v24 = vpop.f32.mrf.mxu1 }
 0x1bf   : > { %v5031_v22 = vld [vmem:[%s5239_s26 + $0x208] ss:$16 sps:$4 sm:$0xff]   ;;  %v5036_v24 = vld [vmem:[%s5239_s26 + $0x224] ss:$16 sps:$4 sm:$0xff]  }
 0x1c0   : > { %v1602_v31 = vpop.f32.mrf.mxu0  ;;  %v1891_v33 = vpop.f32.mrf.mxu1 }
 0x1c1   : > { %v5713_v46 = vadd.f32 %v1891_v33, %v1602_v31 }
 0x1c2   : > { %v1604_v48 = vpop.f32.mrf.mxu0  ;;  %v1893_v54 = vpop.f32.mrf.mxu1 }
 0x1c4   : > { %v1607_v58 = vpop.f32.mrf.mxu0  ;;  %2952 = vmatmul.mubr.bf16.gmra.mxu0 %v5022_v32  ;;  %v1896_v61 = vpop.f32.mrf.mxu1  ;;  %3241 = vmatmul.mubr.bf16.gmra.mxu1 %v5025_v37  ;;  %v5039_v32 = vld [vmem:[%s5239_s26 + $0x22c] ss:$16 sps:$4 sm:$0xff]  }
 0x1c5   : > { %2959 = vmatprep.mubr.bf16.mxu0 %v5030_v41  ;;  %v5716_v62 = vadd.f32 %v1896_v61, %v1607_v58  ;;  %3248 = vmatprep.mubr.bf16.mxu1 %v5033_v51 }
 0x1c6   : > { %v1609_v4 = vpop.f32.mrf.mxu0  ;;  %v1898_v10 = vpop.f32.mrf.mxu1 }
 0x1c7   : > { %5997 = vst [vmem:[#allocation2_spill] sm:$0xff] %v5716_v62  ;;  %v5034_v4 = vld [vmem:[%s5239_s26 + $0x220] ss:$16 sps:$4 sm:$0xff]  }
 0x1c8   : > { %v1610_v12 = vpop.f32.mrf.mxu0  ;;  %v1899_v16 = vpop.f32.mrf.mxu1 }
 0x1c9   : > { %v5721_v31 = vadd.f32 %v1899_v16, %v1610_v12  ;;  %v5037_v12 = vld [vmem:[%s5239_s26 + $0x228] ss:$16 sps:$4 sm:$0xff]   ;;  %v5042_v16 = vld [vmem:[%s5239_s26 + $0x244] ss:$16 sps:$4 sm:$0xff]  }
 0x1ca   : > { %v1612_v33 = vpop.f32.mrf.mxu0  ;;  %v1901_v48 = vpop.f32.mrf.mxu1 }
 0x1cb   : > { %5998 = vst [vmem:[#allocation3_spill] sm:$0xff] %v5721_v31 }
 0x1cc   : > { %v1615_v37 = vpop.f32.mrf.mxu0  ;;  %2960 = vmatmul.mubr.bf16.gmra.mxu0 %v5028_v15  ;;  %v1904_v41 = vpop.f32.mrf.mxu1  ;;  %3249 = vmatmul.mubr.bf16.gmra.mxu1 %v5031_v22  ;;  %v5045_v15 = vld [vmem:[%s5239_s26 + $0x24c] ss:$16 sps:$4 sm:$0xff]  }
 0x1cd   : > { %2967 = vmatprep.mubr.bf16.mxu0 %v5036_v24  ;;  %v5724_v51 = vadd.f32 %v1904_v41, %v1615_v37  ;;  %3256 = vmatprep.mubr.bf16.mxu1 %v5039_v32 }
 0x1ce   : > { %v1617_v54 = vpop.f32.mrf.mxu0  ;;  %v1906_v58 = vpop.f32.mrf.mxu1 }
 0x1cf   : > { %5999 = vst [vmem:[#allocation4_spill] sm:$0xff] %v5724_v51  ;;  %v5040_v58 = vld [vmem:[%s5239_s26 + $0x240] ss:$16 sps:$4 sm:$0xff]  }
 0x1d0   : > { %v1618_v61 = vpop.f32.mrf.mxu0  ;;  %v1907_v10 = vpop.f32.mrf.mxu1 }
 0x1d1   : > { %v5729_v33 = vadd.f32 %v1907_v10, %v1618_v61  ;;  %v5043_v10 = vld [vmem:[%s5239_s26 + $0x248] ss:$16 sps:$4 sm:$0xff]  }
 0x1d2   : > { %v1620_v48 = vpop.f32.mrf.mxu0  ;;  %v1909_v31 = vpop.f32.mrf.mxu1 }
 0x1d3   : > { %6000 = vst [vmem:[#allocation5_spill] sm:$0xff] %v5729_v33  ;;  %v5048_v48 = vld [vmem:[%s5239_s26 + $0x264] ss:$16 sps:$4 sm:$0xff]  }
 0x1d4   : > { %v1623_v22 = vpop.f32.mrf.mxu0  ;;  %2968 = vmatmul.mubr.bf16.gmra.mxu0 %v5034_v4  ;;  %v1912_v24 = vpop.f32.mrf.mxu1  ;;  %3257 = vmatmul.mubr.bf16.gmra.mxu1 %v5037_v12  ;;  %v5051_v4 = vld [vmem:[%s5239_s26 + $0x26c] ss:$16 sps:$4 sm:$0xff]  }
 0x1d5   : > { %2975 = vmatprep.mubr.bf16.mxu0 %v5042_v16  ;;  %v5732_v32 = vadd.f32 %v1912_v24, %v1623_v22  ;;  %3264 = vmatprep.mubr.bf16.mxu1 %v5045_v15 }
 0x1d6   : > { %v1625_v37 = vpop.f32.mrf.mxu0  ;;  %v1914_v41 = vpop.f32.mrf.mxu1 }
 0x1d7   : > { %6001 = vst [vmem:[#allocation6_spill] sm:$0xff] %v5732_v32  ;;  %v5046_v41 = vld [vmem:[%s5239_s26 + $0x260] ss:$16 sps:$4 sm:$0xff]  }
 0x1d8   : > { %v1626_v54 = vpop.f32.mrf.mxu0  ;;  %v1915_v61 = vpop.f32.mrf.mxu1 }
 0x1d9   : > { %v5737_v33 = vadd.f32 %v1915_v61, %v1626_v54  ;;  %v5049_v61 = vld [vmem:[%s5239_s26 + $0x268] ss:$16 sps:$4 sm:$0xff]  }
 0x1da   : > { %v1628_v31 = vpop.f32.mrf.mxu0  ;;  %v1917_v51 = vpop.f32.mrf.mxu1 }
 0x1db   : > { %6002 = vst [vmem:[#allocation7_spill] sm:$0xff] %v5737_v33  ;;  %v5054_v31 = vld [vmem:[%s5239_s26 + $0x284] ss:$16 sps:$4 sm:$0xff]  }
 0x1dc   : > { %v1631_v12 = vpop.f32.mrf.mxu0  ;;  %2976 = vmatmul.mubr.bf16.gmra.mxu0 %v5040_v58  ;;  %v1920_v16 = vpop.f32.mrf.mxu1  ;;  %3265 = vmatmul.mubr.bf16.gmra.mxu1 %v5043_v10  ;;  %v5057_v58 = vld [vmem:[%s5239_s26 + $0x28c] ss:$16 sps:$4 sm:$0xff]  }
 0x1dd   : > { %2983 = vmatprep.mubr.bf16.mxu0 %v5048_v48  ;;  %v5740_v15 = vadd.f32 %v1920_v16, %v1631_v12  ;;  %3272 = vmatprep.mubr.bf16.mxu1 %v5051_v4 }
 0x1de   : > { %v1633_v22 = vpop.f32.mrf.mxu0  ;;  %v1922_v24 = vpop.f32.mrf.mxu1 }
 0x1df   : > { %6003 = vst [vmem:[#allocation8_spill] sm:$0xff] %v5740_v15  ;;  %v5052_v24 = vld [vmem:[%s5239_s26 + $0x280] ss:$16 sps:$4 sm:$0xff]  }
 0x1e0   : > { %v1634_v37 = vpop.f32.mrf.mxu0  ;;  %v1923_v54 = vpop.f32.mrf.mxu1 }
 0x1e1   : > { %v5745_v33 = vadd.f32 %v1923_v54, %v1634_v37  ;;  %v5055_v54 = vld [vmem:[%s5239_s26 + $0x288] ss:$16 sps:$4 sm:$0xff]  }
 0x1e2   : > { %v1636_v51 = vpop.f32.mrf.mxu0  ;;  %v1925_v32 = vpop.f32.mrf.mxu1 }
 0x1e3   : > { %6004 = vst [vmem:[#allocation9_spill] sm:$0xff] %v5745_v33  ;;  %v5060_v51 = vld [vmem:[%s5239_s26 + $0x2a4] ss:$16 sps:$4 sm:$0xff]  }
 0x1e4   : > { %v1639_v10 = vpop.f32.mrf.mxu0  ;;  %2984 = vmatmul.mubr.bf16.gmra.mxu0 %v5046_v41  ;;  %v1928_v48 = vpop.f32.mrf.mxu1  ;;  %3273 = vmatmul.mubr.bf16.gmra.mxu1 %v5049_v61  ;;  %v5063_v41 = vld [vmem:[%s5239_s26 + $0x2ac] ss:$16 sps:$4 sm:$0xff]  }
 0x1e5   : > { %2991 = vmatprep.mubr.bf16.mxu0 %v5054_v31  ;;  %v5748_v4 = vadd.f32 %v1928_v48, %v1639_v10  ;;  %3280 = vmatprep.mubr.bf16.mxu1 %v5057_v58 }
 0x1e6   : > { %v1641_v12 = vpop.f32.mrf.mxu0  ;;  %v1930_v16 = vpop.f32.mrf.mxu1 }
 0x1e7   : > { %6005 = vst [vmem:[#allocation10_spill] sm:$0xff] %v5748_v4  ;;  %v5058_v16 = vld [vmem:[%s5239_s26 + $0x2a0] ss:$16 sps:$4 sm:$0xff]  }
 0x1e8   : > { %v1642_v22 = vpop.f32.mrf.mxu0  ;;  %v1931_v37 = vpop.f32.mrf.mxu1 }
 0x1e9   : > { %v5753_v33 = vadd.f32 %v1931_v37, %v1642_v22  ;;  %v5061_v37 = vld [vmem:[%s5239_s26 + $0x2a8] ss:$16 sps:$4 sm:$0xff]  }
 0x1ea   : > { %v1644_v32 = vpop.f32.mrf.mxu0  ;;  %v1933_v15 = vpop.f32.mrf.mxu1 }
 0x1eb   : > { %6006 = vst [vmem:[#allocation11_spill] sm:$0xff] %v5753_v33  ;;  %v5066_v32 = vld [vmem:[%s5239_s26 + $0x2c4] ss:$16 sps:$4 sm:$0xff]  }
 0x1ec   : > { %v1647_v61 = vpop.f32.mrf.mxu0  ;;  %2992 = vmatmul.mubr.bf16.gmra.mxu0 %v5052_v24  ;;  %v1936_v31 = vpop.f32.mrf.mxu1  ;;  %3281 = vmatmul.mubr.bf16.gmra.mxu1 %v5055_v54  ;;  %v5069_v24 = vld [vmem:[%s5239_s26 + $0x2cc] ss:$16 sps:$4 sm:$0xff]  }
 0x1ed   : > { %2999 = vmatprep.mubr.bf16.mxu0 %v5060_v51  ;;  %v5756_v58 = vadd.f32 %v1936_v31, %v1647_v61  ;;  %3288 = vmatprep.mubr.bf16.mxu1 %v5063_v41 }
 0x1ee   : > { %v1649_v10 = vpop.f32.mrf.mxu0  ;;  %v1938_v48 = vpop.f32.mrf.mxu1 }
 0x1ef   : > { %6007 = vst [vmem:[#allocation12_spill] sm:$0xff] %v5756_v58  ;;  %v5064_v48 = vld [vmem:[%s5239_s26 + $0x2c0] ss:$16 sps:$4 sm:$0xff]  }
 0x1f0   : > { %v1650_v12 = vpop.f32.mrf.mxu0  ;;  %v1939_v22 = vpop.f32.mrf.mxu1 }
 0x1f1   : > { %v5761_v33 = vadd.f32 %v1939_v22, %v1650_v12  ;;  %v5067_v22 = vld [vmem:[%s5239_s26 + $0x2c8] ss:$16 sps:$4 sm:$0xff]  }
 0x1f2   : > { %v1652_v15 = vpop.f32.mrf.mxu0  ;;  %v1941_v4 = vpop.f32.mrf.mxu1 }
 0x1f3   : > { %6008 = vst [vmem:[#allocation13_spill] sm:$0xff] %v5761_v33  ;;  %v5072_v15 = vld [vmem:[%s5239_s26 + $0x2e4] ss:$16 sps:$4 sm:$0xff]  }
 0x1f4   : > { %v1655_v54 = vpop.f32.mrf.mxu0  ;;  %3000 = vmatmul.mubr.bf16.gmra.mxu0 %v5058_v16  ;;  %v1944_v51 = vpop.f32.mrf.mxu1  ;;  %3289 = vmatmul.mubr.bf16.gmra.mxu1 %v5061_v37  ;;  %v5075_v16 = vld [vmem:[%s5239_s26 + $0x2ec] ss:$16 sps:$4 sm:$0xff]  }
 0x1f5   : > { %3007 = vmatprep.mubr.bf16.mxu0 %v5066_v32  ;;  %v5764_v41 = vadd.f32 %v1944_v51, %v1655_v54  ;;  %3296 = vmatprep.mubr.bf16.mxu1 %v5069_v24 }
 0x1f6   : > { %v1657_v61 = vpop.f32.mrf.mxu0  ;;  %v1946_v31 = vpop.f32.mrf.mxu1 }
 0x1f7   : > { %6009 = vst [vmem:[#allocation14_spill] sm:$0xff] %v5764_v41  ;;  %v5070_v31 = vld [vmem:[%s5239_s26 + $0x2e0] ss:$16 sps:$4 sm:$0xff]  }
 0x1f8   : > { %v1658_v10 = vpop.f32.mrf.mxu0  ;;  %v1947_v12 = vpop.f32.mrf.mxu1 }
 0x1f9   : > { %v5769_v33 = vadd.f32 %v1947_v12, %v1658_v10  ;;  %v5073_v12 = vld [vmem:[%s5239_s26 + $0x2e8] ss:$16 sps:$4 sm:$0xff]  }
 0x1fa   : > { %v1660_v4 = vpop.f32.mrf.mxu0  ;;  %v1949_v58 = vpop.f32.mrf.mxu1 }
 0x1fb   : > { %6010 = vst [vmem:[#allocation15_spill] sm:$0xff] %v5769_v33  ;;  %v5078_v4 = vld [vmem:[%s5239_s26 + $0x304] ss:$16 sps:$4 sm:$0xff]  }
 0x1fc   : > { %v1663_v37 = vpop.f32.mrf.mxu0  ;;  %3008 = vmatmul.mubr.bf16.gmra.mxu0 %v5064_v48  ;;  %v1952_v32 = vpop.f32.mrf.mxu1  ;;  %3297 = vmatmul.mubr.bf16.gmra.mxu1 %v5067_v22  ;;  %v5081_v48 = vld [vmem:[%s5239_s26 + $0x30c] ss:$16 sps:$4 sm:$0xff]  }
 0x1fd   : > { %3015 = vmatprep.mubr.bf16.mxu0 %v5072_v15  ;;  %v5772_v24 = vadd.f32 %v1952_v32, %v1663_v37  ;;  %3304 = vmatprep.mubr.bf16.mxu1 %v5075_v16 }
 0x1fe   : > { %v1665_v54 = vpop.f32.mrf.mxu0  ;;  %v1954_v51 = vpop.f32.mrf.mxu1 }
 0x1ff   : > { %6011 = vst [vmem:[#allocation16_spill] sm:$0xff] %v5772_v24  ;;  %v5076_v51 = vld [vmem:[%s5239_s26 + $0x300] ss:$16 sps:$4 sm:$0xff]   ;;  %v5087_v24 = vld [vmem:[%s5239_s26 + $0x32c] ss:$16 sps:$4 sm:$0xff]  }
 0x200   : > { %v1666_v61 = vpop.f32.mrf.mxu0  ;;  %v1955_v10 = vpop.f32.mrf.mxu1 }
 0x201   : > { %v5777_v33 = vadd.f32 %v1955_v10, %v1666_v61  ;;  %v5079_v10 = vld [vmem:[%s5239_s26 + $0x308] ss:$16 sps:$4 sm:$0xff]  }
 0x202   : > { %v1668_v58 = vpop.f32.mrf.mxu0  ;;  %v1957_v41 = vpop.f32.mrf.mxu1 }
 0x203   : > { %6012 = vst [vmem:[#allocation17_spill] sm:$0xff] %v5777_v33  ;;  %v5084_v33 = vld [vmem:[%s5239_s26 + $0x324] ss:$16 sps:$4 sm:$0xff]  }
 0x204   : > { %v1671_v22 = vpop.f32.mrf.mxu0  ;;  %3016 = vmatmul.mubr.bf16.gmra.mxu0 %v5070_v31  ;;  %v1960_v15 = vpop.f32.mrf.mxu1  ;;  %3305 = vmatmul.mubr.bf16.gmra.mxu1 %v5073_v12 }
 0x205   : > { %3023 = vmatprep.mubr.bf16.mxu0 %v5078_v4  ;;  %v5780_v16 = vadd.f32 %v1960_v15, %v1671_v22  ;;  %3312 = vmatprep.mubr.bf16.mxu1 %v5081_v48  ;;  %v5792_v48 = vld [vmem:[%s5995_s2] ss:$0 sm:$0xff] }
 0x206   : > { %v1673_v37 = vpop.f32.mrf.mxu0  ;;  %v1962_v32 = vpop.f32.mrf.mxu1 }
 0x207   : > { %6013 = vst [vmem:[#allocation18_spill] sm:$0xff] %v5780_v16  ;;  %v5082_v32 = vld [vmem:[%s5239_s26 + $0x320] ss:$16 sps:$4 sm:$0xff]  }
 0x208   : > { %v1674_v54 = vpop.f32.mrf.mxu0  ;;  %v1963_v61 = vpop.f32.mrf.mxu1 }
 0x209   : > { %v5785_v58 = vadd.f32 %v1963_v61, %v1674_v54  ;;  %v5085_v61 = vld [vmem:[%s5239_s26 + $0x328] ss:$16 sps:$4 sm:$0xff]  }
 0x20a   : > { %v1676_v41 = vpop.f32.mrf.mxu0  ;;  %v1965_v62 = vpop.f32.mrf.mxu1 }
 0x20b   : > { %6014 = vst [vmem:[#allocation19_spill] sm:$0xff] %v5785_v58  ;;  %v5093_v41 = vld [vmem:[%s5239_s26 + $0x34c] ss:$16 sps:$4 sm:$0xff]  }
 0x20c   : > { %v2833_v31 = vpop.f32.mrf.mxu0  ;;  %3024 = vmatmul.mubr.bf16.gmra.mxu0 %v5076_v51  ;;  %v3122_v4 = vpop.f32.mrf.mxu1  ;;  %3313 = vmatmul.mubr.bf16.gmra.mxu1 %v5079_v10  ;;  %v5090_v10 = vld [vmem:[%s5239_s26 + $0x344] ss:$16 sps:$4 sm:$0xff]  }
 0x20d   : > { %v2834_v12 = vadd.f32 %v2833_v31, %v5532_v42  ;;  %3031 = vmatprep.mubr.bf16.mxu0 %v5084_v33  ;;  %3320 = vmatprep.mubr.bf16.mxu1 %v5087_v24 }
 0x20e   : > { %v2835_v22 = vpop.f32.mrf.mxu0  ;;  %v3124_v37 = vpop.f32.mrf.mxu1 }
 0x20f   : > { %v3123_v15 = vadd.f32 %v3122_v4, %v2834_v12 }
 0x210   : > { %v2836_v62 = vpop.f32.mrf.mxu0  ;;  %v3125_v42 = vpop.f32.mrf.mxu1 }
 0x211   : > { %v3384_v54 = vadd.f32 %v5792_v48, %v3123_v15  ;;  %v2837_v51 = vadd.f32 %v2836_v62, %v5537_v50 }
 0x212   : > { %v2838_v33 = vpop.f32.mrf.mxu0  ;;  %v3127_v58 = vpop.f32.mrf.mxu1 }
 0x213   : > { %v3126_v31 = vadd.f32 %v3125_v42, %v2837_v51  ;;  %v3448_v24 = vmul.f32 0.2, %v3384_v54  ;;  %v5088_v51 = vld [vmem:[%s5239_s26 + $0x340] ss:$16 sps:$4 sm:$0xff]  }
 0x214   : > { %v2841_v16 = vpop.f32.mrf.mxu0  ;;  %3032 = vmatmul.mubr.bf16.gmra.mxu0 %v5082_v32  ;;  %v3130_v22 = vpop.f32.mrf.mxu1  ;;  %3321 = vmatmul.mubr.bf16.gmra.mxu1 %v5085_v61  ;;  %v5096_v61 = vld [vmem:[%s5239_s26 + $0x364] ss:$16 sps:$4 sm:$0xff]  }
 0x215   : > { %v3385_v12 = vadd.f32 %v5792_v48, %v3126_v31  ;;  %v2842_v4 = vadd.f32 %v2841_v16, %v5540_v56  ;;  %3039 = vmatprep.mubr.bf16.mxu0 %v5090_v10  ;;  %3328 = vmatprep.mubr.bf16.mxu1 %v5093_v41  ;;  %v3512_v32 = vmax.f32 %v3384_v54, %v3448_v24  ;;  %v5091_v31 = vld [vmem:[%s5239_s26 + $0x348] ss:$16 sps:$4 sm:$0xff]   ;;  %v5099_v41 = vld [vmem:[%s5239_s26 + $0x36c] ss:$16 sps:$4 sm:$0xff]  }
 0x216   : > { %v2843_v50 = vpop.f32.mrf.mxu0  ;;  %v3132_v58 = vpop.f32.mrf.mxu1 }
 0x217   : > { %v3449_v15 = vmul.f32 0.2, %v3385_v12  ;;  %v3131_v37 = vadd.f32 %v3130_v22, %v2842_v4 }
 0x218   : > { %v2844_v62 = vpop.f32.mrf.mxu0  ;;  %v3133_v16 = vpop.f32.mrf.mxu1 }
 0x219   : > { %v3513_v42 = vmax.f32 %v3385_v12, %v3449_v15  ;;  %v3386_v33 = vadd.f32 %v5792_v48, %v3131_v37  ;;  %v2845_v56 = vadd.f32 %v2844_v62, %v5545_v63 }
 0x21a   : > { %v2846_v10 = vpop.f32.mrf.mxu0  ;;  %v3135_v50 = vpop.f32.mrf.mxu1 }
 0x21b   : > { %v4478_v4 = vpack.c.bf16 %v3513_v42, %v3512_v32  ;;  %v3134_v22 = vadd.f32 %v3133_v16, %v2845_v56  ;;  %v3450_v24 = vmul.f32 0.2, %v3386_v33  ;;  %v5102_v50 = vld [vmem:[%s5239_s26 + $0x384] ss:$16 sps:$4 sm:$0xff]  }
 0x21c   : > { %v2849_v54 = vpop.f32.mrf.mxu0  ;;  %3040 = vmatmul.mubr.bf16.gmra.mxu0 %v5088_v51  ;;  %v3138_v15 = vpop.f32.mrf.mxu1  ;;  %3329 = vmatmul.mubr.bf16.gmra.mxu1 %v5091_v31  ;;  %v5094_v51 = vld [vmem:[%s5239_s26 + $0x360] ss:$16 sps:$4 sm:$0xff]  }
 0x21d   : > { %4479 = vst [vmem:[%s5811_s30] sm:$0xff] %v4478_v4   ;;  %v3387_v63 = vadd.f32 %v5792_v48, %v3134_v22  ;;  %v2850_v12 = vadd.f32 %v2849_v54, %v5548_v6  ;;  %3047 = vmatprep.mubr.bf16.mxu0 %v5096_v61  ;;  %3336 = vmatprep.mubr.bf16.mxu1 %v5099_v41  ;;  %v5097_v22 = vld [vmem:[%s5239_s26 + $0x368] ss:$16 sps:$4 sm:$0xff]   ;;  %v5105_v61 = vld [vmem:[%s5239_s26 + $0x38c] ss:$16 sps:$4 sm:$0xff]  }
 0x21e   : > { %v2851_v37 = vpop.f32.mrf.mxu0  ;;  %v3140_v32 = vpop.f32.mrf.mxu1  ;;  %v3514_v56 = vmax.f32 %v3386_v33, %v3450_v24 }
 0x21f   : > { %v3451_v58 = vmul.f32 0.2, %v3387_v63  ;;  %v3139_v62 = vadd.f32 %v3138_v15, %v2850_v12 }
 0x220   : > { %v2852_v42 = vpop.f32.mrf.mxu0  ;;  %v3141_v4 = vpop.f32.mrf.mxu1 }
 0x221   : > { %v3515_v16 = vmax.f32 %v3387_v63, %v3451_v58  ;;  %v3388_v10 = vadd.f32 %v5792_v48, %v3139_v62  ;;  %v2853_v6 = vadd.f32 %v2852_v42, %v5553_v14 }
 0x222   : > { %v2854_v31 = vpop.f32.mrf.mxu0  ;;  %v3143_v41 = vpop.f32.mrf.mxu1 }
 0x223   : > { %v4483_v54 = vpack.c.bf16 %v3515_v16, %v3514_v56  ;;  %v3142_v37 = vadd.f32 %v3141_v4, %v2853_v6  ;;  %v3452_v15 = vmul.f32 0.2, %v3388_v10  ;;  %v5103_v31 = vld [vmem:[%s5239_s26 + $0x388] ss:$16 sps:$4 sm:$0xff]  }
 0x224   : > { %v2857_v12 = vpop.f32.mrf.mxu0  ;;  %3048 = vmatmul.mubr.bf16.gmra.mxu0 %v5094_v51  ;;  %v3146_v63 = vpop.f32.mrf.mxu1  ;;  %3337 = vmatmul.mubr.bf16.gmra.mxu1 %v5097_v22  ;;  %v5100_v51 = vld [vmem:[%s5239_s26 + $0x380] ss:$16 sps:$4 sm:$0xff]  }
 0x225   : > { %4635 = vst [vmem:[%s5811_s30 + $0x8] sm:$0xff] %v4483_v54   ;;  %v3389_v33 = vadd.f32 %v5792_v48, %v3142_v37  ;;  %v2858_v24 = vadd.f32 %v2857_v12, %v5556_v20  ;;  %3055 = vmatprep.mubr.bf16.mxu0 %v5102_v50  ;;  %3344 = vmatprep.mubr.bf16.mxu1 %v5105_v61  ;;  %v5108_v54 = vld [vmem:[%s5239_s26 + $0x3a4] ss:$16 sps:$4 sm:$0xff]   ;;  %v5111_v50 = vld [vmem:[%s5239_s26 + $0x3ac] ss:$16 sps:$4 sm:$0xff]  }
 0x226   : > { %v2859_v14 = vpop.f32.mrf.mxu0  ;;  %v3148_v32 = vpop.f32.mrf.mxu1  ;;  %v3516_v56 = vmax.f32 %v3388_v10, %v3452_v15 }
 0x227   : > { %v3453_v58 = vmul.f32 0.2, %v3389_v33  ;;  %v3147_v62 = vadd.f32 %v3146_v63, %v2858_v24  ;;  %v5106_v32 = vld [vmem:[%s5239_s26 + $0x3a0] ss:$16 sps:$4 sm:$0xff]  }
 0x228   : > { %v2860_v42 = vpop.f32.mrf.mxu0  ;;  %v3149_v4 = vpop.f32.mrf.mxu1 }
 0x229   : > { %v3517_v16 = vmax.f32 %v3389_v33, %v3453_v58  ;;  %v3390_v6 = vadd.f32 %v5792_v48, %v3147_v62  ;;  %v2861_v20 = vadd.f32 %v2860_v42, %v5561_v28 }
 0x22a   : > { %v2862_v22 = vpop.f32.mrf.mxu0  ;;  %v3151_v61 = vpop.f32.mrf.mxu1 }
 0x22b   : > { %v4488_v37 = vpack.c.bf16 %v3517_v16, %v3516_v56  ;;  %v3150_v41 = vadd.f32 %v3149_v4, %v2861_v20  ;;  %v3454_v24 = vmul.f32 0.2, %v3390_v6  ;;  %v5109_v20 = vld [vmem:[%s5239_s26 + $0x3a8] ss:$16 sps:$4 sm:$0xff]   ;;  %v5114_v4 = vld [vmem:[%s5239_s26 + $0x3c4] ss:$16 sps:$4 sm:$0xff]  }
 0x22c   : > { %v2865_v12 = vpop.f32.mrf.mxu0  ;;  %3056 = vmatmul.mubr.bf16.gmra.mxu0 %v5100_v51  ;;  %v3154_v33 = vpop.f32.mrf.mxu1  ;;  %3345 = vmatmul.mubr.bf16.gmra.mxu1 %v5103_v31 }
 0x22d   : > { %4636 = vst [vmem:[%s5811_s30 + $0x10] sm:$0xff] %v4488_v37   ;;  %v3391_v10 = vadd.f32 %v5792_v48, %v3150_v41  ;;  %v2866_v15 = vadd.f32 %v2865_v12, %v5564_v34  ;;  %3063 = vmatprep.mubr.bf16.mxu0 %v5108_v54  ;;  %3352 = vmatprep.mubr.bf16.mxu1 %v5111_v50  ;;  %v5117_v54 = vld [vmem:[%s5239_s26 + $0x3cc] ss:$16 sps:$4 sm:$0xff]  }
 0x22e   : > { %v2867_v28 = vpop.f32.mrf.mxu0  ;;  %v3156_v58 = vpop.f32.mrf.mxu1  ;;  %v3518_v42 = vmax.f32 %v3390_v6, %v3454_v24 }
 0x22f   : > { %v3455_v63 = vmul.f32 0.2, %v3391_v10  ;;  %v3155_v14 = vadd.f32 %v3154_v33, %v2866_v15 }
 0x230   : > { %v2868_v62 = vpop.f32.mrf.mxu0  ;;  %v3157_v16 = vpop.f32.mrf.mxu1 }
 0x231   : > { %v3519_v51 = vmax.f32 %v3391_v10, %v3455_v63  ;;  %v3392_v56 = vadd.f32 %v5792_v48, %v3155_v14  ;;  %v2869_v34 = vadd.f32 %v2868_v62, %v5569_v43  ;;  %v5112_v63 = vld [vmem:[%s5239_s26 + $0x3c0] ss:$16 sps:$4 sm:$0xff]  }
 0x232   : > { %v2870_v31 = vpop.f32.mrf.mxu0  ;;  %v3159_v50 = vpop.f32.mrf.mxu1 }
 0x233   : > { %v4493_v22 = vpack.c.bf16 %v3519_v51, %v3518_v42  ;;  %v3158_v37 = vadd.f32 %v3157_v16, %v2869_v34  ;;  %v3456_v61 = vmul.f32 0.2, %v3392_v56  ;;  %v5115_v42 = vld [vmem:[%s5239_s26 + $0x3c8] ss:$16 sps:$4 sm:$0xff]   ;;  %v5120_v51 = vld [vmem:[%s5239_s26 + $0x3e4] ss:$16 sps:$4 sm:$0xff]  }
 0x234   : > { %v2873_v41 = vpop.f32.mrf.mxu0  ;;  %3064 = vmatmul.mubr.bf16.gmra.mxu0 %v5106_v32  ;;  %v3162_v24 = vpop.f32.mrf.mxu1  ;;  %3353 = vmatmul.mubr.bf16.gmra.mxu1 %v5109_v20  ;;  %v5123_v16 = vld [vmem:[%s5239_s26 + $0x3ec] ss:$16 sps:$4 sm:$0xff]  }
 0x235   : > { %4637 = vst [vmem:[%s5811_s30 + $0x18] sm:$0xff] %v4493_v22   ;;  %v3393_v6 = vadd.f32 %v5792_v48, %v3158_v37  ;;  %v2874_v12 = vadd.f32 %v2873_v41, %v5572_v49  ;;  %3071 = vmatprep.mubr.bf16.mxu0 %v5114_v4  ;;  %3360 = vmatprep.mubr.bf16.mxu1 %v5117_v54 }
 0x236   : > { %v2875_v43 = vpop.f32.mrf.mxu0  ;;  %v3164_v33 = vpop.f32.mrf.mxu1  ;;  %v3520_v14 = vmax.f32 %v3392_v56, %v3456_v61 }
 0x237   : > { %v3457_v10 = vmul.f32 0.2, %v3393_v6  ;;  %v3163_v15 = vadd.f32 %v3162_v24, %v2874_v12  ;;  %v5118_v24 = vld [vmem:[%s5239_s26 + $0x3e0] ss:$16 sps:$4 sm:$0xff]  }
 0x238   : > { %v2876_v28 = vpop.f32.mrf.mxu0  ;;  %v3165_v32 = vpop.f32.mrf.mxu1 }
 0x239   : > { %v3521_v58 = vmax.f32 %v3393_v6, %v3457_v10  ;;  %v3394_v62 = vadd.f32 %v5792_v48, %v3163_v15  ;;  %v2877_v49 = vadd.f32 %v2876_v28, %v5577_v59 }
 0x23a   : > { %v2878_v34 = vpop.f32.mrf.mxu0  ;;  %v3167_v31 = vpop.f32.mrf.mxu1 }
 0x23b   : > { %v4498_v20 = vpack.c.bf16 %v3521_v58, %v3520_v14  ;;  %v3166_v4 = vadd.f32 %v3165_v32, %v2877_v49  ;;  %v3458_v22 = vmul.f32 0.2, %v3394_v62 }
 0x23c   : > { %v2881_v54 = vpop.f32.mrf.mxu0  ;;  %3072 = vmatmul.mubr.bf16.gmra.mxu0 %v5112_v63  ;;  %v3170_v50 = vpop.f32.mrf.mxu1  ;;  %3361 = vmatmul.mubr.bf16.gmra.mxu1 %v5115_v42 }
 0x23d   : > { %4638 = vst [vmem:[%s5811_s30 + $0x20] sm:$0xff] %v4498_v20   ;;  %v3395_v56 = vadd.f32 %v5792_v48, %v3166_v4  ;;  %v2882_v37 = vadd.f32 %v2881_v54, %v5580_v2  ;;  %3079 = vmatprep.mubr.bf16.mxu0 %v5120_v51  ;;  %3368 = vmatprep.mubr.bf16.mxu1 %v5123_v16  ;;  %v5121_v2 = vld [vmem:[%s5239_s26 + $0x3e8] ss:$16 sps:$4 sm:$0xff]  }
 0x23e   : > { %v2883_v59 = vpop.f32.mrf.mxu0  ;;  %v3172_v6 = vpop.f32.mrf.mxu1  ;;  %v3522_v43 = vmax.f32 %v3394_v62, %v3458_v22 }
 0x23f   : > { %v3459_v41 = vmul.f32 0.2, %v3395_v56  ;;  %v3171_v61 = vadd.f32 %v3170_v50, %v2882_v37 }
 0x240   : > { %v2884_v12 = vpop.f32.mrf.mxu0  ;;  %v3173_v28 = vpop.f32.mrf.mxu1 }
 0x241   : > { %v3523_v10 = vmax.f32 %v3395_v56, %v3459_v41  ;;  %v3396_v15 = vadd.f32 %v5792_v48, %v3171_v61  ;;  %v2885_v33 = vadd.f32 %v2884_v12, %v5585_v11 }
 0x242   : > { %v2886_v63 = vpop.f32.mrf.mxu0  ;;  %v3175_v49 = vpop.f32.mrf.mxu1 }
 0x243   : > { %v4503_v14 = vpack.c.bf16 %v3523_v10, %v3522_v43  ;;  %v3174_v58 = vadd.f32 %v3173_v28, %v2885_v33  ;;  %v3460_v42 = vmul.f32 0.2, %v3396_v15 }
 0x244   : > { %v2889_v32 = vpop.f32.mrf.mxu0  ;;  %3080 = vmatmul.mubr.bf16.gmra.mxu0 %v5118_v24  ;;  %v3178_v62 = vpop.f32.mrf.mxu1  ;;  %3369 = vmatmul.mubr.bf16.gmra.mxu1 %v5121_v2 }
 0x245   : > { %4639 = vst [vmem:[%s5811_s30 + $0x28] sm:$0xff] %v4503_v14   ;;  %v3397_v51 = vadd.f32 %v5792_v48, %v3174_v58  ;;  %v2890_v34 = vadd.f32 %v2889_v32, %v5588_v18  ;;  %v3524_v54 = vmax.f32 %v3396_v15, %v3460_v42 }
 0x246   : > { %v2891_v16 = vpop.f32.mrf.mxu0  ;;  %v3180_v4 = vpop.f32.mrf.mxu1 }
 0x247   : > { %v3461_v20 = vmul.f32 0.2, %v3397_v51  ;;  %v3179_v11 = vadd.f32 %v3178_v62, %v2890_v34 }
 0x248   : > { %v2892_v31 = vpop.f32.mrf.mxu0  ;;  %v3181_v50 = vpop.f32.mrf.mxu1 }
 0x249   : > { %v3525_v22 = vmax.f32 %v3397_v51, %v3461_v20  ;;  %v3398_v56 = vadd.f32 %v5792_v48, %v3179_v11  ;;  %v2893_v37 = vadd.f32 %v2892_v31, %v5593_v27 }
 0x24a   : > { %v2894_v59 = vpop.f32.mrf.mxu0  ;;  %v3183_v6 = vpop.f32.mrf.mxu1 }
 0x24b   : > { %v4508_v41 = vpack.c.bf16 %v3525_v22, %v3524_v54  ;;  %v3182_v61 = vadd.f32 %v3181_v50, %v2893_v37  ;;  %v3462_v12 = vmul.f32 0.2, %v3398_v56 }
 0x24c   : > { %v2897_v18 = vpop.f32.mrf.mxu0  ;;  %v3186_v10 = vpop.f32.mrf.mxu1 }
 0x24d   : > { %4640 = vst [vmem:[%s5811_s30 + $0x30] sm:$0xff] %v4508_v41   ;;  %v3399_v24 = vadd.f32 %v5792_v48, %v3182_v61  ;;  %v2898_v43 = vadd.f32 %v2897_v18, %v5596_v35  ;;  %v3526_v27 = vmax.f32 %v3398_v56, %v3462_v12 }
 0x24e   : > { %v2899_v15 = vpop.f32.mrf.mxu0  ;;  %v3188_v2 = vpop.f32.mrf.mxu1 }
 0x24f   : > { %v3463_v33 = vmul.f32 0.2, %v3399_v24  ;;  %v3187_v28 = vadd.f32 %v3186_v10, %v2898_v43 }
 0x250   : > { %v2900_v63 = vpop.f32.mrf.mxu0  ;;  %v3189_v32 = vpop.f32.mrf.mxu1 }
 0x251   : > { %v3527_v14 = vmax.f32 %v3399_v24, %v3463_v33  ;;  %v3400_v58 = vadd.f32 %v5792_v48, %v3187_v28  ;;  %v2901_v49 = vadd.f32 %v2900_v63, %v5601_v45 }
 0x252   : > { %v2902_v42 = vpop.f32.mrf.mxu0  ;;  %v3191_v62 = vpop.f32.mrf.mxu1 }
 0x253   : > { %v4513_v51 = vpack.c.bf16 %v3527_v14, %v3526_v27  ;;  %v3190_v34 = vadd.f32 %v3189_v32, %v2901_v49  ;;  %v3464_v35 = vmul.f32 0.2, %v3400_v58 }
 0x254   : > { %v2905_v16 = vpop.f32.mrf.mxu0  ;;  %v3194_v4 = vpop.f32.mrf.mxu1 }
 0x255   : > { %4641 = vst [vmem:[%s5811_s30 + $0x38] sm:$0xff] %v4513_v51   ;;  %v3401_v20 = vadd.f32 %v5792_v48, %v3190_v34  ;;  %v2906_v11 = vadd.f32 %v2905_v16, %v5604_v53  ;;  %v3528_v45 = vmax.f32 %v3400_v58, %v3464_v35 }
 0x256   : > { %v2907_v31 = vpop.f32.mrf.mxu0  ;;  %v3196_v56 = vpop.f32.mrf.mxu1 }
 0x257   : > { %v3465_v54 = vmul.f32 0.2, %v3401_v20  ;;  %v3195_v22 = vadd.f32 %v3194_v4, %v2906_v11 }
 0x258   : > { %v2908_v37 = vpop.f32.mrf.mxu0  ;;  %v3197_v61 = vpop.f32.mrf.mxu1 }
 0x259   : > { %v3529_v50 = vmax.f32 %v3401_v20, %v3465_v54  ;;  %v3402_v59 = vadd.f32 %v5792_v48, %v3195_v22  ;;  %v2909_v41 = vadd.f32 %v2908_v37, %v5609_v1 }
 0x25a   : > { %v2910_v6 = vpop.f32.mrf.mxu0  ;;  %v3199_v24 = vpop.f32.mrf.mxu1 }
 0x25b   : > { %v4518_v18 = vpack.c.bf16 %v3529_v50, %v3528_v45  ;;  %v3198_v12 = vadd.f32 %v3197_v61, %v2909_v41  ;;  %v3466_v53 = vmul.f32 0.2, %v3402_v59 }
 0x25c   : > { %v2913_v43 = vpop.f32.mrf.mxu0  ;;  %v3202_v33 = vpop.f32.mrf.mxu1 }
 0x25d   : > { %4642 = vst [vmem:[%s5811_s30 + $0x40] sm:$0xff] %v4518_v18   ;;  %v3403_v10 = vadd.f32 %v5792_v48, %v3198_v12  ;;  %v2914_v15 = vadd.f32 %v2913_v43, %v5612_v8  ;;  %v3530_v1 = vmax.f32 %v3402_v59, %v3466_v53 }
 0x25e   : > { %v2915_v28 = vpop.f32.mrf.mxu0  ;;  %v3204_v27 = vpop.f32.mrf.mxu1 }
 0x25f   : > { %v3467_v2 = vmul.f32 0.2, %v3403_v10  ;;  %v3203_v63 = vadd.f32 %v3202_v33, %v2914_v15 }
 0x260   : > { %v2916_v14 = vpop.f32.mrf.mxu0  ;;  %v3205_v42 = vpop.f32.mrf.mxu1 }
 0x261   : > { %v3531_v58 = vmax.f32 %v3403_v10, %v3467_v2  ;;  %v3404_v49 = vadd.f32 %v5792_v48, %v3203_v63  ;;  %v2917_v32 = vadd.f32 %v2916_v14, %v5617_v19 }
 0x262   : > { %v2918_v51 = vpop.f32.mrf.mxu0  ;;  %v3207_v16 = vpop.f32.mrf.mxu1 }
 0x263   : > { %v4523_v34 = vpack.c.bf16 %v3531_v58, %v3530_v1  ;;  %v3206_v62 = vadd.f32 %v3205_v42, %v2917_v32  ;;  %v3468_v8 = vmul.f32 0.2, %v3404_v49 }
 0x264   : > { %v2921_v35 = vpop.f32.mrf.mxu0  ;;  %v3210_v4 = vpop.f32.mrf.mxu1 }
 0x265   : > { %4643 = vst [vmem:[%s5811_s30 + $0x48] sm:$0xff] %v4523_v34   ;;  %v3405_v20 = vadd.f32 %v5792_v48, %v3206_v62  ;;  %v2922_v11 = vadd.f32 %v2921_v35, %v5620_v26  ;;  %v3532_v19 = vmax.f32 %v3404_v49, %v3468_v8 }
 0x266   : > { %v2923_v31 = vpop.f32.mrf.mxu0  ;;  %v3212_v56 = vpop.f32.mrf.mxu1 }
 0x267   : > { %v3469_v54 = vmul.f32 0.2, %v3405_v20  ;;  %v3211_v22 = vadd.f32 %v3210_v4, %v2922_v11 }
 0x268   : > { %v2924_v37 = vpop.f32.mrf.mxu0  ;;  %v3213_v41 = vpop.f32.mrf.mxu1 }
 0x269   : > { %v3533_v45 = vmax.f32 %v3405_v20, %v3469_v54  ;;  %v3406_v50 = vadd.f32 %v5792_v48, %v3211_v22  ;;  %v2925_v59 = vadd.f32 %v2924_v37, %v5625_v38 }
 0x26a   : > { %v2926_v61 = vpop.f32.mrf.mxu0  ;;  %v3215_v12 = vpop.f32.mrf.mxu1 }
 0x26b   : > { %v4528_v6 = vpack.c.bf16 %v3533_v45, %v3532_v19  ;;  %v3214_v18 = vadd.f32 %v3213_v41, %v2925_v59  ;;  %v3470_v26 = vmul.f32 0.2, %v3406_v50 }
 0x26c   : > { %v2929_v24 = vpop.f32.mrf.mxu0  ;;  %v3218_v10 = vpop.f32.mrf.mxu1 }
 0x26d   : > { %4644 = vst [vmem:[%s5811_s30 + $0x50] sm:$0xff] %v4528_v6   ;;  %v3407_v43 = vadd.f32 %v5792_v48, %v3214_v18  ;;  %v2930_v53 = vadd.f32 %v2929_v24, %v5628_v47  ;;  %v3534_v38 = vmax.f32 %v3406_v50, %v3470_v26 }
 0x26e   : > { %v2931_v15 = vpop.f32.mrf.mxu0  ;;  %v3220_v2 = vpop.f32.mrf.mxu1 }
 0x26f   : > { %v3471_v33 = vmul.f32 0.2, %v3407_v43  ;;  %v3219_v28 = vadd.f32 %v3218_v10, %v2930_v53 }
 0x270   : > { %v2932_v63 = vpop.f32.mrf.mxu0  ;;  %v3221_v58 = vpop.f32.mrf.mxu1 }
 0x271   : > { %v3535_v27 = vmax.f32 %v3407_v43, %v3471_v33  ;;  %v3408_v14 = vadd.f32 %v5792_v48, %v3219_v28  ;;  %v2933_v1 = vadd.f32 %v2932_v63, %v5633_v60 }
 0x272   : > { %v2934_v49 = vpop.f32.mrf.mxu0  ;;  %v3223_v51 = vpop.f32.mrf.mxu1 }
 0x273   : > { %v4533_v32 = vpack.c.bf16 %v3535_v27, %v3534_v38  ;;  %v3222_v42 = vadd.f32 %v3221_v58, %v2933_v1  ;;  %v3472_v47 = vmul.f32 0.2, %v3408_v14 }
 0x274   : > { %v2937_v34 = vpop.f32.mrf.mxu0  ;;  %v3226_v35 = vpop.f32.mrf.mxu1 }
 0x275   : > { %4645 = vst [vmem:[%s5811_s30 + $0x58] sm:$0xff] %v4533_v32   ;;  %v3409_v62 = vadd.f32 %v5792_v48, %v3222_v42  ;;  %v2938_v16 = vadd.f32 %v2937_v34, %v5636_v5  ;;  %v3536_v60 = vmax.f32 %v3408_v14, %v3472_v47 }
 0x276   : > { %v2939_v8 = vpop.f32.mrf.mxu0  ;;  %v3228_v4 = vpop.f32.mrf.mxu1 }
 0x277   : > { %v3473_v20 = vmul.f32 0.2, %v3409_v62  ;;  %v3227_v11 = vadd.f32 %v3226_v35, %v2938_v16 }
 0x278   : > { %v2940_v31 = vpop.f32.mrf.mxu0  ;;  %v3229_v37 = vpop.f32.mrf.mxu1 }
 0x279   : > { %v3537_v54 = vmax.f32 %v3409_v62, %v3473_v20  ;;  %v3410_v22 = vadd.f32 %v5792_v48, %v3227_v11  ;;  %v2941_v56 = vadd.f32 %v2940_v31, %v5641_v17 }
 0x27a   : > { %v2942_v19 = vpop.f32.mrf.mxu0  ;;  %v3231_v59 = vpop.f32.mrf.mxu1 }
 0x27b   : > { %v4538_v45 = vpack.c.bf16 %v3537_v54, %v3536_v60  ;;  %v3230_v50 = vadd.f32 %v3229_v37, %v2941_v56  ;;  %v3474_v5 = vmul.f32 0.2, %v3410_v22 }
 0x27c   : > { %v2945_v41 = vpop.f32.mrf.mxu0  ;;  %v3234_v18 = vpop.f32.mrf.mxu1 }
 0x27d   : > { %4646 = vst [vmem:[%s5811_s30 + $0x60] sm:$0xff] %v4538_v45   ;;  %v3411_v61 = vadd.f32 %v5792_v48, %v3230_v50  ;;  %v2946_v6 = vadd.f32 %v2945_v41, %v5644_v29  ;;  %v3538_v17 = vmax.f32 %v3410_v22, %v3474_v5 }
 0x27e   : > { %v2947_v12 = vpop.f32.mrf.mxu0  ;;  %v3236_v43 = vpop.f32.mrf.mxu1 }
 0x27f   : > { %v3475_v24 = vmul.f32 0.2, %v3411_v61  ;;  %v3235_v26 = vadd.f32 %v3234_v18, %v2946_v6 }
 0x280   : > { %v2948_v53 = vpop.f32.mrf.mxu0  ;;  %v3237_v28 = vpop.f32.mrf.mxu1 }
 0x281   : > { %v3539_v10 = vmax.f32 %v3411_v61, %v3475_v24  ;;  %v3412_v15 = vadd.f32 %v5792_v48, %v3235_v26  ;;  %v2949_v33 = vadd.f32 %v2948_v53, %v5649_v40 }
 0x282   : > { %v2950_v2 = vpop.f32.mrf.mxu0  ;;  %v3239_v27 = vpop.f32.mrf.mxu1 }
 0x283   : > { %v4543_v63 = vpack.c.bf16 %v3539_v10, %v3538_v17  ;;  %v3238_v38 = vadd.f32 %v3237_v28, %v2949_v33  ;;  %v3476_v29 = vmul.f32 0.2, %v3412_v15 }
 0x284   : > { %v2953_v14 = vpop.f32.mrf.mxu0  ;;  %v3242_v49 = vpop.f32.mrf.mxu1 }
 0x285   : > { %4647 = vst [vmem:[%s5811_s30 + $0x68] sm:$0xff] %v4543_v63   ;;  %v3413_v1 = vadd.f32 %v5792_v48, %v3238_v38  ;;  %v2954_v58 = vadd.f32 %v2953_v14, %v5652_v52  ;;  %v3540_v40 = vmax.f32 %v3412_v15, %v3476_v29 }
 0x286   : > { %v2955_v32 = vpop.f32.mrf.mxu0  ;;  %v3244_v34 = vpop.f32.mrf.mxu1 }
 0x287   : > { %v3477_v42 = vmul.f32 0.2, %v3413_v1  ;;  %v3243_v51 = vadd.f32 %v3242_v49, %v2954_v58 }
 0x288   : > { %v2956_v47 = vpop.f32.mrf.mxu0  ;;  %v3245_v8 = vpop.f32.mrf.mxu1 }
 0x289   : > { %v3541_v62 = vmax.f32 %v3413_v1, %v3477_v42  ;;  %v3414_v16 = vadd.f32 %v5792_v48, %v3243_v51  ;;  %v2957_v35 = vadd.f32 %v2956_v47, %v5657_v3 }
 0x28a   : > { %v2958_v20 = vpop.f32.mrf.mxu0  ;;  %v3247_v31 = vpop.f32.mrf.mxu1 }
 0x28b   : > { %v4548_v11 = vpack.c.bf16 %v3541_v62, %v3540_v40  ;;  %v3246_v4 = vadd.f32 %v3245_v8, %v2957_v35  ;;  %v3478_v52 = vmul.f32 0.2, %v3414_v16 }
 0x28c   : > { %v2961_v60 = vpop.f32.mrf.mxu0  ;;  %v3250_v56 = vpop.f32.mrf.mxu1 }
 0x28d   : > { %4648 = vst [vmem:[%s5811_s30 + $0x70] sm:$0xff] %v4548_v11   ;;  %v3415_v54 = vadd.f32 %v5792_v48, %v3246_v4  ;;  %v2962_v22 = vadd.f32 %v2961_v60, %v5660_v13  ;;  %v3542_v3 = vmax.f32 %v3414_v16, %v3478_v52 }
 0x28e   : > { %v2963_v37 = vpop.f32.mrf.mxu0  ;;  %v3252_v50 = vpop.f32.mrf.mxu1 }
 0x28f   : > { %v3479_v19 = vmul.f32 0.2, %v3415_v54  ;;  %v3251_v45 = vadd.f32 %v3250_v56, %v2962_v22 }
 0x290   : > { %v2964_v59 = vpop.f32.mrf.mxu0  ;;  %v3253_v6 = vpop.f32.mrf.mxu1 }
 0x291   : > { %v3543_v41 = vmax.f32 %v3415_v54, %v3479_v19  ;;  %v3416_v5 = vadd.f32 %v5792_v48, %v3251_v45  ;;  %v2965_v61 = vadd.f32 %v2964_v59, %v5665_v30 }
 0x292   : > { %v2966_v18 = vpop.f32.mrf.mxu0  ;;  %v3255_v26 = vpop.f32.mrf.mxu1 }
 0x293   : > { %v4553_v12 = vpack.c.bf16 %v3543_v41, %v3542_v3  ;;  %v3254_v24 = vadd.f32 %v3253_v6, %v2965_v61  ;;  %v3480_v13 = vmul.f32 0.2, %v3416_v5 }
 0x294   : > { %v2969_v43 = vpop.f32.mrf.mxu0  ;;  %v3258_v10 = vpop.f32.mrf.mxu1 }
 0x295   : > { %4649 = vst [vmem:[%s5811_s30 + $0x78] sm:$0xff] %v4553_v12   ;;  %v3417_v53 = vadd.f32 %v5792_v48, %v3254_v24  ;;  %v2970_v17 = vadd.f32 %v2969_v43, %v5668_v39  ;;  %v3544_v30 = vmax.f32 %v3416_v5, %v3480_v13 }
 0x296   : > { %v2971_v15 = vpop.f32.mrf.mxu0  ;;  %v3260_v2 = vpop.f32.mrf.mxu1 }
 0x297   : > { %v3481_v33 = vmul.f32 0.2, %v3417_v53  ;;  %v3259_v28 = vadd.f32 %v3258_v10, %v2970_v17 }
 0x298   : > { %v2972_v63 = vpop.f32.mrf.mxu0  ;;  %v3261_v29 = vpop.f32.mrf.mxu1 }
 0x299   : > { %v3545_v38 = vmax.f32 %v3417_v53, %v3481_v33  ;;  %v3418_v27 = vadd.f32 %v5792_v48, %v3259_v28  ;;  %v2973_v14 = vadd.f32 %v2972_v63, %v5673_v57 }
 0x29a   : > { %v2974_v1 = vpop.f32.mrf.mxu0  ;;  %v3263_v32 = vpop.f32.mrf.mxu1 }
 0x29b   : > { %v4558_v58 = vpack.c.bf16 %v3545_v38, %v3544_v30  ;;  %v3262_v49 = vadd.f32 %v3261_v29, %v2973_v14  ;;  %v3482_v39 = vmul.f32 0.2, %v3418_v27 }
 0x29c   : > { %v2977_v42 = vpop.f32.mrf.mxu0  ;;  %v3266_v47 = vpop.f32.mrf.mxu1 }
 0x29d   : > { %4650 = vst [vmem:[%s5811_s30 + $0x80] sm:$0xff] %v4558_v58   ;;  %v3419_v51 = vadd.f32 %v5792_v48, %v3262_v49  ;;  %v2978_v34 = vadd.f32 %v2977_v42, %v5676_v7  ;;  %v3546_v57 = vmax.f32 %v3418_v27, %v3482_v39 }
 0x29e   : > { %v2979_v40 = vpop.f32.mrf.mxu0  ;;  %v3268_v35 = vpop.f32.mrf.mxu1 }
 0x29f   : > { %v3483_v62 = vmul.f32 0.2, %v3419_v51  ;;  %v3267_v16 = vadd.f32 %v3266_v47, %v2978_v34 }
 0x2a0   : > { %v2980_v8 = vpop.f32.mrf.mxu0  ;;  %v3269_v31 = vpop.f32.mrf.mxu1 }
 0x2a1   : > { %v3547_v20 = vmax.f32 %v3419_v51, %v3483_v62  ;;  %v3420_v11 = vadd.f32 %v5792_v48, %v3267_v16  ;;  %v2981_v4 = vadd.f32 %v2980_v8, %v5681_v23 }
 0x2a2   : > { %v2982_v60 = vpop.f32.mrf.mxu0  ;;  %v3271_v22 = vpop.f32.mrf.mxu1 }
 0x2a3   : > { %v4563_v52 = vpack.c.bf16 %v3547_v20, %v3546_v57  ;;  %v3270_v54 = vadd.f32 %v3269_v31, %v2981_v4  ;;  %v3484_v7 = vmul.f32 0.2, %v3420_v11 }
 0x2a4   : > { %v2985_v56 = vpop.f32.mrf.mxu0  ;;  %v3274_v45 = vpop.f32.mrf.mxu1 }
 0x2a5   : > { %4651 = vst [vmem:[%s5811_s30 + $0x88] sm:$0xff] %v4563_v52   ;;  %v3421_v37 = vadd.f32 %v5792_v48, %v3270_v54  ;;  %v2986_v19 = vadd.f32 %v2985_v56, %v5684_v36  ;;  %v3548_v23 = vmax.f32 %v3420_v11, %v3484_v7 }
 0x2a6   : > { %v2987_v50 = vpop.f32.mrf.mxu0  ;;  %v3276_v41 = vpop.f32.mrf.mxu1 }
 0x2a7   : > { %v3485_v59 = vmul.f32 0.2, %v3421_v37  ;;  %v3275_v3 = vadd.f32 %v3274_v45, %v2986_v19 }
 0x2a8   : > { %v2988_v5 = vpop.f32.mrf.mxu0  ;;  %v3277_v12 = vpop.f32.mrf.mxu1 }
 0x2a9   : > { %v3549_v61 = vmax.f32 %v3421_v37, %v3485_v59  ;;  %v3422_v6 = vadd.f32 %v5792_v48, %v3275_v3  ;;  %v2989_v18 = vadd.f32 %v2988_v5, %v5689_v55 }
 0x2aa   : > { %v2990_v24 = vpop.f32.mrf.mxu0  ;;  %v3279_v13 = vpop.f32.mrf.mxu1 }
 0x2ab   : > { %v4568_v26 = vpack.c.bf16 %v3549_v61, %v3548_v23  ;;  %v3278_v43 = vadd.f32 %v3277_v12, %v2989_v18  ;;  %v3486_v36 = vmul.f32 0.2, %v3422_v6 }
 0x2ac   : > { %v2993_v53 = vpop.f32.mrf.mxu0  ;;  %v3282_v15 = vpop.f32.mrf.mxu1 }
 0x2ad   : > { %4652 = vst [vmem:[%s5811_s30 + $0x90] sm:$0xff] %v4568_v26   ;;  %v3423_v17 = vadd.f32 %v5792_v48, %v3278_v43  ;;  %v2994_v10 = vadd.f32 %v2993_v53, %v5692_v9  ;;  %v3550_v55 = vmax.f32 %v3422_v6, %v3486_v36  ;;  %v6015_v43 = vld [vmem:[#allocation2_spill] sm:$0xff] }
 0x2ae   : > { %v2995_v33 = vpop.f32.mrf.mxu0  ;;  %v3284_v63 = vpop.f32.mrf.mxu1 }
 0x2af   : > { %v3487_v28 = vmul.f32 0.2, %v3423_v17  ;;  %v3283_v2 = vadd.f32 %v3282_v15, %v2994_v10 }
 0x2b0   : > { %v2996_v30 = vpop.f32.mrf.mxu0  ;;  %v3285_v29 = vpop.f32.mrf.mxu1 }
 0x2b1   : > { %v3551_v38 = vmax.f32 %v3423_v17, %v3487_v28  ;;  %v3424_v27 = vadd.f32 %v5792_v48, %v3283_v2  ;;  %v2997_v14 = vadd.f32 %v2996_v30, %v5697_v25  ;;  %v5943_v2 = vld [vmem:[%s5995_s2] ss:$0 sm:$0xff]  ;;  %v6016_v30 = vld [vmem:[#allocation3_spill] sm:$0xff] }
 0x2b2   : > { %v2998_v1 = vpop.f32.mrf.mxu0  ;;  %v3287_v32 = vpop.f32.mrf.mxu1 }
 0x2b3   : > { %v4573_v58 = vpack.c.bf16 %v3551_v38, %v3550_v55  ;;  %v3286_v49 = vadd.f32 %v3285_v29, %v2997_v14  ;;  %v3488_v9 = vmul.f32 0.2, %v3424_v27  ;;  %v6017_v32 = vld [vmem:[#allocation4_spill] sm:$0xff] }
 0x2b4   : > { %v3001_v42 = vpop.f32.mrf.mxu0  ;;  %v3290_v34 = vpop.f32.mrf.mxu1 }
 0x2b5   : > { %4653 = vst [vmem:[%s5811_s30 + $0x98] sm:$0xff] %v4573_v58   ;;  %v3425_v39 = vadd.f32 %v5792_v48, %v3286_v49  ;;  %v3002_v51 = vadd.f32 %v3001_v42, %v5700_v44  ;;  %v3552_v25 = vmax.f32 %v3424_v27, %v3488_v9 }
 0x2b6   : > { %v3003_v47 = vpop.f32.mrf.mxu0  ;;  %v3292_v16 = vpop.f32.mrf.mxu1 }
 0x2b7   : > { %v3489_v40 = vmul.f32 0.2, %v3425_v39  ;;  %v3291_v62 = vadd.f32 %v3290_v34, %v3002_v51 }
 0x2b8   : > { %v3004_v35 = vpop.f32.mrf.mxu0  ;;  %v3293_v11 = vpop.f32.mrf.mxu1 }
 0x2b9   : > { %v3553_v8 = vmax.f32 %v3425_v39, %v3489_v40  ;;  %v3426_v57 = vadd.f32 %v5792_v48, %v3291_v62  ;;  %v3005_v20 = vadd.f32 %v3004_v35, %v5705_v0 }
 0x2ba   : > { %v3006_v4 = vpop.f32.mrf.mxu0  ;;  %v3295_v52 = vpop.f32.mrf.mxu1 }
 0x2bb   : > { %v4578_v31 = vpack.c.bf16 %v3553_v8, %v3552_v25  ;;  %v3294_v60 = vadd.f32 %v3293_v11, %v3005_v20  ;;  %v3490_v44 = vmul.f32 0.2, %v3426_v57  ;;  %v6018_v25 = vld [vmem:[#allocation5_spill] sm:$0xff] }
 0x2bc   : > { %v3009_v54 = vpop.f32.mrf.mxu0  ;;  %v3298_v7 = vpop.f32.mrf.mxu1 }
 0x2bd   : > { %4654 = vst [vmem:[%s5811_s30 + $0xa0] sm:$0xff] %v4578_v31   ;;  %v3427_v22 = vadd.f32 %v5792_v48, %v3294_v60  ;;  %v3010_v56 = vadd.f32 %v3009_v54, %v5708_v21  ;;  %v3554_v0 = vmax.f32 %v3426_v57, %v3490_v44  ;;  %v6019_v44 = vld [vmem:[#allocation6_spill] sm:$0xff] }
 0x2be   : > { %v3011_v37 = vpop.f32.mrf.mxu0  ;;  %v3300_v50 = vpop.f32.mrf.mxu1 }
 0x2bf   : > { %v3491_v19 = vmul.f32 0.2, %v3427_v22  ;;  %v3299_v45 = vadd.f32 %v3298_v7, %v3010_v56 }
 0x2c0   : > { %v3012_v59 = vpop.f32.mrf.mxu0  ;;  %v3301_v23 = vpop.f32.mrf.mxu1 }
 0x2c1   : > { %v3555_v3 = vmax.f32 %v3427_v22, %v3491_v19  ;;  %v3428_v41 = vadd.f32 %v5792_v48, %v3299_v45  ;;  %v3013_v5 = vadd.f32 %v3012_v59, %v5713_v46 }
 0x2c2   : > { %v3014_v61 = vpop.f32.mrf.mxu0  ;;  %v3303_v12 = vpop.f32.mrf.mxu1 }
 0x2c3   : > { %v4583_v6 = vpack.c.bf16 %v3555_v3, %v3554_v0  ;;  %v3302_v18 = vadd.f32 %v3301_v23, %v3013_v5  ;;  %v3492_v21 = vmul.f32 0.2, %v3428_v41 }
 0x2c4   : > { %v3017_v24 = vpop.f32.mrf.mxu0  ;;  %v3306_v53 = vpop.f32.mrf.mxu1 }
 0x2c5   : > { %4655 = vst [vmem:[%s5811_s30 + $0xa8] sm:$0xff] %v4583_v6   ;;  %v3429_v26 = vadd.f32 %v5792_v48, %v3302_v18  ;;  %v3018_v13 = vadd.f32 %v3017_v24, %v6015_v43  ;;  %v3556_v46 = vmax.f32 %v3428_v41, %v3492_v21  ;;  %v6020_v41 = vld [vmem:[#allocation7_spill] sm:$0xff]  ;;  %v6021_v43 = vld [vmem:[#allocation8_spill] sm:$0xff] }
 0x2c6   : > { %v3019_v36 = vpop.f32.mrf.mxu0  ;;  %v3308_v15 = vpop.f32.mrf.mxu1 }
 0x2c7   : > { %v3493_v17 = vmul.f32 0.2, %v3429_v26  ;;  %v3307_v10 = vadd.f32 %v3306_v53, %v3018_v13 }
 0x2c8   : > { %v3020_v33 = vpop.f32.mrf.mxu0  ;;  %v3309_v55 = vpop.f32.mrf.mxu1 }
 0x2c9   : > { %v3557_v28 = vmax.f32 %v3429_v26, %v3493_v17  ;;  %v3430_v63 = vadd.f32 %v5943_v2, %v3307_v10  ;;  %v3021_v48 = vadd.f32 %v3020_v33, %v6016_v30  ;;  %v6022_v30 = vld [vmem:[#allocation9_spill] sm:$0xff] }
 0x2ca   : > { %v3022_v38 = vpop.f32.mrf.mxu0  ;;  %v3311_v29 = vpop.f32.mrf.mxu1 }
 0x2cb   : > { %v4588_v27 = vpack.c.bf16 %v3557_v28, %v3556_v46  ;;  %v3310_v14 = vadd.f32 %v3309_v55, %v3021_v48  ;;  %v3494_v58 = vmul.f32 0.2, %v3430_v63 }
 0x2cc   : > { %v3025_v1 = vpop.f32.mrf.mxu0  ;;  %v3314_v9 = vpop.f32.mrf.mxu1 }
 0x2cd   : > { %4656 = vst [vmem:[%s5811_s30 + $0xb0] sm:$0xff] %v4588_v27   ;;  %v3431_v49 = vadd.f32 %v5943_v2, %v3310_v14  ;;  %v3026_v42 = vadd.f32 %v3025_v1, %v6017_v32  ;;  %v3558_v62 = vmax.f32 %v3430_v63, %v3494_v58  ;;  %v6023_v32 = vld [vmem:[#allocation10_spill] sm:$0xff] }
 0x2ce   : > { %v3027_v39 = vpop.f32.mrf.mxu0  ;;  %v3316_v47 = vpop.f32.mrf.mxu1 }
 0x2cf   : > { %v3495_v51 = vmul.f32 0.2, %v3431_v49  ;;  %v3315_v34 = vadd.f32 %v3314_v9, %v3026_v42 }
 0x2d0   : > { %v3028_v40 = vpop.f32.mrf.mxu0  ;;  %v3317_v57 = vpop.f32.mrf.mxu1 }
 0x2d1   : > { %v3559_v16 = vmax.f32 %v3431_v49, %v3495_v51  ;;  %v3432_v35 = vadd.f32 %v5943_v2, %v3315_v34  ;;  %v3029_v8 = vadd.f32 %v3028_v40, %v6018_v25  ;;  %v6024_v25 = vld [vmem:[#allocation11_spill] sm:$0xff] }
 0x2d2   : > { %v3030_v20 = vpop.f32.mrf.mxu0  ;;  %v3319_v31 = vpop.f32.mrf.mxu1 }
 0x2d3   : > { %v4593_v11 = vpack.c.bf16 %v3559_v16, %v3558_v62  ;;  %v3318_v4 = vadd.f32 %v3317_v57, %v3029_v8  ;;  %v3496_v52 = vmul.f32 0.2, %v3432_v35 }
 0x2d4   : > { %v3033_v60 = vpop.f32.mrf.mxu0  ;;  %v3322_v56 = vpop.f32.mrf.mxu1 }
 0x2d5   : > { %4657 = vst [vmem:[%s5811_s30 + $0xb8] sm:$0xff] %v4593_v11   ;;  %v3433_v54 = vadd.f32 %v5943_v2, %v3318_v4  ;;  %v3034_v22 = vadd.f32 %v3033_v60, %v6019_v44  ;;  %v3560_v59 = vmax.f32 %v3432_v35, %v3496_v52  ;;  %v6025_v44 = vld [vmem:[#allocation12_spill] sm:$0xff] }
 0x2d6   : > { %v3035_v7 = vpop.f32.mrf.mxu0  ;;  %v3324_v45 = vpop.f32.mrf.mxu1 }
 0x2d7   : > { %v3497_v37 = vmul.f32 0.2, %v3433_v54  ;;  %v3323_v19 = vadd.f32 %v3322_v56, %v3034_v22 }
 0x2d8   : > { %v3036_v50 = vpop.f32.mrf.mxu0  ;;  %v3325_v23 = vpop.f32.mrf.mxu1 }
 0x2d9   : > { %v3561_v0 = vmax.f32 %v3433_v54, %v3497_v37  ;;  %v3434_v3 = vadd.f32 %v5943_v2, %v3323_v19  ;;  %v3037_v5 = vadd.f32 %v3036_v50, %v6020_v41  ;;  %v6026_v41 = vld [vmem:[#allocation13_spill] sm:$0xff] }
 0x2da   : > { %v3038_v61 = vpop.f32.mrf.mxu0  ;;  %v3327_v12 = vpop.f32.mrf.mxu1 }
 0x2db   : > { %v4598_v6 = vpack.c.bf16 %v3561_v0, %v3560_v59  ;;  %v3326_v18 = vadd.f32 %v3325_v23, %v3037_v5  ;;  %v3498_v21 = vmul.f32 0.2, %v3434_v3 }
 0x2dc   : > { %v3041_v24 = vpop.f32.mrf.mxu0  ;;  %v3330_v53 = vpop.f32.mrf.mxu1 }
 0x2dd   : > { %4658 = vst [vmem:[%s5811_s30 + $0xc0] sm:$0xff] %v4598_v6   ;;  %v3435_v26 = vadd.f32 %v5943_v2, %v3326_v18  ;;  %v3042_v13 = vadd.f32 %v3041_v24, %v6021_v43  ;;  %v3562_v46 = vmax.f32 %v3434_v3, %v3498_v21  ;;  %v6027_v43 = vld [vmem:[#allocation14_spill] sm:$0xff] }
 0x2de   : > { %v3043_v36 = vpop.f32.mrf.mxu0  ;;  %v3332_v15 = vpop.f32.mrf.mxu1 }
 0x2df   : > { %v3499_v17 = vmul.f32 0.2, %v3435_v26  ;;  %v3331_v10 = vadd.f32 %v3330_v53, %v3042_v13 }
 0x2e0   : > { %v3044_v33 = vpop.f32.mrf.mxu0  ;;  %v3333_v55 = vpop.f32.mrf.mxu1 }
 0x2e1   : > { %v3563_v28 = vmax.f32 %v3435_v26, %v3499_v17  ;;  %v3436_v63 = vadd.f32 %v5943_v2, %v3331_v10  ;;  %v3045_v48 = vadd.f32 %v3044_v33, %v6022_v30  ;;  %v6028_v30 = vld [vmem:[#allocation15_spill] sm:$0xff] }
 0x2e2   : > { %v3046_v38 = vpop.f32.mrf.mxu0  ;;  %v3335_v29 = vpop.f32.mrf.mxu1 }
 0x2e3   : > { %v4603_v27 = vpack.c.bf16 %v3563_v28, %v3562_v46  ;;  %v3334_v14 = vadd.f32 %v3333_v55, %v3045_v48  ;;  %v3500_v58 = vmul.f32 0.2, %v3436_v63 }
 0x2e4   : > { %v3049_v1 = vpop.f32.mrf.mxu0  ;;  %v3338_v9 = vpop.f32.mrf.mxu1 }
 0x2e5   : > { %4659 = vst [vmem:[%s5811_s30 + $0xc8] sm:$0xff] %v4603_v27   ;;  %v3437_v49 = vadd.f32 %v5943_v2, %v3334_v14  ;;  %v3050_v42 = vadd.f32 %v3049_v1, %v6023_v32  ;;  %v3564_v62 = vmax.f32 %v3436_v63, %v3500_v58  ;;  %v6029_v32 = vld [vmem:[#allocation16_spill] sm:$0xff] }
 0x2e6   : > { %v3051_v39 = vpop.f32.mrf.mxu0  ;;  %v3340_v47 = vpop.f32.mrf.mxu1 }
 0x2e7   : > { %v3501_v51 = vmul.f32 0.2, %v3437_v49  ;;  %v3339_v34 = vadd.f32 %v3338_v9, %v3050_v42 }
 0x2e8   : > { %v3052_v40 = vpop.f32.mrf.mxu0  ;;  %v3341_v57 = vpop.f32.mrf.mxu1 }
 0x2e9   : > { %v3565_v16 = vmax.f32 %v3437_v49, %v3501_v51  ;;  %v3438_v35 = vadd.f32 %v5943_v2, %v3339_v34  ;;  %v3053_v8 = vadd.f32 %v3052_v40, %v6024_v25  ;;  %v6030_v25 = vld [vmem:[#allocation17_spill] sm:$0xff] }
 0x2ea   : > { %v3054_v20 = vpop.f32.mrf.mxu0  ;;  %v3343_v31 = vpop.f32.mrf.mxu1 }
 0x2eb   : > { %v4608_v11 = vpack.c.bf16 %v3565_v16, %v3564_v62  ;;  %v3342_v4 = vadd.f32 %v3341_v57, %v3053_v8  ;;  %v3502_v52 = vmul.f32 0.2, %v3438_v35 }
 0x2ec   : > { %v3057_v60 = vpop.f32.mrf.mxu0  ;;  %v3346_v56 = vpop.f32.mrf.mxu1 }
 0x2ed   : > { %4660 = vst [vmem:[%s5811_s30 + $0xd0] sm:$0xff] %v4608_v11   ;;  %v3439_v54 = vadd.f32 %v5943_v2, %v3342_v4  ;;  %v3058_v22 = vadd.f32 %v3057_v60, %v6025_v44  ;;  %v3566_v59 = vmax.f32 %v3438_v35, %v3502_v52  ;;  %v6031_v44 = vld [vmem:[#allocation18_spill] sm:$0xff] }
 0x2ee   : > { %v3059_v7 = vpop.f32.mrf.mxu0  ;;  %v3348_v45 = vpop.f32.mrf.mxu1 }
 0x2ef   : > { %v3503_v37 = vmul.f32 0.2, %v3439_v54  ;;  %v3347_v19 = vadd.f32 %v3346_v56, %v3058_v22 }
 0x2f0   : > { %v3060_v50 = vpop.f32.mrf.mxu0  ;;  %v3349_v23 = vpop.f32.mrf.mxu1 }
 0x2f1   : > { %v3567_v0 = vmax.f32 %v3439_v54, %v3503_v37  ;;  %v3440_v3 = vadd.f32 %v5943_v2, %v3347_v19  ;;  %v3061_v5 = vadd.f32 %v3060_v50, %v6026_v41  ;;  %v6032_v41 = vld [vmem:[#allocation19_spill] sm:$0xff] }
 0x2f2   : > { %v3062_v61 = vpop.f32.mrf.mxu0  ;;  %v3351_v12 = vpop.f32.mrf.mxu1 }
 0x2f3   : > { %v4613_v6 = vpack.c.bf16 %v3567_v0, %v3566_v59  ;;  %v3350_v18 = vadd.f32 %v3349_v23, %v3061_v5  ;;  %v3504_v21 = vmul.f32 0.2, %v3440_v3 }
 0x2f4   : > { %v3065_v24 = vpop.f32.mrf.mxu0  ;;  %v3354_v53 = vpop.f32.mrf.mxu1 }
 0x2f5   : > { %4661 = vst [vmem:[%s5811_s30 + $0xd8] sm:$0xff] %v4613_v6   ;;  %v3441_v26 = vadd.f32 %v5943_v2, %v3350_v18  ;;  %v3066_v13 = vadd.f32 %v3065_v24, %v6027_v43  ;;  %v3568_v46 = vmax.f32 %v3440_v3, %v3504_v21 }
 0x2f6   : > { %v3067_v36 = vpop.f32.mrf.mxu0  ;;  %v3356_v15 = vpop.f32.mrf.mxu1 }
 0x2f7   : > { %v3505_v17 = vmul.f32 0.2, %v3441_v26  ;;  %v3355_v10 = vadd.f32 %v3354_v53, %v3066_v13 }
 0x2f8   : > { %v3068_v33 = vpop.f32.mrf.mxu0  ;;  %v3357_v55 = vpop.f32.mrf.mxu1 }
 0x2f9   : > { %v3569_v28 = vmax.f32 %v3441_v26, %v3505_v17  ;;  %v3442_v63 = vadd.f32 %v5943_v2, %v3355_v10  ;;  %v3069_v48 = vadd.f32 %v3068_v33, %v6028_v30 }
 0x2fa   : > { %v3070_v38 = vpop.f32.mrf.mxu0  ;;  %v3359_v29 = vpop.f32.mrf.mxu1 }
 0x2fb   : > { %v4618_v27 = vpack.c.bf16 %v3569_v28, %v3568_v46  ;;  %v3358_v14 = vadd.f32 %v3357_v55, %v3069_v48  ;;  %v3506_v58 = vmul.f32 0.2, %v3442_v63 }
 0x2fc   : > { %v3073_v1 = vpop.f32.mrf.mxu0  ;;  %v3362_v9 = vpop.f32.mrf.mxu1 }
 0x2fd   : > { %4662 = vst [vmem:[%s5811_s30 + $0xe0] sm:$0xff] %v4618_v27   ;;  %v3443_v49 = vadd.f32 %v5943_v2, %v3358_v14  ;;  %v3074_v42 = vadd.f32 %v3073_v1, %v6029_v32  ;;  %v3570_v62 = vmax.f32 %v3442_v63, %v3506_v58 }
 0x2fe   : > { %v3075_v39 = vpop.f32.mrf.mxu0  ;;  %v3364_v47 = vpop.f32.mrf.mxu1 }
 0x2ff   : > { %v3507_v51 = vmul.f32 0.2, %v3443_v49  ;;  %v3363_v34 = vadd.f32 %v3362_v9, %v3074_v42 }
 0x300   : > { %v3076_v40 = vpop.f32.mrf.mxu0  ;;  %v3365_v57 = vpop.f32.mrf.mxu1 }
 0x301   : > { %v3571_v16 = vmax.f32 %v3443_v49, %v3507_v51  ;;  %v3444_v35 = vadd.f32 %v5943_v2, %v3363_v34  ;;  %v3077_v8 = vadd.f32 %v3076_v40, %v6030_v25 }
 0x302   : > { %v3078_v20 = vpop.f32.mrf.mxu0  ;;  %v3367_v31 = vpop.f32.mrf.mxu1 }
 0x303   : > { %v4623_v11 = vpack.c.bf16 %v3571_v16, %v3570_v62  ;;  %v3366_v4 = vadd.f32 %v3365_v57, %v3077_v8  ;;  %v3508_v52 = vmul.f32 0.2, %v3444_v35 }
 0x304   : > { %v3081_v60 = vpop.f32.mrf.mxu0  ;;  %v3370_v56 = vpop.f32.mrf.mxu1 }
 0x305   : > { %4663 = vst [vmem:[%s5811_s30 + $0xe8] sm:$0xff] %v4623_v11   ;;  %v3445_v54 = vadd.f32 %v5943_v2, %v3366_v4  ;;  %v3082_v22 = vadd.f32 %v3081_v60, %v6031_v44  ;;  %v3572_v59 = vmax.f32 %v3444_v35, %v3508_v52 }
 0x306   : > { %v3083_v7 = vpop.f32.mrf.mxu0  ;;  %v3372_v45 = vpop.f32.mrf.mxu1 }
 0x307   : > { %v3509_v37 = vmul.f32 0.2, %v3445_v54  ;;  %v3371_v19 = vadd.f32 %v3370_v56, %v3082_v22 }
 0x308   : > { %v3084_v50 = vpop.f32.mrf.mxu0  ;;  %v3373_v23 = vpop.f32.mrf.mxu1 }
 0x309   : > { %v3573_v0 = vmax.f32 %v3445_v54, %v3509_v37  ;;  %v3446_v3 = vadd.f32 %v5943_v2, %v3371_v19  ;;  %v3085_v5 = vadd.f32 %v3084_v50, %v6032_v41 }
 0x30a   : > { %v3086_v61 = vpop.f32.mrf.mxu0  ;;  %v3375_v12 = vpop.f32.mrf.mxu1 }
 0x30b   : > { %v4628_v6 = vpack.c.bf16 %v3573_v0, %v3572_v59  ;;  %v3374_v18 = vadd.f32 %v3373_v23, %v3085_v5  ;;  %v3510_v24 = vmul.f32 0.2, %v3446_v3 }
 0x30d   : > { %4664 = vst [vmem:[%s5811_s30 + $0xf0] sm:$0xff] %v4628_v6   ;;  %v3447_v21 = vadd.f32 %v5943_v2, %v3374_v18  ;;  %v3574_v43 = vmax.f32 %v3446_v3, %v3510_v24 }
 0x30f   : > { %v3511_v26 = vmul.f32 0.2, %v3447_v21 }
 0x311   : > { %v3575_v13 = vmax.f32 %v3447_v21, %v3511_v26 }
 0x313   : > { %v4633_v53 = vpack.c.bf16 %v3575_v13, %v3574_v43 }
 0x315   : > { %4665 = vst [vmem:[%s5811_s30 + $0xf8] sm:$0xff] %v4633_v53  }
 0x316 PF: > { %s13_s12 = sadd.s32 1, %s5131_s12  }
 0x317   : > { %p10_p4 = scmp.ge.s32.totalorder %s13_s12, 4  }
 0x319   :  { %12 = sbr.rel (!%p10_p4) target bundleno = 1 (0x1), region = 63 }

// kernel: _lambda_.6
= control target key start
LH: loop header
LB: loop body
LE: loop exit
PB: predicated region body
PF: predicated region fallthrough
CT: control target
= control target key end

     0   :  { %s3493_s12 = smov 0   ;;  %s4171_s0 = inlined_call_operand.vmem [shape: bf16[2,272,512], index: 0, kind: input, shape index: {}]   ;;  %s4172_s1 = inlined_call_operand.vmem [shape: bf16[2,512,128], index: 1, kind: input, shape index: {}]   ;;  %s4173_s2 = inlined_call_operand.vmem [shape: f32[1,128], index: 2, kind: input, shape index: {}]   ;;  %s4174_s3 = inlined_call_operand.vmem [shape: bf16[2,256,128], index: 3, kind: output, shape index: {}]  }
   0x1 LB: > { %s2415_s13 = sadd.s32 4294967295, %s3471_s12   ;;  %p2419_p0 = scmp.ge.s32.totalorder %s3471_s12, 1  ;;  %s3471_s12 = sphi %s3493_s12, %s13_s12  }
   0x2   : > { %p137_p1 = scmp.lt.s32.totalorder %s3471_s12, 3 }
   0x4   : > { %p138_p2 = pnand %p2419_p0, %p137_p1 }
   0x6   : > { %141 = sbr.rel (%p138_p2) target bundleno = 507 (0x1fb), region = 32 }
   0xb   : > { %v3299_v0 = vld [vmem:[%s4172_s1 + $0x178] sm:$0xff]   ;;  %v3303_v4 = vld [vmem:[%s4172_s1 + $0x170] sm:$0xff]   ;;  %v3307_v8 = vld [vmem:[%s4172_s1 + $0x168] sm:$0xff]   ;;  %p161_p3 = scmp.lt.s32.totalorder %s2415_s13, 1 }
   0xc   : > { %v3300_v1 = vld [vmem:[%s4172_s1 + $0x1f8] sm:$0xff]   ;;  %2842 = vmatprep.subr.bf16.mxu0 %v3299_v0  ;;  %v3304_v5 = vld [vmem:[%s4172_s1 + $0x1f0] sm:$0xff]   ;;  %v3308_v9 = vld [vmem:[%s4172_s1 + $0x1e8] sm:$0xff]  }
   0xd   : > { %v3301_v2 = vld [vmem:[%s4172_s1 + $0x138] sm:$0xff]   ;;  %2954 = vmatprep.subr.bf16.mxu1 %v3300_v1  ;;  %v3305_v6 = vld [vmem:[%s4172_s1 + $0x130] sm:$0xff]   ;;  %v3309_v10 = vld [vmem:[%s4172_s1 + $0x128] sm:$0xff]   ;;  %s4188_s13 = smov (!%p161_p3, %s2415_s13), 1 }
   0xe   : > { %v3302_v3 = vld [vmem:[%s4172_s1 + $0x1b8] sm:$0xff]   ;;  %2843 = vmatpush3.bf16.msra.mxu0 %v3301_v2  ;;  %v3306_v7 = vld [vmem:[%s4172_s1 + $0x1b0] sm:$0xff]   ;;  %v3310_v11 = vld [vmem:[%s4172_s1 + $0x1a8] sm:$0xff]   ;;  %s3290_s16 = smul.u32 544, %s4188_s13  ;;  %s2714_s24 = sshll.u32 %s4188_s13, 7 }
   0xf   : > { %2955 = vmatpush3.bf16.msra.mxu1 %v3302_v3  ;;  %2844 = vmatprep.subr.bf16.mxu0 %v3303_v4  ;;  %v3311_v12 = vld [vmem:[%s4172_s1 + $0x160] sm:$0xff]   ;;  %v3315_v16 = vld [vmem:[%s4172_s1 + $0x158] sm:$0xff]   ;;  %v3319_v20 = vld [vmem:[%s4172_s1 + $0x150] sm:$0xff]   ;;  %s4093_s28 = scalar_lea.vmem %s4174_s3, %s2714_s24 }
  0x10   : > { %2956 = vmatprep.subr.bf16.mxu1 %v3304_v5  ;;  %v3312_v13 = vld [vmem:[%s4172_s1 + $0x1e0] sm:$0xff]   ;;  %v3316_v17 = vld [vmem:[%s4172_s1 + $0x1d8] sm:$0xff]   ;;  %v3320_v21 = vld [vmem:[%s4172_s1 + $0x1d0] sm:$0xff]   ;;  %s3601_s27 = scalar_lea.vmem %s4171_s0, %s3290_s16 }
  0x11   : > { %v3313_v14 = vld [vmem:[%s4172_s1 + $0x120] sm:$0xff]   ;;  %v3317_v18 = vld [vmem:[%s4172_s1 + $0x118] sm:$0xff]   ;;  %v3321_v22 = vld [vmem:[%s4172_s1 + $0x110] sm:$0xff]  }
  0x12   : > { %2845 = vmatpush3.bf16.msra.mxu0 %v3305_v6  ;;  %v3314_v15 = vld [vmem:[%s4172_s1 + $0x1a0] sm:$0xff]   ;;  %v3318_v19 = vld [vmem:[%s4172_s1 + $0x198] sm:$0xff]   ;;  %v3322_v23 = vld [vmem:[%s4172_s1 + $0x190] sm:$0xff]  }
  0x13   : > { %2957 = vmatpush3.bf16.msra.mxu1 %v3306_v7  ;;  %2846 = vmatprep.subr.bf16.mxu0 %v3307_v8  ;;  %v3323_v24 = vld [vmem:[%s4172_s1 + $0x148] sm:$0xff]   ;;  %v3327_v28 = vld [vmem:[%s4172_s1 + $0x140] sm:$0xff]   ;;  %v3337_v36 = vld [vmem:[%s4172_s1 + $0x78] sm:$0xff]  }
  0x14   : > { %2958 = vmatprep.subr.bf16.mxu1 %v3308_v9  ;;  %v3324_v25 = vld [vmem:[%s4172_s1 + $0x1c8] sm:$0xff]   ;;  %v3328_v29 = vld [vmem:[%s4172_s1 + $0x1c0] sm:$0xff]   ;;  %v3338_v37 = vld [vmem:[%s4172_s1 + $0x38] sm:$0xff]  }
  0x15   : > { %v3325_v26 = vld [vmem:[%s4172_s1 + $0x108] sm:$0xff]   ;;  %v3329_v30 = vld [vmem:[%s4172_s1 + $0x100] sm:$0xff]   ;;  %v3339_v38 = vld [vmem:[%s4172_s1 + $0xf8] sm:$0xff]  }
  0x16   : > { %2847 = vmatpush3.bf16.msra.mxu0 %v3309_v10  ;;  %v3326_v27 = vld [vmem:[%s4172_s1 + $0x188] sm:$0xff]   ;;  %v3330_v31 = vld [vmem:[%s4172_s1 + $0x180] sm:$0xff]   ;;  %v3340_v39 = vld [vmem:[%s4172_s1 + $0xb8] sm:$0xff]  }
  0x17   : > { %2959 = vmatpush3.bf16.msra.mxu1 %v3310_v11  ;;  %2848 = vmatprep.subr.bf16.mxu0 %v3311_v12  ;;  %v3610_v32 = vld [vmem:[%s3601_s27 + $0x20] ss:$16 sps:$4 sm:$0xff]   ;;  %v3613_v33 = vld [vmem:[%s3601_s27 + $0x24] ss:$16 sps:$4 sm:$0xff]   ;;  %v3616_v34 = vld [vmem:[%s3601_s27 + $0x28] ss:$16 sps:$4 sm:$0xff]  }
  0x18   : > { %2960 = vmatprep.subr.bf16.mxu1 %v3312_v13  ;;  %v3619_v35 = vld [vmem:[%s3601_s27 + $0x2c] ss:$16 sps:$4 sm:$0xff]   ;;  %973 = vmatprep.mubr.bf16.mxu0 %v3613_v33  ;;  %v3638_v40 = vld [vmem:[%s3601_s27 + $0x44] ss:$16 sps:$4 sm:$0xff]   ;;  %v3644_v42 = vld [vmem:[%s3601_s27 + $0x40] ss:$16 sps:$4 sm:$0xff]  }
  0x19   : > { %1134 = vmatprep.mubr.bf16.mxu1 %v3619_v35  ;;  %v3641_v41 = vld [vmem:[%s3601_s27 + $0x4c] ss:$16 sps:$4 sm:$0xff]   ;;  %v3648_v43 = vld [vmem:[%s3601_s27 + $0x48] ss:$16 sps:$4 sm:$0xff]   ;;  %v3652_v44 = vld [vmem:[%s3601_s27 + $0x64] ss:$16 sps:$4 sm:$0xff]  }
  0x1a   : > { %2849 = vmatpush3.bf16.msra.mxu0 %v3313_v14  ;;  %v3655_v45 = vld [vmem:[%s3601_s27 + $0x6c] ss:$16 sps:$4 sm:$0xff]   ;;  %v3353_v46 = vld [vmem:[%s4172_s1 + $0x70] sm:$0xff]   ;;  %v3677_v51 = vld [vmem:[%s3601_s27 + $0x68] ss:$16 sps:$4 sm:$0xff]  }
  0x1b   : > { %2961 = vmatpush3.bf16.msra.mxu1 %v3314_v15  ;;  %2850 = vmatprep.subr.bf16.mxu0 %v3315_v16  ;;  %v3354_v47 = vld [vmem:[%s4172_s1 + $0x30] sm:$0xff]   ;;  %v3683_v53 = vld [vmem:[%s3601_s27 + $0x8c] ss:$16 sps:$4 sm:$0xff]   ;;  %v3696_v56 = vld [vmem:[%s3601_s27 + $0x88] ss:$16 sps:$4 sm:$0xff]  }
  0x1c   : > { %2962 = vmatprep.subr.bf16.mxu1 %v3316_v17  ;;  %v3668_v48 = vld [vmem:[%s3601_s27 + $0x60] ss:$16 sps:$4 sm:$0xff]   ;;  %v3680_v52 = vld [vmem:[%s3601_s27 + $0x84] ss:$16 sps:$4 sm:$0xff]   ;;  %v3369_v55 = vld [vmem:[%s4172_s1 + $0x68] sm:$0xff]  }
  0x1d   : > { %v3355_v49 = vld [vmem:[%s4172_s1 + $0xf0] sm:$0xff]   ;;  %v3370_v58 = vld [vmem:[%s4172_s1 + $0x28] sm:$0xff]   ;;  %v3385_v1 = vld [vmem:[%s4172_s1 + $0x60] sm:$0xff]  }
  0x1e   : > { %2851 = vmatpush3.bf16.msra.mxu0 %v3317_v18  ;;  %v3356_v50 = vld [vmem:[%s4172_s1 + $0xb0] sm:$0xff]   ;;  %v3371_v59 = vld [vmem:[%s4172_s1 + $0xe8] sm:$0xff]   ;;  %v3386_v3 = vld [vmem:[%s4172_s1 + $0x20] sm:$0xff]  }
  0x1f   : > { %2963 = vmatpush3.bf16.msra.mxu1 %v3318_v19  ;;  %2852 = vmatprep.subr.bf16.mxu0 %v3319_v20  ;;  %v3690_v54 = vld [vmem:[%s3601_s27 + $0x80] ss:$16 sps:$4 sm:$0xff]   ;;  %v3699_v57 = vld [vmem:[%s3601_s27 + $0xa4] ss:$16 sps:$4 sm:$0xff]   ;;  %v3372_v60 = vld [vmem:[%s4172_s1 + $0xa8] sm:$0xff]  }
  0x20   : > { %2964 = vmatprep.subr.bf16.mxu1 %v3320_v21  ;;  %v3711_v61 = vld [vmem:[%s3601_s27 + $0xac] ss:$16 sps:$4 sm:$0xff]   ;;  %v3718_v62 = vld [vmem:[%s3601_s27 + $0xa0] ss:$16 sps:$4 sm:$0xff]   ;;  %v3721_v63 = vld [vmem:[%s3601_s27 + $0xa8] ss:$16 sps:$4 sm:$0xff]  }
  0x21   : > { %v3724_v0 = vld [vmem:[%s3601_s27 + $0xc4] ss:$16 sps:$4 sm:$0xff]   ;;  %v3730_v2 = vld [vmem:[%s3601_s27 + $0xcc] ss:$16 sps:$4 sm:$0xff]   ;;  %v3746_v6 = vld [vmem:[%s3601_s27 + $0xc0] ss:$16 sps:$4 sm:$0xff]  }
  0x22   : > { %2853 = vmatpush3.bf16.msra.mxu0 %v3321_v22  ;;  %v3387_v4 = vld [vmem:[%s4172_s1 + $0xe0] sm:$0xff]   ;;  %v3749_v7 = vld [vmem:[%s3601_s27 + $0xc8] ss:$16 sps:$4 sm:$0xff]   ;;  %v3755_v9 = vld [vmem:[%s3601_s27 + $0xec] ss:$16 sps:$4 sm:$0xff]  }
  0x23   : > { %2965 = vmatpush3.bf16.msra.mxu1 %v3322_v23  ;;  %2854 = vmatprep.subr.bf16.mxu0 %v3323_v24  ;;  %v3388_v5 = vld [vmem:[%s4172_s1 + $0xa0] sm:$0xff]   ;;  %v3401_v10 = vld [vmem:[%s4172_s1 + $0x58] sm:$0xff]   ;;  %v3417_v18 = vld [vmem:[%s4172_s1 + $0x50] sm:$0xff]  }
  0x24   : > { %2966 = vmatprep.subr.bf16.mxu1 %v3324_v25  ;;  %v3752_v8 = vld [vmem:[%s3601_s27 + $0xe4] ss:$16 sps:$4 sm:$0xff]   ;;  %v3402_v11 = vld [vmem:[%s4172_s1 + $0x18] sm:$0xff]   ;;  %v3774_v14 = vld [vmem:[%s3601_s27 + $0xe0] ss:$16 sps:$4 sm:$0xff]  }
  0x25   : > { %v3403_v12 = vld [vmem:[%s4172_s1 + $0xd8] sm:$0xff]   ;;  %v3780_v16 = vld [vmem:[%s3601_s27 + $0x104] ss:$16 sps:$4 sm:$0xff]   ;;  %v3802_v22 = vld [vmem:[%s3601_s27 + $0x100] ss:$16 sps:$4 sm:$0xff]  }
  0x26   : > { %2855 = vmatpush3.bf16.msra.mxu0 %v3325_v26  ;;  %v3404_v13 = vld [vmem:[%s4172_s1 + $0x98] sm:$0xff]   ;;  %v3418_v19 = vld [vmem:[%s4172_s1 + $0x10] sm:$0xff]   ;;  %v3433_v26 = vld [vmem:[%s4172_s1 + $0x48] sm:$0xff]  }
  0x27   : > { %2967 = vmatpush3.bf16.msra.mxu1 %v3326_v27  ;;  %2856 = vmatprep.subr.bf16.mxu0 %v3327_v28  ;;  %v3777_v15 = vld [vmem:[%s3601_s27 + $0xe8] ss:$16 sps:$4 sm:$0xff]   ;;  %v3783_v17 = vld [vmem:[%s3601_s27 + $0x10c] ss:$16 sps:$4 sm:$0xff]   ;;  %v3419_v20 = vld [vmem:[%s4172_s1 + $0xd0] sm:$0xff]  }
  0x28   : > { %2968 = vmatprep.subr.bf16.mxu1 %v3328_v29  ;;  %v3420_v21 = vld [vmem:[%s4172_s1 + $0x90] sm:$0xff]   ;;  %v3805_v23 = vld [vmem:[%s3601_s27 + $0x108] ss:$16 sps:$4 sm:$0xff]   ;;  %v3811_v25 = vld [vmem:[%s3601_s27 + $0x12c] ss:$16 sps:$4 sm:$0xff]  }
  0x29   : > { %v3808_v24 = vld [vmem:[%s3601_s27 + $0x124] ss:$16 sps:$4 sm:$0xff]   ;;  %v3434_v27 = vld [vmem:[%s4172_s1 + $0x8] sm:$0xff]  }
  0x2a   : > { %2857 = vmatpush3.bf16.msra.mxu0 %v3329_v30  ;;  %v3435_v28 = vld [vmem:[%s4172_s1 + $0xc8] sm:$0xff]   ;;  %v3830_v30 = vld [vmem:[%s3601_s27 + $0x120] ss:$16 sps:$4 sm:$0xff]  }
  0x2b   : > { %2969 = vmatpush3.bf16.msra.mxu1 %v3330_v31  ;;  %3066 = vmatprep.subr.bf16.mxu0 %v3337_v36  ;;  %v3436_v29 = vld [vmem:[%s4172_s1 + $0x88] sm:$0xff]   ;;  %v3836_v36 = vld [vmem:[%s3601_s27 + $0x144] ss:$16 sps:$4 sm:$0xff]  }
  0x2c   : > { %3178 = vmatprep.subr.bf16.mxu1 %v3339_v38  ;;  %v3833_v31 = vld [vmem:[%s3601_s27 + $0x128] ss:$16 sps:$4 sm:$0xff]   ;;  %v3449_v38 = vld [vmem:[%s4172_s1 + $0x40] sm:$0xff]  }
  0x2d   : > { %974 = vmatmul.mubr.bf16.vlgmr.msra.gmra.mxu0 %v3610_v32 }
  0x2e   : > { %1135 = vmatmul.mubr.bf16.vlgmr.msra.gmra.mxu1 %v3616_v34  ;;  %3067 = vmatpush3.bf16.msra.mxu0 %v3338_v37  ;;  %v3839_v37 = vld [vmem:[%s3601_s27 + $0x14c] ss:$16 sps:$4 sm:$0xff]  }
  0x2f   : > { %3179 = vmatpush3.bf16.msra.mxu1 %v3340_v39  ;;  %981 = vmatprep.mubr.bf16.mxu0 %v3638_v40  ;;  %v3450_v39 = vld [vmem:[%s4172_s1] sm:$0xff]  }
  0x30   : > { %1142 = vmatprep.mubr.bf16.mxu1 %v3641_v41  ;;  %3068 = vmatprep.subr.bf16.mxu0 %v3353_v46  ;;  %v3852_v46 = vld [vmem:[%s3601_s27 + $0x140] ss:$16 sps:$4 sm:$0xff]  }
  0x31   : > { %3180 = vmatprep.subr.bf16.mxu1 %v3355_v49  ;;  %v3452_v49 = vld [vmem:[%s4172_s1 + $0x80] sm:$0xff]  }
  0x32   : > { %3069 = vmatpush3.bf16.msra.mxu0 %v3354_v47  ;;  %v3451_v47 = vld [vmem:[%s4172_s1 + $0xc0] sm:$0xff]  }
  0x33   : > { %3181 = vmatpush3.bf16.msra.mxu1 %v3356_v50  ;;  %3070 = vmatprep.subr.bf16.mxu0 %v3369_v55  ;;  %v3861_v50 = vld [vmem:[%s3601_s27 + $0x148] ss:$16 sps:$4 sm:$0xff]   ;;  %v3864_v55 = vld [vmem:[%s3601_s27 + $0x164] ss:$16 sps:$4 sm:$0xff]  }
  0x34   : > { %3182 = vmatprep.subr.bf16.mxu1 %v3371_v59  ;;  %v3874_v59 = vld [vmem:[%s3601_s27 + $0x160] ss:$16 sps:$4 sm:$0xff]  }
  0x35   : > { %982 = vmatmul.mubr.bf16.gmra.mxu0 %v3644_v42 }
  0x36   : > { %1143 = vmatmul.mubr.bf16.gmra.mxu1 %v3648_v43  ;;  %989 = vmatprep.mubr.bf16.mxu0 %v3652_v44 }
  0x37   : > { %1150 = vmatprep.mubr.bf16.mxu1 %v3655_v45  ;;  %3071 = vmatpush3.bf16.msra.mxu0 %v3370_v58  ;;  %v3867_v58 = vld [vmem:[%s3601_s27 + $0x16c] ss:$16 sps:$4 sm:$0xff]  }
  0x38   : > { %3183 = vmatpush3.bf16.msra.mxu1 %v3372_v60  ;;  %3072 = vmatprep.subr.bf16.mxu0 %v3385_v1  ;;  %v3877_v60 = vld [vmem:[%s3601_s27 + $0x168] ss:$16 sps:$4 sm:$0xff]   ;;  %v3880_v1 = vld [vmem:[%s3601_s27 + $0x184] ss:$16 sps:$4 sm:$0xff]  }
  0x39   : > { %3184 = vmatprep.subr.bf16.mxu1 %v3387_v4  ;;  %v3890_v4 = vld [vmem:[%s3601_s27 + $0x180] ss:$16 sps:$4 sm:$0xff]  }
  0x3b   : > { %3073 = vmatpush3.bf16.msra.mxu0 %v3386_v3  ;;  %v3883_v3 = vld [vmem:[%s3601_s27 + $0x18c] ss:$16 sps:$4 sm:$0xff]  }
  0x3c   : > { %3185 = vmatpush3.bf16.msra.mxu1 %v3388_v5  ;;  %3074 = vmatprep.subr.bf16.mxu0 %v3401_v10  ;;  %v3893_v5 = vld [vmem:[%s3601_s27 + $0x188] ss:$16 sps:$4 sm:$0xff]   ;;  %v3896_v10 = vld [vmem:[%s3601_s27 + $0x1a4] ss:$16 sps:$4 sm:$0xff]  }
  0x3d   : > { %990 = vmatmul.mubr.bf16.gmra.mxu0 %v3668_v48  ;;  %3186 = vmatprep.subr.bf16.mxu1 %v3403_v12  ;;  %v3906_v12 = vld [vmem:[%s3601_s27 + $0x1a0] ss:$16 sps:$4 sm:$0xff]  }
  0x3e   : > { %1151 = vmatmul.mubr.bf16.gmra.mxu1 %v3677_v51  ;;  %997 = vmatprep.mubr.bf16.mxu0 %v3680_v52 }
  0x3f   : > { %1158 = vmatprep.mubr.bf16.mxu1 %v3683_v53  ;;  %3075 = vmatpush3.bf16.msra.mxu0 %v3402_v11  ;;  %v3899_v11 = vld [vmem:[%s3601_s27 + $0x1ac] ss:$16 sps:$4 sm:$0xff]  }
  0x40   : > { %3187 = vmatpush3.bf16.msra.mxu1 %v3404_v13  ;;  %3076 = vmatprep.subr.bf16.mxu0 %v3417_v18  ;;  %v3909_v13 = vld [vmem:[%s3601_s27 + $0x1a8] ss:$16 sps:$4 sm:$0xff]   ;;  %v3912_v18 = vld [vmem:[%s3601_s27 + $0x1c4] ss:$16 sps:$4 sm:$0xff]  }
  0x41   : > { %3188 = vmatprep.subr.bf16.mxu1 %v3419_v20  ;;  %v3922_v20 = vld [vmem:[%s3601_s27 + $0x1c0] ss:$16 sps:$4 sm:$0xff]  }
  0x42   : > { %4179 = vst [vmem:[#allocation2_spill] sm:$0xff] %v3922_v20 }
  0x43   : > { %3077 = vmatpush3.bf16.msra.mxu0 %v3418_v19  ;;  %v3915_v19 = vld [vmem:[%s3601_s27 + $0x1cc] ss:$16 sps:$4 sm:$0xff]  }
  0x44   : > { %3189 = vmatpush3.bf16.msra.mxu1 %v3420_v21  ;;  %3078 = vmatprep.subr.bf16.mxu0 %v3433_v26  ;;  %v3925_v21 = vld [vmem:[%s3601_s27 + $0x1c8] ss:$16 sps:$4 sm:$0xff]   ;;  %v3928_v26 = vld [vmem:[%s3601_s27 + $0x1e4] ss:$16 sps:$4 sm:$0xff]  }
  0x45   : > { %998 = vmatmul.mubr.bf16.gmra.mxu0 %v3690_v54  ;;  %3190 = vmatprep.subr.bf16.mxu1 %v3435_v28  ;;  %4180 = vst [vmem:[#allocation3_spill] sm:$0xff] %v3925_v21  ;;  %4181 = vst [vmem:[#allocation4_spill] sm:$0xff] %v3928_v26  ;;  %v3938_v28 = vld [vmem:[%s3601_s27 + $0x1e0] ss:$16 sps:$4 sm:$0xff]  }
  0x46   : > { %1159 = vmatmul.mubr.bf16.gmra.mxu1 %v3696_v56  ;;  %1005 = vmatprep.mubr.bf16.mxu0 %v3699_v57 }
  0x47   : > { %1166 = vmatprep.mubr.bf16.mxu1 %v3711_v61  ;;  %3079 = vmatpush3.bf16.msra.mxu0 %v3434_v27  ;;  %v3931_v27 = vld [vmem:[%s3601_s27 + $0x1ec] ss:$16 sps:$4 sm:$0xff]  }
  0x48   : > { %3191 = vmatpush3.bf16.msra.mxu1 %v3436_v29  ;;  %3080 = vmatprep.subr.bf16.mxu0 %v3449_v38  ;;  %4182 = vst [vmem:[#allocation5_spill] sm:$0xff] %v3931_v27  ;;  %v3941_v29 = vld [vmem:[%s3601_s27 + $0x1e8] ss:$16 sps:$4 sm:$0xff]   ;;  %v3453_v38 = vld [vmem:[%s3601_s27 + $0x204] ss:$16 sps:$4 sm:$0xff]  }
  0x49   : > { %3192 = vmatprep.subr.bf16.mxu1 %v3451_v47  ;;  %v3457_v47 = vld [vmem:[%s3601_s27 + $0x200] ss:$16 sps:$4 sm:$0xff]  }
  0x4b   : > { %3081 = vmatpush3.bf16.msra.mxu0 %v3450_v39  ;;  %v3455_v39 = vld [vmem:[%s3601_s27 + $0x20c] ss:$16 sps:$4 sm:$0xff]  }
  0x4c   : > { %3193 = vmatpush3.bf16.msra.mxu1 %v3452_v49  ;;  %v3458_v49 = vld [vmem:[%s3601_s27 + $0x208] ss:$16 sps:$4 sm:$0xff]  }
  0x4d   : > { %1006 = vmatmul.mubr.bf16.gmra.mxu0 %v3718_v62 }
  0x4e   : > { %1167 = vmatmul.mubr.bf16.gmra.mxu1 %v3721_v63  ;;  %1013 = vmatprep.mubr.bf16.mxu0 %v3724_v0 }
  0x4f   : > { %1174 = vmatprep.mubr.bf16.mxu1 %v3730_v2 }
  0x55   : > { %1014 = vmatmul.mubr.bf16.gmra.mxu0 %v3746_v6 }
  0x56   : > { %1175 = vmatmul.mubr.bf16.gmra.mxu1 %v3749_v7  ;;  %1021 = vmatprep.mubr.bf16.mxu0 %v3752_v8 }
  0x57   : > { %1182 = vmatprep.mubr.bf16.mxu1 %v3755_v9 }
  0x5d   : > { %1022 = vmatmul.mubr.bf16.gmra.mxu0 %v3774_v14 }
  0x5e   : > { %1183 = vmatmul.mubr.bf16.gmra.mxu1 %v3777_v15  ;;  %1029 = vmatprep.mubr.bf16.mxu0 %v3780_v16 }
  0x5f   : > { %1190 = vmatprep.mubr.bf16.mxu1 %v3783_v17 }
  0x65   : > { %1030 = vmatmul.mubr.bf16.gmra.mxu0 %v3802_v22 }
  0x66   : > { %1191 = vmatmul.mubr.bf16.gmra.mxu1 %v3805_v23  ;;  %1037 = vmatprep.mubr.bf16.mxu0 %v3808_v24 }
  0x67   : > { %1198 = vmatprep.mubr.bf16.mxu1 %v3811_v25 }
  0x6d   : > { %1038 = vmatmul.mubr.bf16.gmra.mxu0 %v3830_v30 }
  0x6e   : > { %1199 = vmatmul.mubr.bf16.gmra.mxu1 %v3833_v31  ;;  %1045 = vmatprep.mubr.bf16.mxu0 %v3836_v36 }
  0x6f   : > { %1206 = vmatprep.mubr.bf16.mxu1 %v3839_v37 }
  0x75   : > { %1046 = vmatmul.mubr.bf16.gmra.mxu0 %v3852_v46 }
  0x76   : > { %1207 = vmatmul.mubr.bf16.gmra.mxu1 %v3861_v50  ;;  %1053 = vmatprep.mubr.bf16.mxu0 %v3864_v55 }
  0x77   : > { %1214 = vmatprep.mubr.bf16.mxu1 %v3867_v58 }
  0x7d   : > { %1054 = vmatmul.mubr.bf16.gmra.mxu0 %v3874_v59 }
  0x7e   : > { %1215 = vmatmul.mubr.bf16.gmra.mxu1 %v3877_v60  ;;  %1061 = vmatprep.mubr.bf16.mxu0 %v3880_v1 }
  0x7f   : > { %1222 = vmatprep.mubr.bf16.mxu1 %v3883_v3 }
  0x85   : > { %1062 = vmatmul.mubr.bf16.gmra.mxu0 %v3890_v4 }
  0x86   : > { %1223 = vmatmul.mubr.bf16.gmra.mxu1 %v3893_v5  ;;  %1069 = vmatprep.mubr.bf16.mxu0 %v3896_v10 }
  0x87   : > { %1230 = vmatprep.mubr.bf16.mxu1 %v3899_v11 }
  0x8d   : > { %1070 = vmatmul.mubr.bf16.gmra.mxu0 %v3906_v12 }
  0x8e   : > { %1231 = vmatmul.mubr.bf16.gmra.mxu1 %v3909_v13  ;;  %1077 = vmatprep.mubr.bf16.mxu0 %v3912_v18 }
  0x8f   : > { %1238 = vmatprep.mubr.bf16.mxu1 %v3915_v19 }
  0x95   : > { %1078 = vmatmul.mubr.bf16.gmra.mxu0 %v3922_v20  ;;  %v3462_v20 = vld [vmem:[%s3601_s27 + $0x8] ss:$16 sps:$4 sm:$0xff]  }
  0x96   : > { %1239 = vmatmul.mubr.bf16.gmra.mxu1 %v3925_v21  ;;  %1085 = vmatprep.mubr.bf16.mxu0 %v3928_v26  ;;  %v3461_v21 = vld [vmem:[%s3601_s27 + $0x4] ss:$16 sps:$4 sm:$0xff]   ;;  %v3464_v26 = vld [vmem:[%s3601_s27 + $0xc] ss:$16 sps:$4 sm:$0xff]  }
  0x97   : > { %1246 = vmatprep.mubr.bf16.mxu1 %v3931_v27  ;;  %v3459_v27 = vld [vmem:[%s3601_s27] ss:$16 sps:$4 sm:$0xff]  }
  0x9d   : > { %1086 = vmatmul.mubr.bf16.gmra.mxu0 %v3938_v28 }
  0x9e   : > { %1247 = vmatmul.mubr.bf16.gmra.mxu1 %v3941_v29  ;;  %1093 = vmatprep.mubr.bf16.mxu0 %v3453_v38 }
  0x9f   : > { %1254 = vmatprep.mubr.bf16.mxu1 %v3455_v39 }
  0xa5   : > { %1094 = vmatmul.mubr.bf16.gmra.mxu0 %v3457_v47 }
  0xa6   : > { %1255 = vmatmul.mubr.bf16.gmra.mxu1 %v3458_v49  ;;  %1807 = vmatprep.mubr.bf16.mxu0 %v3461_v21 }
  0xa7   : > { %1968 = vmatprep.mubr.bf16.mxu1 %v3464_v26 }
  0xad   : > { %1808 = vmatmul.mubr.bf16.vlgmr.msra.gmra.mxu0 %v3459_v27 }
  0xae   : > { %1969 = vmatmul.mubr.bf16.vlgmr.msra.gmra.mxu1 %v3462_v20  ;;  %1815 = vmatprep.mubr.bf16.mxu0 %v3613_v33 }
  0xaf   : > { %1976 = vmatprep.mubr.bf16.mxu1 %v3619_v35 }
  0xb5   : > { %1816 = vmatmul.mubr.bf16.gmra.mxu0 %v3610_v32 }
  0xb6   : > { %1977 = vmatmul.mubr.bf16.gmra.mxu1 %v3616_v34  ;;  %1823 = vmatprep.mubr.bf16.mxu0 %v3638_v40 }
  0xb7   : > { %1984 = vmatprep.mubr.bf16.mxu1 %v3641_v41 }
  0xbd   : > { %1824 = vmatmul.mubr.bf16.gmra.mxu0 %v3644_v42 }
  0xbe   : > { %1985 = vmatmul.mubr.bf16.gmra.mxu1 %v3648_v43  ;;  %1831 = vmatprep.mubr.bf16.mxu0 %v3652_v44 }
  0xbf   : > { %1992 = vmatprep.mubr.bf16.mxu1 %v3655_v45 }
  0xc5   : > { %1832 = vmatmul.mubr.bf16.gmra.mxu0 %v3668_v48 }
  0xc6   : > { %1993 = vmatmul.mubr.bf16.gmra.mxu1 %v3677_v51  ;;  %1839 = vmatprep.mubr.bf16.mxu0 %v3680_v52 }
  0xc7   : > { %2000 = vmatprep.mubr.bf16.mxu1 %v3683_v53 }
  0xcd   : > { %1840 = vmatmul.mubr.bf16.gmra.mxu0 %v3690_v54 }
  0xce   : > { %2001 = vmatmul.mubr.bf16.gmra.mxu1 %v3696_v56  ;;  %1847 = vmatprep.mubr.bf16.mxu0 %v3699_v57 }
  0xcf   : > { %2008 = vmatprep.mubr.bf16.mxu1 %v3711_v61 }
  0xd5   : > { %1848 = vmatmul.mubr.bf16.gmra.mxu0 %v3718_v62 }
  0xd6   : > { %2009 = vmatmul.mubr.bf16.gmra.mxu1 %v3721_v63  ;;  %1855 = vmatprep.mubr.bf16.mxu0 %v3724_v0 }
  0xd7   : > { %2016 = vmatprep.mubr.bf16.mxu1 %v3730_v2 }
  0xdd   : > { %1856 = vmatmul.mubr.bf16.gmra.mxu0 %v3746_v6 }
  0xde   : > { %2017 = vmatmul.mubr.bf16.gmra.mxu1 %v3749_v7  ;;  %1863 = vmatprep.mubr.bf16.mxu0 %v3752_v8 }
  0xdf   : > { %2024 = vmatprep.mubr.bf16.mxu1 %v3755_v9 }
  0xe5   : > { %1864 = vmatmul.mubr.bf16.gmra.mxu0 %v3774_v14 }
  0xe6   : > { %2025 = vmatmul.mubr.bf16.gmra.mxu1 %v3777_v15  ;;  %1871 = vmatprep.mubr.bf16.mxu0 %v3780_v16 }
  0xe7   : > { %2032 = vmatprep.mubr.bf16.mxu1 %v3783_v17 }
  0xed   : > { %v2858_v32 = vpop.f32.mrf.mxu0  ;;  %1872 = vmatmul.mubr.bf16.gmra.mxu0 %v3802_v22 }
  0xee   : > { %v2970_v33 = vpop.f32.mrf.mxu1  ;;  %2033 = vmatmul.mubr.bf16.gmra.mxu1 %v3805_v23  ;;  %1879 = vmatprep.mubr.bf16.mxu0 %v3808_v24 }
  0xef   : > { %v2859_v34 = vpop.f32.mrf.mxu0  ;;  %2040 = vmatprep.mubr.bf16.mxu1 %v3811_v25 }
  0xf0   : > { %v2860_v35 = vadd.f32 %v2859_v34, %v2858_v32  ;;  %v2971_v40 = vpop.f32.mrf.mxu1 }
  0xf1   : > { %v2972_v41 = vadd.f32 %v2971_v40, %v2970_v33  ;;  %v2861_v42 = vpop.f32.mrf.mxu0 }
  0xf2   : > { %v2973_v43 = vpop.f32.mrf.mxu1 }
  0xf3   : > { %v3987_v44 = vadd.f32 %v2972_v41, %v2860_v35  ;;  %v2862_v45 = vpop.f32.mrf.mxu0 }
  0xf4   : > { %v2863_v48 = vadd.f32 %v2862_v45, %v2861_v42  ;;  %v2974_v51 = vpop.f32.mrf.mxu1 }
  0xf5   : > { %v2975_v52 = vadd.f32 %v2974_v51, %v2973_v43  ;;  %v2864_v53 = vpop.f32.mrf.mxu0  ;;  %1880 = vmatmul.mubr.bf16.gmra.mxu0 %v3830_v30 }
  0xf6   : > { %v2976_v54 = vpop.f32.mrf.mxu1  ;;  %2041 = vmatmul.mubr.bf16.gmra.mxu1 %v3833_v31  ;;  %1887 = vmatprep.mubr.bf16.mxu0 %v3836_v36 }
  0xf7   : > { %v3992_v56 = vadd.f32 %v2975_v52, %v2863_v48  ;;  %v2865_v57 = vpop.f32.mrf.mxu0  ;;  %2048 = vmatprep.mubr.bf16.mxu1 %v3839_v37 }
  0xf8   : > { %v2866_v61 = vadd.f32 %v2865_v57, %v2864_v53  ;;  %v2977_v62 = vpop.f32.mrf.mxu1 }
  0xf9   : > { %v2978_v63 = vadd.f32 %v2977_v62, %v2976_v54  ;;  %v2867_v0 = vpop.f32.mrf.mxu0 }
  0xfa   : > { %v2979_v2 = vpop.f32.mrf.mxu1 }
  0xfb   : > { %v3995_v6 = vadd.f32 %v2978_v63, %v2866_v61  ;;  %v2868_v7 = vpop.f32.mrf.mxu0 }
  0xfc   : > { %v2869_v8 = vadd.f32 %v2868_v7, %v2867_v0  ;;  %v2980_v9 = vpop.f32.mrf.mxu1 }
  0xfd   : > { %v2981_v14 = vadd.f32 %v2980_v9, %v2979_v2  ;;  %v2870_v15 = vpop.f32.mrf.mxu0  ;;  %1888 = vmatmul.mubr.bf16.gmra.mxu0 %v3852_v46 }
  0xfe   : > { %v2982_v16 = vpop.f32.mrf.mxu1  ;;  %2049 = vmatmul.mubr.bf16.gmra.mxu1 %v3861_v50  ;;  %1895 = vmatprep.mubr.bf16.mxu0 %v3864_v55 }
  0xff   : > { %v4000_v17 = vadd.f32 %v2981_v14, %v2869_v8  ;;  %v2871_v22 = vpop.f32.mrf.mxu0  ;;  %2056 = vmatprep.mubr.bf16.mxu1 %v3867_v58 }
 0x100   : > { %v2872_v23 = vadd.f32 %v2871_v22, %v2870_v15  ;;  %v2983_v24 = vpop.f32.mrf.mxu1  ;;  %v4185_v22 = vld [vmem:[#allocation4_spill] sm:$0xff] }
 0x101   : > { %v2984_v25 = vadd.f32 %v2983_v24, %v2982_v16  ;;  %v2873_v30 = vpop.f32.mrf.mxu0  ;;  %v4184_v16 = vld [vmem:[#allocation3_spill] sm:$0xff]  ;;  %v4186_v24 = vld [vmem:[#allocation5_spill] sm:$0xff] }
 0x102   : > { %v2985_v31 = vpop.f32.mrf.mxu1 }
 0x103   : > { %v4003_v36 = vadd.f32 %v2984_v25, %v2872_v23  ;;  %v2874_v37 = vpop.f32.mrf.mxu0 }
 0x104   : > { %v2875_v20 = vadd.f32 %v2874_v37, %v2873_v30  ;;  %v2986_v46 = vpop.f32.mrf.mxu1 }
 0x105   : > { %v2987_v21 = vadd.f32 %v2986_v46, %v2985_v31  ;;  %v2876_v26 = vpop.f32.mrf.mxu0  ;;  %1896 = vmatmul.mubr.bf16.gmra.mxu0 %v3874_v59 }
 0x106   : > { %v2988_v50 = vpop.f32.mrf.mxu1  ;;  %2057 = vmatmul.mubr.bf16.gmra.mxu1 %v3877_v60  ;;  %1903 = vmatprep.mubr.bf16.mxu0 %v3880_v1 }
 0x107   : > { %v4008_v55 = vadd.f32 %v2987_v21, %v2875_v20  ;;  %v2877_v58 = vpop.f32.mrf.mxu0  ;;  %2064 = vmatprep.mubr.bf16.mxu1 %v3883_v3 }
 0x108   : > { %v2878_v27 = vadd.f32 %v2877_v58, %v2876_v26  ;;  %v2989_v38 = vpop.f32.mrf.mxu1 }
 0x109   : > { %v2990_v39 = vadd.f32 %v2989_v38, %v2988_v50  ;;  %v2879_v47 = vpop.f32.mrf.mxu0 }
 0x10a   : > { %v2991_v49 = vpop.f32.mrf.mxu1 }
 0x10b   : > { %v4011_v32 = vadd.f32 %v2990_v39, %v2878_v27  ;;  %v2880_v33 = vpop.f32.mrf.mxu0 }
 0x10c   : > { %v2881_v34 = vadd.f32 %v2880_v33, %v2879_v47  ;;  %v2992_v59 = vpop.f32.mrf.mxu1 }
 0x10d   : > { %v2993_v35 = vadd.f32 %v2992_v59, %v2991_v49  ;;  %v2882_v40 = vpop.f32.mrf.mxu0  ;;  %1904 = vmatmul.mubr.bf16.gmra.mxu0 %v3890_v4 }
 0x10e   : > { %v2994_v60 = vpop.f32.mrf.mxu1  ;;  %2065 = vmatmul.mubr.bf16.gmra.mxu1 %v3893_v5  ;;  %1911 = vmatprep.mubr.bf16.mxu0 %v3896_v10 }
 0x10f   : > { %v4016_v1 = vadd.f32 %v2993_v35, %v2881_v34  ;;  %v2883_v3 = vpop.f32.mrf.mxu0  ;;  %2072 = vmatprep.mubr.bf16.mxu1 %v3899_v11 }
 0x110   : > { %v2884_v41 = vadd.f32 %v2883_v3, %v2882_v40  ;;  %v2995_v42 = vpop.f32.mrf.mxu1 }
 0x111   : > { %v2996_v43 = vadd.f32 %v2995_v42, %v2994_v60  ;;  %v2885_v45 = vpop.f32.mrf.mxu0 }
 0x112   : > { %v2997_v48 = vpop.f32.mrf.mxu1 }
 0x113   : > { %v4019_v51 = vadd.f32 %v2996_v43, %v2884_v41  ;;  %v2886_v52 = vpop.f32.mrf.mxu0 }
 0x114   : > { %v2887_v53 = vadd.f32 %v2886_v52, %v2885_v45  ;;  %v2998_v4 = vpop.f32.mrf.mxu1 }
 0x115   : > { %v2999_v54 = vadd.f32 %v2998_v4, %v2997_v48  ;;  %v2888_v57 = vpop.f32.mrf.mxu0  ;;  %1912 = vmatmul.mubr.bf16.gmra.mxu0 %v3906_v12 }
 0x116   : > { %v3000_v5 = vpop.f32.mrf.mxu1  ;;  %2073 = vmatmul.mubr.bf16.gmra.mxu1 %v3909_v13  ;;  %1919 = vmatprep.mubr.bf16.mxu0 %v3912_v18  ;;  %v4183_v13 = vld [vmem:[#allocation2_spill] sm:$0xff] }
 0x117   : > { %v4024_v10 = vadd.f32 %v2999_v54, %v2887_v53  ;;  %v2889_v11 = vpop.f32.mrf.mxu0  ;;  %2080 = vmatprep.mubr.bf16.mxu1 %v3915_v19 }
 0x118   : > { %v2890_v61 = vadd.f32 %v2889_v11, %v2888_v57  ;;  %v3001_v62 = vpop.f32.mrf.mxu1 }
 0x119   : > { %v3002_v63 = vadd.f32 %v3001_v62, %v3000_v5  ;;  %v2891_v0 = vpop.f32.mrf.mxu0 }
 0x11a   : > { %v3003_v2 = vpop.f32.mrf.mxu1 }
 0x11b   : > { %v4027_v7 = vadd.f32 %v3002_v63, %v2890_v61  ;;  %v2892_v8 = vpop.f32.mrf.mxu0 }
 0x11c   : > { %v2893_v9 = vadd.f32 %v2892_v8, %v2891_v0  ;;  %v3004_v12 = vpop.f32.mrf.mxu1 }
 0x11d   : > { %v3005_v14 = vadd.f32 %v3004_v12, %v3003_v2  ;;  %v2894_v15 = vpop.f32.mrf.mxu0  ;;  %1920 = vmatmul.mubr.bf16.gmra.mxu0 %v4183_v13 }
 0x11e   : > { %v3006_v18 = vpop.f32.mrf.mxu1  ;;  %2081 = vmatmul.mubr.bf16.gmra.mxu1 %v4184_v16  ;;  %1927 = vmatprep.mubr.bf16.mxu0 %v4185_v22 }
 0x11f   : > { %v4032_v19 = vadd.f32 %v3005_v14, %v2893_v9  ;;  %v2895_v23 = vpop.f32.mrf.mxu0  ;;  %2088 = vmatprep.mubr.bf16.mxu1 %v4186_v24 }
 0x120   : > { %v2896_v25 = vadd.f32 %v2895_v23, %v2894_v15  ;;  %v3007_v30 = vpop.f32.mrf.mxu1 }
 0x121   : > { %v3008_v31 = vadd.f32 %v3007_v30, %v3006_v18  ;;  %v2897_v37 = vpop.f32.mrf.mxu0 }
 0x122   : > { %v3009_v20 = vpop.f32.mrf.mxu1 }
 0x123   : > { %v4035_v46 = vadd.f32 %v3008_v31, %v2896_v25  ;;  %v2898_v21 = vpop.f32.mrf.mxu0 }
 0x124   : > { %v2899_v26 = vadd.f32 %v2898_v21, %v2897_v37  ;;  %v3010_v50 = vpop.f32.mrf.mxu1 }
 0x125   : > { %v3011_v58 = vadd.f32 %v3010_v50, %v3009_v20  ;;  %v2900_v27 = vpop.f32.mrf.mxu0  ;;  %1928 = vmatmul.mubr.bf16.gmra.mxu0 %v3938_v28 }
 0x126   : > { %v3012_v38 = vpop.f32.mrf.mxu1  ;;  %2089 = vmatmul.mubr.bf16.gmra.mxu1 %v3941_v29 }
 0x127   : > { %v4039_v39 = vadd.f32 %v3011_v58, %v2899_v26  ;;  %v2901_v47 = vpop.f32.mrf.mxu0 }
 0x128   : > { %v2902_v49 = vadd.f32 %v2901_v47, %v2900_v27  ;;  %v3013_v33 = vpop.f32.mrf.mxu1 }
 0x129   : > { %v3014_v34 = vadd.f32 %v3013_v33, %v3012_v38  ;;  %v2903_v59 = vpop.f32.mrf.mxu0 }
 0x12a   : > { %v3015_v35 = vpop.f32.mrf.mxu1 }
 0x12b   : > { %v4041_v40 = vadd.f32 %v3014_v34, %v2902_v49  ;;  %v2904_v60 = vpop.f32.mrf.mxu0 }
 0x12c   : > { %v2905_v3 = vadd.f32 %v2904_v60, %v2903_v59  ;;  %v3016_v41 = vpop.f32.mrf.mxu1 }
 0x12d   : > { %v3017_v42 = vadd.f32 %v3016_v41, %v3015_v35  ;;  %v2906_v43 = vpop.f32.mrf.mxu0 }
 0x12e   : > { %v3018_v45 = vpop.f32.mrf.mxu1 }
 0x12f   : > { %v4043_v28 = vadd.f32 %v3017_v42, %v2905_v3  ;;  %v2907_v48 = vpop.f32.mrf.mxu0 }
 0x130   : > { %v2908_v29 = vadd.f32 %v2907_v48, %v2906_v43  ;;  %v3019_v52 = vpop.f32.mrf.mxu1 }
 0x131   : > { %v3020_v53 = vadd.f32 %v3019_v52, %v3018_v45  ;;  %v2909_v4 = vpop.f32.mrf.mxu0 }
 0x132   : > { %v3021_v54 = vpop.f32.mrf.mxu1 }
 0x133   : > { %v4045_v57 = vadd.f32 %v3020_v53, %v2908_v29  ;;  %v2910_v5 = vpop.f32.mrf.mxu0 }
 0x134   : > { %v2911_v11 = vadd.f32 %v2910_v5, %v2909_v4  ;;  %v3022_v61 = vpop.f32.mrf.mxu1 }
 0x135   : > { %v3023_v62 = vadd.f32 %v3022_v61, %v3021_v54  ;;  %v2912_v63 = vpop.f32.mrf.mxu0 }
 0x136   : > { %v3024_v0 = vpop.f32.mrf.mxu1 }
 0x137   : > { %v4047_v2 = vadd.f32 %v3023_v62, %v2911_v11  ;;  %v2913_v8 = vpop.f32.mrf.mxu0 }
 0x138   : > { %v2914_v9 = vadd.f32 %v2913_v8, %v2912_v63  ;;  %v3025_v12 = vpop.f32.mrf.mxu1 }
 0x139   : > { %v3026_v14 = vadd.f32 %v3025_v12, %v3024_v0  ;;  %v2915_v15 = vpop.f32.mrf.mxu0 }
 0x13a   : > { %v3027_v13 = vpop.f32.mrf.mxu1 }
 0x13b   : > { %v4049_v18 = vadd.f32 %v3026_v14, %v2914_v9  ;;  %v2916_v16 = vpop.f32.mrf.mxu0 }
 0x13c   : > { %v2917_v22 = vadd.f32 %v2916_v16, %v2915_v15  ;;  %v3028_v23 = vpop.f32.mrf.mxu1 }
 0x13d   : > { %v3029_v24 = vadd.f32 %v3028_v23, %v3027_v13  ;;  %v2918_v25 = vpop.f32.mrf.mxu0 }
 0x13e   : > { %v3030_v30 = vpop.f32.mrf.mxu1 }
 0x13f   : > { %v4051_v31 = vadd.f32 %v3029_v24, %v2917_v22  ;;  %v2919_v37 = vpop.f32.mrf.mxu0 }
 0x140   : > { %v2920_v20 = vadd.f32 %v2919_v37, %v2918_v25  ;;  %v3031_v21 = vpop.f32.mrf.mxu1 }
 0x141   : > { %v3032_v26 = vadd.f32 %v3031_v21, %v3030_v30  ;;  %v2921_v50 = vpop.f32.mrf.mxu0 }
 0x142   : > { %v3033_v58 = vpop.f32.mrf.mxu1 }
 0x143   : > { %v4053_v27 = vadd.f32 %v3032_v26, %v2920_v20  ;;  %v2922_v38 = vpop.f32.mrf.mxu0 }
 0x144   : > { %v2923_v47 = vadd.f32 %v2922_v38, %v2921_v50  ;;  %v3034_v49 = vpop.f32.mrf.mxu1 }
 0x145   : > { %v3035_v33 = vadd.f32 %v3034_v49, %v3033_v58  ;;  %v2924_v34 = vpop.f32.mrf.mxu0 }
 0x146   : > { %v3036_v59 = vpop.f32.mrf.mxu1 }
 0x147   : > { %v4055_v35 = vadd.f32 %v3035_v33, %v2923_v47  ;;  %v2925_v60 = vpop.f32.mrf.mxu0 }
 0x148   : > { %v2926_v3 = vadd.f32 %v2925_v60, %v2924_v34  ;;  %v3037_v41 = vpop.f32.mrf.mxu1 }
 0x149   : > { %v3038_v42 = vadd.f32 %v3037_v41, %v3036_v59  ;;  %v2927_v43 = vpop.f32.mrf.mxu0 }
 0x14a   : > { %v3039_v45 = vpop.f32.mrf.mxu1 }
 0x14b   : > { %v4057_v48 = vadd.f32 %v3038_v42, %v2926_v3  ;;  %v2928_v29 = vpop.f32.mrf.mxu0 }
 0x14c   : > { %v2929_v52 = vadd.f32 %v2928_v29, %v2927_v43  ;;  %v3040_v53 = vpop.f32.mrf.mxu1 }
 0x14d   : > { %v3041_v4 = vadd.f32 %v3040_v53, %v3039_v45  ;;  %v2930_v54 = vpop.f32.mrf.mxu0 }
 0x14e   : > { %v3042_v5 = vpop.f32.mrf.mxu1 }
 0x14f   : > { %v4059_v11 = vadd.f32 %v3041_v4, %v2929_v52  ;;  %v2931_v61 = vpop.f32.mrf.mxu0 }
 0x150   : > { %v2932_v62 = vadd.f32 %v2931_v61, %v2930_v54  ;;  %v3043_v63 = vpop.f32.mrf.mxu1 }
 0x151   : > { %v3044_v0 = vadd.f32 %v3043_v63, %v3042_v5  ;;  %v2933_v8 = vpop.f32.mrf.mxu0 }
 0x152   : > { %v3045_v9 = vpop.f32.mrf.mxu1 }
 0x153   : > { %v4061_v12 = vadd.f32 %v3044_v0, %v2932_v62  ;;  %v2934_v14 = vpop.f32.mrf.mxu0 }
 0x154   : > { %v2935_v15 = vadd.f32 %v2934_v14, %v2933_v8  ;;  %v3046_v13 = vpop.f32.mrf.mxu1 }
 0x155   : > { %v3047_v16 = vadd.f32 %v3046_v13, %v3045_v9  ;;  %v2936_v22 = vpop.f32.mrf.mxu0 }
 0x156   : > { %v3048_v23 = vpop.f32.mrf.mxu1 }
 0x157   : > { %v4063_v24 = vadd.f32 %v3047_v16, %v2935_v15  ;;  %v2937_v25 = vpop.f32.mrf.mxu0 }
 0x158   : > { %v2938_v30 = vadd.f32 %v2937_v25, %v2936_v22  ;;  %v3049_v37 = vpop.f32.mrf.mxu1 }
 0x159   : > { %v3050_v20 = vadd.f32 %v3049_v37, %v3048_v23  ;;  %v2939_v21 = vpop.f32.mrf.mxu0 }
 0x15a   : > { %v3051_v26 = vpop.f32.mrf.mxu1 }
 0x15b   : > { %v4065_v50 = vadd.f32 %v3050_v20, %v2938_v30  ;;  %v2940_v58 = vpop.f32.mrf.mxu0 }
 0x15c   : > { %v2941_v38 = vadd.f32 %v2940_v58, %v2939_v21  ;;  %v3052_v47 = vpop.f32.mrf.mxu1 }
 0x15d   : > { %v3053_v49 = vadd.f32 %v3052_v47, %v3051_v26  ;;  %v2942_v33 = vpop.f32.mrf.mxu0 }
 0x15e   : > { %v3054_v34 = vpop.f32.mrf.mxu1 }
 0x15f   : > { %v4067_v59 = vadd.f32 %v3053_v49, %v2941_v38  ;;  %v2943_v60 = vpop.f32.mrf.mxu0 }
 0x160   : > { %v2944_v3 = vadd.f32 %v2943_v60, %v2942_v33  ;;  %v3055_v41 = vpop.f32.mrf.mxu1 }
 0x161   : > { %v3056_v42 = vadd.f32 %v3055_v41, %v3054_v34  ;;  %v2945_v43 = vpop.f32.mrf.mxu0  ;;  %v4081_v34 = vld [vmem:[%s4173_s2] ss:$0 sm:$0xff] }
 0x162   : > { %v3057_v45 = vpop.f32.mrf.mxu1 }
 0x163   : > { %v4069_v29 = vadd.f32 %v3056_v42, %v2944_v3  ;;  %v2946_v52 = vpop.f32.mrf.mxu0 }
 0x164   : > { %v2947_v53 = vadd.f32 %v2946_v52, %v2945_v43  ;;  %v3058_v4 = vpop.f32.mrf.mxu1 }
 0x165   : > { %v3059_v54 = vadd.f32 %v3058_v4, %v3057_v45  ;;  %v2948_v5 = vpop.f32.mrf.mxu0 }
 0x166   : > { %v3060_v61 = vpop.f32.mrf.mxu1 }
 0x167   : > { %v4071_v62 = vadd.f32 %v3059_v54, %v2947_v53  ;;  %v2949_v63 = vpop.f32.mrf.mxu0 }
 0x168   : > { %v2950_v0 = vadd.f32 %v2949_v63, %v2948_v5  ;;  %v3061_v8 = vpop.f32.mrf.mxu1 }
 0x169   : > { %v3062_v9 = vadd.f32 %v3061_v8, %v3060_v61  ;;  %v2951_v14 = vpop.f32.mrf.mxu0 }
 0x16a   : > { %v3063_v15 = vpop.f32.mrf.mxu1 }
 0x16b   : > { %v4073_v13 = vadd.f32 %v3062_v9, %v2950_v0  ;;  %v2952_v16 = vpop.f32.mrf.mxu0 }
 0x16c   : > { %v2953_v22 = vadd.f32 %v2952_v16, %v2951_v14  ;;  %v3064_v23 = vpop.f32.mrf.mxu1 }
 0x16d   : > { %v3065_v25 = vadd.f32 %v3064_v23, %v3063_v15  ;;  %v3082_v30 = vpop.f32.mrf.mxu0 }
 0x16e   : > { %v3194_v37 = vpop.f32.mrf.mxu1 }
 0x16f   : > { %v4075_v20 = vadd.f32 %v3065_v25, %v2953_v22  ;;  %v3083_v21 = vpop.f32.mrf.mxu0 }
 0x170   : > { %v3084_v26 = vadd.f32 %v3083_v21, %v3082_v30  ;;  %v3195_v58 = vpop.f32.mrf.mxu1 }
 0x171   : > { %v3085_v38 = vpop.f32.mrf.mxu0  ;;  %v3196_v49 = vadd.f32 %v3195_v58, %v3194_v37 }
 0x172   : > { %v1810_v47 = vadd.f32 %v3084_v26, %v3987_v44  ;;  %v3197_v33 = vpop.f32.mrf.mxu1 }
 0x173   : > { %v3086_v60 = vpop.f32.mrf.mxu0 }
 0x174   : > { %v1971_v3 = vadd.f32 %v3196_v49, %v1810_v47  ;;  %v3087_v41 = vadd.f32 %v3086_v60, %v3085_v38  ;;  %v3198_v42 = vpop.f32.mrf.mxu1 }
 0x175   : > { %v3088_v43 = vpop.f32.mrf.mxu0  ;;  %v3199_v53 = vadd.f32 %v3198_v42, %v3197_v33 }
 0x176   : > { %v2104_v45 = vadd.f32 %v4081_v34, %v1971_v3  ;;  %v1813_v52 = vadd.f32 %v3087_v41, %v3992_v56  ;;  %v3200_v4 = vpop.f32.mrf.mxu1 }
 0x177   : > { %v3089_v44 = vpop.f32.mrf.mxu0 }
 0x178   : > { %v1974_v54 = vadd.f32 %v3199_v53, %v1813_v52  ;;  %v3090_v5 = vadd.f32 %v3089_v44, %v3088_v43  ;;  %v3201_v61 = vpop.f32.mrf.mxu1  ;;  %v2136_v63 = vmul.f32 0.2, %v2104_v45 }
 0x179   : > { %v3091_v0 = vpop.f32.mrf.mxu0  ;;  %v3202_v14 = vadd.f32 %v3201_v61, %v3200_v4 }
 0x17a   : > { %v2105_v8 = vadd.f32 %v4081_v34, %v1974_v54  ;;  %v1818_v9 = vadd.f32 %v3090_v5, %v3995_v6  ;;  %v3203_v15 = vpop.f32.mrf.mxu1  ;;  %v2168_v30 = vmax.f32 %v2104_v45, %v2136_v63 }
 0x17b   : > { %v3092_v16 = vpop.f32.mrf.mxu0 }
 0x17c   : > { %v2137_v22 = vmul.f32 0.2, %v2105_v8  ;;  %v1979_v23 = vadd.f32 %v3202_v14, %v1818_v9  ;;  %v3093_v25 = vadd.f32 %v3092_v16, %v3091_v0  ;;  %v3204_v56 = vpop.f32.mrf.mxu1 }
 0x17d   : > { %v3094_v37 = vpop.f32.mrf.mxu0  ;;  %v3205_v38 = vadd.f32 %v3204_v56, %v3203_v15 }
 0x17e   : > { %v2169_v21 = vmax.f32 %v2105_v8, %v2137_v22  ;;  %v2106_v26 = vadd.f32 %v4081_v34, %v1979_v23  ;;  %v1821_v58 = vadd.f32 %v3093_v25, %v4000_v17  ;;  %v3206_v47 = vpop.f32.mrf.mxu1 }
 0x17f   : > { %v3095_v6 = vpop.f32.mrf.mxu0 }
 0x180   : > { %v2750_v49 = vpack.c.bf16 %v2169_v21, %v2168_v30  ;;  %v1982_v33 = vadd.f32 %v3205_v38, %v1821_v58  ;;  %v3096_v60 = vadd.f32 %v3095_v6, %v3094_v37  ;;  %v3207_v3 = vpop.f32.mrf.mxu1  ;;  %v2138_v41 = vmul.f32 0.2, %v2106_v26 }
 0x181   : > { %v3097_v42 = vpop.f32.mrf.mxu0  ;;  %v3208_v45 = vadd.f32 %v3207_v3, %v3206_v47 }
 0x182   : > { %2751 = vst [vmem:[%s4093_s28] sm:$0xff] %v2750_v49   ;;  %v2107_v43 = vadd.f32 %v4081_v34, %v1982_v33  ;;  %v1826_v17 = vadd.f32 %v3096_v60, %v4003_v36  ;;  %v3209_v52 = vpop.f32.mrf.mxu1  ;;  %v2170_v61 = vmax.f32 %v2106_v26, %v2138_v41 }
 0x183   : > { %v3098_v53 = vpop.f32.mrf.mxu0 }
 0x184   : > { %v2139_v4 = vmul.f32 0.2, %v2107_v43  ;;  %v1987_v44 = vadd.f32 %v3208_v45, %v1826_v17  ;;  %v3099_v54 = vadd.f32 %v3098_v53, %v3097_v42  ;;  %v3210_v5 = vpop.f32.mrf.mxu1 }
 0x185   : > { %v3100_v63 = vpop.f32.mrf.mxu0  ;;  %v3211_v14 = vadd.f32 %v3210_v5, %v3209_v52 }
 0x186   : > { %v2171_v0 = vmax.f32 %v2107_v43, %v2139_v4  ;;  %v2108_v8 = vadd.f32 %v4081_v34, %v1987_v44  ;;  %v1829_v9 = vadd.f32 %v3099_v54, %v4008_v55  ;;  %v3212_v15 = vpop.f32.mrf.mxu1 }
 0x187   : > { %v3101_v16 = vpop.f32.mrf.mxu0 }
 0x188   : > { %v2755_v22 = vpack.c.bf16 %v2171_v0, %v2170_v61  ;;  %v1990_v36 = vadd.f32 %v3211_v14, %v1829_v9  ;;  %v3102_v23 = vadd.f32 %v3101_v16, %v3100_v63  ;;  %v3213_v25 = vpop.f32.mrf.mxu1  ;;  %v2140_v56 = vmul.f32 0.2, %v2108_v8 }
 0x189   : > { %v3103_v30 = vpop.f32.mrf.mxu0  ;;  %v3214_v26 = vadd.f32 %v3213_v25, %v3212_v15 }
 0x18a   : > { %2827 = vst [vmem:[%s4093_s28 + $0x8] sm:$0xff] %v2755_v22   ;;  %v2109_v37 = vadd.f32 %v4081_v34, %v1990_v36  ;;  %v1834_v21 = vadd.f32 %v3102_v23, %v4011_v32  ;;  %v3215_v58 = vpop.f32.mrf.mxu1  ;;  %v2172_v33 = vmax.f32 %v2108_v8, %v2140_v56 }
 0x18b   : > { %v3104_v38 = vpop.f32.mrf.mxu0 }
 0x18c   : > { %v2141_v47 = vmul.f32 0.2, %v2109_v37  ;;  %v1995_v6 = vadd.f32 %v3214_v26, %v1834_v21  ;;  %v3105_v55 = vadd.f32 %v3104_v38, %v3103_v30  ;;  %v3216_v49 = vpop.f32.mrf.mxu1 }
 0x18d   : > { %v3106_v60 = vpop.f32.mrf.mxu0  ;;  %v3217_v43 = vadd.f32 %v3216_v49, %v3215_v58 }
 0x18e   : > { %v2173_v3 = vmax.f32 %v2109_v37, %v2141_v47  ;;  %v2110_v41 = vadd.f32 %v4081_v34, %v1995_v6  ;;  %v1837_v42 = vadd.f32 %v3105_v55, %v4016_v1  ;;  %v3218_v17 = vpop.f32.mrf.mxu1 }
 0x18f   : > { %v3107_v45 = vpop.f32.mrf.mxu0 }
 0x190   : > { %v2760_v52 = vpack.c.bf16 %v2173_v3, %v2172_v33  ;;  %v1998_v32 = vadd.f32 %v3217_v43, %v1837_v42  ;;  %v3108_v53 = vadd.f32 %v3107_v45, %v3106_v60  ;;  %v3219_v4 = vpop.f32.mrf.mxu1  ;;  %v2142_v44 = vmul.f32 0.2, %v2110_v41 }
 0x191   : > { %v3109_v54 = vpop.f32.mrf.mxu0  ;;  %v3220_v63 = vadd.f32 %v3219_v4, %v3218_v17 }
 0x192   : > { %2828 = vst [vmem:[%s4093_s28 + $0x10] sm:$0xff] %v2760_v52   ;;  %v2111_v5 = vadd.f32 %v4081_v34, %v1998_v32  ;;  %v1842_v61 = vadd.f32 %v3108_v53, %v4019_v51  ;;  %v3221_v0 = vpop.f32.mrf.mxu1  ;;  %v2174_v16 = vmax.f32 %v2110_v41, %v2142_v44 }
 0x193   : > { %v3110_v8 = vpop.f32.mrf.mxu0 }
 0x194   : > { %v2143_v9 = vmul.f32 0.2, %v2111_v5  ;;  %v2003_v14 = vadd.f32 %v3220_v63, %v1842_v61  ;;  %v3111_v1 = vadd.f32 %v3110_v8, %v3109_v54  ;;  %v3222_v15 = vpop.f32.mrf.mxu1 }
 0x195   : > { %v3112_v22 = vpop.f32.mrf.mxu0  ;;  %v3223_v56 = vadd.f32 %v3222_v15, %v3221_v0 }
 0x196   : > { %v2175_v36 = vmax.f32 %v2111_v5, %v2143_v9  ;;  %v2112_v23 = vadd.f32 %v4081_v34, %v2003_v14  ;;  %v1845_v25 = vadd.f32 %v3111_v1, %v4024_v10  ;;  %v3224_v30 = vpop.f32.mrf.mxu1 }
 0x197   : > { %v3113_v37 = vpop.f32.mrf.mxu0 }
 0x198   : > { %v2765_v21 = vpack.c.bf16 %v2175_v36, %v2174_v16  ;;  %v2006_v51 = vadd.f32 %v3223_v56, %v1845_v25  ;;  %v3114_v26 = vadd.f32 %v3113_v37, %v3112_v22  ;;  %v3225_v58 = vpop.f32.mrf.mxu1  ;;  %v2144_v38 = vmul.f32 0.2, %v2112_v23 }
 0x199   : > { %v3115_v47 = vpop.f32.mrf.mxu0  ;;  %v3226_v49 = vadd.f32 %v3225_v58, %v3224_v30 }
 0x19a   : > { %2829 = vst [vmem:[%s4093_s28 + $0x18] sm:$0xff] %v2765_v21   ;;  %v2113_v6 = vadd.f32 %v4081_v34, %v2006_v51  ;;  %v1850_v55 = vadd.f32 %v3114_v26, %v4027_v7  ;;  %v3227_v33 = vpop.f32.mrf.mxu1  ;;  %v2176_v43 = vmax.f32 %v2112_v23, %v2144_v38 }
 0x19b   : > { %v3116_v60 = vpop.f32.mrf.mxu0 }
 0x19c   : > { %v2145_v3 = vmul.f32 0.2, %v2113_v6  ;;  %v2011_v41 = vadd.f32 %v3226_v49, %v1850_v55  ;;  %v3117_v10 = vadd.f32 %v3116_v60, %v3115_v47  ;;  %v3228_v42 = vpop.f32.mrf.mxu1 }
 0x19d   : > { %v3118_v17 = vpop.f32.mrf.mxu0  ;;  %v3229_v53 = vadd.f32 %v3228_v42, %v3227_v33 }
 0x19e   : > { %v2177_v45 = vmax.f32 %v2113_v6, %v2145_v3  ;;  %v2114_v52 = vadd.f32 %v4081_v34, %v2011_v41  ;;  %v1853_v32 = vadd.f32 %v3117_v10, %v4032_v19  ;;  %v3230_v4 = vpop.f32.mrf.mxu1 }
 0x19f   : > { %v3119_v44 = vpop.f32.mrf.mxu0 }
 0x1a0   : > { %v2770_v54 = vpack.c.bf16 %v2177_v45, %v2176_v43  ;;  %v2014_v7 = vadd.f32 %v3229_v53, %v1853_v32  ;;  %v3120_v5 = vadd.f32 %v3119_v44, %v3118_v17  ;;  %v3231_v61 = vpop.f32.mrf.mxu1  ;;  %v2146_v63 = vmul.f32 0.2, %v2114_v52 }
 0x1a1   : > { %v3121_v0 = vpop.f32.mrf.mxu0  ;;  %v3232_v14 = vadd.f32 %v3231_v61, %v3230_v4 }
 0x1a2   : > { %2830 = vst [vmem:[%s4093_s28 + $0x20] sm:$0xff] %v2770_v54   ;;  %v2115_v8 = vadd.f32 %v4081_v34, %v2014_v7  ;;  %v1858_v9 = vadd.f32 %v3120_v5, %v4035_v46  ;;  %v3233_v1 = vpop.f32.mrf.mxu1  ;;  %v2178_v23 = vmax.f32 %v2114_v52, %v2146_v63 }
 0x1a3   : > { %v3122_v15 = vpop.f32.mrf.mxu0 }
 0x1a4   : > { %v2147_v16 = vmul.f32 0.2, %v2115_v8  ;;  %v2019_v22 = vadd.f32 %v3232_v14, %v1858_v9  ;;  %v3123_v19 = vadd.f32 %v3122_v15, %v3121_v0  ;;  %v3234_v36 = vpop.f32.mrf.mxu1 }
 0x1a5   : > { %v3124_v25 = vpop.f32.mrf.mxu0  ;;  %v3235_v21 = vadd.f32 %v3234_v36, %v3233_v1 }
 0x1a6   : > { %v2179_v56 = vmax.f32 %v2115_v8, %v2147_v16  ;;  %v2116_v30 = vadd.f32 %v4081_v34, %v2019_v22  ;;  %v1861_v37 = vadd.f32 %v3123_v19, %v4039_v39  ;;  %v3236_v51 = vpop.f32.mrf.mxu1 }
 0x1a7   : > { %v3125_v26 = vpop.f32.mrf.mxu0 }
 0x1a8   : > { %v2775_v58 = vpack.c.bf16 %v2179_v56, %v2178_v23  ;;  %v2022_v46 = vadd.f32 %v3235_v21, %v1861_v37  ;;  %v3126_v38 = vadd.f32 %v3125_v26, %v3124_v25  ;;  %v3237_v47 = vpop.f32.mrf.mxu1  ;;  %v2148_v6 = vmul.f32 0.2, %v2116_v30 }
 0x1a9   : > { %v3127_v55 = vpop.f32.mrf.mxu0  ;;  %v3238_v60 = vadd.f32 %v3237_v47, %v3236_v51 }
 0x1aa   : > { %2831 = vst [vmem:[%s4093_s28 + $0x28] sm:$0xff] %v2775_v58   ;;  %v2117_v49 = vadd.f32 %v4081_v34, %v2022_v46  ;;  %v1866_v33 = vadd.f32 %v3126_v38, %v4041_v40  ;;  %v3239_v3 = vpop.f32.mrf.mxu1  ;;  %v2180_v17 = vmax.f32 %v2116_v30, %v2148_v6 }
 0x1ab   : > { %v3128_v41 = vpop.f32.mrf.mxu0 }
 0x1ac   : > { %v2149_v10 = vmul.f32 0.2, %v2117_v49  ;;  %v2027_v42 = vadd.f32 %v3238_v60, %v1866_v33  ;;  %v3129_v39 = vadd.f32 %v3128_v41, %v3127_v55  ;;  %v3240_v43 = vpop.f32.mrf.mxu1 }
 0x1ad   : > { %v3130_v45 = vpop.f32.mrf.mxu0  ;;  %v3241_v4 = vadd.f32 %v3240_v43, %v3239_v3 }
 0x1ae   : > { %v2181_v52 = vmax.f32 %v2117_v49, %v2149_v10  ;;  %v2118_v32 = vadd.f32 %v4081_v34, %v2027_v42  ;;  %v1869_v53 = vadd.f32 %v3129_v39, %v4043_v28  ;;  %v3242_v44 = vpop.f32.mrf.mxu1 }
 0x1af   : > { %v3131_v54 = vpop.f32.mrf.mxu0 }
 0x1b0   : > { %v2780_v7 = vpack.c.bf16 %v2181_v52, %v2180_v17  ;;  %v2030_v40 = vadd.f32 %v3241_v4, %v1869_v53  ;;  %v3132_v5 = vadd.f32 %v3131_v54, %v3130_v45  ;;  %v3243_v61 = vpop.f32.mrf.mxu1  ;;  %v2150_v63 = vmul.f32 0.2, %v2118_v32 }
 0x1b1   : > { %v3133_v0 = vpop.f32.mrf.mxu0  ;;  %v3244_v14 = vadd.f32 %v3243_v61, %v3242_v44 }
 0x1b2   : > { %2832 = vst [vmem:[%s4093_s28 + $0x30] sm:$0xff] %v2780_v7   ;;  %v2119_v8 = vadd.f32 %v4081_v34, %v2030_v40  ;;  %v1874_v9 = vadd.f32 %v3132_v5, %v4045_v57  ;;  %v3245_v1 = vpop.f32.mrf.mxu1  ;;  %v2182_v36 = vmax.f32 %v2118_v32, %v2150_v63 }
 0x1b3   : > { %v3134_v15 = vpop.f32.mrf.mxu0 }
 0x1b4   : > { %v2151_v16 = vmul.f32 0.2, %v2119_v8  ;;  %v2035_v22 = vadd.f32 %v3244_v14, %v1874_v9  ;;  %v3135_v28 = vadd.f32 %v3134_v15, %v3133_v0  ;;  %v3246_v19 = vpop.f32.mrf.mxu1 }
 0x1b5   : > { %v3136_v23 = vpop.f32.mrf.mxu0  ;;  %v3247_v37 = vadd.f32 %v3246_v19, %v3245_v1 }
 0x1b6   : > { %v2183_v25 = vmax.f32 %v2119_v8, %v2151_v16  ;;  %v2120_v56 = vadd.f32 %v4081_v34, %v2035_v22  ;;  %v1877_v30 = vadd.f32 %v3135_v28, %v4047_v2  ;;  %v3248_v21 = vpop.f32.mrf.mxu1 }
 0x1b7   : > { %v3137_v51 = vpop.f32.mrf.mxu0 }
 0x1b8   : > { %v2785_v26 = vpack.c.bf16 %v2183_v25, %v2182_v36  ;;  %v2038_v57 = vadd.f32 %v3247_v37, %v1877_v30  ;;  %v3138_v58 = vadd.f32 %v3137_v51, %v3136_v23  ;;  %v3249_v46 = vpop.f32.mrf.mxu1  ;;  %v2152_v38 = vmul.f32 0.2, %v2120_v56 }
 0x1b9   : > { %v3139_v47 = vpop.f32.mrf.mxu0  ;;  %v3250_v49 = vadd.f32 %v3249_v46, %v3248_v21 }
 0x1ba   : > { %2833 = vst [vmem:[%s4093_s28 + $0x38] sm:$0xff] %v2785_v26   ;;  %v2121_v6 = vadd.f32 %v4081_v34, %v2038_v57  ;;  %v1882_v55 = vadd.f32 %v3138_v58, %v4049_v18  ;;  %v3251_v33 = vpop.f32.mrf.mxu1  ;;  %v2184_v42 = vmax.f32 %v2120_v56, %v2152_v38 }
 0x1bb   : > { %v3140_v60 = vpop.f32.mrf.mxu0 }
 0x1bc   : > { %v2153_v3 = vmul.f32 0.2, %v2121_v6  ;;  %v2043_v41 = vadd.f32 %v3250_v49, %v1882_v55  ;;  %v3141_v2 = vadd.f32 %v3140_v60, %v3139_v47  ;;  %v3252_v10 = vpop.f32.mrf.mxu1 }
 0x1bd   : > { %v3142_v39 = vpop.f32.mrf.mxu0  ;;  %v3253_v52 = vadd.f32 %v3252_v10, %v3251_v33 }
 0x1be   : > { %v2185_v43 = vmax.f32 %v2121_v6, %v2153_v3  ;;  %v2122_v17 = vadd.f32 %v4081_v34, %v2043_v41  ;;  %v1885_v45 = vadd.f32 %v3141_v2, %v4051_v31  ;;  %v3254_v32 = vpop.f32.mrf.mxu1 }
 0x1bf   : > { %v3143_v53 = vpop.f32.mrf.mxu0 }
 0x1c0   : > { %v2790_v4 = vpack.c.bf16 %v2185_v43, %v2184_v42  ;;  %v2046_v18 = vadd.f32 %v3253_v52, %v1885_v45  ;;  %v3144_v44 = vadd.f32 %v3143_v53, %v3142_v39  ;;  %v3255_v54 = vpop.f32.mrf.mxu1  ;;  %v2154_v7 = vmul.f32 0.2, %v2122_v17 }
 0x1c1   : > { %v3145_v40 = vpop.f32.mrf.mxu0  ;;  %v3256_v63 = vadd.f32 %v3255_v54, %v3254_v32 }
 0x1c2   : > { %2834 = vst [vmem:[%s4093_s28 + $0x40] sm:$0xff] %v2790_v4   ;;  %v2123_v5 = vadd.f32 %v4081_v34, %v2046_v18  ;;  %v1890_v61 = vadd.f32 %v3144_v44, %v4053_v27  ;;  %v3257_v0 = vpop.f32.mrf.mxu1  ;;  %v2186_v15 = vmax.f32 %v2122_v17, %v2154_v7 }
 0x1c3   : > { %v3146_v8 = vpop.f32.mrf.mxu0 }
 0x1c4   : > { %v2155_v9 = vmul.f32 0.2, %v2123_v5  ;;  %v2051_v14 = vadd.f32 %v3256_v63, %v1890_v61  ;;  %v3147_v31 = vadd.f32 %v3146_v8, %v3145_v40  ;;  %v3258_v1 = vpop.f32.mrf.mxu1 }
 0x1c5   : > { %v3148_v16 = vpop.f32.mrf.mxu0  ;;  %v3259_v36 = vadd.f32 %v3258_v1, %v3257_v0 }
 0x1c6   : > { %v2187_v22 = vmax.f32 %v2123_v5, %v2155_v9  ;;  %v2124_v28 = vadd.f32 %v4081_v34, %v2051_v14  ;;  %v1893_v19 = vadd.f32 %v3147_v31, %v4055_v35  ;;  %v3260_v23 = vpop.f32.mrf.mxu1 }
 0x1c7   : > { %v3149_v25 = vpop.f32.mrf.mxu0 }
 0x1c8   : > { %v2795_v56 = vpack.c.bf16 %v2187_v22, %v2186_v15  ;;  %v2054_v27 = vadd.f32 %v3259_v36, %v1893_v19  ;;  %v3150_v30 = vadd.f32 %v3149_v25, %v3148_v16  ;;  %v3261_v37 = vpop.f32.mrf.mxu1  ;;  %v2156_v21 = vmul.f32 0.2, %v2124_v28 }
 0x1c9   : > { %v3151_v51 = vpop.f32.mrf.mxu0  ;;  %v3262_v58 = vadd.f32 %v3261_v37, %v3260_v23 }
 0x1ca   : > { %2835 = vst [vmem:[%s4093_s28 + $0x48] sm:$0xff] %v2795_v56   ;;  %v2125_v26 = vadd.f32 %v4081_v34, %v2054_v27  ;;  %v1898_v57 = vadd.f32 %v3150_v30, %v4057_v48  ;;  %v3263_v46 = vpop.f32.mrf.mxu1  ;;  %v2188_v49 = vmax.f32 %v2124_v28, %v2156_v21 }
 0x1cb   : > { %v3152_v38 = vpop.f32.mrf.mxu0 }
 0x1cc   : > { %v2157_v47 = vmul.f32 0.2, %v2125_v26  ;;  %v2059_v6 = vadd.f32 %v3262_v58, %v1898_v57  ;;  %v3153_v35 = vadd.f32 %v3152_v38, %v3151_v51  ;;  %v3264_v55 = vpop.f32.mrf.mxu1 }
 0x1cd   : > { %v3154_v33 = vpop.f32.mrf.mxu0  ;;  %v3265_v2 = vadd.f32 %v3264_v55, %v3263_v46 }
 0x1ce   : > { %v2189_v60 = vmax.f32 %v2125_v26, %v2157_v47  ;;  %v2126_v3 = vadd.f32 %v4081_v34, %v2059_v6  ;;  %v1901_v41 = vadd.f32 %v3153_v35, %v4059_v11  ;;  %v3266_v10 = vpop.f32.mrf.mxu1 }
 0x1cf   : > { %v3155_v42 = vpop.f32.mrf.mxu0 }
 0x1d0   : > { %v2800_v39 = vpack.c.bf16 %v2189_v60, %v2188_v49  ;;  %v2062_v48 = vadd.f32 %v3265_v2, %v1901_v41  ;;  %v3156_v43 = vadd.f32 %v3155_v42, %v3154_v33  ;;  %v3267_v17 = vpop.f32.mrf.mxu1  ;;  %v2158_v45 = vmul.f32 0.2, %v2126_v3 }
 0x1d1   : > { %v3157_v52 = vpop.f32.mrf.mxu0  ;;  %v3268_v4 = vadd.f32 %v3267_v17, %v3266_v10 }
 0x1d2   : > { %2836 = vst [vmem:[%s4093_s28 + $0x50] sm:$0xff] %v2800_v39   ;;  %v2127_v32 = vadd.f32 %v4081_v34, %v2062_v48  ;;  %v1906_v53 = vadd.f32 %v3156_v43, %v4061_v12  ;;  %v3269_v18 = vpop.f32.mrf.mxu1  ;;  %v2190_v5 = vmax.f32 %v2126_v3, %v2158_v45 }
 0x1d3   : > { %v3158_v44 = vpop.f32.mrf.mxu0 }
 0x1d4   : > { %v2159_v54 = vmul.f32 0.2, %v2127_v32  ;;  %v2067_v7 = vadd.f32 %v3268_v4, %v1906_v53  ;;  %v3159_v11 = vadd.f32 %v3158_v44, %v3157_v52  ;;  %v3270_v40 = vpop.f32.mrf.mxu1 }
 0x1d5   : > { %v3160_v61 = vpop.f32.mrf.mxu0  ;;  %v3271_v9 = vadd.f32 %v3270_v40, %v3269_v18 }
 0x1d6   : > { %v2191_v63 = vmax.f32 %v2127_v32, %v2159_v54  ;;  %v2128_v0 = vadd.f32 %v4081_v34, %v2067_v7  ;;  %v1909_v8 = vadd.f32 %v3159_v11, %v4063_v24  ;;  %v3272_v14 = vpop.f32.mrf.mxu1 }
 0x1d7   : > { %v3161_v31 = vpop.f32.mrf.mxu0 }
 0x1d8   : > { %v2805_v1 = vpack.c.bf16 %v2191_v63, %v2190_v5  ;;  %v2070_v12 = vadd.f32 %v3271_v9, %v1909_v8  ;;  %v3162_v15 = vadd.f32 %v3161_v31, %v3160_v61  ;;  %v3273_v16 = vpop.f32.mrf.mxu1  ;;  %v2160_v22 = vmul.f32 0.2, %v2128_v0 }
 0x1d9   : > { %v3163_v28 = vpop.f32.mrf.mxu0  ;;  %v3274_v23 = vadd.f32 %v3273_v16, %v3272_v14 }
 0x1da   : > { %2837 = vst [vmem:[%s4093_s28 + $0x58] sm:$0xff] %v2805_v1   ;;  %v2129_v19 = vadd.f32 %v4081_v34, %v2070_v12  ;;  %v1914_v36 = vadd.f32 %v3162_v15, %v4065_v50  ;;  %v3275_v25 = vpop.f32.mrf.mxu1  ;;  %v2192_v21 = vmax.f32 %v2128_v0, %v2160_v22 }
 0x1db   : > { %v3164_v56 = vpop.f32.mrf.mxu0 }
 0x1dc   : > { %v2161_v27 = vmul.f32 0.2, %v2129_v19  ;;  %v2075_v30 = vadd.f32 %v3274_v23, %v1914_v36  ;;  %v3165_v24 = vadd.f32 %v3164_v56, %v3163_v28  ;;  %v3276_v37 = vpop.f32.mrf.mxu1 }
 0x1dd   : > { %v3166_v51 = vpop.f32.mrf.mxu0  ;;  %v3277_v46 = vadd.f32 %v3276_v37, %v3275_v25 }
 0x1de   : > { %v2193_v26 = vmax.f32 %v2129_v19, %v2161_v27  ;;  %v2130_v57 = vadd.f32 %v4081_v34, %v2075_v30  ;;  %v1917_v58 = vadd.f32 %v3165_v24, %v4067_v59  ;;  %v3278_v38 = vpop.f32.mrf.mxu1 }
 0x1df   : > { %v3167_v47 = vpop.f32.mrf.mxu0 }
 0x1e0   : > { %v2810_v6 = vpack.c.bf16 %v2193_v26, %v2192_v21  ;;  %v2078_v50 = vadd.f32 %v3277_v46, %v1917_v58  ;;  %v3168_v35 = vadd.f32 %v3167_v47, %v3166_v51  ;;  %v3279_v55 = vpop.f32.mrf.mxu1  ;;  %v2162_v49 = vmul.f32 0.2, %v2130_v57 }
 0x1e1   : > { %v3169_v33 = vpop.f32.mrf.mxu0  ;;  %v3280_v41 = vadd.f32 %v3279_v55, %v3278_v38 }
 0x1e2   : > { %2838 = vst [vmem:[%s4093_s28 + $0x60] sm:$0xff] %v2810_v6   ;;  %v2131_v60 = vadd.f32 %v4081_v34, %v2078_v50  ;;  %v1922_v3 = vadd.f32 %v3168_v35, %v4069_v29  ;;  %v3281_v2 = vpop.f32.mrf.mxu1  ;;  %v2194_v43 = vmax.f32 %v2130_v57, %v2162_v49 }
 0x1e3   : > { %v3170_v10 = vpop.f32.mrf.mxu0 }
 0x1e4   : > { %v2163_v42 = vmul.f32 0.2, %v2131_v60  ;;  %v2083_v39 = vadd.f32 %v3280_v41, %v1922_v3  ;;  %v3171_v59 = vadd.f32 %v3170_v10, %v3169_v33  ;;  %v3282_v48 = vpop.f32.mrf.mxu1 }
 0x1e5   : > { %v3172_v17 = vpop.f32.mrf.mxu0  ;;  %v3283_v53 = vadd.f32 %v3282_v48, %v3281_v2 }
 0x1e6   : > { %v2195_v45 = vmax.f32 %v2131_v60, %v2163_v42  ;;  %v2132_v52 = vadd.f32 %v4081_v34, %v2083_v39  ;;  %v1925_v32 = vadd.f32 %v3171_v59, %v4071_v62  ;;  %v3284_v4 = vpop.f32.mrf.mxu1 }
 0x1e7   : > { %v3173_v18 = vpop.f32.mrf.mxu0 }
 0x1e8   : > { %v2815_v44 = vpack.c.bf16 %v2195_v45, %v2194_v43  ;;  %v2086_v29 = vadd.f32 %v3283_v53, %v1925_v32  ;;  %v3174_v54 = vadd.f32 %v3173_v18, %v3172_v17  ;;  %v3285_v7 = vpop.f32.mrf.mxu1  ;;  %v2164_v11 = vmul.f32 0.2, %v2132_v52 }
 0x1e9   : > { %v3175_v40 = vpop.f32.mrf.mxu0  ;;  %v3286_v63 = vadd.f32 %v3285_v7, %v3284_v4 }
 0x1ea   : > { %2839 = vst [vmem:[%s4093_s28 + $0x68] sm:$0xff] %v2815_v44   ;;  %v2133_v5 = vadd.f32 %v4081_v34, %v2086_v29  ;;  %v1930_v61 = vadd.f32 %v3174_v54, %v4073_v13  ;;  %v3287_v0 = vpop.f32.mrf.mxu1  ;;  %v2196_v1 = vmax.f32 %v2132_v52, %v2164_v11 }
 0x1eb   : > { %v3176_v8 = vpop.f32.mrf.mxu0 }
 0x1ec   : > { %v2165_v9 = vmul.f32 0.2, %v2133_v5  ;;  %v2091_v62 = vadd.f32 %v3286_v63, %v1930_v61  ;;  %v3177_v14 = vadd.f32 %v3176_v8, %v3175_v40  ;;  %v3288_v31 = vpop.f32.mrf.mxu1 }
 0x1ed   : > { %v3289_v22 = vadd.f32 %v3288_v31, %v3287_v0 }
 0x1ee   : > { %v2197_v12 = vmax.f32 %v2133_v5, %v2165_v9  ;;  %v2134_v15 = vadd.f32 %v4081_v34, %v2091_v62  ;;  %v1933_v16 = vadd.f32 %v3177_v14, %v4075_v20 }
 0x1f0   : > { %v2820_v28 = vpack.c.bf16 %v2197_v12, %v2196_v1  ;;  %v2094_v19 = vadd.f32 %v3289_v22, %v1933_v16  ;;  %v2166_v36 = vmul.f32 0.2, %v2134_v15 }
 0x1f2   : > { %2840 = vst [vmem:[%s4093_s28 + $0x70] sm:$0xff] %v2820_v28   ;;  %v2135_v13 = vadd.f32 %v4081_v34, %v2094_v19  ;;  %v2198_v25 = vmax.f32 %v2134_v15, %v2166_v36 }
 0x1f4   : > { %v2167_v23 = vmul.f32 0.2, %v2135_v13 }
 0x1f6   : > { %v2199_v56 = vmax.f32 %v2135_v13, %v2167_v23 }
 0x1f8   : > { %v2825_v27 = vpack.c.bf16 %v2199_v56, %v2198_v25 }
 0x1fa   : > { %2841 = vst [vmem:[%s4093_s28 + $0x78] sm:$0xff] %v2825_v27  }
 0x1fb PF: > { %s13_s12 = sadd.s32 1, %s3471_s12  }
 0x1fc   : > { %p10_p4 = scmp.ge.s32.totalorder %s13_s12, 4  }
 0x1fe   :  { %12 = sbr.rel (!%p10_p4) target bundleno = 1 (0x1), region = 63 }

// kernel: _lambda_.7
= control target key start
LH: loop header
LB: loop body
LE: loop exit
PB: predicated region body
PF: predicated region fallthrough
CT: control target
= control target key end

     0   :  { %s3693_s12 = smov 0   ;;  %s5002_s0 = inlined_call_operand.vmem [shape: bf16[2,72,1024], index: 0, kind: input, shape index: {}]   ;;  %s5003_s1 = inlined_call_operand.vmem [shape: bf16[2,1024,256], index: 1, kind: input, shape index: {}]   ;;  %s5004_s2 = inlined_call_operand.vmem [shape: f32[1,256], index: 2, kind: input, shape index: {}]   ;;  %s5005_s3 = inlined_call_operand.vmem [shape: f32[2,64,256], index: 3, kind: output, shape index: {}]  }
   0x1 LB: > { %s2807_s13 = sadd.s32 4294967295, %s3671_s12   ;;  %p2811_p0 = scmp.ge.s32.totalorder %s3671_s12, 1  ;;  %s3671_s12 = sphi %s3693_s12, %s13_s12  }
   0x2   : > { %p137_p1 = scmp.lt.s32.totalorder %s3671_s12, 3 }
   0x4   : > { %p138_p2 = pnand %p2811_p0, %p137_p1 }
   0x6   : > { %141 = sbr.rel (%p138_p2) target bundleno = 502 (0x1f6), region = 32 }
   0xb   : > { %v3275_v0 = vld [vmem:[%s5003_s1 + $0x474] ss:$8 sps:$4 sm:$0xff]   ;;  %v3279_v2 = vld [vmem:[%s5003_s1 + $0x470] ss:$8 sps:$4 sm:$0xff]   ;;  %v3281_v4 = vld [vmem:[%s5003_s1 + $0x464] ss:$8 sps:$4 sm:$0xff]  }
   0xc   : > { %v3277_v1 = vld [vmem:[%s5003_s1 + $0x574] ss:$8 sps:$4 sm:$0xff]   ;;  %1292 = vmatprep.subr.bf16.mxu0 %v3275_v0  ;;  %v3280_v3 = vld [vmem:[%s5003_s1 + $0x570] ss:$8 sps:$4 sm:$0xff]   ;;  %v3283_v5 = vld [vmem:[%s5003_s1 + $0x564] ss:$8 sps:$4 sm:$0xff]  }
   0xd   : > { %1365 = vmatprep.subr.bf16.mxu1 %v3277_v1  ;;  %1293 = vmatpush1.bf16.msra.mxu0 %v3279_v2  ;;  %v3285_v6 = vld [vmem:[%s5003_s1 + $0x460] ss:$8 sps:$4 sm:$0xff]   ;;  %v3287_v8 = vld [vmem:[%s5003_s1 + $0x454] ss:$8 sps:$4 sm:$0xff]   ;;  %v3291_v10 = vld [vmem:[%s5003_s1 + $0x450] ss:$8 sps:$4 sm:$0xff]  }
   0xe   : > { %1366 = vmatpush1.bf16.msra.mxu1 %v3280_v3  ;;  %1294 = vmatprep.subr.bf16.mxu0 %v3281_v4  ;;  %v3286_v7 = vld [vmem:[%s5003_s1 + $0x560] ss:$8 sps:$4 sm:$0xff]   ;;  %v3289_v9 = vld [vmem:[%s5003_s1 + $0x554] ss:$8 sps:$4 sm:$0xff]   ;;  %v3292_v11 = vld [vmem:[%s5003_s1 + $0x550] ss:$8 sps:$4 sm:$0xff]  }
   0xf   : > { %1367 = vmatprep.subr.bf16.mxu1 %v3283_v5  ;;  %v3293_v12 = vld [vmem:[%s5003_s1 + $0x444] ss:$8 sps:$4 sm:$0xff]   ;;  %v3297_v14 = vld [vmem:[%s5003_s1 + $0x440] ss:$8 sps:$4 sm:$0xff]   ;;  %v3299_v16 = vld [vmem:[%s5003_s1 + $0x434] ss:$8 sps:$4 sm:$0xff]  }
  0x10   : > { %v3295_v13 = vld [vmem:[%s5003_s1 + $0x544] ss:$8 sps:$4 sm:$0xff]   ;;  %v3298_v15 = vld [vmem:[%s5003_s1 + $0x540] ss:$8 sps:$4 sm:$0xff]   ;;  %v3301_v17 = vld [vmem:[%s5003_s1 + $0x534] ss:$8 sps:$4 sm:$0xff]  }
  0x11   : > { %1295 = vmatpush1.bf16.msra.mxu0 %v3285_v6  ;;  %v3303_v18 = vld [vmem:[%s5003_s1 + $0x430] ss:$8 sps:$4 sm:$0xff]   ;;  %v3305_v20 = vld [vmem:[%s5003_s1 + $0x424] ss:$8 sps:$4 sm:$0xff]   ;;  %v3309_v22 = vld [vmem:[%s5003_s1 + $0x420] ss:$8 sps:$4 sm:$0xff]  }
  0x12   : > { %1368 = vmatpush1.bf16.msra.mxu1 %v3286_v7  ;;  %1296 = vmatprep.subr.bf16.mxu0 %v3287_v8  ;;  %v3304_v19 = vld [vmem:[%s5003_s1 + $0x530] ss:$8 sps:$4 sm:$0xff]   ;;  %v3307_v21 = vld [vmem:[%s5003_s1 + $0x524] ss:$8 sps:$4 sm:$0xff]   ;;  %v3310_v23 = vld [vmem:[%s5003_s1 + $0x520] ss:$8 sps:$4 sm:$0xff]  }
  0x13   : > { %1369 = vmatprep.subr.bf16.mxu1 %v3289_v9  ;;  %v3311_v24 = vld [vmem:[%s5003_s1 + $0x414] ss:$8 sps:$4 sm:$0xff]   ;;  %v3315_v26 = vld [vmem:[%s5003_s1 + $0x410] ss:$8 sps:$4 sm:$0xff]   ;;  %v3317_v28 = vld [vmem:[%s5003_s1 + $0x404] ss:$8 sps:$4 sm:$0xff]  }
  0x14   : > { %v3313_v25 = vld [vmem:[%s5003_s1 + $0x514] ss:$8 sps:$4 sm:$0xff]   ;;  %v3316_v27 = vld [vmem:[%s5003_s1 + $0x510] ss:$8 sps:$4 sm:$0xff]   ;;  %v3319_v29 = vld [vmem:[%s5003_s1 + $0x504] ss:$8 sps:$4 sm:$0xff]  }
  0x15   : > { %1297 = vmatpush1.bf16.msra.mxu0 %v3291_v10  ;;  %v3321_v30 = vld [vmem:[%s5003_s1 + $0x400] ss:$8 sps:$4 sm:$0xff]   ;;  %p161_p3 = scmp.lt.s32.totalorder %s2807_s13, 1  ;;  %v3323_v32 = vld [vmem:[%s5003_s1 + $0x4f4] ss:$8 sps:$4 sm:$0xff]  }
  0x16   : > { %1370 = vmatpush1.bf16.msra.mxu1 %v3292_v11  ;;  %1298 = vmatprep.subr.bf16.mxu0 %v3293_v12  ;;  %v3322_v31 = vld [vmem:[%s5003_s1 + $0x500] ss:$8 sps:$4 sm:$0xff]   ;;  %v3325_v33 = vld [vmem:[%s5003_s1 + $0x5f4] ss:$8 sps:$4 sm:$0xff]   ;;  %v3327_v34 = vld [vmem:[%s5003_s1 + $0x4f0] ss:$8 sps:$4 sm:$0xff]  }
  0x17   : > { %1371 = vmatprep.subr.bf16.mxu1 %v3295_v13  ;;  %v3328_v35 = vld [vmem:[%s5003_s1 + $0x5f0] ss:$8 sps:$4 sm:$0xff]   ;;  %s5055_s13 = smov (!%p161_p3, %s2807_s13), 1  ;;  %v3329_v36 = vld [vmem:[%s5003_s1 + $0x4e4] ss:$8 sps:$4 sm:$0xff]  }
  0x18   : > { %v3331_v37 = vld [vmem:[%s5003_s1 + $0x5e4] ss:$8 sps:$4 sm:$0xff]   ;;  %v3333_v38 = vld [vmem:[%s5003_s1 + $0x4e0] ss:$8 sps:$4 sm:$0xff]   ;;  %s3266_s17 = smul.u32 288, %s5055_s13  ;;  %s3265_s23 = sshll.u32 %s5055_s13, 7 }
  0x19   : > { %1299 = vmatpush1.bf16.msra.mxu0 %v3297_v14  ;;  %v3334_v39 = vld [vmem:[%s5003_s1 + $0x5e0] ss:$8 sps:$4 sm:$0xff]   ;;  %v3335_v40 = vld [vmem:[%s5003_s1 + $0x4d4] ss:$8 sps:$4 sm:$0xff]   ;;  %v3339_v42 = vld [vmem:[%s5003_s1 + $0x4d0] ss:$8 sps:$4 sm:$0xff]   ;;  %s4939_s25 = scalar_lea.vmem %s5005_s3, %s3265_s23 }
  0x1a   : > { %1372 = vmatpush1.bf16.msra.mxu1 %v3298_v15  ;;  %1300 = vmatprep.subr.bf16.mxu0 %v3299_v16  ;;  %v3337_v41 = vld [vmem:[%s5003_s1 + $0x5d4] ss:$8 sps:$4 sm:$0xff]   ;;  %v3340_v43 = vld [vmem:[%s5003_s1 + $0x5d0] ss:$8 sps:$4 sm:$0xff]   ;;  %s3843_s30 = scalar_lea.vmem %s5002_s0, %s3266_s17  ;;  %v3341_v44 = vld [vmem:[%s5003_s1 + $0x4c4] ss:$8 sps:$4 sm:$0xff]  }
  0x1b   : > { %1373 = vmatprep.subr.bf16.mxu1 %v3301_v17  ;;  %v3343_v45 = vld [vmem:[%s5003_s1 + $0x5c4] ss:$8 sps:$4 sm:$0xff]   ;;  %v3345_v46 = vld [vmem:[%s5003_s1 + $0x4c0] ss:$8 sps:$4 sm:$0xff]   ;;  %v3347_v52 = vld [vmem:[%s5003_s1 + $0x4b4] ss:$8 sps:$4 sm:$0xff]  }
  0x1c   : > { %v3346_v47 = vld [vmem:[%s5003_s1 + $0x5c0] ss:$8 sps:$4 sm:$0xff]   ;;  %v3349_v54 = vld [vmem:[%s5003_s1 + $0x5b4] ss:$8 sps:$4 sm:$0xff]   ;;  %v3351_v56 = vld [vmem:[%s5003_s1 + $0x4b0] ss:$8 sps:$4 sm:$0xff]  }
  0x1d   : > { %1301 = vmatpush1.bf16.msra.mxu0 %v3303_v18  ;;  %v3858_v48 = vld [vmem:[%s3843_s30 + $0x20] sm:$0xff]  ;;  %v3862_v50 = vld [vmem:[%s3843_s30 + $0x28] sm:$0xff]  ;;  %v3352_v57 = vld [vmem:[%s5003_s1 + $0x5b0] ss:$8 sps:$4 sm:$0xff]  }
  0x1e   : > { %1374 = vmatpush1.bf16.msra.mxu1 %v3304_v19  ;;  %1302 = vmatprep.subr.bf16.mxu0 %v3305_v20  ;;  %v335_v49 = vld [vmem:[%s3843_s30 + $0x40] sm:$0xff]  ;;  %v336_v51 = vld [vmem:[%s3843_s30 + $0x48] sm:$0xff]  ;;  %v3359_v62 = vld [vmem:[%s5003_s1 + $0x494] ss:$8 sps:$4 sm:$0xff]  }
  0x1f   : > { %1375 = vmatprep.subr.bf16.mxu1 %v3307_v21  ;;  %v2944_v53 = vcombine.high %v3858_v48, %v335_v49  ;;  %v2946_v55 = vcombine.high %v3862_v50, %v336_v51  ;;  %v3353_v58 = vld [vmem:[%s5003_s1 + $0x4a4] ss:$8 sps:$4 sm:$0xff]   ;;  %v3357_v60 = vld [vmem:[%s5003_s1 + $0x4a0] ss:$8 sps:$4 sm:$0xff]   ;;  %v3361_v63 = vld [vmem:[%s5003_s1 + $0x594] ss:$8 sps:$4 sm:$0xff]   ;;  %v2943_v8 = vcombine.low %v3858_v48, %v335_v49  ;;  %v2945_v9 = vcombine.low %v3862_v50, %v336_v51 }
  0x20   : > { %v3355_v59 = vld [vmem:[%s5003_s1 + $0x5a4] ss:$8 sps:$4 sm:$0xff]   ;;  %v3358_v61 = vld [vmem:[%s5003_s1 + $0x5a0] ss:$8 sps:$4 sm:$0xff]   ;;  %v3363_v0 = vld [vmem:[%s5003_s1 + $0x490] ss:$8 sps:$4 sm:$0xff]  }
  0x21   : > { %1303 = vmatpush1.bf16.msra.mxu0 %v3309_v22  ;;  %1324 = vmatprep.mubr.bf16.mxu0 %v2944_v53  ;;  %v3364_v1 = vld [vmem:[%s5003_s1 + $0x590] ss:$8 sps:$4 sm:$0xff]   ;;  %v3365_v2 = vld [vmem:[%s5003_s1 + $0x484] ss:$8 sps:$4 sm:$0xff]   ;;  %v3369_v4 = vld [vmem:[%s5003_s1 + $0x480] ss:$8 sps:$4 sm:$0xff]  }
  0x22   : > { %1376 = vmatpush1.bf16.msra.mxu1 %v3310_v23  ;;  %1304 = vmatprep.subr.bf16.mxu0 %v3311_v24  ;;  %v3367_v3 = vld [vmem:[%s5003_s1 + $0x584] ss:$8 sps:$4 sm:$0xff]   ;;  %v3370_v5 = vld [vmem:[%s5003_s1 + $0x580] ss:$8 sps:$4 sm:$0xff]   ;;  %v3373_v6 = vld [vmem:[%s5003_s1 + $0x674] ss:$8 sps:$4 sm:$0xff]  }
  0x23   : > { %1377 = vmatprep.subr.bf16.mxu1 %v3313_v25  ;;  %1397 = vmatprep.mubr.bf16.mxu1 %v2946_v55  ;;  %v3376_v7 = vld [vmem:[%s5003_s1 + $0x774] ss:$8 sps:$4 sm:$0xff]   ;;  %v3371_v10 = vld [vmem:[%s5003_s1 + $0x670] ss:$8 sps:$4 sm:$0xff]   ;;  %v3379_v12 = vld [vmem:[%s5003_s1 + $0x664] ss:$8 sps:$4 sm:$0xff]  }
  0x24   : > { %v3374_v11 = vld [vmem:[%s5003_s1 + $0x770] ss:$8 sps:$4 sm:$0xff]   ;;  %v3382_v13 = vld [vmem:[%s5003_s1 + $0x764] ss:$8 sps:$4 sm:$0xff]   ;;  %v3377_v14 = vld [vmem:[%s5003_s1 + $0x660] ss:$8 sps:$4 sm:$0xff]  }
  0x25   : > { %1305 = vmatpush1.bf16.msra.mxu0 %v3315_v26  ;;  %v3380_v15 = vld [vmem:[%s5003_s1 + $0x760] ss:$8 sps:$4 sm:$0xff]   ;;  %v3385_v16 = vld [vmem:[%s5003_s1 + $0x654] ss:$8 sps:$4 sm:$0xff]   ;;  %v3383_v24 = vld [vmem:[%s5003_s1 + $0x650] ss:$8 sps:$4 sm:$0xff]  }
  0x26   : > { %1378 = vmatpush1.bf16.msra.mxu1 %v3316_v27  ;;  %1306 = vmatprep.subr.bf16.mxu0 %v3317_v28  ;;  %v3388_v17 = vld [vmem:[%s5003_s1 + $0x754] ss:$8 sps:$4 sm:$0xff]   ;;  %v339_v18 = vld [vmem:[%s3843_s30 + $0x60] sm:$0xff]  ;;  %v340_v20 = vld [vmem:[%s3843_s30 + $0x68] sm:$0xff] }
  0x27   : > { %1379 = vmatprep.subr.bf16.mxu1 %v3319_v29  ;;  %v3949_v19 = vld [vmem:[%s3843_s30 + $0x80] sm:$0xff]  ;;  %v3954_v22 = vld [vmem:[%s3843_s30 + $0x88] sm:$0xff]  ;;  %v3386_v25 = vld [vmem:[%s5003_s1 + $0x750] ss:$8 sps:$4 sm:$0xff]  }
  0x28   : > { %v2952_v21 = vcombine.high %v339_v18, %v3949_v19  ;;  %v2954_v23 = vcombine.high %v340_v20, %v3954_v22  ;;  %v2951_v26 = vcombine.low %v339_v18, %v3949_v19  ;;  %v2953_v27 = vcombine.low %v340_v20, %v3954_v22  ;;  %v3391_v28 = vld [vmem:[%s5003_s1 + $0x644] ss:$8 sps:$4 sm:$0xff]   ;;  %v3419_v18 = vld [vmem:[%s5003_s1 + $0x6f0] ss:$8 sps:$4 sm:$0xff]  }
  0x29   : > { %1307 = vmatpush1.bf16.msra.mxu0 %v3321_v30  ;;  %v3394_v29 = vld [vmem:[%s5003_s1 + $0x744] ss:$8 sps:$4 sm:$0xff]   ;;  %v3389_v30 = vld [vmem:[%s5003_s1 + $0x640] ss:$8 sps:$4 sm:$0xff]   ;;  %v3422_v20 = vld [vmem:[%s5003_s1 + $0x7f0] ss:$8 sps:$4 sm:$0xff]  }
  0x2a   : > { %1380 = vmatpush1.bf16.msra.mxu1 %v3322_v31  ;;  %1308 = vmatprep.subr.bf16.mxu0 %v3323_v32  ;;  %v3392_v31 = vld [vmem:[%s5003_s1 + $0x740] ss:$8 sps:$4 sm:$0xff]  }
  0x2b   : > { %1381 = vmatprep.subr.bf16.mxu1 %v3325_v33  ;;  %v3978_v32 = vld [vmem:[%s3843_s30 + $0xa0] sm:$0xff]  ;;  %v4025_v53 = vld [vmem:[%s3843_s30 + $0xe8] sm:$0xff] }
  0x2c   : > { %v3981_v33 = vld [vmem:[%s3843_s30 + $0xc0] sm:$0xff] }
  0x2d   : > { %1309 = vmatpush2.bf16.msra.mxu0 %v3327_v34  ;;  %v3984_v34 = vld [vmem:[%s3843_s30 + $0xa8] sm:$0xff]  ;;  %v4020_v49 = vld [vmem:[%s3843_s30 + $0xe0] sm:$0xff] }
  0x2e   : > { %1382 = vmatpush2.bf16.msra.mxu1 %v3328_v35  ;;  %1310 = vmatprep.subr.bf16.mxu0 %v3329_v36  ;;  %v3987_v35 = vld [vmem:[%s3843_s30 + $0xc8] sm:$0xff]  ;;  %v3397_v36 = vld [vmem:[%s5003_s1 + $0x634] ss:$8 sps:$4 sm:$0xff]   ;;  %v359_v51 = vld [vmem:[%s3843_s30 + $0x100] sm:$0xff]  ;;  %v3122_v55 = vcombine.high %v3954_v22, %v3984_v34 }
  0x2f   : > { %1383 = vmatprep.subr.bf16.mxu1 %v3331_v37  ;;  %v2960_v37 = vcombine.high %v3978_v32, %v3981_v33 }
  0x31   : > { %1311 = vmatpush2.bf16.msra.mxu0 %v3333_v38  ;;  %v2962_v38 = vcombine.high %v3984_v34, %v3987_v35 }
  0x32   : > { %1384 = vmatpush2.bf16.msra.mxu1 %v3334_v39  ;;  %1312 = vmatprep.subr.bf16.mxu0 %v3335_v40  ;;  %v3400_v39 = vld [vmem:[%s5003_s1 + $0x734] ss:$8 sps:$4 sm:$0xff]   ;;  %v3395_v40 = vld [vmem:[%s5003_s1 + $0x630] ss:$8 sps:$4 sm:$0xff]  }
  0x33   : > { %1385 = vmatprep.subr.bf16.mxu1 %v3337_v41  ;;  %v3398_v41 = vld [vmem:[%s5003_s1 + $0x730] ss:$8 sps:$4 sm:$0xff]  }
  0x35   : > { %1313 = vmatpush2.bf16.msra.mxu0 %v3339_v42  ;;  %v2959_v42 = vcombine.low %v3978_v32, %v3981_v33 }
  0x36   : > { %1386 = vmatpush2.bf16.msra.mxu1 %v3340_v43  ;;  %1314 = vmatprep.subr.bf16.mxu0 %v3341_v44  ;;  %v2961_v43 = vcombine.low %v3984_v34, %v3987_v35  ;;  %v3403_v44 = vld [vmem:[%s5003_s1 + $0x624] ss:$8 sps:$4 sm:$0xff]  }
  0x37   : > { %1387 = vmatprep.subr.bf16.mxu1 %v3343_v45  ;;  %v3120_v45 = vcombine.high %v3949_v19, %v3978_v32 }
  0x39   : > { %1315 = vmatpush2.bf16.msra.mxu0 %v3345_v46  ;;  %v3119_v46 = vcombine.low %v3949_v19, %v3978_v32  ;;  %v3601_v19 = vld [vmem:[%s5003_s1 + $0x214] ss:$8 sps:$4 sm:$0xff]  }
  0x3a   : > { %1388 = vmatpush2.bf16.msra.mxu1 %v3346_v47  ;;  %1316 = vmatprep.subr.bf16.mxu0 %v3347_v52  ;;  %v3406_v47 = vld [vmem:[%s5003_s1 + $0x724] ss:$8 sps:$4 sm:$0xff]   ;;  %v2968_v52 = vcombine.high %v4020_v49, %v359_v51  ;;  %v4572_v32 = vld [vmem:[%s3843_s30 + $0x10] sm:$0xff] }
  0x3b   : > { %1389 = vmatprep.subr.bf16.mxu1 %v3349_v54  ;;  %v360_v54 = vld [vmem:[%s3843_s30 + $0x108] sm:$0xff] }
  0x3d   : > { %1317 = vmatpush2.bf16.msra.mxu0 %v3351_v56  ;;  %v3401_v56 = vld [vmem:[%s5003_s1 + $0x620] ss:$8 sps:$4 sm:$0xff]  }
  0x3e   : > { %1390 = vmatpush2.bf16.msra.mxu1 %v3352_v57  ;;  %1318 = vmatprep.subr.bf16.mxu0 %v3353_v58  ;;  %v3404_v57 = vld [vmem:[%s5003_s1 + $0x720] ss:$8 sps:$4 sm:$0xff]   ;;  %v2970_v58 = vcombine.high %v4025_v53, %v360_v54 }
  0x3f   : > { %1391 = vmatprep.subr.bf16.mxu1 %v3355_v59  ;;  %v3121_v59 = vcombine.low %v3954_v22, %v3984_v34  ;;  %v3604_v22 = vld [vmem:[%s5003_s1 + $0x314] ss:$8 sps:$4 sm:$0xff]  }
  0x40   : > { %v4575_v34 = vld [vmem:[%s3843_s30 + $0x18] sm:$0xff] }
  0x41   : > { %1319 = vmatpush2.bf16.msra.mxu0 %v3357_v60  ;;  %v3409_v60 = vld [vmem:[%s5003_s1 + $0x614] ss:$8 sps:$4 sm:$0xff]  }
  0x42   : > { %1392 = vmatpush2.bf16.msra.mxu1 %v3358_v61  ;;  %1320 = vmatprep.subr.bf16.mxu0 %v3359_v62  ;;  %v3412_v61 = vld [vmem:[%s5003_s1 + $0x714] ss:$8 sps:$4 sm:$0xff]   ;;  %v3407_v62 = vld [vmem:[%s5003_s1 + $0x610] ss:$8 sps:$4 sm:$0xff]  }
  0x43   : > { %1393 = vmatprep.subr.bf16.mxu1 %v3361_v63  ;;  %v3410_v63 = vld [vmem:[%s5003_s1 + $0x710] ss:$8 sps:$4 sm:$0xff]  }
  0x45   : > { %1321 = vmatpush2.bf16.msra.mxu0 %v3363_v0  ;;  %v2967_v0 = vcombine.low %v4020_v49, %v359_v51  ;;  %v3457_v51 = vld [vmem:[%s5003_s1 + $0x694] ss:$8 sps:$4 sm:$0xff]  }
  0x46   : > { %1394 = vmatpush2.bf16.msra.mxu1 %v3364_v1  ;;  %1322 = vmatprep.subr.bf16.mxu0 %v3365_v2  ;;  %v2969_v1 = vcombine.low %v4025_v53, %v360_v54  ;;  %v3415_v2 = vld [vmem:[%s5003_s1 + $0x604] ss:$8 sps:$4 sm:$0xff]   ;;  %v3455_v54 = vld [vmem:[%s5003_s1 + $0x690] ss:$8 sps:$4 sm:$0xff]  }
  0x47   : > { %1395 = vmatprep.subr.bf16.mxu1 %v3367_v3  ;;  %v3128_v3 = vcombine.high %v3981_v33, %v4020_v49 }
  0x49   : > { %1323 = vmatpush2.bf16.msra.mxu0 %v3369_v4  ;;  %v3127_v4 = vcombine.low %v3981_v33, %v4020_v49  ;;  %v3613_v33 = vld [vmem:[%s5003_s1 + $0x2f4] ss:$8 sps:$4 sm:$0xff]   ;;  %v3611_v49 = vld [vmem:[%s5003_s1 + $0x2f0] ss:$8 sps:$4 sm:$0xff]  }
  0x4a   : > { %1396 = vmatpush2.bf16.msra.mxu1 %v3370_v5  ;;  %1438 = vmatprep.subr.bf16.mxu0 %v3373_v6  ;;  %v3418_v5 = vld [vmem:[%s5003_s1 + $0x704] ss:$8 sps:$4 sm:$0xff]   ;;  %v3413_v6 = vld [vmem:[%s5003_s1 + $0x600] ss:$8 sps:$4 sm:$0xff]  }
  0x4b   : > { %1511 = vmatprep.subr.bf16.mxu1 %v3376_v7  ;;  %v3416_v7 = vld [vmem:[%s5003_s1 + $0x700] ss:$8 sps:$4 sm:$0xff]  }
  0x4c   : > { %1325 = vmatmul.mubr.bf16.vlgmr.msra.gmra.mxu0 %v2943_v8  ;;  %v4070_v8 = vld [vmem:[%s3843_s30 + $0x30] sm:$0xff] }
  0x4d   : > { %1398 = vmatmul.mubr.bf16.vlgmr.msra.gmra.mxu1 %v2945_v9  ;;  %1439 = vmatpush1.bf16.msra.mxu0 %v3371_v10  ;;  %v3130_v9 = vcombine.high %v3987_v35, %v4025_v53  ;;  %v4075_v10 = vld [vmem:[%s3843_s30 + $0x50] sm:$0xff] }
  0x4e   : > { %1512 = vmatpush1.bf16.msra.mxu1 %v3374_v11  ;;  %1440 = vmatprep.subr.bf16.mxu0 %v3379_v12  ;;  %v4078_v11 = vld [vmem:[%s3843_s30 + $0x38] sm:$0xff] }
  0x4f   : > { %1513 = vmatprep.subr.bf16.mxu1 %v3382_v13  ;;  %1334 = vmatprep.mubr.bf16.mxu0 %v2952_v21  ;;  %v4081_v12 = vld [vmem:[%s3843_s30 + $0x58] sm:$0xff]  ;;  %v3129_v13 = vcombine.low %v3987_v35, %v4025_v53  ;;  %v3427_v21 = vld [vmem:[%s5003_s1 + $0x6e4] ss:$8 sps:$4 sm:$0xff]  }
  0x50   : > { %1407 = vmatprep.mubr.bf16.mxu1 %v2954_v23  ;;  %v3430_v23 = vld [vmem:[%s5003_s1 + $0x7e4] ss:$8 sps:$4 sm:$0xff]   ;;  %v3616_v35 = vld [vmem:[%s5003_s1 + $0x3f4] ss:$8 sps:$4 sm:$0xff]   ;;  %v3614_v53 = vld [vmem:[%s5003_s1 + $0x3f0] ss:$8 sps:$4 sm:$0xff]  }
  0x51   : > { %1441 = vmatpush1.bf16.msra.mxu0 %v3377_v14  ;;  %v3421_v14 = vld [vmem:[%s5003_s1 + $0x6f4] ss:$8 sps:$4 sm:$0xff]  }
  0x52   : > { %1514 = vmatpush1.bf16.msra.mxu1 %v3380_v15  ;;  %1442 = vmatprep.subr.bf16.mxu0 %v3385_v16  ;;  %v2948_v15 = vcombine.high %v4070_v8, %v4075_v10  ;;  %v3424_v16 = vld [vmem:[%s5003_s1 + $0x7f4] ss:$8 sps:$4 sm:$0xff]  }
  0x53   : > { %1515 = vmatprep.subr.bf16.mxu1 %v3388_v17  ;;  %v2950_v17 = vcombine.high %v4078_v11, %v4081_v12 }
  0x54   : > { %1335 = vmatmul.mubr.bf16.gmra.mxu0 %v2951_v26  ;;  %v3433_v26 = vld [vmem:[%s5003_s1 + $0x6d4] ss:$8 sps:$4 sm:$0xff]  }
  0x55   : > { %1408 = vmatmul.mubr.bf16.gmra.mxu1 %v2953_v27  ;;  %1443 = vmatpush1.bf16.msra.mxu0 %v3383_v24  ;;  %v3425_v24 = vld [vmem:[%s5003_s1 + $0x6e0] ss:$8 sps:$4 sm:$0xff]   ;;  %v3436_v27 = vld [vmem:[%s5003_s1 + $0x7d4] ss:$8 sps:$4 sm:$0xff]  }
  0x56   : > { %1516 = vmatpush1.bf16.msra.mxu1 %v3386_v25  ;;  %1444 = vmatprep.subr.bf16.mxu0 %v3391_v28  ;;  %v3428_v25 = vld [vmem:[%s5003_s1 + $0x7e0] ss:$8 sps:$4 sm:$0xff]   ;;  %v3431_v28 = vld [vmem:[%s5003_s1 + $0x6d0] ss:$8 sps:$4 sm:$0xff]  }
  0x57   : > { %1517 = vmatprep.subr.bf16.mxu1 %v3394_v29  ;;  %1344 = vmatprep.mubr.bf16.mxu0 %v2960_v37  ;;  %v3434_v29 = vld [vmem:[%s5003_s1 + $0x7d0] ss:$8 sps:$4 sm:$0xff]   ;;  %v3440_v37 = vld [vmem:[%s5003_s1 + $0x7c0] ss:$8 sps:$4 sm:$0xff]  }
  0x58   : > { %1417 = vmatprep.mubr.bf16.mxu1 %v2962_v38  ;;  %v3445_v38 = vld [vmem:[%s5003_s1 + $0x6b4] ss:$8 sps:$4 sm:$0xff]  }
  0x59   : > { %1445 = vmatpush1.bf16.msra.mxu0 %v3389_v30  ;;  %v3439_v30 = vld [vmem:[%s5003_s1 + $0x6c4] ss:$8 sps:$4 sm:$0xff]  }
  0x5a   : > { %1518 = vmatpush1.bf16.msra.mxu1 %v3392_v31  ;;  %1446 = vmatprep.subr.bf16.mxu0 %v3397_v36  ;;  %v3442_v31 = vld [vmem:[%s5003_s1 + $0x7c4] ss:$8 sps:$4 sm:$0xff]   ;;  %v3437_v36 = vld [vmem:[%s5003_s1 + $0x6c0] ss:$8 sps:$4 sm:$0xff]  }
  0x5b   : > { %1519 = vmatprep.subr.bf16.mxu1 %v3400_v39  ;;  %v3448_v39 = vld [vmem:[%s5003_s1 + $0x7b4] ss:$8 sps:$4 sm:$0xff]  }
  0x5c   : > { %1345 = vmatmul.mubr.bf16.gmra.mxu0 %v2959_v42  ;;  %v3451_v42 = vld [vmem:[%s5003_s1 + $0x6a4] ss:$8 sps:$4 sm:$0xff]  }
  0x5d   : > { %1418 = vmatmul.mubr.bf16.gmra.mxu1 %v2961_v43  ;;  %1447 = vmatpush1.bf16.msra.mxu0 %v3395_v40  ;;  %v3443_v40 = vld [vmem:[%s5003_s1 + $0x6b0] ss:$8 sps:$4 sm:$0xff]   ;;  %v3454_v43 = vld [vmem:[%s5003_s1 + $0x7a4] ss:$8 sps:$4 sm:$0xff]  }
  0x5e   : > { %1520 = vmatpush1.bf16.msra.mxu1 %v3398_v41  ;;  %1448 = vmatprep.subr.bf16.mxu0 %v3403_v44  ;;  %v3446_v41 = vld [vmem:[%s5003_s1 + $0x7b0] ss:$8 sps:$4 sm:$0xff]   ;;  %v3449_v44 = vld [vmem:[%s5003_s1 + $0x6a0] ss:$8 sps:$4 sm:$0xff]  }
  0x5f   : > { %1521 = vmatprep.subr.bf16.mxu1 %v3406_v47  ;;  %1354 = vmatprep.mubr.bf16.mxu0 %v2968_v52  ;;  %v3452_v47 = vld [vmem:[%s5003_s1 + $0x7a0] ss:$8 sps:$4 sm:$0xff]   ;;  %v3460_v52 = vld [vmem:[%s5003_s1 + $0x794] ss:$8 sps:$4 sm:$0xff]  }
  0x60   : > { %1427 = vmatprep.mubr.bf16.mxu1 %v2970_v58  ;;  %v3466_v58 = vld [vmem:[%s5003_s1 + $0x784] ss:$8 sps:$4 sm:$0xff]  }
  0x61   : > { %1449 = vmatpush1.bf16.msra.mxu0 %v3401_v56  ;;  %v3458_v56 = vld [vmem:[%s5003_s1 + $0x790] ss:$8 sps:$4 sm:$0xff]  }
  0x62   : > { %1522 = vmatpush1.bf16.msra.mxu1 %v3404_v57  ;;  %1450 = vmatprep.subr.bf16.mxu0 %v3409_v60  ;;  %v3463_v57 = vld [vmem:[%s5003_s1 + $0x684] ss:$8 sps:$4 sm:$0xff]   ;;  %v3461_v60 = vld [vmem:[%s5003_s1 + $0x680] ss:$8 sps:$4 sm:$0xff]  }
  0x63   : > { %1523 = vmatprep.subr.bf16.mxu1 %v3412_v61  ;;  %v3464_v61 = vld [vmem:[%s5003_s1 + $0x780] ss:$8 sps:$4 sm:$0xff]  }
  0x64   : > { %1355 = vmatmul.mubr.bf16.gmra.mxu0 %v2967_v0  ;;  %v3467_v0 = vld [vmem:[%s5003_s1 + $0x70] ss:$8 sps:$4 sm:$0xff]  }
  0x65   : > { %1428 = vmatmul.mubr.bf16.gmra.mxu1 %v2969_v1  ;;  %1451 = vmatpush1.bf16.msra.mxu0 %v3407_v62  ;;  %v3469_v62 = vld [vmem:[%s5003_s1 + $0x74] ss:$8 sps:$4 sm:$0xff]   ;;  %v3470_v1 = vld [vmem:[%s5003_s1 + $0x170] ss:$8 sps:$4 sm:$0xff]  }
  0x66   : > { %1524 = vmatpush1.bf16.msra.mxu1 %v3410_v63  ;;  %1452 = vmatprep.subr.bf16.mxu0 %v3415_v2  ;;  %v3472_v63 = vld [vmem:[%s5003_s1 + $0x174] ss:$8 sps:$4 sm:$0xff]  }
  0x67   : > { %1525 = vmatprep.subr.bf16.mxu1 %v3418_v5  ;;  %1470 = vmatprep.mubr.bf16.mxu0 %v2948_v15  ;;  %v4198_v2 = vld [vmem:[%s3843_s30 + $0x70] sm:$0xff]  ;;  %v4211_v15 = vld [vmem:[%s3843_s30 + $0x98] sm:$0xff] }
  0x68   : > { %1543 = vmatprep.mubr.bf16.mxu1 %v2950_v17  ;;  %v4201_v5 = vld [vmem:[%s3843_s30 + $0x90] sm:$0xff]  ;;  %v3478_v17 = vld [vmem:[%s5003_s1 + $0x164] ss:$8 sps:$4 sm:$0xff]  }
  0x69   : > { %1453 = vmatpush1.bf16.msra.mxu0 %v3413_v6  ;;  %v2947_v6 = vcombine.low %v4070_v8, %v4075_v10 }
  0x6a   : > { %1526 = vmatpush1.bf16.msra.mxu1 %v3416_v7  ;;  %1454 = vmatprep.subr.bf16.mxu0 %v3421_v14  ;;  %v2949_v7 = vcombine.low %v4078_v11, %v4081_v12  ;;  %v4208_v14 = vld [vmem:[%s3843_s30 + $0x78] sm:$0xff] }
  0x6b   : > { %1527 = vmatprep.subr.bf16.mxu1 %v3424_v16  ;;  %v3475_v16 = vld [vmem:[%s5003_s1 + $0x64] ss:$8 sps:$4 sm:$0xff]  }
  0x6d   : > { %1455 = vmatpush2.bf16.msra.mxu0 %v3419_v18  ;;  %v2956_v18 = vcombine.high %v4198_v2, %v4201_v5 }
  0x6e   : > { %1528 = vmatpush2.bf16.msra.mxu1 %v3422_v20  ;;  %1456 = vmatprep.subr.bf16.mxu0 %v3427_v21  ;;  %v2958_v20 = vcombine.high %v4208_v14, %v4211_v15  ;;  %v3473_v21 = vld [vmem:[%s5003_s1 + $0x60] ss:$8 sps:$4 sm:$0xff]  }
  0x6f   : > { %1529 = vmatprep.subr.bf16.mxu1 %v3430_v23  ;;  %v3476_v23 = vld [vmem:[%s5003_s1 + $0x160] ss:$8 sps:$4 sm:$0xff]  }
  0x71   : > { %1457 = vmatpush2.bf16.msra.mxu0 %v3425_v24  ;;  %v3481_v24 = vld [vmem:[%s5003_s1 + $0x54] ss:$8 sps:$4 sm:$0xff]  }
  0x72   : > { %1530 = vmatpush2.bf16.msra.mxu1 %v3428_v25  ;;  %1458 = vmatprep.subr.bf16.mxu0 %v3433_v26  ;;  %v3484_v25 = vld [vmem:[%s5003_s1 + $0x154] ss:$8 sps:$4 sm:$0xff]   ;;  %v3479_v26 = vld [vmem:[%s5003_s1 + $0x50] ss:$8 sps:$4 sm:$0xff]  }
  0x73   : > { %1531 = vmatprep.subr.bf16.mxu1 %v3436_v27  ;;  %v3482_v27 = vld [vmem:[%s5003_s1 + $0x150] ss:$8 sps:$4 sm:$0xff]  }
  0x75   : > { %1459 = vmatpush2.bf16.msra.mxu0 %v3431_v28  ;;  %v4242_v28 = vld [vmem:[%s3843_s30 + $0xb0] sm:$0xff] }
  0x76   : > { %1532 = vmatpush2.bf16.msra.mxu1 %v3434_v29  ;;  %1460 = vmatprep.subr.bf16.mxu0 %v3439_v30  ;;  %v4245_v29 = vld [vmem:[%s3843_s30 + $0xd0] sm:$0xff]  ;;  %v2955_v30 = vcombine.low %v4198_v2, %v4201_v5 }
  0x77   : > { %1533 = vmatprep.subr.bf16.mxu1 %v3442_v31  ;;  %v2957_v31 = vcombine.low %v4208_v14, %v4211_v15 }
  0x79   : > { %1461 = vmatpush2.bf16.msra.mxu0 %v3437_v36  ;;  %v4252_v36 = vld [vmem:[%s3843_s30 + $0xb8] sm:$0xff] }
  0x7a   : > { %1534 = vmatpush2.bf16.msra.mxu1 %v3440_v37  ;;  %1462 = vmatprep.subr.bf16.mxu0 %v3445_v38  ;;  %v4255_v37 = vld [vmem:[%s3843_s30 + $0xd8] sm:$0xff]  ;;  %v3487_v38 = vld [vmem:[%s5003_s1 + $0x44] ss:$8 sps:$4 sm:$0xff]  }
  0x7b   : > { %1535 = vmatprep.subr.bf16.mxu1 %v3448_v39  ;;  %v3116_v39 = vcombine.high %v4075_v10, %v4198_v2 }
  0x7d   : > { %1463 = vmatpush2.bf16.msra.mxu0 %v3443_v40  ;;  %v3118_v40 = vcombine.high %v4081_v12, %v4208_v14 }
  0x7e   : > { %1536 = vmatpush2.bf16.msra.mxu1 %v3446_v41  ;;  %1464 = vmatprep.subr.bf16.mxu0 %v3451_v42  ;;  %v3490_v41 = vld [vmem:[%s5003_s1 + $0x144] ss:$8 sps:$4 sm:$0xff]   ;;  %v3115_v42 = vcombine.low %v4075_v10, %v4198_v2 }
  0x7f   : > { %1537 = vmatprep.subr.bf16.mxu1 %v3454_v43  ;;  %v3117_v43 = vcombine.low %v4081_v12, %v4208_v14 }
  0x81   : > { %1465 = vmatpush2.bf16.msra.mxu0 %v3449_v44  ;;  %v3485_v44 = vld [vmem:[%s5003_s1 + $0x40] ss:$8 sps:$4 sm:$0xff]  }
  0x82   : > { %1538 = vmatpush2.bf16.msra.mxu1 %v3452_v47  ;;  %1466 = vmatprep.subr.bf16.mxu0 %v3457_v51  ;;  %v2964_v47 = vcombine.high %v4242_v28, %v4245_v29  ;;  %v2966_v51 = vcombine.high %v4252_v36, %v4255_v37 }
  0x83   : > { %1539 = vmatprep.subr.bf16.mxu1 %v3460_v52  ;;  %v3488_v52 = vld [vmem:[%s5003_s1 + $0x140] ss:$8 sps:$4 sm:$0xff]  }
  0x85   : > { %1467 = vmatpush2.bf16.msra.mxu0 %v3455_v54  ;;  %v3124_v54 = vcombine.high %v4201_v5, %v4242_v28 }
  0x86   : > { %1540 = vmatpush2.bf16.msra.mxu1 %v3458_v56  ;;  %1468 = vmatprep.subr.bf16.mxu0 %v3463_v57  ;;  %v3493_v56 = vld [vmem:[%s5003_s1 + $0x34] ss:$8 sps:$4 sm:$0xff]  }
  0x87   : > { %1541 = vmatprep.subr.bf16.mxu1 %v3466_v58  ;;  %v3496_v57 = vld [vmem:[%s5003_s1 + $0x134] ss:$8 sps:$4 sm:$0xff]   ;;  %v3126_v58 = vcombine.high %v4211_v15, %v4252_v36 }
  0x89   : > { %1469 = vmatpush2.bf16.msra.mxu0 %v3461_v60  ;;  %v4292_v60 = vld [vmem:[%s3843_s30 + $0xf0] sm:$0xff] }
  0x8a   : > { %1542 = vmatpush2.bf16.msra.mxu1 %v3464_v61  ;;  %2384 = vmatprep.subr.bf16.mxu0 %v3469_v62  ;;  %v361_v61 = vld [vmem:[%s3843_s30 + $0x110] sm:$0xff]  ;;  %v3123_v62 = vcombine.low %v4201_v5, %v4242_v28 }
  0x8b   : > { %2457 = vmatprep.subr.bf16.mxu1 %v3472_v63  ;;  %v4298_v63 = vld [vmem:[%s3843_s30 + $0xf8] sm:$0xff] }
  0x8c   : > { %1471 = vmatmul.mubr.bf16.vlgmr.msra.gmra.mxu0 %v2947_v6  ;;  %v362_v6 = vld [vmem:[%s3843_s30 + $0x118] sm:$0xff] }
  0x8d   : > { %1544 = vmatmul.mubr.bf16.vlgmr.msra.gmra.mxu1 %v2949_v7  ;;  %2385 = vmatpush1.bf16.msra.mxu0 %v3467_v0  ;;  %v2963_v0 = vcombine.low %v4242_v28, %v4245_v29  ;;  %v3491_v7 = vld [vmem:[%s5003_s1 + $0x30] ss:$8 sps:$4 sm:$0xff]  }
  0x8e   : > { %2458 = vmatpush1.bf16.msra.mxu1 %v3470_v1  ;;  %2386 = vmatprep.subr.bf16.mxu0 %v3475_v16  ;;  %v2965_v1 = vcombine.low %v4252_v36, %v4255_v37  ;;  %v3494_v16 = vld [vmem:[%s5003_s1 + $0x130] ss:$8 sps:$4 sm:$0xff]  }
  0x8f   : > { %2459 = vmatprep.subr.bf16.mxu1 %v3478_v17  ;;  %1480 = vmatprep.mubr.bf16.mxu0 %v2956_v18  ;;  %v3499_v17 = vld [vmem:[%s5003_s1 + $0x24] ss:$8 sps:$4 sm:$0xff]  }
  0x90   : > { %1553 = vmatprep.mubr.bf16.mxu1 %v2958_v20  ;;  %v3502_v18 = vld [vmem:[%s5003_s1 + $0x124] ss:$8 sps:$4 sm:$0xff]   ;;  %v3125_v20 = vcombine.low %v4211_v15, %v4252_v36 }
  0x91   : > { %2387 = vmatpush1.bf16.msra.mxu0 %v3473_v21  ;;  %v2972_v21 = vcombine.high %v4292_v60, %v361_v61 }
  0x92   : > { %2460 = vmatpush1.bf16.msra.mxu1 %v3476_v23  ;;  %2388 = vmatprep.subr.bf16.mxu0 %v3481_v24  ;;  %v2974_v23 = vcombine.high %v4298_v63, %v362_v6  ;;  %v3497_v24 = vld [vmem:[%s5003_s1 + $0x20] ss:$8 sps:$4 sm:$0xff]  }
  0x93   : > { %2461 = vmatprep.subr.bf16.mxu1 %v3484_v25  ;;  %v3500_v25 = vld [vmem:[%s5003_s1 + $0x120] ss:$8 sps:$4 sm:$0xff]  }
  0x94   : > { %1481 = vmatmul.mubr.bf16.gmra.mxu0 %v2955_v30  ;;  %v3134_v30 = vcombine.high %v4255_v37, %v4298_v63 }
  0x95   : > { %1554 = vmatmul.mubr.bf16.gmra.mxu1 %v2957_v31  ;;  %2389 = vmatpush1.bf16.msra.mxu0 %v3479_v26  ;;  %v3132_v26 = vcombine.high %v4245_v29, %v4292_v60  ;;  %v3508_v31 = vld [vmem:[%s5003_s1 + $0x114] ss:$8 sps:$4 sm:$0xff]  }
  0x96   : > { %2462 = vmatpush1.bf16.msra.mxu1 %v3482_v27  ;;  %2390 = vmatprep.subr.bf16.mxu0 %v3487_v38  ;;  %v3505_v27 = vld [vmem:[%s5003_s1 + $0x14] ss:$8 sps:$4 sm:$0xff]   ;;  %v3131_v38 = vcombine.low %v4245_v29, %v4292_v60 }
  0x97   : > { %2463 = vmatprep.subr.bf16.mxu1 %v3490_v41  ;;  %1490 = vmatprep.mubr.bf16.mxu0 %v2964_v47  ;;  %v3503_v41 = vld [vmem:[%s5003_s1 + $0x10] ss:$8 sps:$4 sm:$0xff]   ;;  %v2971_v47 = vcombine.low %v4292_v60, %v361_v61  ;;  %v3133_v61 = vcombine.low %v4255_v37, %v4298_v63 }
  0x98   : > { %1563 = vmatprep.mubr.bf16.mxu1 %v2966_v51  ;;  %v2973_v51 = vcombine.low %v4298_v63, %v362_v6 }
  0x99   : > { %2391 = vmatpush1.bf16.msra.mxu0 %v3485_v44  ;;  %v3506_v44 = vld [vmem:[%s5003_s1 + $0x110] ss:$8 sps:$4 sm:$0xff]  }
  0x9a   : > { %2464 = vmatpush1.bf16.msra.mxu1 %v3488_v52  ;;  %2392 = vmatprep.subr.bf16.mxu0 %v3493_v56  ;;  %v4348_v52 = vld [vmem:[%s3843_s30] sm:$0xff]  ;;  %v4351_v56 = vld [vmem:[%s3843_s30 + $0x8] sm:$0xff] }
  0x9b   : > { %2465 = vmatprep.subr.bf16.mxu1 %v3496_v57  ;;  %v3511_v57 = vld [vmem:[%s5003_s1 + $0x4] ss:$8 sps:$4 sm:$0xff]   ;;  %v3106_v6 = vcombine.high %v4351_v56, %v3862_v50  ;;  %v3515_v50 = vld [vmem:[%s5003_s1 + $0xf0] ss:$8 sps:$4 sm:$0xff]  }
  0x9c   : > { %1491 = vmatmul.mubr.bf16.gmra.mxu0 %v2963_v0  ;;  %v3514_v0 = vld [vmem:[%s5003_s1 + $0x104] ss:$8 sps:$4 sm:$0xff]  }
  0x9d   : > { %1564 = vmatmul.mubr.bf16.gmra.mxu1 %v2965_v1  ;;  %2393 = vmatpush1.bf16.msra.mxu0 %v3491_v7  ;;  %v3104_v1 = vcombine.high %v4348_v52, %v3858_v48  ;;  %v3509_v7 = vld [vmem:[%s5003_s1] ss:$8 sps:$4 sm:$0xff]   ;;  %v3520_v48 = vld [vmem:[%s5003_s1 + $0x1f4] ss:$8 sps:$4 sm:$0xff]  }
  0x9e   : > { %2466 = vmatpush1.bf16.msra.mxu1 %v3494_v16  ;;  %2394 = vmatprep.subr.bf16.mxu0 %v3499_v17  ;;  %v3512_v16 = vld [vmem:[%s5003_s1 + $0x100] ss:$8 sps:$4 sm:$0xff]   ;;  %v3517_v17 = vld [vmem:[%s5003_s1 + $0xf4] ss:$8 sps:$4 sm:$0xff]  }
  0x9f   : > { %2467 = vmatprep.subr.bf16.mxu1 %v3502_v18  ;;  %1500 = vmatprep.mubr.bf16.mxu0 %v2972_v21  ;;  %v3518_v18 = vld [vmem:[%s5003_s1 + $0x1f0] ss:$8 sps:$4 sm:$0xff]   ;;  %v3523_v21 = vld [vmem:[%s5003_s1 + $0xe4] ss:$8 sps:$4 sm:$0xff]  }
  0xa0   : > { %1573 = vmatprep.mubr.bf16.mxu1 %v2974_v23  ;;  %v3526_v23 = vld [vmem:[%s5003_s1 + $0x1e4] ss:$8 sps:$4 sm:$0xff]  }
  0xa1   : > { %2395 = vmatpush1.bf16.msra.mxu0 %v3497_v24  ;;  %v3521_v24 = vld [vmem:[%s5003_s1 + $0xe0] ss:$8 sps:$4 sm:$0xff]  }
  0xa2   : > { %2468 = vmatpush1.bf16.msra.mxu1 %v3500_v25  ;;  %2396 = vmatprep.subr.bf16.mxu0 %v3505_v27  ;;  %v3524_v25 = vld [vmem:[%s5003_s1 + $0x1e0] ss:$8 sps:$4 sm:$0xff]   ;;  %v3529_v27 = vld [vmem:[%s5003_s1 + $0xd4] ss:$8 sps:$4 sm:$0xff]  }
  0xa3   : > { %2469 = vmatprep.subr.bf16.mxu1 %v3508_v31  ;;  %v3532_v31 = vld [vmem:[%s5003_s1 + $0x1d4] ss:$8 sps:$4 sm:$0xff]  }
  0xa4   : > { %1501 = vmatmul.mubr.bf16.gmra.mxu0 %v2971_v47  ;;  %v3535_v47 = vld [vmem:[%s5003_s1 + $0xc4] ss:$8 sps:$4 sm:$0xff]  }
  0xa5   : > { %1574 = vmatmul.mubr.bf16.gmra.mxu1 %v2973_v51  ;;  %2397 = vmatpush1.bf16.msra.mxu0 %v3503_v41  ;;  %v3527_v41 = vld [vmem:[%s5003_s1 + $0xd0] ss:$8 sps:$4 sm:$0xff]   ;;  %v3538_v51 = vld [vmem:[%s5003_s1 + $0x1c4] ss:$8 sps:$4 sm:$0xff]  }
  0xa6   : > { %2470 = vmatpush1.bf16.msra.mxu1 %v3506_v44  ;;  %2398 = vmatprep.subr.bf16.mxu0 %v3511_v57  ;;  %v3530_v44 = vld [vmem:[%s5003_s1 + $0x1d0] ss:$8 sps:$4 sm:$0xff]   ;;  %v3533_v57 = vld [vmem:[%s5003_s1 + $0xc0] ss:$8 sps:$4 sm:$0xff]  }
  0xa7   : > { %2471 = vmatprep.subr.bf16.mxu1 %v3514_v0  ;;  %2416 = vmatprep.mubr.bf16.mxu0 %v3104_v1  ;;  %v3536_v0 = vld [vmem:[%s5003_s1 + $0x1c0] ss:$8 sps:$4 sm:$0xff]   ;;  %v3541_v1 = vld [vmem:[%s5003_s1 + $0xb4] ss:$8 sps:$4 sm:$0xff]  }
  0xa8   : > { %2489 = vmatprep.mubr.bf16.mxu1 %v3106_v6  ;;  %v3544_v6 = vld [vmem:[%s5003_s1 + $0x1b4] ss:$8 sps:$4 sm:$0xff]  }
  0xa9   : > { %2399 = vmatpush1.bf16.msra.mxu0 %v3509_v7  ;;  %v3539_v7 = vld [vmem:[%s5003_s1 + $0xb0] ss:$8 sps:$4 sm:$0xff]  }
  0xaa   : > { %2472 = vmatpush1.bf16.msra.mxu1 %v3512_v16  ;;  %2400 = vmatprep.subr.bf16.mxu0 %v3517_v17  ;;  %v3542_v16 = vld [vmem:[%s5003_s1 + $0x1b0] ss:$8 sps:$4 sm:$0xff]   ;;  %v3547_v17 = vld [vmem:[%s5003_s1 + $0xa4] ss:$8 sps:$4 sm:$0xff]  }
  0xab   : > { %2473 = vmatprep.subr.bf16.mxu1 %v3520_v48  ;;  %v3550_v48 = vld [vmem:[%s5003_s1 + $0x1a4] ss:$8 sps:$4 sm:$0xff]  }
  0xad   : > { %2401 = vmatpush2.bf16.msra.mxu0 %v3515_v50  ;;  %v3545_v50 = vld [vmem:[%s5003_s1 + $0xa0] ss:$8 sps:$4 sm:$0xff]  }
  0xae   : > { %2474 = vmatpush2.bf16.msra.mxu1 %v3518_v18  ;;  %2402 = vmatprep.subr.bf16.mxu0 %v3523_v21  ;;  %v3548_v18 = vld [vmem:[%s5003_s1 + $0x1a0] ss:$8 sps:$4 sm:$0xff]   ;;  %v3553_v21 = vld [vmem:[%s5003_s1 + $0x94] ss:$8 sps:$4 sm:$0xff]  }
  0xaf   : > { %2475 = vmatprep.subr.bf16.mxu1 %v3526_v23  ;;  %v3556_v23 = vld [vmem:[%s5003_s1 + $0x194] ss:$8 sps:$4 sm:$0xff]  }
  0xb1   : > { %2403 = vmatpush2.bf16.msra.mxu0 %v3521_v24  ;;  %v3551_v24 = vld [vmem:[%s5003_s1 + $0x90] ss:$8 sps:$4 sm:$0xff]  }
  0xb2   : > { %2476 = vmatpush2.bf16.msra.mxu1 %v3524_v25  ;;  %2404 = vmatprep.subr.bf16.mxu0 %v3529_v27  ;;  %v3554_v25 = vld [vmem:[%s5003_s1 + $0x190] ss:$8 sps:$4 sm:$0xff]   ;;  %v3559_v27 = vld [vmem:[%s5003_s1 + $0x84] ss:$8 sps:$4 sm:$0xff]  }
  0xb3   : > { %2477 = vmatprep.subr.bf16.mxu1 %v3532_v31  ;;  %v3562_v31 = vld [vmem:[%s5003_s1 + $0x184] ss:$8 sps:$4 sm:$0xff]  }
  0xb5   : > { %2405 = vmatpush2.bf16.msra.mxu0 %v3527_v41  ;;  %v3557_v41 = vld [vmem:[%s5003_s1 + $0x80] ss:$8 sps:$4 sm:$0xff]  }
  0xb6   : > { %2478 = vmatpush2.bf16.msra.mxu1 %v3530_v44  ;;  %2406 = vmatprep.subr.bf16.mxu0 %v3535_v47  ;;  %v3560_v44 = vld [vmem:[%s5003_s1 + $0x180] ss:$8 sps:$4 sm:$0xff]   ;;  %v3565_v47 = vld [vmem:[%s5003_s1 + $0x274] ss:$8 sps:$4 sm:$0xff]  }
  0xb7   : > { %2479 = vmatprep.subr.bf16.mxu1 %v3538_v51  ;;  %v3568_v51 = vld [vmem:[%s5003_s1 + $0x374] ss:$8 sps:$4 sm:$0xff]  }
  0xb9   : > { %2407 = vmatpush2.bf16.msra.mxu0 %v3533_v57  ;;  %v3659_v57 = vld [vmem:[%s3843_s30 + $0x20] sm:$0xff] }
  0xba   : > { %2480 = vmatpush2.bf16.msra.mxu1 %v3536_v0  ;;  %2408 = vmatprep.subr.bf16.mxu0 %v3541_v1  ;;  %v3103_v0 = vcombine.low %v4348_v52, %v3659_v57  ;;  %v3660_v1 = vld [vmem:[%s3843_s30 + $0x28] sm:$0xff] }
  0xbb   : > { %2481 = vmatprep.subr.bf16.mxu1 %v3544_v6  ;;  %v3105_v6 = vcombine.low %v4351_v56, %v3660_v1  ;;  %v3571_v52 = vld [vmem:[%s5003_s1 + $0x264] ss:$8 sps:$4 sm:$0xff]   ;;  %v3581_v1 = vld [vmem:[%s5003_s1 + $0x240] ss:$8 sps:$4 sm:$0xff]  }
  0xbc   : > { %v3574_v56 = vld [vmem:[%s5003_s1 + $0x364] ss:$8 sps:$4 sm:$0xff]  }
  0xbd   : > { %2409 = vmatpush2.bf16.msra.mxu0 %v3539_v7  ;;  %v179_v7 = vld [vmem:[%s3843_s30 + $0x40] sm:$0xff] }
  0xbe   : > { %2482 = vmatpush2.bf16.msra.mxu1 %v3542_v16  ;;  %2410 = vmatprep.subr.bf16.mxu0 %v3547_v17  ;;  %v180_v16 = vld [vmem:[%s3843_s30 + $0x48] sm:$0xff]  ;;  %v3563_v17 = vld [vmem:[%s5003_s1 + $0x270] ss:$8 sps:$4 sm:$0xff]  }
  0xbf   : > { %2483 = vmatprep.subr.bf16.mxu1 %v3550_v48  ;;  %v3566_v48 = vld [vmem:[%s5003_s1 + $0x370] ss:$8 sps:$4 sm:$0xff]   ;;  %v3583_v57 = vld [vmem:[%s5003_s1 + $0x244] ss:$8 sps:$4 sm:$0xff]  }
  0xc1   : > { %2411 = vmatpush2.bf16.msra.mxu0 %v3545_v50  ;;  %v3661_v50 = vld [vmem:[%s3843_s30 + $0x60] sm:$0xff] }
  0xc2   : > { %2484 = vmatpush2.bf16.msra.mxu1 %v3548_v18  ;;  %2412 = vmatprep.subr.bf16.mxu0 %v3553_v21  ;;  %v3112_v18 = vcombine.high %v179_v7, %v3661_v50  ;;  %v3662_v21 = vld [vmem:[%s3843_s30 + $0x68] sm:$0xff] }
  0xc3   : > { %2485 = vmatprep.subr.bf16.mxu1 %v3556_v23  ;;  %v3114_v23 = vcombine.high %v180_v16, %v3662_v21 }
  0xc5   : > { %2413 = vmatpush2.bf16.msra.mxu0 %v3551_v24  ;;  %v3569_v24 = vld [vmem:[%s5003_s1 + $0x260] ss:$8 sps:$4 sm:$0xff]  }
  0xc6   : > { %2486 = vmatpush2.bf16.msra.mxu1 %v3554_v25  ;;  %2414 = vmatprep.subr.bf16.mxu0 %v3559_v27  ;;  %v3572_v25 = vld [vmem:[%s5003_s1 + $0x360] ss:$8 sps:$4 sm:$0xff]   ;;  %v3577_v27 = vld [vmem:[%s5003_s1 + $0x254] ss:$8 sps:$4 sm:$0xff]  }
  0xc7   : > { %2487 = vmatprep.subr.bf16.mxu1 %v3562_v31  ;;  %v3580_v31 = vld [vmem:[%s5003_s1 + $0x354] ss:$8 sps:$4 sm:$0xff]  }
  0xc9   : > { %2415 = vmatpush2.bf16.msra.mxu0 %v3557_v41  ;;  %v3111_v41 = vcombine.low %v179_v7, %v3661_v50  ;;  %v3589_v7 = vld [vmem:[%s5003_s1 + $0x234] ss:$8 sps:$4 sm:$0xff]   ;;  %v3108_v50 = vcombine.high %v4572_v32, %v4070_v8  ;;  %v3608_v8 = vld [vmem:[%s5003_s1 + $0x300] ss:$8 sps:$4 sm:$0xff]  }
  0xca   : > { %2488 = vmatpush2.bf16.msra.mxu1 %v3560_v44  ;;  %2530 = vmatprep.subr.bf16.mxu0 %v3565_v47  ;;  %v3113_v44 = vcombine.low %v180_v16, %v3662_v21  ;;  %v3575_v47 = vld [vmem:[%s5003_s1 + $0x250] ss:$8 sps:$4 sm:$0xff]   ;;  %v3592_v16 = vld [vmem:[%s5003_s1 + $0x334] ss:$8 sps:$4 sm:$0xff]   ;;  %v3605_v21 = vld [vmem:[%s5003_s1 + $0x200] ss:$8 sps:$4 sm:$0xff]  }
  0xcb   : > { %2603 = vmatprep.subr.bf16.mxu1 %v3568_v51  ;;  %v3578_v51 = vld [vmem:[%s5003_s1 + $0x350] ss:$8 sps:$4 sm:$0xff]  }
  0xcc   : > { %2417 = vmatmul.mubr.bf16.vlgmr.msra.gmra.mxu0 %v3103_v0  ;;  %v3586_v0 = vld [vmem:[%s5003_s1 + $0x344] ss:$8 sps:$4 sm:$0xff]  }
  0xcd   : > { %2490 = vmatmul.mubr.bf16.vlgmr.msra.gmra.mxu1 %v3105_v6  ;;  %2531 = vmatpush1.bf16.msra.mxu0 %v3563_v17  ;;  %v3584_v6 = vld [vmem:[%s5003_s1 + $0x340] ss:$8 sps:$4 sm:$0xff]   ;;  %v3587_v17 = vld [vmem:[%s5003_s1 + $0x230] ss:$8 sps:$4 sm:$0xff]  }
  0xce   : > { %2604 = vmatpush1.bf16.msra.mxu1 %v3566_v48  ;;  %2532 = vmatprep.subr.bf16.mxu0 %v3571_v52  ;;  %v3590_v48 = vld [vmem:[%s5003_s1 + $0x330] ss:$8 sps:$4 sm:$0xff]   ;;  %v3593_v52 = vld [vmem:[%s5003_s1 + $0x220] ss:$8 sps:$4 sm:$0xff]  }
  0xcf   : > { %2605 = vmatprep.subr.bf16.mxu1 %v3574_v56  ;;  %2426 = vmatprep.mubr.bf16.mxu0 %v3112_v18  ;;  %v3596_v56 = vld [vmem:[%s5003_s1 + $0x320] ss:$8 sps:$4 sm:$0xff]   ;;  %v3110_v18 = vcombine.high %v4575_v34, %v4078_v11  ;;  %v3622_v11 = vld [vmem:[%s5003_s1 + $0x3e4] ss:$8 sps:$4 sm:$0xff]  }
  0xd0   : > { %2499 = vmatprep.mubr.bf16.mxu1 %v3114_v23  ;;  %v3620_v23 = vld [vmem:[%s5003_s1 + $0x3e0] ss:$8 sps:$4 sm:$0xff]  }
  0xd1   : > { %2533 = vmatpush1.bf16.msra.mxu0 %v3569_v24  ;;  %v3625_v24 = vld [vmem:[%s5003_s1 + $0x2d4] ss:$8 sps:$4 sm:$0xff]  }
  0xd2   : > { %2606 = vmatpush1.bf16.msra.mxu1 %v3572_v25  ;;  %2534 = vmatprep.subr.bf16.mxu0 %v3577_v27  ;;  %v3628_v25 = vld [vmem:[%s5003_s1 + $0x3d4] ss:$8 sps:$4 sm:$0xff]   ;;  %v3623_v27 = vld [vmem:[%s5003_s1 + $0x2d0] ss:$8 sps:$4 sm:$0xff]  }
  0xd3   : > { %2607 = vmatprep.subr.bf16.mxu1 %v3580_v31  ;;  %v3626_v31 = vld [vmem:[%s5003_s1 + $0x3d0] ss:$8 sps:$4 sm:$0xff]  }
  0xd4   : > { %2427 = vmatmul.mubr.bf16.gmra.mxu0 %v3111_v41  ;;  %v3631_v41 = vld [vmem:[%s5003_s1 + $0x2c4] ss:$8 sps:$4 sm:$0xff]  }
  0xd5   : > { %2500 = vmatmul.mubr.bf16.gmra.mxu1 %v3113_v44  ;;  %2535 = vmatpush1.bf16.msra.mxu0 %v3575_v47  ;;  %v3634_v44 = vld [vmem:[%s5003_s1 + $0x3c4] ss:$8 sps:$4 sm:$0xff]   ;;  %v3629_v47 = vld [vmem:[%s5003_s1 + $0x2c0] ss:$8 sps:$4 sm:$0xff]  }
  0xd6   : > { %2608 = vmatpush1.bf16.msra.mxu1 %v3578_v51  ;;  %2536 = vmatprep.subr.bf16.mxu0 %v3583_v57  ;;  %v3632_v51 = vld [vmem:[%s5003_s1 + $0x3c0] ss:$8 sps:$4 sm:$0xff]   ;;  %v3637_v57 = vld [vmem:[%s5003_s1 + $0x2b4] ss:$8 sps:$4 sm:$0xff]  }
  0xd7   : > { %2609 = vmatprep.subr.bf16.mxu1 %v3586_v0  ;;  %2436 = vmatprep.mubr.bf16.mxu0 %v3120_v45  ;;  %v3595_v45 = vld [vmem:[%s5003_s1 + $0x224] ss:$8 sps:$4 sm:$0xff]   ;;  %v3640_v0 = vld [vmem:[%s5003_s1 + $0x3b4] ss:$8 sps:$4 sm:$0xff]  }
  0xd8   : > { %2509 = vmatprep.mubr.bf16.mxu1 %v3122_v55  ;;  %v3598_v55 = vld [vmem:[%s5003_s1 + $0x324] ss:$8 sps:$4 sm:$0xff]  }
  0xd9   : > { %2537 = vmatpush1.bf16.msra.mxu0 %v3581_v1  ;;  %v3635_v1 = vld [vmem:[%s5003_s1 + $0x2b0] ss:$8 sps:$4 sm:$0xff]  }
  0xda   : > { %2610 = vmatpush1.bf16.msra.mxu1 %v3584_v6  ;;  %2538 = vmatprep.subr.bf16.mxu0 %v3589_v7  ;;  %v3638_v6 = vld [vmem:[%s5003_s1 + $0x3b0] ss:$8 sps:$4 sm:$0xff]   ;;  %v3643_v7 = vld [vmem:[%s5003_s1 + $0x2a4] ss:$8 sps:$4 sm:$0xff]  }
  0xdb   : > { %2611 = vmatprep.subr.bf16.mxu1 %v3592_v16  ;;  %v3646_v16 = vld [vmem:[%s5003_s1 + $0x3a4] ss:$8 sps:$4 sm:$0xff]  }
  0xdc   : > { %2437 = vmatmul.mubr.bf16.gmra.mxu0 %v3119_v46  ;;  %v3599_v46 = vld [vmem:[%s5003_s1 + $0x210] ss:$8 sps:$4 sm:$0xff]  }
  0xdd   : > { %2510 = vmatmul.mubr.bf16.gmra.mxu1 %v3121_v59  ;;  %2539 = vmatpush1.bf16.msra.mxu0 %v3587_v17  ;;  %v3602_v59 = vld [vmem:[%s5003_s1 + $0x310] ss:$8 sps:$4 sm:$0xff]   ;;  %v3641_v17 = vld [vmem:[%s5003_s1 + $0x2a0] ss:$8 sps:$4 sm:$0xff]  }
  0xde   : > { %2612 = vmatpush1.bf16.msra.mxu1 %v3590_v48  ;;  %2540 = vmatprep.subr.bf16.mxu0 %v3595_v45  ;;  %v3644_v48 = vld [vmem:[%s5003_s1 + $0x3a0] ss:$8 sps:$4 sm:$0xff]   ;;  %v3649_v45 = vld [vmem:[%s5003_s1 + $0x294] ss:$8 sps:$4 sm:$0xff]  }
  0xdf   : > { %2613 = vmatprep.subr.bf16.mxu1 %v3598_v55  ;;  %2446 = vmatprep.mubr.bf16.mxu0 %v3128_v3  ;;  %v3607_v3 = vld [vmem:[%s5003_s1 + $0x204] ss:$8 sps:$4 sm:$0xff]   ;;  %v3652_v55 = vld [vmem:[%s5003_s1 + $0x394] ss:$8 sps:$4 sm:$0xff]  }
  0xe0   : > { %2519 = vmatprep.mubr.bf16.mxu1 %v3130_v9  ;;  %v3610_v9 = vld [vmem:[%s5003_s1 + $0x304] ss:$8 sps:$4 sm:$0xff]  }
  0xe1   : > { %2541 = vmatpush1.bf16.msra.mxu0 %v3593_v52  ;;  %v3647_v52 = vld [vmem:[%s5003_s1 + $0x290] ss:$8 sps:$4 sm:$0xff]  }
  0xe2   : > { %2614 = vmatpush1.bf16.msra.mxu1 %v3596_v56  ;;  %2542 = vmatprep.subr.bf16.mxu0 %v3601_v19  ;;  %v3650_v56 = vld [vmem:[%s5003_s1 + $0x390] ss:$8 sps:$4 sm:$0xff]   ;;  %v3655_v19 = vld [vmem:[%s5003_s1 + $0x284] ss:$8 sps:$4 sm:$0xff]  }
  0xe3   : > { %2615 = vmatprep.subr.bf16.mxu1 %v3604_v22  ;;  %v3658_v22 = vld [vmem:[%s5003_s1 + $0x384] ss:$8 sps:$4 sm:$0xff]  }
  0xe4   : > { %2447 = vmatmul.mubr.bf16.gmra.mxu0 %v3127_v4  ;;  %v3619_v4 = vld [vmem:[%s5003_s1 + $0x2e4] ss:$8 sps:$4 sm:$0xff]  }
  0xe5   : > { %2520 = vmatmul.mubr.bf16.gmra.mxu1 %v3129_v13  ;;  %2543 = vmatpush1.bf16.msra.mxu0 %v3599_v46  ;;  %v3617_v13 = vld [vmem:[%s5003_s1 + $0x2e0] ss:$8 sps:$4 sm:$0xff]  }
  0xe6   : > { %2616 = vmatpush1.bf16.msra.mxu1 %v3602_v59  ;;  %2544 = vmatprep.subr.bf16.mxu0 %v3607_v3  ;;  %v3653_v46 = vld [vmem:[%s5003_s1 + $0x280] ss:$8 sps:$4 sm:$0xff]   ;;  %v3663_v3 = vld [vmem:[%s3843_s30 + $0x30] sm:$0xff] }
  0xe7   : > { %2617 = vmatprep.subr.bf16.mxu1 %v3610_v9  ;;  %2562 = vmatprep.mubr.bf16.mxu0 %v3108_v50  ;;  %v3656_v59 = vld [vmem:[%s5003_s1 + $0x380] ss:$8 sps:$4 sm:$0xff]   ;;  %v3107_v9 = vcombine.low %v4572_v32, %v3663_v3  ;;  %v3664_v50 = vld [vmem:[%s3843_s30 + $0x38] sm:$0xff] }
  0xe8   : > { %2635 = vmatprep.mubr.bf16.mxu1 %v3110_v18  ;;  %v3109_v18 = vcombine.low %v4575_v34, %v3664_v50 }
  0xe9   : > { %2545 = vmatpush1.bf16.msra.mxu0 %v3605_v21 }
  0xea   : > { %2618 = vmatpush1.bf16.msra.mxu1 %v3608_v8  ;;  %2546 = vmatprep.subr.bf16.mxu0 %v3613_v33 }
  0xeb   : > { %2619 = vmatprep.subr.bf16.mxu1 %v3616_v35 }
  0xed   : > { %2547 = vmatpush2.bf16.msra.mxu0 %v3611_v49 }
  0xee   : > { %2620 = vmatpush2.bf16.msra.mxu1 %v3614_v53  ;;  %2548 = vmatprep.subr.bf16.mxu0 %v3619_v4 }
  0xef   : > { %2621 = vmatprep.subr.bf16.mxu1 %v3622_v11 }
  0xf1   : > { %2549 = vmatpush2.bf16.msra.mxu0 %v3617_v13 }
  0xf2   : > { %2622 = vmatpush2.bf16.msra.mxu1 %v3620_v23  ;;  %2550 = vmatprep.subr.bf16.mxu0 %v3625_v24 }
  0xf3   : > { %2623 = vmatprep.subr.bf16.mxu1 %v3628_v25 }
  0xf5   : > { %2551 = vmatpush2.bf16.msra.mxu0 %v3623_v27 }
  0xf6   : > { %2624 = vmatpush2.bf16.msra.mxu1 %v3626_v31  ;;  %2552 = vmatprep.subr.bf16.mxu0 %v3631_v41 }
  0xf7   : > { %2625 = vmatprep.subr.bf16.mxu1 %v3634_v44 }
  0xf9   : > { %2553 = vmatpush2.bf16.msra.mxu0 %v3629_v47 }
  0xfa   : > { %2626 = vmatpush2.bf16.msra.mxu1 %v3632_v51  ;;  %2554 = vmatprep.subr.bf16.mxu0 %v3637_v57 }
  0xfb   : > { %2627 = vmatprep.subr.bf16.mxu1 %v3640_v0 }
  0xfd   : > { %2555 = vmatpush2.bf16.msra.mxu0 %v3635_v1 }
  0xfe   : > { %2628 = vmatpush2.bf16.msra.mxu1 %v3638_v6  ;;  %2556 = vmatprep.subr.bf16.mxu0 %v3643_v7 }
  0xff   : > { %2629 = vmatprep.subr.bf16.mxu1 %v3646_v16 }
 0x101   : > { %2557 = vmatpush2.bf16.msra.mxu0 %v3641_v17 }
 0x102   : > { %2630 = vmatpush2.bf16.msra.mxu1 %v3644_v48  ;;  %2558 = vmatprep.subr.bf16.mxu0 %v3649_v45 }
 0x103   : > { %2631 = vmatprep.subr.bf16.mxu1 %v3652_v55 }
 0x105   : > { %2559 = vmatpush2.bf16.msra.mxu0 %v3647_v52 }
 0x106   : > { %2632 = vmatpush2.bf16.msra.mxu1 %v3650_v56  ;;  %2560 = vmatprep.subr.bf16.mxu0 %v3655_v19 }
 0x107   : > { %2633 = vmatprep.subr.bf16.mxu1 %v3658_v22 }
 0x109   : > { %2561 = vmatpush2.bf16.msra.mxu0 %v3653_v46 }
 0x10a   : > { %2634 = vmatpush2.bf16.msra.mxu1 %v3656_v59 }
 0x10c   : > { %v1326_v21 = vpop.f32.mrf.mxu0  ;;  %2563 = vmatmul.mubr.bf16.vlgmr.msra.gmra.mxu0 %v3107_v9 }
 0x10d   : > { %v1399_v8 = vpop.f32.mrf.mxu1  ;;  %2636 = vmatmul.mubr.bf16.vlgmr.msra.gmra.mxu1 %v3109_v18  ;;  %2572 = vmatprep.mubr.bf16.mxu0 %v3116_v39 }
 0x10e   : > { %v4705_v33 = vadd.f32 %v1399_v8, %v1326_v21  ;;  %2645 = vmatprep.mubr.bf16.mxu1 %v3118_v40  ;;  %v1328_v32 = vpop.f32.mrf.mxu0 }
 0x10f   : > { %v1401_v35 = vpop.f32.mrf.mxu1 }
 0x110   : > { %v4713_v49 = vadd.f32 %v1401_v35, %v1328_v32  ;;  %v1330_v34 = vpop.f32.mrf.mxu0 }
 0x111   : > { %v1403_v53 = vpop.f32.mrf.mxu1 }
 0x112   : > { %v4715_v4 = vadd.f32 %v1403_v53, %v1330_v34  ;;  %v1332_v11 = vpop.f32.mrf.mxu0 }
 0x113   : > { %v1405_v13 = vpop.f32.mrf.mxu1 }
 0x114   : > { %v4717_v23 = vadd.f32 %v1405_v13, %v1332_v11  ;;  %2573 = vmatmul.mubr.bf16.gmra.mxu0 %v3115_v42  ;;  %v1336_v39 = vpop.f32.mrf.mxu0 }
 0x115   : > { %2646 = vmatmul.mubr.bf16.gmra.mxu1 %v3117_v43  ;;  %v1409_v40 = vpop.f32.mrf.mxu1  ;;  %2582 = vmatprep.mubr.bf16.mxu0 %v3124_v54 }
 0x116   : > { %2655 = vmatprep.mubr.bf16.mxu1 %v3126_v58  ;;  %v4731_v24 = vadd.f32 %v1409_v40, %v1336_v39  ;;  %v1338_v25 = vpop.f32.mrf.mxu0 }
 0x117   : > { %v1411_v27 = vpop.f32.mrf.mxu1 }
 0x118   : > { %v4733_v10 = vadd.f32 %v1411_v27, %v1338_v25  ;;  %v1340_v2 = vpop.f32.mrf.mxu0 }
 0x119   : > { %v1413_v42 = vpop.f32.mrf.mxu1 }
 0x11a   : > { %v4735_v12 = vadd.f32 %v1413_v42, %v1340_v2  ;;  %v1342_v14 = vpop.f32.mrf.mxu0 }
 0x11b   : > { %v1415_v43 = vpop.f32.mrf.mxu1 }
 0x11c   : > { %v4737_v31 = vadd.f32 %v1415_v43, %v1342_v14  ;;  %2583 = vmatmul.mubr.bf16.gmra.mxu0 %v3123_v62  ;;  %v1346_v54 = vpop.f32.mrf.mxu0 }
 0x11d   : > { %2656 = vmatmul.mubr.bf16.gmra.mxu1 %v3125_v20  ;;  %v1419_v58 = vpop.f32.mrf.mxu1  ;;  %2592 = vmatprep.mubr.bf16.mxu0 %v3132_v26 }
 0x11e   : > { %2665 = vmatprep.mubr.bf16.mxu1 %v3134_v30  ;;  %v4751_v41 = vadd.f32 %v1419_v58, %v1346_v54  ;;  %v1348_v44 = vpop.f32.mrf.mxu0 }
 0x11f   : > { %v1421_v47 = vpop.f32.mrf.mxu1 }
 0x120   : > { %v4753_v5 = vadd.f32 %v1421_v47, %v1348_v44  ;;  %v1350_v28 = vpop.f32.mrf.mxu0 }
 0x121   : > { %v1423_v62 = vpop.f32.mrf.mxu1 }
 0x122   : > { %v4755_v15 = vadd.f32 %v1423_v62, %v1350_v28  ;;  %v1352_v36 = vpop.f32.mrf.mxu0 }
 0x123   : > { %v1425_v20 = vpop.f32.mrf.mxu1 }
 0x124   : > { %v4757_v51 = vadd.f32 %v1425_v20, %v1352_v36  ;;  %2593 = vmatmul.mubr.bf16.gmra.mxu0 %v3131_v38  ;;  %v1356_v26 = vpop.f32.mrf.mxu0 }
 0x125   : > { %2666 = vmatmul.mubr.bf16.gmra.mxu1 %v3133_v61  ;;  %v1429_v30 = vpop.f32.mrf.mxu1 }
 0x126   : > { %v4765_v57 = vadd.f32 %v1429_v30, %v1356_v26  ;;  %v1358_v0 = vpop.f32.mrf.mxu0 }
 0x127   : > { %v1431_v1 = vpop.f32.mrf.mxu1 }
 0x128   : > { %v4767_v6 = vadd.f32 %v1431_v1, %v1358_v0  ;;  %v1360_v7 = vpop.f32.mrf.mxu0 }
 0x129   : > { %v1433_v16 = vpop.f32.mrf.mxu1 }
 0x12a   : > { %5006 = vst [vmem:[#allocation2_spill] sm:$0xff] %v4767_v6  ;;  %v4769_v17 = vadd.f32 %v1433_v16, %v1360_v7  ;;  %v1362_v48 = vpop.f32.mrf.mxu0 }
 0x12b   : > { %v1435_v45 = vpop.f32.mrf.mxu1 }
 0x12c   : > { %5007 = vst [vmem:[#allocation3_spill] sm:$0xff] %v4769_v17  ;;  %v4771_v29 = vadd.f32 %v1435_v45, %v1362_v48 }
 0x12e   : > { %5008 = vst [vmem:[#allocation4_spill] sm:$0xff] %v4771_v29 }
 0x14c   : > { %v1472_v60 = vpop.f32.mrf.mxu0 }
 0x14d   : > { %v4773_v38 = vpop.f32.mrf.mxu1 }
 0x14e   : > { %v1474_v37 = vpop.f32.mrf.mxu0 }
 0x14f   : > { %v4775_v63 = vpop.f32.mrf.mxu1 }
 0x150   : > { %v1476_v61 = vpop.f32.mrf.mxu0 }
 0x151   : > { %v4777_v55 = vpop.f32.mrf.mxu1 }
 0x152   : > { %v4779_v52 = vpop.f32.mrf.mxu0 }
 0x153   : > { %v4781_v56 = vpop.f32.mrf.mxu1 }
 0x154   : > { %v4783_v19 = vpop.f32.mrf.mxu0 }
 0x155   : > { %v4785_v22 = vpop.f32.mrf.mxu1 }
 0x156   : > { %v4787_v46 = vpop.f32.mrf.mxu0 }
 0x157   : > { %v4789_v59 = vpop.f32.mrf.mxu1 }
 0x158   : > { %v4791_v3 = vpop.f32.mrf.mxu0 }
 0x159   : > { %v4793_v9 = vpop.f32.mrf.mxu1 }
 0x15a   : > { %v4795_v50 = vpop.f32.mrf.mxu0 }
 0x15b   : > { %v4797_v18 = vpop.f32.mrf.mxu1 }
 0x15c   : > { %v4799_v21 = vpop.f32.mrf.mxu0 }
 0x15d   : > { %v4801_v8 = vpop.f32.mrf.mxu1 }
 0x15e   : > { %v4803_v32 = vpop.f32.mrf.mxu0 }
 0x15f   : > { %v4805_v35 = vpop.f32.mrf.mxu1 }
 0x160   : > { %v4807_v34 = vpop.f32.mrf.mxu0 }
 0x161   : > { %v4809_v53 = vpop.f32.mrf.mxu1 }
 0x162   : > { %v4811_v11 = vpop.f32.mrf.mxu0 }
 0x163   : > { %v4813_v13 = vpop.f32.mrf.mxu1 }
 0x164   : > { %v4815_v39 = vpop.f32.mrf.mxu0 }
 0x165   : > { %v4817_v40 = vpop.f32.mrf.mxu1 }
 0x166   : > { %5009 = vst [vmem:[#allocation5_spill] sm:$0xff] %v4817_v40  ;;  %v4819_v25 = vpop.f32.mrf.mxu0 }
 0x167   : > { %5010 = vst [vmem:[#allocation6_spill] sm:$0xff] %v4819_v25  ;;  %v4821_v27 = vpop.f32.mrf.mxu1 }
 0x168   : > { %5011 = vst [vmem:[#allocation7_spill] sm:$0xff] %v4821_v27  ;;  %v4823_v2 = vpop.f32.mrf.mxu0 }
 0x169   : > { %5012 = vst [vmem:[#allocation8_spill] sm:$0xff] %v4823_v2  ;;  %v4825_v42 = vpop.f32.mrf.mxu1 }
 0x16a   : > { %5013 = vst [vmem:[#allocation9_spill] sm:$0xff] %v4825_v42  ;;  %v4827_v14 = vpop.f32.mrf.mxu0 }
 0x16b   : > { %5014 = vst [vmem:[#allocation10_spill] sm:$0xff] %v4827_v14  ;;  %v4829_v43 = vpop.f32.mrf.mxu1 }
 0x16c   : > { %5015 = vst [vmem:[#allocation11_spill] sm:$0xff] %v4829_v43 }
 0x18c   : > { %v2418_v54 = vpop.f32.mrf.mxu0 }
 0x18d   : > { %v2491_v58 = vpop.f32.mrf.mxu1 }
 0x18e   : > { %v2420_v44 = vpop.f32.mrf.mxu0 }
 0x18f   : > { %v2493_v47 = vpop.f32.mrf.mxu1 }
 0x190   : > { %v2422_v28 = vpop.f32.mrf.mxu0 }
 0x191   : > { %v4831_v62 = vpop.f32.mrf.mxu1 }
 0x192   : > { %v2424_v36 = vpop.f32.mrf.mxu0 }
 0x193   : > { %v4833_v20 = vpop.f32.mrf.mxu1 }
 0x194   : > { %v4835_v26 = vpop.f32.mrf.mxu0 }
 0x195   : > { %v4837_v30 = vpop.f32.mrf.mxu1 }
 0x196   : > { %v4839_v0 = vpop.f32.mrf.mxu0 }
 0x197   : > { %v4841_v1 = vpop.f32.mrf.mxu1 }
 0x198   : > { %v4843_v7 = vpop.f32.mrf.mxu0 }
 0x199   : > { %v4845_v16 = vpop.f32.mrf.mxu1 }
 0x19a   : > { %5016 = vst [vmem:[#allocation12_spill] sm:$0xff] %v4845_v16  ;;  %v4847_v48 = vpop.f32.mrf.mxu0 }
 0x19b   : > { %v4849_v45 = vpop.f32.mrf.mxu1 }
 0x19c   : > { %5017 = vst [vmem:[#allocation13_spill] sm:$0xff] %v4849_v45  ;;  %v4851_v43 = vpop.f32.mrf.mxu0  ;;  %v2678_v45 = vlaneseq }
 0x19d   : > { %5018 = vst [vmem:[#allocation14_spill] sm:$0xff] %v4851_v43  ;;  %v4853_v42 = vpop.f32.mrf.mxu1  ;;  %v1473_v43 = vadd.f32 %v1472_v60, %v4705_v33  ;;  %v1479_v33 = vadd.f32 %v4779_v52, %v4717_v23  ;;  %v1493_v52 = vadd.f32 %v4799_v21, %v4751_v41  ;;  %v1497_v41 = vadd.f32 %v4807_v34, %v4755_v15 }
 0x19e   : > { %5019 = vst [vmem:[#allocation15_spill] sm:$0xff] %v4853_v42  ;;  %v4855_v14 = vpop.f32.mrf.mxu0 }
 0x19f   : > { %5020 = vst [vmem:[#allocation16_spill] sm:$0xff] %v4855_v14  ;;  %v4857_v29 = vpop.f32.mrf.mxu1 }
 0x1a0   : > { %5021 = vst [vmem:[#allocation17_spill] sm:$0xff] %v4857_v29  ;;  %v4859_v27 = vpop.f32.mrf.mxu0  ;;  %v1475_v29 = vadd.f32 %v1474_v37, %v4713_v49  ;;  %v1483_v49 = vadd.f32 %v4783_v19, %v4731_v24  ;;  %v1485_v37 = vadd.f32 %v4787_v46, %v4733_v10  ;;  %v1489_v24 = vadd.f32 %v4795_v50, %v4737_v31 }
 0x1a1   : > { %5022 = vst [vmem:[#allocation18_spill] sm:$0xff] %v4859_v27  ;;  %v4861_v2 = vpop.f32.mrf.mxu1  ;;  %v2679_v27 = vshrl.u32 %v2678_v45, 7  ;;  %v1495_v50 = vadd.f32 %v4803_v32, %v4753_v5 }
 0x1a2   : > { %5023 = vst [vmem:[#allocation19_spill] sm:$0xff] %v4861_v2  ;;  %v4863_v17 = vpop.f32.mrf.mxu0  ;;  %v1546_v2 = vadd.f32 %v4773_v38, %v1473_v43 }
 0x1a3   : > { %5024 = vst [vmem:[#allocation20_spill] sm:$0xff] %v4863_v17  ;;  %v4865_v40 = vpop.f32.mrf.mxu1  ;;  %v1477_v17 = vadd.f32 %v1476_v61, %v4715_v4  ;;  %v2676_v4 = vld [vmem:[%s5004_s2] sm:$0x3] }
 0x1a4   : > { %5025 = vst [vmem:[#allocation21_spill] sm:$0xff] %v4865_v40  ;;  %v4867_v16 = vpop.f32.mrf.mxu0  ;;  %v2419_v60 = vadd.f32 %v2418_v54, %v1546_v2 }
 0x1a5   : > { %5026 = vst [vmem:[#allocation22_spill] sm:$0xff] %v4867_v16  ;;  %v4869_v25 = vpop.f32.mrf.mxu1  ;;  %v2684_v16 = vsub.s32 1, %v2679_v27 }
 0x1a6   : > { %5027 = vst [vmem:[#allocation23_spill] sm:$0xff] %v4869_v25  ;;  %v4872_v42 = vpop.f32.mrf.mxu0  ;;  %v1548_v25 = vadd.f32 %v4775_v63, %v1475_v29  ;;  %v1487_v29 = vadd.f32 %v4791_v3, %v4735_v12  ;;  %v2492_v61 = vadd.f32 %v2491_v58, %v2419_v60  ;;  %v1556_v12 = vadd.f32 %v4785_v22, %v1483_v49 }
 0x1a7   : > { %5028 = vst [vmem:[#allocation24_spill] sm:$0xff] %v4872_v42  ;;  %v4874_v14 = vpop.f32.mrf.mxu1  ;;  %v2680_v42 = vsub.s32 0, %v2679_v27  ;;  %v4907_v46 = vrot.slane %v2676_v4, %v2684_v16  ;;  %v1566_v58 = vadd.f32 %v4801_v8, %v1493_v52  ;;  %v1570_v8 = vadd.f32 %v4809_v53, %v1497_v41 }
 0x1a8   : > { %5029 = vst [vmem:[#allocation25_spill] sm:$0xff] %v4874_v14  ;;  %v4879_v6 = vpop.f32.mrf.mxu0  ;;  %v1550_v14 = vadd.f32 %v4777_v55, %v1477_v17  ;;  %v2421_v38 = vadd.f32 %v2420_v44, %v1548_v25  ;;  %v1552_v17 = vadd.f32 %v4781_v56, %v1479_v33  ;;  %v1558_v56 = vadd.f32 %v4789_v59, %v1485_v37  ;;  %v5032_v37 = vld [vmem:[#allocation12_spill] sm:$0xff] }
 0x1a9   : > { %v4881_v40 = vpop.f32.mrf.mxu1  ;;  %v4905_v10 = vrot.slane %v2676_v4, %v2680_v42  ;;  %v1560_v31 = vadd.f32 %v4793_v9, %v1487_v29  ;;  %v1499_v59 = vadd.f32 %v4811_v11, %v4757_v51  ;;  %v2429_v9 = vadd.f32 %v4835_v26, %v1556_v12  ;;  %v5031_v4 = vld [vmem:[#allocation6_spill] sm:$0xff]  ;;  %v5034_v12 = vld [vmem:[#allocation5_spill] sm:$0xff] }
 0x1aa   : > { %v4896_v23 = vpop.f32.mrf.mxu0  ;;  %v2423_v55 = vadd.f32 %v2422_v28, %v1550_v14  ;;  %v2494_v3 = vadd.f32 %v2493_v47, %v2421_v38  ;;  %v2425_v27 = vadd.f32 %v2424_v36, %v1552_v17  ;;  %v1562_v14 = vadd.f32 %v4797_v18, %v1489_v24  ;;  %v5033_v29 = vld [vmem:[#allocation14_spill] sm:$0xff] }
 0x1ab   : > { %v4898_v63 = vpop.f32.mrf.mxu1  ;;  %v2431_v5 = vadd.f32 %v4839_v0, %v1558_v56  ;;  %v1568_v28 = vadd.f32 %v4805_v35, %v1495_v50  ;;  %v1503_v51 = vadd.f32 %v4815_v39, %v4765_v57  ;;  %v2433_v11 = vadd.f32 %v4843_v7, %v1560_v31  ;;  %v5037_v31 = vld [vmem:[#allocation13_spill] sm:$0xff] }
 0x1ac   : > { %v2496_v22 = vadd.f32 %v4831_v62, %v2423_v55  ;;  %v2498_v15 = vadd.f32 %v4833_v20, %v2425_v27  ;;  %v1572_v45 = vadd.f32 %v4813_v13, %v1499_v59  ;;  %v2502_v33 = vadd.f32 %v4837_v30, %v2429_v9  ;;  %v5030_v13 = vld [vmem:[#allocation2_spill] sm:$0xff]  ;;  %v5035_v27 = vld [vmem:[#allocation3_spill] sm:$0xff] }
 0x1ad   : > { %v2504_v35 = vadd.f32 %v4841_v1, %v2431_v5  ;;  %v2435_v53 = vadd.f32 %v4847_v48, %v1562_v14  ;;  %v1505_v30 = vadd.f32 %v5031_v4, %v5030_v13  ;;  %v2506_v1 = vadd.f32 %v5032_v37, %v2433_v11  ;;  %v5039_v9 = vld [vmem:[#allocation15_spill] sm:$0xff] }
 0x1ae   : > { %v2439_v48 = vadd.f32 %v5033_v29, %v1566_v58  ;;  %v5038_v58 = vld [vmem:[#allocation16_spill] sm:$0xff]  ;;  %v5046_v13 = vld [vmem:[#allocation19_spill] sm:$0xff] }
 0x1af   : > { %v2508_v50 = vadd.f32 %v5037_v31, %v2435_v53  ;;  %v2441_v59 = vadd.f32 %v5038_v58, %v1568_v28 }
 0x1b0   : > { %v2512_v5 = vadd.f32 %v5039_v9, %v2439_v48 }
 0x1cc   : > { %v2564_v19 = vpop.f32.mrf.mxu0 }
 0x1cd   : > { %v2637_v25 = vpop.f32.mrf.mxu1  ;;  %v2565_v2 = vadd.f32 %v2564_v19, %v2492_v61 }
 0x1ce   : > { %v2566_v21 = vpop.f32.mrf.mxu0 }
 0x1cf   : > { %v2639_v42 = vpop.f32.mrf.mxu1  ;;  %v2638_v43 = vadd.f32 %v2637_v25, %v2565_v2  ;;  %v2567_v54 = vadd.f32 %v2566_v21, %v2494_v3  ;;  %v1576_v3 = vadd.f32 %v5034_v12, %v1503_v51  ;;  %v5036_v2 = vld [vmem:[#allocation8_spill] sm:$0xff] }
 0x1d0   : > { %v2568_v32 = vpop.f32.mrf.mxu0  ;;  %v1507_v56 = vadd.f32 %v5036_v2, %v5035_v27 }
 0x1d1   : > { %v2641_v44 = vpop.f32.mrf.mxu1  ;;  %v2688_v18 = vadd.f32 %v4905_v10, %v2638_v43  ;;  %v2640_v34 = vadd.f32 %v2639_v42, %v2567_v54  ;;  %v2569_v47 = vadd.f32 %v2568_v32, %v2496_v22  ;;  %v5040_v32 = vld [vmem:[#allocation18_spill] sm:$0xff] }
 0x1d2   : > { %v2570_v62 = vpop.f32.mrf.mxu0 }
 0x1d3   : > { %v2643_v36 = vpop.f32.mrf.mxu1  ;;  %v2704_v26 = vmul.f32 0.2, %v2688_v18  ;;  %v2689_v0 = vadd.f32 %v4907_v46, %v2640_v34  ;;  %v2642_v20 = vadd.f32 %v2641_v44, %v2569_v47  ;;  %v2571_v16 = vadd.f32 %v2570_v62, %v2498_v15 }
 0x1d4   : > { %v2574_v57 = vpop.f32.mrf.mxu0  ;;  %v2443_v44 = vadd.f32 %v5040_v32, %v1570_v8 }
 0x1d5   : > { %v2647_v39 = vpop.f32.mrf.mxu1  ;;  %v2720_v7 = vmax.f32 %v2688_v18, %v2704_v26  ;;  %v2705_v60 = vmul.f32 0.2, %v2689_v0  ;;  %v2690_v49 = vadd.f32 %v4905_v10, %v2642_v20  ;;  %v2644_v38 = vadd.f32 %v2643_v36, %v2571_v16  ;;  %v5041_v36 = vld [vmem:[#allocation7_spill] sm:$0xff]  ;;  %v5043_v20 = vld [vmem:[#allocation10_spill] sm:$0xff]  ;;  %v5044_v16 = vld [vmem:[#allocation20_spill] sm:$0xff] }
 0x1d6   : > { %v2575_v17 = vadd.f32 %v2574_v57, %v2502_v33  ;;  %v2576_v24 = vpop.f32.mrf.mxu0  ;;  %v1578_v26 = vadd.f32 %v5041_v36, %v1505_v30  ;;  %v2445_v33 = vadd.f32 %v5044_v16, %v1572_v45  ;;  %v2516_v4 = vadd.f32 %v5046_v13, %v2443_v44  ;;  %v5047_v30 = vld [vmem:[#allocation22_spill] sm:$0xff] }
 0x1d7   : > { %v2649_v61 = vpop.f32.mrf.mxu1  ;;  %2736 = vst [vmem:[%s4939_s25] sm:$0xff] %v2720_v7  ;;  %v2721_v55 = vmax.f32 %v2689_v0, %v2705_v60  ;;  %v2706_v52 = vmul.f32 0.2, %v2690_v49  ;;  %v2691_v19 = vadd.f32 %v4907_v46, %v2644_v38  ;;  %v2577_v25 = vadd.f32 %v2576_v24, %v2504_v35  ;;  %v5042_v0 = vld [vmem:[#allocation4_spill] sm:$0xff] }
 0x1d8   : > { %v2648_v41 = vadd.f32 %v2647_v39, %v2575_v17  ;;  %v2578_v21 = vpop.f32.mrf.mxu0  ;;  %v1509_v28 = vadd.f32 %v5043_v20, %v5042_v0  ;;  %v2449_v37 = vadd.f32 %v5047_v30, %v1576_v3 }
 0x1d9   : > { %v2651_v42 = vpop.f32.mrf.mxu1  ;;  %2737 = vst [vmem:[%s4939_s25 + $0x8] sm:$0xff] %v2721_v55  ;;  %v2722_v14 = vmax.f32 %v2690_v49, %v2706_v52  ;;  %v2707_v22 = vmul.f32 0.2, %v2691_v19  ;;  %v2650_v43 = vadd.f32 %v2649_v61, %v2577_v25  ;;  %v2579_v54 = vadd.f32 %v2578_v21, %v2506_v1  ;;  %v5045_v49 = vld [vmem:[#allocation17_spill] sm:$0xff] }
 0x1da   : > { %v2692_v15 = vadd.f32 %v4905_v10, %v2648_v41  ;;  %v2580_v18 = vpop.f32.mrf.mxu0  ;;  %v2514_v38 = vadd.f32 %v5045_v49, %v2441_v59  ;;  %v5048_v55 = vld [vmem:[#allocation21_spill] sm:$0xff] }
 0x1db   : > { %v2653_v34 = vpop.f32.mrf.mxu1  ;;  %2738 = vst [vmem:[%s4939_s25 + $0x10] sm:$0xff] %v2722_v14  ;;  %v2723_v47 = vmax.f32 %v2691_v19, %v2707_v22  ;;  %v2693_v51 = vadd.f32 %v4907_v46, %v2650_v43  ;;  %v2652_v11 = vadd.f32 %v2651_v42, %v2579_v54  ;;  %v2581_v62 = vadd.f32 %v2580_v18, %v2508_v50  ;;  %v5049_v19 = vld [vmem:[#allocation24_spill] sm:$0xff]  ;;  %v5050_v21 = vld [vmem:[#allocation9_spill] sm:$0xff]  ;;  %v5051_v14 = vld [vmem:[#allocation11_spill] sm:$0xff] }
 0x1dc   : > { %v2708_v35 = vmul.f32 0.2, %v2692_v15  ;;  %v2584_v53 = vpop.f32.mrf.mxu0  ;;  %v2518_v52 = vadd.f32 %v5048_v55, %v2445_v33  ;;  %v2451_v25 = vadd.f32 %v5049_v19, %v1578_v26  ;;  %v1580_v42 = vadd.f32 %v5050_v21, %v1507_v56  ;;  %v5052_v43 = vld [vmem:[#allocation23_spill] sm:$0xff] }
 0x1dd   : > { %v2657_v8 = vpop.f32.mrf.mxu1  ;;  %2739 = vst [vmem:[%s4939_s25 + $0x18] sm:$0xff] %v2723_v47  ;;  %v2709_v57 = vmul.f32 0.2, %v2693_v51  ;;  %v2694_v39 = vadd.f32 %v4905_v10, %v2652_v11  ;;  %v2654_v7 = vadd.f32 %v2653_v34, %v2581_v62  ;;  %v2585_v60 = vadd.f32 %v2584_v53, %v2512_v5  ;;  %v5053_v34 = vld [vmem:[#allocation25_spill] sm:$0xff] }
 0x1de   : > { %v2724_v1 = vmax.f32 %v2692_v15, %v2708_v35  ;;  %v2586_v29 = vpop.f32.mrf.mxu0  ;;  %v1582_v22 = vadd.f32 %v5051_v14, %v1509_v28  ;;  %v2522_v54 = vadd.f32 %v5052_v43, %v2449_v37  ;;  %v2453_v18 = vadd.f32 %v4879_v6, %v1580_v42 }
 0x1df   : > { %v2659_v45 = vpop.f32.mrf.mxu1  ;;  %v2725_v48 = vmax.f32 %v2693_v51, %v2709_v57  ;;  %v2710_v17 = vmul.f32 0.2, %v2694_v39  ;;  %v2695_v24 = vadd.f32 %v4907_v46, %v2654_v7  ;;  %v2658_v61 = vadd.f32 %v2657_v8, %v2585_v60 }
 0x1e0   : > { %2740 = vst [vmem:[%s4939_s25 + $0x20] sm:$0xff] %v2724_v1  ;;  %v2587_v12 = vadd.f32 %v2586_v29, %v2514_v38  ;;  %v2588_v27 = vpop.f32.mrf.mxu0  ;;  %v2524_v47 = vadd.f32 %v5053_v34, %v2451_v25  ;;  %v2455_v56 = vadd.f32 %v4896_v23, %v1582_v22  ;;  %v2526_v8 = vadd.f32 %v4881_v40, %v2453_v18 }
 0x1e1   : > { %v2661_v2 = vpop.f32.mrf.mxu1  ;;  %2741 = vst [vmem:[%s4939_s25 + $0x28] sm:$0xff] %v2725_v48  ;;  %v2726_v31 = vmax.f32 %v2694_v39, %v2710_v17  ;;  %v2711_v3 = vmul.f32 0.2, %v2695_v24  ;;  %v2696_v50 = vadd.f32 %v4905_v10, %v2658_v61  ;;  %v2589_v41 = vadd.f32 %v2588_v27, %v2516_v4 }
 0x1e2   : > { %v2660_v58 = vadd.f32 %v2659_v45, %v2587_v12  ;;  %v2590_v59 = vpop.f32.mrf.mxu0  ;;  %v2528_v57 = vadd.f32 %v4898_v63, %v2455_v56 }
 0x1e3   : > { %v2663_v9 = vpop.f32.mrf.mxu1  ;;  %2742 = vst [vmem:[%s4939_s25 + $0x30] sm:$0xff] %v2726_v31  ;;  %v2727_v5 = vmax.f32 %v2695_v24, %v2711_v3  ;;  %v2712_v32 = vmul.f32 0.2, %v2696_v50  ;;  %v2662_v44 = vadd.f32 %v2661_v2, %v2589_v41  ;;  %v2591_v15 = vadd.f32 %v2590_v59, %v2518_v52 }
 0x1e4   : > { %v2697_v51 = vadd.f32 %v4907_v46, %v2660_v58  ;;  %v2594_v11 = vpop.f32.mrf.mxu0 }
 0x1e5   : > { %v2667_v62 = vpop.f32.mrf.mxu1  ;;  %2743 = vst [vmem:[%s4939_s25 + $0x38] sm:$0xff] %v2727_v5  ;;  %v2728_v36 = vmax.f32 %v2696_v50, %v2712_v32  ;;  %v2698_v26 = vadd.f32 %v4905_v10, %v2662_v44  ;;  %v2664_v0 = vadd.f32 %v2663_v9, %v2591_v15  ;;  %v2595_v20 = vadd.f32 %v2594_v11, %v2522_v54 }
 0x1e6   : > { %v2713_v28 = vmul.f32 0.2, %v2697_v51  ;;  %v2596_v16 = vpop.f32.mrf.mxu0 }
 0x1e7   : > { %v2669_v33 = vpop.f32.mrf.mxu1  ;;  %2744 = vst [vmem:[%s4939_s25 + $0x40] sm:$0xff] %v2728_v36  ;;  %v2714_v6 = vmul.f32 0.2, %v2698_v26  ;;  %v2699_v35 = vadd.f32 %v4907_v46, %v2664_v0  ;;  %v2668_v23 = vadd.f32 %v2667_v62, %v2595_v20  ;;  %v2597_v53 = vadd.f32 %v2596_v16, %v2524_v47 }
 0x1e8   : > { %v2729_v39 = vmax.f32 %v2697_v51, %v2713_v28  ;;  %v2598_v7 = vpop.f32.mrf.mxu0 }
 0x1e9   : > { %v2671_v60 = vpop.f32.mrf.mxu1  ;;  %v2730_v49 = vmax.f32 %v2698_v26, %v2714_v6  ;;  %v2715_v38 = vmul.f32 0.2, %v2699_v35  ;;  %v2700_v13 = vadd.f32 %v4905_v10, %v2668_v23  ;;  %v2670_v4 = vadd.f32 %v2669_v33, %v2597_v53 }
 0x1ea   : > { %2745 = vst [vmem:[%s4939_s25 + $0x48] sm:$0xff] %v2729_v39  ;;  %v2599_v30 = vadd.f32 %v2598_v7, %v2526_v8  ;;  %v2600_v37 = vpop.f32.mrf.mxu0 }
 0x1eb   : > { %2746 = vst [vmem:[%s4939_s25 + $0x50] sm:$0xff] %v2730_v49  ;;  %v2731_v1 = vmax.f32 %v2699_v35, %v2715_v38  ;;  %v2716_v29 = vmul.f32 0.2, %v2700_v13  ;;  %v2701_v40 = vadd.f32 %v4907_v46, %v2670_v4  ;;  %v2601_v63 = vadd.f32 %v2600_v37, %v2528_v57  ;;  %v2673_v48 = vpop.f32.mrf.mxu1 }
 0x1ec   : > { %v2672_v45 = vadd.f32 %v2671_v60, %v2599_v30 }
 0x1ed   : > { %2747 = vst [vmem:[%s4939_s25 + $0x58] sm:$0xff] %v2731_v1  ;;  %v2732_v17 = vmax.f32 %v2700_v13, %v2716_v29  ;;  %v2717_v24 = vmul.f32 0.2, %v2701_v40  ;;  %v2674_v61 = vadd.f32 %v2673_v48, %v2601_v63 }
 0x1ee   : > { %v2702_v55 = vadd.f32 %v4905_v10, %v2672_v45 }
 0x1ef   : > { %2748 = vst [vmem:[%s4939_s25 + $0x60] sm:$0xff] %v2732_v17  ;;  %v2733_v52 = vmax.f32 %v2701_v40, %v2717_v24  ;;  %v2703_v19 = vadd.f32 %v4907_v46, %v2674_v61 }
 0x1f0   : > { %v2718_v25 = vmul.f32 0.2, %v2702_v55 }
 0x1f1   : > { %2749 = vst [vmem:[%s4939_s25 + $0x68] sm:$0xff] %v2733_v52  ;;  %v2719_v12 = vmul.f32 0.2, %v2703_v19 }
 0x1f2   : > { %v2734_v27 = vmax.f32 %v2702_v55, %v2718_v25 }
 0x1f3   : > { %v2735_v2 = vmax.f32 %v2703_v19, %v2719_v12 }
 0x1f4   : > { %2750 = vst [vmem:[%s4939_s25 + $0x70] sm:$0xff] %v2734_v27 }
 0x1f5   : > { %2751 = vst [vmem:[%s4939_s25 + $0x78] sm:$0xff] %v2735_v2 }
 0x1f6 PF: > { %s13_s12 = sadd.s32 1, %s3671_s12  }
 0x1f7   : > { %p10_p4 = scmp.ge.s32.totalorder %s13_s12, 4  }
 0x1f9   :  { %12 = sbr.rel (!%p10_p4) target bundleno = 1 (0x1), region = 63 }

</bundles_post_ra>
